<compile_context>
chip_gen: v7x
topology: tpu7x:2x2x1
jax: 0.10.0
libtpu: 0.0.40
codegen_flags: <defaults>
</compile_context>

<pallas_src>
import jax
import jax.numpy as jnp
from jax.experimental import pallas as pl
from jax.experimental.pallas import tpu as pltpu


def _round_up(x, m):
    return ((x + m - 1) // m) * m


def ranknet_kernel(x_ref,
                   w1_ref, b1_ref,
                   w2_ref, b2_ref,
                   w3_ref, b3_ref,
                   w4a_ref, w4b_ref, b4_ref,
                   w5_ref, b5_ref,
                   out_ref):
    """Fused forward: stacked siamese tower (run once per tile) + output head.

    x_ref is (2*TB, E): rows [0:TB] = item_1 tile, rows [TB:2*TB] = item_2 tile
    (interleaved in the wrapper), so the shared tower runs ONCE on 2*TB rows.
    Weights are VMEM-resident (constant index_map, single-buffered).
    """
    TB = x_ref.shape[0] // 2

    def layer(a_bf16, w_ref, b_ref):
        # bf16 x bf16 matmul, f32 accumulate; bias+ReLU in f32; store act as bf16.
        acc = jnp.dot(a_bf16, w_ref[...], preferred_element_type=jnp.float32)
        return jnp.maximum(acc + b_ref[...], 0.0).astype(jnp.bfloat16)

    x = x_ref[...].astype(jnp.bfloat16)                 # (2*TB, E)
    h = layer(x, w1_ref, b1_ref)                        # (2*TB, 2048) bf16
    h = layer(h, w2_ref, b2_ref)                        # (2*TB, 1024) bf16
    # Dropout(p=0.1) -> identity in eval mode.
    f = layer(h, w3_ref, b3_ref)                        # (2*TB, 256)  bf16

    f1 = f[:TB]                                         # base(item_1)
    f2 = f[TB:]                                         # base(item_2)

    # concat(f1, f2) @ w4 == f1 @ w4[:256] + f2 @ w4[256:]  (no lane concat)
    acc = (jnp.dot(f1, w4a_ref[...], preferred_element_type=jnp.float32)
           + jnp.dot(f2, w4b_ref[...], preferred_element_type=jnp.float32))
    h = jnp.maximum(acc + b4_ref[...], 0.0)             # (TB, 256) f32

    # Final (256 -> 1) layer on the VPU/XLU (skip a 1-column MXU matmul).
    logit = jnp.sum(h * w5_ref[...], axis=-1, keepdims=True) + b5_ref[...]
    out_ref[...] = jax.nn.sigmoid(logit).astype(out_ref.dtype)   # (TB, 1)


def ranknet_forward(x1, x2, params, *, batch_tile=256):
    """Grid over batch tiles; weights pinned (single-buffered) in VMEM."""
    B, E = x1.shape

    # Pick a tile that (a) is a multiple of 8 on the sublane axis and
    # (b) yields >= 2 grid steps whenever B >= 16, so v7x's two TensorCores
    # both get work; capped at batch_tile (keep <= 256 for v7x VMEM headroom).
    half = _round_up(pl.cdiv(B, 2), 8)
    TB = min(_round_up(batch_tile, 8), max(8, half))
    B_pad = _round_up(B, TB)
    if B_pad != B:
        pad = B_pad - B
        x1 = jnp.pad(x1, ((0, pad), (0, 0)))
        x2 = jnp.pad(x2, ((0, pad), (0, 0)))

    G = B_pad // TB

    # Interleave item_1 / item_2 per tile -> one (G*2*TB, E) activation stream.
    x = jnp.concatenate(
        [x1.reshape(G, TB, E), x2.reshape(G, TB, E)], axis=1
    ).reshape(G * 2 * TB, E)

    act_spec = pl.BlockSpec((2 * TB, E), lambda i: (i, 0))

    def pinned(arr):
        # Full-array block, same block every grid step -> DMA'd once, stays
        # resident. Single-buffered: the second pipeline buffer is never used.
        return pl.BlockSpec(arr.shape, lambda i: (0, 0),
                            pipeline_mode=pl.Buffered(1))

    weights = (params["w1"], params["b1"],
               params["w2"], params["b2"],
               params["w3"], params["b3"],
               params["w4a"], params["w4b"], params["b4"],
               params["w5"], params["b5"])
    in_specs = [act_spec] + [pinned(a) for a in weights]

    out = pl.pallas_call(
        ranknet_kernel,
        grid=(G,),
        out_shape=jax.ShapeDtypeStruct((B_pad, 1), jnp.float32),
        in_specs=in_specs,
        out_specs=pl.BlockSpec((TB, 1), lambda i: (i, 0)),
        compiler_params=pltpu.CompilerParams(
            dimension_semantics=("parallel",),
            vmem_limit_bytes=48 << 20,
        ),
    )(x, *weights)
    return out[:B]


def init_linear(key, fan_in, fan_out):
    """PyTorch-style init: U(-1/sqrt(fan_in), 1/sqrt(fan_in)), stored (in, out)."""
    kw, kb = jax.random.split(key)
    bound = 1.0 / jnp.sqrt(jnp.float32(fan_in))
    w = jax.random.uniform(kw, (fan_in, fan_out), jnp.float32, -bound, bound)
    b = jax.random.uniform(kb, (1, fan_out), jnp.float32, -bound, bound)
    return w, b


def reference_forward(x1, x2, p):
    """Pure-JAX reference mirroring the kernel's dtype path exactly."""
    def layer(a_bf16, w, b):
        acc = jnp.dot(a_bf16, w, preferred_element_type=jnp.float32)
        return jnp.maximum(acc + b, 0.0).astype(jnp.bfloat16)

    def tower(x):
        h = layer(x.astype(jnp.bfloat16), p["w1"], p["b1"])
        h = layer(h, p["w2"], p["b2"])
        return layer(h, p["w3"], p["b3"])

    f1, f2 = tower(x1), tower(x2)
    acc = (jnp.dot(f1, p["w4a"], preferred_element_type=jnp.float32)
           + jnp.dot(f2, p["w4b"], preferred_element_type=jnp.float32))
    h = jnp.maximum(acc + p["b4"], 0.0)
    logit = jnp.sum(h * p["w5"], axis=-1, keepdims=True) + p["b5"]
    return jax.nn.sigmoid(logit)


def reference_forward_f32(x1, x2, p32):
    """Full-f32 reference with the original (uncast) weights, for drift check."""
    def tower(x):
        h = jnp.maximum(x @ p32["w1"] + p32["b1"], 0.0)
        h = jnp.maximum(h @ p32["w2"] + p32["b2"], 0.0)
        return jnp.maximum(h @ p32["w3"] + p32["b3"], 0.0)

    delta = jnp.concatenate([tower(x1), tower(x2)], axis=1)
    h = jnp.maximum(delta @ p32["w4"] + p32["b4"], 0.0)
    return jax.nn.sigmoid(h @ p32["w5"] + p32["b5"])


if __name__ == "__main__":
    key = jax.random.PRNGKey(0)
    E = 64   # backend.model.embedding_size (synthetic, small)
    B = 8    # batch

    k1, k2, k3, k4, k5, kx1, kx2 = jax.random.split(key, 7)
    w1, b1 = init_linear(k1, E, 2048)
    w2, b2 = init_linear(k2, 2048, 1024)
    w3, b3 = init_linear(k3, 1024, 256)
    w4, b4 = init_linear(k4, 512, 256)
    w5, b5 = init_linear(k5, 256, 1)

    params = dict(
        w1=w1.astype(jnp.bfloat16), b1=b1,
        w2=w2.astype(jnp.bfloat16), b2=b2,
        w3=w3.astype(jnp.bfloat16), b3=b3,
        w4a=w4[:256].astype(jnp.bfloat16),   # multiplies base(item_1)
        w4b=w4[256:].astype(jnp.bfloat16),   # multiplies base(item_2)
        b4=b4,
        w5=w5.reshape(1, 256), b5=b5,        # tiny last layer kept f32, row layout
    )
    params_f32 = dict(w1=w1, b1=b1, w2=w2, b2=b2, w3=w3, b3=b3,
                      w4=w4, b4=b4, w5=w5, b5=b5)

    item_1 = jax.random.normal(kx1, (B, E), jnp.float32)
    item_2 = jax.random.normal(kx2, (B, E), jnp.float32)

    out = jax.block_until_ready(ranknet_forward(item_1, item_2, params))
    ref = jax.block_until_ready(reference_forward(item_1, item_2, params))
    ref32 = jax.block_until_ready(reference_forward_f32(item_1, item_2, params_f32))

    assert out.shape == (B, 1), out.shape
    assert bool(jnp.all(jnp.isfinite(out))), out
    # Tight check vs a reference on the same bf16 dtype path.
    assert jnp.allclose(out, ref, atol=2e-3, rtol=2e-3), (out, ref)
    # Loose drift check vs the original full-f32 model.
    assert jnp.allclose(out, ref32, atol=3e-2, rtol=3e-2), (out, ref32)
    print("KERNEL_OK")
</pallas_src>

<mosaic_0001>
module attributes {stable_mosaic.version = 11 : i64} {
  func.func @ranknet_kernel(%arg0: i32, %arg1: memref<16x64xf32, #tpu.memory_space<vmem>>, %arg2: memref<64x2048xbf16, #tpu.memory_space<vmem>>, %arg3: memref<1x2048xf32, #tpu.memory_space<vmem>>, %arg4: memref<2048x1024xbf16, #tpu.memory_space<vmem>>, %arg5: memref<1x1024xf32, #tpu.memory_space<vmem>>, %arg6: memref<1024x256xbf16, #tpu.memory_space<vmem>>, %arg7: memref<1x256xf32, #tpu.memory_space<vmem>>, %arg8: memref<256x256xbf16, #tpu.memory_space<vmem>>, %arg9: memref<256x256xbf16, #tpu.memory_space<vmem>>, %arg10: memref<1x256xf32, #tpu.memory_space<vmem>>, %arg11: memref<1x256xf32, #tpu.memory_space<vmem>>, %arg12: memref<1x1xf32, #tpu.memory_space<vmem>>, %arg13: memref<8x1xf32, #tpu.memory_space<vmem>>) attributes {dimension_semantics = [#tpu.dimension_semantics<parallel>], iteration_bounds = array<i64: 1>, scalar_prefetch = 0 : i64, scratch_operands = 0 : i64, tpu.core_type = #tpu.core_type<tc>, window_params = [{transform_indices = @transform_0, window_bounds = array<i64: 16, 64>}, {pipeline_mode = #tpu.pipeline_mode<synchronous>, transform_indices = @transform_1, window_bounds = array<i64: 64, 2048>}, {pipeline_mode = #tpu.pipeline_mode<synchronous>, transform_indices = @transform_2, window_bounds = array<i64: 1, 2048>}, {pipeline_mode = #tpu.pipeline_mode<synchronous>, transform_indices = @transform_3, window_bounds = array<i64: 2048, 1024>}, {pipeline_mode = #tpu.pipeline_mode<synchronous>, transform_indices = @transform_4, window_bounds = array<i64: 1, 1024>}, {pipeline_mode = #tpu.pipeline_mode<synchronous>, transform_indices = @transform_5, window_bounds = array<i64: 1024, 256>}, {pipeline_mode = #tpu.pipeline_mode<synchronous>, transform_indices = @transform_6, window_bounds = array<i64: 1, 256>}, {pipeline_mode = #tpu.pipeline_mode<synchronous>, transform_indices = @transform_7, window_bounds = array<i64: 256, 256>}, {pipeline_mode = #tpu.pipeline_mode<synchronous>, transform_indices = @transform_8, window_bounds = array<i64: 256, 256>}, {pipeline_mode = #tpu.pipeline_mode<synchronous>, transform_indices = @transform_9, window_bounds = array<i64: 1, 256>}, {pipeline_mode = #tpu.pipeline_mode<synchronous>, transform_indices = @transform_10, window_bounds = array<i64: 1, 256>}, {pipeline_mode = #tpu.pipeline_mode<synchronous>, transform_indices = @transform_11, window_bounds = array<i64: 1, 1>}, {transform_indices = @transform_12, window_bounds = array<i64: 8, 1>}]} {
    %c0 = arith.constant 0 : index
    %c0_0 = arith.constant 0 : index
    %0 = vector.load %arg1[%c0, %c0_0] : memref<16x64xf32, #tpu.memory_space<vmem>>, vector<16x64xf32>
    %1 = arith.truncf %0 : vector<16x64xf32> to vector<16x64xbf16>
    %c0_1 = arith.constant 0 : index
    %c0_2 = arith.constant 0 : index
    %2 = vector.load %arg2[%c0_1, %c0_2] : memref<64x2048xbf16, #tpu.memory_space<vmem>>, vector<64x2048xbf16>
    %cst = arith.constant dense<0.000000e+00> : vector<16x2048xf32>
    %3 = tpu.matmul %1, %2, %cst {dimension_numbers = #tpu.dot_dimension_numbers<[1], [0], [0], [1], [0, 0, 1, 1], [], []>} : vector<16x64xbf16>, vector<64x2048xbf16>, vector<16x2048xf32> -> vector<16x2048xf32>
    %c0_3 = arith.constant 0 : index
    %c0_4 = arith.constant 0 : index
    %4 = vector.load %arg3[%c0_3, %c0_4] : memref<1x2048xf32, #tpu.memory_space<vmem>>, vector<1x2048xf32>
    %5 = vector.broadcast %4 : vector<1x2048xf32> to vector<16x2048xf32>
    %6 = arith.addf %3, %5 : vector<16x2048xf32>
    %cst_5 = arith.constant 0.000000e+00 : f32
    %7 = vector.broadcast %cst_5 : f32 to vector<16x2048xf32>
    %8 = arith.maximumf %6, %7 : vector<16x2048xf32>
    %9 = arith.truncf %8 : vector<16x2048xf32> to vector<16x2048xbf16>
    %c0_6 = arith.constant 0 : index
    %c0_7 = arith.constant 0 : index
    %10 = vector.load %arg4[%c0_6, %c0_7] : memref<2048x1024xbf16, #tpu.memory_space<vmem>>, vector<2048x1024xbf16>
    %cst_8 = arith.constant dense<0.000000e+00> : vector<16x1024xf32>
    %11 = tpu.matmul %9, %10, %cst_8 {dimension_numbers = #tpu.dot_dimension_numbers<[1], [0], [0], [1], [0, 0, 1, 1], [], []>} : vector<16x2048xbf16>, vector<2048x1024xbf16>, vector<16x1024xf32> -> vector<16x1024xf32>
    %c0_9 = arith.constant 0 : index
    %c0_10 = arith.constant 0 : index
    %12 = vector.load %arg5[%c0_9, %c0_10] : memref<1x1024xf32, #tpu.memory_space<vmem>>, vector<1x1024xf32>
    %13 = vector.broadcast %12 : vector<1x1024xf32> to vector<16x1024xf32>
    %14 = arith.addf %11, %13 : vector<16x1024xf32>
    %cst_11 = arith.constant 0.000000e+00 : f32
    %15 = vector.broadcast %cst_11 : f32 to vector<16x1024xf32>
    %16 = arith.maximumf %14, %15 : vector<16x1024xf32>
    %17 = arith.truncf %16 : vector<16x1024xf32> to vector<16x1024xbf16>
    %c0_12 = arith.constant 0 : index
    %c0_13 = arith.constant 0 : index
    %18 = vector.load %arg6[%c0_12, %c0_13] : memref<1024x256xbf16, #tpu.memory_space<vmem>>, vector<1024x256xbf16>
    %cst_14 = arith.constant dense<0.000000e+00> : vector<16x256xf32>
    %19 = tpu.matmul %17, %18, %cst_14 {dimension_numbers = #tpu.dot_dimension_numbers<[1], [0], [0], [1], [0, 0, 1, 1], [], []>} : vector<16x1024xbf16>, vector<1024x256xbf16>, vector<16x256xf32> -> vector<16x256xf32>
    %c0_15 = arith.constant 0 : index
    %c0_16 = arith.constant 0 : index
    %20 = vector.load %arg7[%c0_15, %c0_16] : memref<1x256xf32, #tpu.memory_space<vmem>>, vector<1x256xf32>
    %21 = vector.broadcast %20 : vector<1x256xf32> to vector<16x256xf32>
    %22 = arith.addf %19, %21 : vector<16x256xf32>
    %cst_17 = arith.constant 0.000000e+00 : f32
    %23 = vector.broadcast %cst_17 : f32 to vector<16x256xf32>
    %24 = arith.maximumf %22, %23 : vector<16x256xf32>
    %25 = arith.truncf %24 : vector<16x256xf32> to vector<16x256xbf16>
    %26 = vector.extract_strided_slice %25 {offsets = [0, 0], sizes = [8, 256], strides = [1, 1]} : vector<16x256xbf16> to vector<8x256xbf16>
    %27 = vector.extract_strided_slice %25 {offsets = [8, 0], sizes = [8, 256], strides = [1, 1]} : vector<16x256xbf16> to vector<8x256xbf16>
    %c0_18 = arith.constant 0 : index
    %c0_19 = arith.constant 0 : index
    %28 = vector.load %arg8[%c0_18, %c0_19] : memref<256x256xbf16, #tpu.memory_space<vmem>>, vector<256x256xbf16>
    %cst_20 = arith.constant dense<0.000000e+00> : vector<8x256xf32>
    %29 = tpu.matmul %26, %28, %cst_20 {dimension_numbers = #tpu.dot_dimension_numbers<[1], [0], [0], [1], [0, 0, 1, 1], [], []>} : vector<8x256xbf16>, vector<256x256xbf16>, vector<8x256xf32> -> vector<8x256xf32>
    %c0_21 = arith.constant 0 : index
    %c0_22 = arith.constant 0 : index
    %30 = vector.load %arg9[%c0_21, %c0_22] : memref<256x256xbf16, #tpu.memory_space<vmem>>, vector<256x256xbf16>
    %cst_23 = arith.constant dense<0.000000e+00> : vector<8x256xf32>
    %31 = tpu.matmul %27, %30, %cst_23 {dimension_numbers = #tpu.dot_dimension_numbers<[1], [0], [0], [1], [0, 0, 1, 1], [], []>} : vector<8x256xbf16>, vector<256x256xbf16>, vector<8x256xf32> -> vector<8x256xf32>
    %32 = arith.addf %29, %31 : vector<8x256xf32>
    %c0_24 = arith.constant 0 : index
    %c0_25 = arith.constant 0 : index
    %33 = vector.load %arg10[%c0_24, %c0_25] : memref<1x256xf32, #tpu.memory_space<vmem>>, vector<1x256xf32>
    %34 = vector.broadcast %33 : vector<1x256xf32> to vector<8x256xf32>
    %35 = arith.addf %32, %34 : vector<8x256xf32>
    %cst_26 = arith.constant 0.000000e+00 : f32
    %36 = vector.broadcast %cst_26 : f32 to vector<8x256xf32>
    %37 = arith.maximumf %35, %36 : vector<8x256xf32>
    %c0_27 = arith.constant 0 : index
    %c0_28 = arith.constant 0 : index
    %38 = vector.load %arg11[%c0_27, %c0_28] : memref<1x256xf32, #tpu.memory_space<vmem>>, vector<1x256xf32>
    %39 = vector.broadcast %38 : vector<1x256xf32> to vector<8x256xf32>
    %40 = arith.mulf %37, %39 : vector<8x256xf32>
    %cst_29 = arith.constant dense<0.000000e+00> : vector<8xf32>
    %41 = vector.multi_reduction <add>, %40, %cst_29 [1] : vector<8x256xf32> to vector<8xf32>
    %42 = vector.shape_cast %41 : vector<8xf32> to vector<8x1xf32>
    %c0_30 = arith.constant 0 : index
    %c0_31 = arith.constant 0 : index
    %43 = vector.load %arg12[%c0_30, %c0_31] : memref<1x1xf32, #tpu.memory_space<vmem>>, vector<1x1xf32>
    %44 = vector.broadcast %43 : vector<1x1xf32> to vector<8x1xf32>
    %45 = arith.addf %42, %44 : vector<8x1xf32>
    %46 = arith.negf %45 : vector<8x1xf32>
    %47 = math.exp %46 : vector<8x1xf32>
    %cst_32 = arith.constant 1.000000e+00 : f32
    %48 = vector.broadcast %cst_32 : f32 to vector<8x1xf32>
    %49 = arith.addf %48, %47 : vector<8x1xf32>
    %50 = arith.divf %48, %49 : vector<8x1xf32>
    %c0_33 = arith.constant 0 : index
    %c0_34 = arith.constant 0 : index
    %51 = vector.load %arg13[%c0_33, %c0_34] : memref<8x1xf32, #tpu.memory_space<vmem>>, vector<8x1xf32>
    tpu.vector_store %arg13[%c0_33, %c0_34], %50 {strides = array<i32>} : memref<8x1xf32, #tpu.memory_space<vmem>>, vector<8x1xf32>,
    return
  }
  func.func @transform_0(%arg0: i32) -> (i32, i32) {
    %c0_i32 = arith.constant 0 : i32
    %c0_i32_0 = arith.constant 0 : i32
    return %arg0, %c0_i32 : i32, i32
  }
  func.func @transform_1(%arg0: i32) -> (i32, i32) {
    %c0_i32 = arith.constant 0 : i32
    %c0_i32_0 = arith.constant 0 : i32
    %c0_i32_1 = arith.constant 0 : i32
    return %c0_i32, %c0_i32_0 : i32, i32
  }
  func.func @transform_2(%arg0: i32) -> (i32, i32) {
    %c0_i32 = arith.constant 0 : i32
    %c0_i32_0 = arith.constant 0 : i32
    %c0_i32_1 = arith.constant 0 : i32
    return %c0_i32, %c0_i32_0 : i32, i32
  }
  func.func @transform_3(%arg0: i32) -> (i32, i32) {
    %c0_i32 = arith.constant 0 : i32
    %c0_i32_0 = arith.constant 0 : i32
    %c0_i32_1 = arith.constant 0 : i32
    return %c0_i32, %c0_i32_0 : i32, i32
  }
  func.func @transform_4(%arg0: i32) -> (i32, i32) {
    %c0_i32 = arith.constant 0 : i32
    %c0_i32_0 = arith.constant 0 : i32
    %c0_i32_1 = arith.constant 0 : i32
    return %c0_i32, %c0_i32_0 : i32, i32
  }
  func.func @transform_5(%arg0: i32) -> (i32, i32) {
    %c0_i32 = arith.constant 0 : i32
    %c0_i32_0 = arith.constant 0 : i32
    %c0_i32_1 = arith.constant 0 : i32
    return %c0_i32, %c0_i32_0 : i32, i32
  }
  func.func @transform_6(%arg0: i32) -> (i32, i32) {
    %c0_i32 = arith.constant 0 : i32
    %c0_i32_0 = arith.constant 0 : i32
    %c0_i32_1 = arith.constant 0 : i32
    return %c0_i32, %c0_i32_0 : i32, i32
  }
  func.func @transform_7(%arg0: i32) -> (i32, i32) {
    %c0_i32 = arith.constant 0 : i32
    %c0_i32_0 = arith.constant 0 : i32
    %c0_i32_1 = arith.constant 0 : i32
    return %c0_i32, %c0_i32_0 : i32, i32
  }
  func.func @transform_8(%arg0: i32) -> (i32, i32) {
    %c0_i32 = arith.constant 0 : i32
    %c0_i32_0 = arith.constant 0 : i32
    %c0_i32_1 = arith.constant 0 : i32
    return %c0_i32, %c0_i32_0 : i32, i32
  }
  func.func @transform_9(%arg0: i32) -> (i32, i32) {
    %c0_i32 = arith.constant 0 : i32
    %c0_i32_0 = arith.constant 0 : i32
    %c0_i32_1 = arith.constant 0 : i32
    return %c0_i32, %c0_i32_0 : i32, i32
  }
  func.func @transform_10(%arg0: i32) -> (i32, i32) {
    %c0_i32 = arith.constant 0 : i32
    %c0_i32_0 = arith.constant 0 : i32
    %c0_i32_1 = arith.constant 0 : i32
    return %c0_i32, %c0_i32_0 : i32, i32
  }
  func.func @transform_11(%arg0: i32) -> (i32, i32) {
    %c0_i32 = arith.constant 0 : i32
    %c0_i32_0 = arith.constant 0 : i32
    %c0_i32_1 = arith.constant 0 : i32
    return %c0_i32, %c0_i32_0 : i32, i32
  }
  func.func @transform_12(%arg0: i32) -> (i32, i32) {
    %c0_i32 = arith.constant 0 : i32
    %c0_i32_0 = arith.constant 0 : i32
    return %arg0, %c0_i32 : i32, i32
  }
}

</mosaic_0001>

<bundles_post_ra>
// kernel: tpu_custom_call.1
= control target key start
LH: loop header
LB: loop body
LE: loop exit
PB: predicated region body
PF: predicated region fallthrough
CT: control target
= control target key end

     0   :  { %s12628_s0 = inlined_call_operand.hbm [shape: f32[16,64], index: 0, kind: input, shape index: {}]   ;;  %s12629_s1 = inlined_call_operand.hbm [shape: bf16[64,2048], index: 1, kind: input, shape index: {}]   ;;  %s12630_s2 = inlined_call_operand.hbm [shape: f32[1,2048], index: 2, kind: input, shape index: {}]   ;;  %s12631_s3 = inlined_call_operand.hbm [shape: bf16[2048,1024], index: 3, kind: input, shape index: {}]   ;;  %s12632_s4 = inlined_call_operand.hbm [shape: f32[1,1024], index: 4, kind: input, shape index: {}]   ;;  %s12633_s5 = inlined_call_operand.hbm [shape: bf16[1024,256], index: 5, kind: input, shape index: {}]   ;;  %s12634_s6 = inlined_call_operand.hbm [shape: f32[1,256], index: 6, kind: input, shape index: {}]   ;;  %s12635_s7 = inlined_call_operand.hbm [shape: bf16[256,256], index: 7, kind: input, shape index: {}]   ;;  %s12636_s8 = inlined_call_operand.hbm [shape: bf16[256,256], index: 8, kind: input, shape index: {}]   ;;  %s12637_s9 = inlined_call_operand.hbm [shape: f32[1,256], index: 9, kind: input, shape index: {}]   ;;  %s12638_s10 = inlined_call_operand.hbm [shape: f32[1,256], index: 10, kind: input, shape index: {}]   ;;  %s12639_s11 = inlined_call_operand.<no memory space> [shape: f32[1,1], index: 11, kind: input, shape index: {}]   ;;  %s12640_s12 = inlined_call_operand.vmem [shape: f32[8,1], index: 12, kind: output, shape index: {}]  }
   0x1   :  { %v17_v0 = vstv %s12639_s11 }
   0x2   :  { %18 = vst [vmem:[#allocation2] sm:$0x1] %v17_v0 }
   0x3   :  { %19 = vsyncpa [#allocation4], 0 }
   0x4   :  { %20 = vsyncpa [#allocation6], 0 }
   0x5   :  { %21 = vsyncpa [#allocation9], 0 }
   0x6   :  { %22 = vsyncpa [#allocation12], 0 }
   0x7   :  { %23 = vsyncpa [#allocation15], 0 }
   0x8   :  { %24 = vsyncpa [#allocation18], 0  ;;  %s12124_s23 = smov [#allocation5]   ;;  %s11870_s27 = scalar_lea.hbm %s12629_s1, 8192 }
   0x9   :  { %s42_s24 = sshll.u32 %s12124_s23, 4  ;;  %p11871_p0 = scmp.ne.s32.totalorder %s12629_s1, %s11870_s27  ;;  %s43_s24 = int_to_ptr.vmem [resolvable:$true] %s42_s24 }
   0xa   :  { %p11874_p1 = scmp.lt.u32.totalorder %s11870_s27, %s12629_s1 }
   0xc   :  { %p11876_p2 = pnand %p11874_p1, %p11871_p0 }
   0xe   :  { %11879 = shalt.err (!%p11876_p2)
}
   0xf   :  { %s11880_s13 = scalar_lea.vmem %s43_s24, 8192  ;;  %p11885_p4 = scmp.lt.s32.totalorder %s43_s24, %s43_s24 }
  0x10   :  { %p11881_p3 = scmp.ne.s32.totalorder %s43_s24, %s11880_s13  ;;  %p11886_p5 = scmp.lt.s32.totalorder %s11880_s13, %s11880_s13 }
  0x12   :  { %p11887_p6 = por %p11886_p5, %p11885_p4 }
  0x14   :  { %p11888_p7 = pnand %p11887_p6, %p11881_p3 }
  0x16   :  { %11891 = shalt.err (!%p11888_p7)
}
  0x17   :  { %s12125_s14 = smov 1024   ;;  %s12126_s15 = smov 64  }
  0x18   :  { %48 = dma.hbm_to_vmem [thread:$0]  %s12629_s1, 8192, %s43_s24, [#allocation6], %s12125_s14, %s12125_s14, %s12126_s15  }
  0x19   :  { %s12127_s18 = smov [#allocation8]   ;;  %s11892_s22 = scalar_lea.hbm %s12631_s3, 131072 }
  0x1a   :  { %s64_s19 = sshll.u32 %s12127_s18, 4  ;;  %p11893_p8 = scmp.ne.s32.totalorder %s12631_s3, %s11892_s22  ;;  %s65_s19 = int_to_ptr.vmem [resolvable:$true] %s64_s19 }
  0x1b   :  { %p11896_p9 = scmp.lt.u32.totalorder %s11892_s22, %s12631_s3 }
  0x1d   :  { %p11898_p10 = pnand %p11896_p9, %p11893_p8 }
  0x1f   :  { %11901 = shalt.err (!%p11898_p10)
}
  0x20   :  { %s11902_s28 = scalar_lea.vmem %s65_s19, 131072  ;;  %p11907_p12 = scmp.lt.s32.totalorder %s65_s19, %s65_s19 }
  0x21   :  { %p11903_p11 = scmp.ne.s32.totalorder %s65_s19, %s11902_s28  ;;  %p11908_p13 = scmp.lt.s32.totalorder %s11902_s28, %s11902_s28 }
  0x23   :  { %p11909_p0 = por %p11908_p13, %p11907_p12 }
  0x25   :  { %p11910_p1 = pnand %p11909_p0, %p11903_p11 }
  0x27   :  { %11913 = shalt.err (!%p11910_p1)
}
  0x28   :  { %s12128_s1 = smov 512   ;;  %s12129_s24 = smov 32  }
  0x29   :  { %70 = dma.hbm_to_vmem [thread:$0]  %s12631_s3, 131072, %s65_s19, [#allocation9], %s12128_s1, %s12128_s1, %s12129_s24  }
  0x2a   :  { %s12130_s11 = smov [#allocation11]   ;;  %s12131_s14 = smov [#allocation14]  }
  0x2b   :  { %s86_s13 = sshll.u32 %s12130_s11, 4  ;;  %s108_s15 = sshll.u32 %s12131_s14, 4  ;;  %s87_s13 = int_to_ptr.vmem [resolvable:$true] %s86_s13  ;;  %s12234_s15 = int_to_ptr.vmem [resolvable:$true] %s108_s15 }
  0x2c   :  { %s11914_s18 = scalar_lea.hbm %s12633_s5, 16384 }
  0x2d   :  { %p11915_p2 = scmp.ne.s32.totalorder %s12633_s5, %s11914_s18  ;;  %p11918_p3 = scmp.lt.u32.totalorder %s11914_s18, %s12633_s5 }
  0x2f   :  { %p11920_p4 = pnand %p11918_p3, %p11915_p2 }
  0x31   :  { %11923 = shalt.err (!%p11920_p4)
}
  0x32   :  { %s11924_s3 = scalar_lea.vmem %s87_s13, 16384  ;;  %p11929_p6 = scmp.lt.s32.totalorder %s87_s13, %s87_s13 }
  0x33   :  { %p11925_p5 = scmp.ne.s32.totalorder %s87_s13, %s11924_s3  ;;  %p11930_p7 = scmp.lt.s32.totalorder %s11924_s3, %s11924_s3 }
  0x35   :  { %p11931_p8 = por %p11930_p7, %p11929_p6 }
  0x37   :  { %p11932_p9 = pnand %p11931_p8, %p11925_p5 }
  0x39   :  { %11935 = shalt.err (!%p11932_p9)
}
  0x3a   :  { %s12132_s19 = smov 128   ;;  %s12133_s25 = smov 8  }
  0x3b   :  { %92 = dma.hbm_to_vmem [thread:$0]  %s12633_s5, 16384, %s87_s13, [#allocation12], %s12132_s19, %s12132_s19, %s12133_s25  }
  0x3c   :  { %s11936_s24 = scalar_lea.hbm %s12635_s7, 4096 }
  0x3d   :  { %p11937_p10 = scmp.ne.s32.totalorder %s12635_s7, %s11936_s24  ;;  %p11940_p11 = scmp.lt.u32.totalorder %s11936_s24, %s12635_s7 }
  0x3f   :  { %p11942_p12 = pnand %p11940_p11, %p11937_p10 }
  0x41   :  { %11945 = shalt.err (!%p11942_p12)
}
  0x42   :  { %s11946_s16 = scalar_lea.vmem %s12234_s15, 4096  ;;  %p11951_p0 = scmp.lt.s32.totalorder %s12234_s15, %s12234_s15 }
  0x43   :  { %p11947_p13 = scmp.ne.s32.totalorder %s12234_s15, %s11946_s16  ;;  %p11952_p1 = scmp.lt.s32.totalorder %s11946_s16, %s11946_s16 }
  0x45   :  { %p11953_p2 = por %p11952_p1, %p11951_p0 }
  0x47   :  { %p11954_p3 = pnand %p11953_p2, %p11947_p13 }
  0x49   :  { %11957 = shalt.err (!%p11954_p3)
}
  0x4a   :  { %114 = dma.hbm_to_vmem [thread:$0]  %s12635_s7, 4096, %s12234_s15, [#allocation15], %s12132_s19, %s12132_s19, %s12133_s25  }
  0x4b   :  { %s12134_s17 = smov [#allocation17]   ;;  %s12135_s20 = smov [#allocation3]  }
  0x4c   :  { %s133_s18 = sshll.u32 %s12134_s17, 4  ;;  %s30_s21 = sshll.u32 %s12135_s20, 4  ;;  %s134_s18 = int_to_ptr.vmem [resolvable:$true] %s133_s18  ;;  %s12271_s21 = int_to_ptr.vmem [resolvable:$true] %s30_s21 }
  0x4d   :  { %s11958_s3 = scalar_lea.hbm %s12637_s9, 32 }
  0x4e   :  { %p11959_p4 = scmp.ne.s32.totalorder %s12637_s9, %s11958_s3  ;;  %p11962_p5 = scmp.lt.u32.totalorder %s11958_s3, %s12637_s9 }
  0x50   :  { %p11964_p6 = pnand %p11962_p5, %p11959_p4 }
  0x52   :  { %11967 = shalt.err (!%p11964_p6)
}
  0x53   :  { %s11968_s7 = scalar_lea.vmem %s134_s18, 32  ;;  %p11973_p8 = scmp.lt.s32.totalorder %s134_s18, %s134_s18 }
  0x54   :  { %p11969_p7 = scmp.ne.s32.totalorder %s134_s18, %s11968_s7  ;;  %p11974_p9 = scmp.lt.s32.totalorder %s11968_s7, %s11968_s7 }
  0x56   :  { %p11975_p10 = por %p11974_p9, %p11973_p8 }
  0x58   :  { %p11976_p11 = pnand %p11975_p10, %p11969_p7 }
  0x5a   :  { %11979 = shalt.err (!%p11976_p11)
}
  0x5b   :  { %136 = dma.hbm_to_vmem [thread:$0]  %s12637_s9, 32, %s134_s18, [#allocation18]  }
  0x5c   :  { %s11980_s11 = scalar_lea.hbm %s12628_s0, 256 }
  0x5d   :  { %p11981_p12 = scmp.ne.s32.totalorder %s12628_s0, %s11980_s11  ;;  %p11984_p13 = scmp.lt.u32.totalorder %s11980_s11, %s12628_s0 }
  0x5f   :  { %p11986_p0 = pnand %p11984_p13, %p11981_p12 }
  0x61   :  { %11989 = shalt.err (!%p11986_p0)
}
  0x62   :  { %s11990_s17 = scalar_lea.vmem %s12271_s21, 256  ;;  %p11995_p2 = scmp.lt.s32.totalorder %s12271_s21, %s12271_s21 }
  0x63   :  { %p11991_p1 = scmp.ne.s32.totalorder %s12271_s21, %s11990_s17  ;;  %p11996_p3 = scmp.lt.s32.totalorder %s11990_s17, %s11990_s17 }
  0x65   :  { %p11997_p4 = por %p11996_p3, %p11995_p2 }
  0x67   :  { %p11998_p5 = pnand %p11997_p4, %p11991_p1 }
  0x69   :  { %12001 = shalt.err (!%p11998_p5)
}
  0x6a   :  { %36 = dma.hbm_to_vmem [thread:$0]  %s12628_s0, 256, %s12271_s21, [#allocation4], %s12132_s19, %s12132_s19, %s12133_s25  }
  0x6b   :  { %s12136_s20 = smov [#allocation7]   ;;  %s12137_s23 = smov [#allocation10]  }
  0x6c   :  { %s55_s22 = sshll.u32 %s12136_s20, 4  ;;  %s77_s3 = sshll.u32 %s12137_s23, 4  ;;  %s56_s22 = int_to_ptr.vmem [resolvable:$true] %s55_s22  ;;  %s78_s3 = int_to_ptr.vmem [resolvable:$true] %s77_s3 }
  0x6d   :  { %s12002_s28 = scalar_lea.hbm %s12630_s2, 256 }
  0x6e   :  { %p12003_p6 = scmp.ne.s32.totalorder %s12630_s2, %s12002_s28  ;;  %p12006_p7 = scmp.lt.u32.totalorder %s12002_s28, %s12630_s2 }
  0x70   :  { %p12008_p8 = pnand %p12006_p7, %p12003_p6 }
  0x72   :  { %12011 = shalt.err (!%p12008_p8)
}
  0x73   :  { %s12012_s0 = scalar_lea.vmem %s56_s22, 256  ;;  %p12017_p10 = scmp.lt.s32.totalorder %s56_s22, %s56_s22 }
  0x74   :  { %p12013_p9 = scmp.ne.s32.totalorder %s56_s22, %s12012_s0  ;;  %p12018_p11 = scmp.lt.s32.totalorder %s12012_s0, %s12012_s0 }
  0x76   :  { %p12019_p12 = por %p12018_p11, %p12017_p10 }
  0x78   :  { %p12020_p13 = pnand %p12019_p12, %p12013_p9 }
  0x7a   :  { %12023 = shalt.err (!%p12020_p13)
}
  0x7b   :  { %58 = dma.hbm_to_vmem [thread:$0]  %s12630_s2, 256, %s56_s22, [#allocation6]  }
  0x7c   :  { %s12024_s14 = scalar_lea.hbm %s12632_s4, 128 }
  0x7d   :  { %p12025_p0 = scmp.ne.s32.totalorder %s12632_s4, %s12024_s14  ;;  %p12028_p1 = scmp.lt.u32.totalorder %s12024_s14, %s12632_s4 }
  0x7f   :  { %p12030_p2 = pnand %p12028_p1, %p12025_p0 }
  0x81   :  { %12033 = shalt.err (!%p12030_p2)
}
  0x82   :  { %s12034_s9 = scalar_lea.vmem %s78_s3, 128  ;;  %p12039_p4 = scmp.lt.s32.totalorder %s78_s3, %s78_s3 }
  0x83   :  { %p12035_p3 = scmp.ne.s32.totalorder %s78_s3, %s12034_s9  ;;  %p12040_p5 = scmp.lt.s32.totalorder %s12034_s9, %s12034_s9 }
  0x85   :  { %p12041_p6 = por %p12040_p5, %p12039_p4 }
  0x87   :  { %p12042_p7 = pnand %p12041_p6, %p12035_p3 }
  0x89   :  { %12045 = shalt.err (!%p12042_p7)
}
  0x8a   :  { %80 = dma.hbm_to_vmem [thread:$0]  %s12632_s4, 128, %s78_s3, [#allocation9]  }
  0x8b   :  { %s12138_s20 = smov [#allocation13]   ;;  %s12139_s23 = smov [#allocation16]  }
  0x8c   :  { %s99_s22 = sshll.u32 %s12138_s20, 4  ;;  %s120_s26 = sshll.u32 %s12139_s23, 4  ;;  %s100_s22 = int_to_ptr.vmem [resolvable:$true] %s99_s22  ;;  %s12329_s26 = int_to_ptr.vmem [resolvable:$true] %s120_s26 }
  0x8d   :  { %s12046_s1 = scalar_lea.hbm %s12634_s6, 32 }
  0x8e   :  { %p12047_p8 = scmp.ne.s32.totalorder %s12634_s6, %s12046_s1  ;;  %p12050_p9 = scmp.lt.u32.totalorder %s12046_s1, %s12634_s6 }
  0x90   :  { %p12052_p10 = pnand %p12050_p9, %p12047_p8 }
  0x92   :  { %12055 = shalt.err (!%p12052_p10)
}
  0x93   :  { %s12056_s4 = scalar_lea.vmem %s100_s22, 32  ;;  %p12061_p12 = scmp.lt.s32.totalorder %s100_s22, %s100_s22 }
  0x94   :  { %p12057_p11 = scmp.ne.s32.totalorder %s100_s22, %s12056_s4  ;;  %p12062_p13 = scmp.lt.s32.totalorder %s12056_s4, %s12056_s4 }
  0x96   :  { %p12063_p0 = por %p12062_p13, %p12061_p12 }
  0x98   :  { %p12064_p1 = pnand %p12063_p0, %p12057_p11 }
  0x9a   :  { %12067 = shalt.err (!%p12064_p1)
}
  0x9b   :  { %102 = dma.hbm_to_vmem [thread:$0]  %s12634_s6, 32, %s100_s22, [#allocation12]  }
  0x9c   :  { %s12068_s11 = scalar_lea.hbm %s12636_s8, 4096 }
  0x9d   :  { %p12069_p2 = scmp.ne.s32.totalorder %s12636_s8, %s12068_s11  ;;  %p12072_p3 = scmp.lt.u32.totalorder %s12068_s11, %s12636_s8 }
  0x9f   :  { %p12074_p4 = pnand %p12072_p3, %p12069_p2 }
  0xa1   :  { %12077 = shalt.err (!%p12074_p4)
}
  0xa2   :  { %s12078_s17 = scalar_lea.vmem %s12329_s26, 4096  ;;  %p12083_p6 = scmp.lt.s32.totalorder %s12329_s26, %s12329_s26 }
  0xa3   :  { %p12079_p5 = scmp.ne.s32.totalorder %s12329_s26, %s12078_s17  ;;  %p12084_p7 = scmp.lt.s32.totalorder %s12078_s17, %s12078_s17 }
  0xa5   :  { %p12085_p8 = por %p12084_p7, %p12083_p6 }
  0xa7   :  { %p12086_p9 = pnand %p12085_p8, %p12079_p5 }
  0xa9   :  { %12089 = shalt.err (!%p12086_p9)
}
  0xaa   :  { %126 = dma.hbm_to_vmem [thread:$0]  %s12636_s8, 4096, %s12329_s26, [#allocation15], %s12132_s19, %s12132_s19, %s12133_s25  }
  0xab   :  { %s12140_s2 = smov [#allocation19]   ;;  %s12090_s23 = scalar_lea.hbm %s12638_s10, 32 }
  0xac   :  { %s143_s18 = sshll.u32 %s12140_s2, 4  ;;  %p12091_p10 = scmp.ne.s32.totalorder %s12638_s10, %s12090_s23  ;;  %s144_s18 = int_to_ptr.vmem [resolvable:$true] %s143_s18 }
  0xad   :  { %p12094_p11 = scmp.lt.u32.totalorder %s12090_s23, %s12638_s10 }
  0xaf   :  { %p12096_p12 = pnand %p12094_p11, %p12091_p10 }
  0xb1   :  { %12099 = shalt.err (!%p12096_p12)
}
  0xb2   :  { %s12100_s15 = scalar_lea.vmem %s144_s18, 32  ;;  %p12105_p0 = scmp.lt.s32.totalorder %s144_s18, %s144_s18 }
  0xb3   :  { %p12101_p13 = scmp.ne.s32.totalorder %s144_s18, %s12100_s15  ;;  %p12106_p1 = scmp.lt.s32.totalorder %s12100_s15, %s12100_s15 }
  0xb5   :  { %p12107_p2 = por %p12106_p1, %p12105_p0 }
  0xb7   :  { %p12108_p3 = pnand %p12107_p2, %p12101_p13 }
  0xb9   :  { %12111 = shalt.err (!%p12108_p3)
}
  0xba   :  { %146 = dma.hbm_to_vmem [thread:$0]  %s12638_s10, 32, %s144_s18, [#allocation18]  }
  0xbb   :  { %12112 = dma.done.wait [#allocation4], 256  }
  0xbc   :  { %12113 = vsyncadd [#allocation4], 4294967040 }
  0xbd   :  { %12114 = dma.done.wait [#allocation6], 8448  }
  0xbe   :  { %12115 = vsyncadd [#allocation6], 4294958848 }
  0xbf   :  { %12116 = dma.done.wait [#allocation9], 131200  }
  0xc0   :  { %12117 = vsyncadd [#allocation9], 4294836096 }
  0xc1   :  { %12118 = dma.done.wait [#allocation12], 16416  }
  0xc2   :  { %12119 = vsyncadd [#allocation12], 4294950880 }
  0xc3   :  { %12120 = dma.done.wait [#allocation15], 8192  }
  0xc4   :  { %12121 = vsyncadd [#allocation15], 4294959104 }
  0xc5   :  { %12122 = dma.done.wait [#allocation18], 64  }
  0xc6   :  { %12123 = vsyncadd [#allocation18], 4294967232  ;;  %v12141_v1 = vmov 0   ;;  %v186_v2 = vld [vmem:[#allocation5] sm:$0xff]  ;;  %v187_v4 = vld [vmem:[#allocation5 + $0x8] sm:$0xff]  ;;  %vm654_vm0 = vcmask 523264  }
  0xc7   :  { %690 = vmatprep.mubr.bf16.mxu0 %v12141_v1  ;;  %733 = vmatprep.mubr.bf16.mxu1 %v12141_v1  ;;  %v194_v3 = vld [vmem:[#allocation5 + $0x40] sm:$0xff]  ;;  %v195_v6 = vld [vmem:[#allocation5 + $0x48] sm:$0xff]  ;;  %v188_v32 = vld [vmem:[#allocation5 + $0x10] sm:$0xff]  ;;  %vm10113_vm1 = vcmask 7168  }
  0xc8   :  { %v10126_v5 = vcombine.high %v186_v2, %v194_v3  ;;  %v10125_v7 = vcombine.low %v186_v2, %v194_v3  ;;  %v202_v8 = vld [vmem:[#allocation5 + $0x80] sm:$0xff]  ;;  %v10128_v10 = vcombine.high %v187_v4, %v195_v6  ;;  %v10127_v11 = vcombine.low %v187_v4, %v195_v6  ;;  %v203_v13 = vld [vmem:[#allocation5 + $0x88] sm:$0xff]  ;;  %v196_v33 = vld [vmem:[#allocation5 + $0x50] sm:$0xff] }
  0xc9   :  { %v210_v9 = vld [vmem:[#allocation5 + $0xc0] sm:$0xff]  ;;  %v211_v14 = vld [vmem:[#allocation5 + $0xc8] sm:$0xff]  ;;  %v189_v34 = vld [vmem:[#allocation5 + $0x18] sm:$0xff]  ;;  %v10130_v40 = vcombine.high %v188_v32, %v196_v33  ;;  %v10129_v45 = vcombine.low %v188_v32, %v196_v33 }
  0xca   :  { %v10142_v12 = vcombine.high %v202_v8, %v210_v9  ;;  %v218_v15 = vld [vmem:[#allocation5 + $0x100] sm:$0xff]  ;;  %658 = vmatprep.subr.bf16.mxu0 %v10126_v5  ;;  %v10144_v16 = vcombine.high %v203_v13, %v211_v14  ;;  %v219_v18 = vld [vmem:[#allocation5 + $0x108] sm:$0xff]  ;;  %701 = vmatprep.subr.bf16.mxu1 %v10128_v10  ;;  %v10141_v20 = vcombine.low %v202_v8, %v210_v9  ;;  %v197_v35 = vld [vmem:[#allocation5 + $0x58] sm:$0xff] }
  0xcb   :  { %v226_v17 = vld [vmem:[#allocation5 + $0x140] sm:$0xff]  ;;  %v227_v19 = vld [vmem:[#allocation5 + $0x148] sm:$0xff]  ;;  %659 = vmatpush1.bf16.msra.mxu0 %v10125_v7  ;;  %702 = vmatpush1.bf16.msra.mxu1 %v10127_v11  ;;  %v10143_v21 = vcombine.low %v203_v13, %v211_v14  ;;  %v183_v37 = vld [vmem:[#allocation3] sm:$0xff]  ;;  %v10132_v43 = vcombine.high %v189_v34, %v197_v35  ;;  %v10131_v51 = vcombine.low %v189_v34, %v197_v35 }
  0xcc   :  { %660 = vmatprep.subr.bf16.mxu0 %v10142_v12  ;;  %v10158_v22 = vcombine.high %v218_v15, %v226_v17  ;;  %703 = vmatprep.subr.bf16.mxu1 %v10144_v16  ;;  %v10160_v23 = vcombine.high %v219_v18, %v227_v19  ;;  %v234_v24 = vld [vmem:[#allocation5 + $0x180] sm:$0xff]  ;;  %v235_v26 = vld [vmem:[#allocation5 + $0x188] sm:$0xff]  ;;  %v10157_v28 = vcombine.low %v218_v15, %v226_v17  ;;  %v184_v38 = vld [vmem:[#allocation3 + $0x8] sm:$0xff] }
  0xcd   :  { %v242_v25 = vld [vmem:[#allocation5 + $0x1c0] sm:$0xff]  ;;  %v243_v27 = vld [vmem:[#allocation5 + $0x1c8] sm:$0xff]  ;;  %v10159_v29 = vcombine.low %v219_v18, %v227_v19  ;;  %v204_v41 = vld [vmem:[#allocation5 + $0x90] sm:$0xff]  ;;  %v12377_v44 = vpack.c.bf16 %v184_v38, %v183_v37 }
  0xce   :  { %v10174_v30 = vcombine.high %v234_v24, %v242_v25  ;;  %v10176_v31 = vcombine.high %v235_v26, %v243_v27  ;;  %v10173_v36 = vcombine.low %v234_v24, %v242_v25  ;;  %v10175_v39 = vcombine.low %v235_v26, %v243_v27  ;;  %v212_v42 = vld [vmem:[#allocation5 + $0xd0] sm:$0xff]  ;;  %v205_v46 = vld [vmem:[#allocation5 + $0x98] sm:$0xff]  ;;  %v190_v3 = vld [vmem:[#allocation5 + $0x20] sm:$0xff] }
  0xcf   :  { %661 = vmatpush1.bf16.msra.mxu0 %v10141_v20  ;;  %704 = vmatpush1.bf16.msra.mxu1 %v10143_v21  ;;  %v213_v47 = vld [vmem:[#allocation5 + $0xd8] sm:$0xff]  ;;  %v10146_v48 = vcombine.high %v204_v41, %v212_v42  ;;  %v220_v49 = vld [vmem:[#allocation5 + $0x110] sm:$0xff]  ;;  %v10145_v53 = vcombine.low %v204_v41, %v212_v42  ;;  %v198_v4 = vld [vmem:[#allocation5 + $0x60] sm:$0xff] }
  0xd0   :  { %662 = vmatprep.subr.bf16.mxu0 %v10158_v22  ;;  %705 = vmatprep.subr.bf16.mxu1 %v10160_v23  ;;  %v228_v50 = vld [vmem:[#allocation5 + $0x150] sm:$0xff]  ;;  %v10148_v52 = vcombine.high %v205_v46, %v213_v47  ;;  %v221_v54 = vld [vmem:[#allocation5 + $0x118] sm:$0xff]  ;;  %v10147_v59 = vcombine.low %v205_v46, %v213_v47  ;;  %v191_v7 = vld [vmem:[#allocation5 + $0x28] sm:$0xff]  ;;  %v10134_v9 = vcombine.high %v190_v3, %v198_v4 }
  0xd1   :  { %v229_v55 = vld [vmem:[#allocation5 + $0x158] sm:$0xff]  ;;  %v10162_v56 = vcombine.high %v220_v49, %v228_v50  ;;  %v236_v57 = vld [vmem:[#allocation5 + $0x190] sm:$0xff]  ;;  %v10161_v61 = vcombine.low %v220_v49, %v228_v50  ;;  %v199_v8 = vld [vmem:[#allocation5 + $0x68] sm:$0xff]  ;;  %v10133_v14 = vcombine.low %v190_v3, %v198_v4 }
  0xd2   :  { %v244_v58 = vld [vmem:[#allocation5 + $0x1d0] sm:$0xff]  ;;  %v10164_v60 = vcombine.high %v221_v54, %v229_v55  ;;  %v237_v62 = vld [vmem:[#allocation5 + $0x198] sm:$0xff]  ;;  %v10163_v2 = vcombine.low %v221_v54, %v229_v55  ;;  %v206_v11 = vld [vmem:[#allocation5 + $0xa0] sm:$0xff]  ;;  %v10136_v13 = vcombine.high %v191_v7, %v199_v8  ;;  %v10135_v18 = vcombine.low %v191_v7, %v199_v8 }
  0xd3   :  { %663 = vmatpush1.bf16.msra.mxu0 %v10157_v28  ;;  %706 = vmatpush1.bf16.msra.mxu1 %v10159_v29  ;;  %v245_v63 = vld [vmem:[#allocation5 + $0x1d8] sm:$0xff]  ;;  %v10178_v0 = vcombine.high %v236_v57, %v244_v58  ;;  %v10177_v6 = vcombine.low %v236_v57, %v244_v58  ;;  %v214_v12 = vld [vmem:[#allocation5 + $0xe0] sm:$0xff]  ;;  %v207_v15 = vld [vmem:[#allocation5 + $0xa8] sm:$0xff] }
  0xd4   :  { %664 = vmatprep.subr.bf16.mxu0 %v10174_v30  ;;  %707 = vmatprep.subr.bf16.mxu1 %v10176_v31  ;;  %v10180_v5 = vcombine.high %v237_v62, %v245_v63  ;;  %v10179_v10 = vcombine.low %v237_v62, %v245_v63  ;;  %v215_v16 = vld [vmem:[#allocation5 + $0xe8] sm:$0xff]  ;;  %v10150_v17 = vcombine.high %v206_v11, %v214_v12  ;;  %v222_v19 = vld [vmem:[#allocation5 + $0x120] sm:$0xff]  ;;  %v192_v33 = vld [vmem:[#allocation5 + $0x30] sm:$0xff] }
  0xd5   :  { %v230_v20 = vld [vmem:[#allocation5 + $0x160] sm:$0xff]  ;;  %v10152_v21 = vcombine.high %v207_v15, %v215_v16  ;;  %v10149_v22 = vcombine.low %v206_v11, %v214_v12  ;;  %v223_v23 = vld [vmem:[#allocation5 + $0x128] sm:$0xff]  ;;  %v10151_v26 = vcombine.low %v207_v15, %v215_v16  ;;  %v200_v34 = vld [vmem:[#allocation5 + $0x70] sm:$0xff] }
  0xd6   :  { %v231_v24 = vld [vmem:[#allocation5 + $0x168] sm:$0xff]  ;;  %v10166_v25 = vcombine.high %v222_v19, %v230_v20  ;;  %v238_v27 = vld [vmem:[#allocation5 + $0x1a0] sm:$0xff]  ;;  %v10165_v31 = vcombine.low %v222_v19, %v230_v20  ;;  %v193_v37 = vld [vmem:[#allocation5 + $0x38] sm:$0xff]  ;;  %v10137_v49 = vcombine.low %v192_v33, %v200_v34 }
  0xd7   :  { %665 = vmatpush1.bf16.msra.mxu0 %v10173_v36  ;;  %708 = vmatpush1.bf16.msra.mxu1 %v10175_v39  ;;  %v246_v28 = vld [vmem:[#allocation5 + $0x1e0] sm:$0xff]  ;;  %v10168_v29 = vcombine.high %v223_v23, %v231_v24  ;;  %v239_v30 = vld [vmem:[#allocation5 + $0x1a8] sm:$0xff]  ;;  %v10167_v36 = vcombine.low %v223_v23, %v231_v24  ;;  %v201_v38 = vld [vmem:[#allocation5 + $0x78] sm:$0xff] }
  0xd8   :  { %744 = vmatprep.subr.bf16.mxu0 %v10130_v40  ;;  %787 = vmatprep.subr.bf16.mxu1 %v10132_v43  ;;  %v247_v32 = vld [vmem:[#allocation5 + $0x1e8] sm:$0xff]  ;;  %v10182_v35 = vcombine.high %v238_v27, %v246_v28  ;;  %v10181_v40 = vcombine.low %v238_v27, %v246_v28  ;;  %v208_v41 = vld [vmem:[#allocation5 + $0xb0] sm:$0xff]  ;;  %v10138_v43 = vcombine.high %v192_v33, %v200_v34  ;;  %v209_v46 = vld [vmem:[#allocation5 + $0xb8] sm:$0xff] }
  0xd9   :  { %v10184_v39 = vcombine.high %v239_v30, %v247_v32  ;;  %v216_v42 = vld [vmem:[#allocation5 + $0xf0] sm:$0xff]  ;;  %v217_v47 = vld [vmem:[#allocation5 + $0xf8] sm:$0xff] }
  0xda   :  { %10189 = vmatmul.mubr.msk.bf16.vlgmr.msra.gmra.mrb[0].mxu0 %vm654_vm0, %v12377_v44  ;;  %10190 = vmatmul.mubr.msk.bf16.vlgmr.msra.gmra.mrb[0].mxu1 %vm654_vm0, %v12377_v44  ;;  %v224_v50 = vld [vmem:[#allocation5 + $0x130] sm:$0xff]  ;;  %v225_v54 = vld [vmem:[#allocation5 + $0x138] sm:$0xff]  ;;  %v10153_v57 = vcombine.low %v208_v41, %v216_v42 }
  0xdb   :  { %745 = vmatpush1.bf16.msra.mxu0 %v10129_v45  ;;  %776 = vmatprep.mubr.bf16.mxu0 %v12141_v1  ;;  %v10183_v45 = vcombine.low %v239_v30, %v247_v32  ;;  %v233_v55 = vld [vmem:[#allocation5 + $0x178] sm:$0xff]  ;;  %v240_v58 = vld [vmem:[#allocation5 + $0x1b0] sm:$0xff] }
  0xdc   :  { %746 = vmatprep.subr.bf16.mxu0 %v10146_v48  ;;  %788 = vmatpush1.bf16.msra.mxu1 %v10131_v51  ;;  %v10140_v48 = vcombine.high %v193_v37, %v201_v38  ;;  %v232_v51 = vld [vmem:[#allocation5 + $0x170] sm:$0xff]  ;;  %v241_v62 = vld [vmem:[#allocation5 + $0x1b8] sm:$0xff] }
  0xdd   :  { %819 = vmatprep.mubr.bf16.mxu1 %v12141_v1  ;;  %789 = vmatprep.subr.bf16.mxu1 %v10148_v52  ;;  %v10154_v52 = vcombine.high %v208_v41, %v216_v42  ;;  %v249_v63 = vld [vmem:[#allocation5 + $0x1f8] sm:$0xff]  ;;  %v1178_v3 = vld [vmem:[#allocation8 + $0x400] sm:$0xff] }
  0xde   :  { %v1182_v4 = vld [vmem:[#allocation8 + $0x420] sm:$0xff] }
  0xdf   :  { %747 = vmatpush1.bf16.msra.mxu0 %v10145_v53  ;;  %v10139_v53 = vcombine.low %v193_v37, %v201_v38  ;;  %v1050_v7 = vld [vmem:[#allocation8] sm:$0xff] }
  0xe0   :  { %748 = vmatprep.subr.bf16.mxu0 %v10162_v56  ;;  %790 = vmatpush1.bf16.msra.mxu1 %v10147_v59  ;;  %v10156_v56 = vcombine.high %v209_v46, %v217_v47  ;;  %v248_v59 = vld [vmem:[#allocation5 + $0x1f0] sm:$0xff] }
  0xe1   :  { %791 = vmatprep.subr.bf16.mxu1 %v10164_v60  ;;  %v10170_v60 = vcombine.high %v224_v50, %v232_v51  ;;  %v1054_v8 = vld [vmem:[#allocation8 + $0x20] sm:$0xff] }
  0xe2   :  { %v1186_v11 = vld [vmem:[#allocation8 + $0x440] sm:$0xff]  ;;  %v10198_v16 = vcombine.high %v1050_v7, %v1054_v8 }
  0xe3   :  { %749 = vmatpush1.bf16.msra.mxu0 %v10161_v61  ;;  %v10155_v61 = vcombine.low %v209_v46, %v217_v47  ;;  %v1190_v12 = vld [vmem:[#allocation8 + $0x460] sm:$0xff] }
  0xe4   :  { %750 = vmatprep.subr.bf16.mxu0 %v10178_v0  ;;  %792 = vmatpush1.bf16.msra.mxu1 %v10163_v2  ;;  %v10172_v0 = vcombine.high %v225_v54, %v233_v55  ;;  %v10169_v2 = vcombine.low %v224_v50, %v232_v51  ;;  %v1062_v15 = vld [vmem:[#allocation8 + $0x60] sm:$0xff]  ;;  %v10334_v20 = vcombine.high %v1186_v11, %v1190_v12 }
  0xe5   :  { %793 = vmatprep.subr.bf16.mxu1 %v10180_v5  ;;  %v10186_v5 = vcombine.high %v240_v58, %v248_v59  ;;  %v1198_v19 = vld [vmem:[#allocation8 + $0x4a0] sm:$0xff] }
  0xe6   :  { %v1070_v23 = vld [vmem:[#allocation8 + $0xa0] sm:$0xff] }
  0xe7   :  { %751 = vmatpush1.bf16.msra.mxu0 %v10177_v6  ;;  %v10171_v6 = vcombine.low %v225_v54, %v233_v55  ;;  %v1206_v27 = vld [vmem:[#allocation8 + $0x4e0] sm:$0xff] }
  0xe8   :  { %830 = vmatprep.subr.bf16.mxu0 %v10134_v9  ;;  %794 = vmatpush1.bf16.msra.mxu1 %v10179_v10  ;;  %v10188_v9 = vcombine.high %v241_v62, %v249_v63  ;;  %v10185_v10 = vcombine.low %v240_v58, %v248_v59  ;;  %v1074_v30 = vld [vmem:[#allocation8 + $0xc0] sm:$0xff] }
  0xe9   :  { %873 = vmatprep.subr.bf16.mxu1 %v10136_v13  ;;  %v10187_v13 = vcombine.low %v241_v62, %v249_v63  ;;  %v1210_v34 = vld [vmem:[#allocation8 + $0x500] sm:$0xff] }
  0xea   :  { %10191 = vmatmul.mubr.msk.bf16.vlgmr.msra.gmra.mrb[4].mxu0 %vm654_vm0, %v12377_v44  ;;  %v1082_v38 = vld [vmem:[#allocation8 + $0x100] sm:$0xff] }
  0xeb   :  { %831 = vmatpush1.bf16.msra.mxu0 %v10133_v14  ;;  %862 = vmatprep.mubr.bf16.mxu0 %v12141_v1  ;;  %v1058_v14 = vld [vmem:[#allocation8 + $0x40] sm:$0xff] }
  0xec   :  { %10192 = vmatmul.mubr.msk.bf16.vlgmr.msra.gmra.mrb[4].mxu1 %vm654_vm0, %v12377_v44  ;;  %832 = vmatprep.subr.bf16.mxu0 %v10150_v17  ;;  %v10325_v17 = vcombine.low %v1178_v3, %v1182_v4  ;;  %v10206_v24 = vcombine.high %v1058_v14, %v1062_v15  ;;  %v1218_v41 = vld [vmem:[#allocation8 + $0x540] sm:$0xff] }
  0xed   :  { %874 = vmatpush1.bf16.msra.mxu1 %v10135_v18  ;;  %905 = vmatprep.mubr.bf16.mxu1 %v12141_v1  ;;  %v1194_v18 = vld [vmem:[#allocation8 + $0x480] sm:$0xff] }
  0xee   :  { %875 = vmatprep.subr.bf16.mxu1 %v10152_v21  ;;  %v10197_v21 = vcombine.low %v1050_v7, %v1054_v8  ;;  %v10342_v28 = vcombine.high %v1194_v18, %v1198_v19  ;;  %v10341_v33 = vcombine.low %v1194_v18, %v1198_v19  ;;  %v1222_v42 = vld [vmem:[#allocation8 + $0x560] sm:$0xff] }
  0xef   :  { %833 = vmatpush1.bf16.msra.mxu0 %v10149_v22  ;;  %v1066_v22 = vld [vmem:[#allocation8 + $0x80] sm:$0xff] }
  0xf0   :  { %834 = vmatprep.subr.bf16.mxu0 %v10166_v25  ;;  %v10333_v25 = vcombine.low %v1186_v11, %v1190_v12  ;;  %v10214_v32 = vcombine.high %v1066_v22, %v1070_v23  ;;  %v10213_v37 = vcombine.low %v1066_v22, %v1070_v23  ;;  %v1090_v46 = vld [vmem:[#allocation8 + $0x140] sm:$0xff] }
  0xf1   :  { %876 = vmatpush1.bf16.msra.mxu1 %v10151_v26  ;;  %v1202_v26 = vld [vmem:[#allocation8 + $0x4c0] sm:$0xff] }
  0xf2   :  { %877 = vmatprep.subr.bf16.mxu1 %v10168_v29  ;;  %v10205_v29 = vcombine.low %v1058_v14, %v1062_v15  ;;  %v1094_v47 = vld [vmem:[#allocation8 + $0x160] sm:$0xff] }
  0xf3   :  { %835 = vmatpush1.bf16.msra.mxu0 %v10165_v31  ;;  %v1078_v31 = vld [vmem:[#allocation8 + $0xe0] sm:$0xff] }
  0xf4   :  { %836 = vmatprep.subr.bf16.mxu0 %v10182_v35  ;;  %v1214_v35 = vld [vmem:[#allocation8 + $0x520] sm:$0xff] }
  0xf5   :  { %878 = vmatpush1.bf16.msra.mxu1 %v10167_v36  ;;  %v10350_v36 = vcombine.high %v1202_v26, %v1206_v27  ;;  %v1226_v50 = vld [vmem:[#allocation8 + $0x580] sm:$0xff] }
  0xf6   :  { %879 = vmatprep.subr.bf16.mxu1 %v10184_v39  ;;  %v1086_v39 = vld [vmem:[#allocation8 + $0x120] sm:$0xff] }
  0xf7   :  { %837 = vmatpush1.bf16.msra.mxu0 %v10181_v40  ;;  %v10349_v40 = vcombine.low %v1202_v26, %v1206_v27  ;;  %v1230_v51 = vld [vmem:[#allocation8 + $0x5a0] sm:$0xff] }
  0xf8   :  { %916 = vmatprep.subr.bf16.mxu0 %v10138_v43  ;;  %v10358_v43 = vcombine.high %v1210_v34, %v1214_v35  ;;  %v1098_v54 = vld [vmem:[#allocation8 + $0x180] sm:$0xff] }
  0xf9   :  { %880 = vmatpush1.bf16.msra.mxu1 %v10183_v45  ;;  %v10221_v45 = vcombine.low %v1074_v30, %v1078_v31  ;;  %v1102_v55 = vld [vmem:[#allocation8 + $0x1a0] sm:$0xff] }
  0xfa   :  { %959 = vmatprep.subr.bf16.mxu1 %v10140_v48  ;;  %10193 = vmatmul.mubr.msk.bf16.vlgmr.msra.gmra.mrb[8].mxu0 %vm654_vm0, %v12377_v44  ;;  %v10230_v48 = vcombine.high %v1082_v38, %v1086_v39  ;;  %v1234_v58 = vld [vmem:[#allocation8 + $0x5c0] sm:$0xff] }
  0xfb   :  { %917 = vmatpush1.bf16.msra.mxu0 %v10137_v49  ;;  %948 = vmatprep.mubr.bf16.mxu0 %v12141_v1  ;;  %v10357_v49 = vcombine.low %v1210_v34, %v1214_v35  ;;  %v1238_v59 = vld [vmem:[#allocation8 + $0x5e0] sm:$0xff] }
  0xfc   :  { %10194 = vmatmul.mubr.msk.bf16.vlgmr.msra.gmra.mrb[8].mxu1 %vm654_vm0, %v12377_v44  ;;  %918 = vmatprep.subr.bf16.mxu0 %v10154_v52  ;;  %v10366_v52 = vcombine.high %v1218_v41, %v1222_v42  ;;  %v1106_v62 = vld [vmem:[#allocation8 + $0x1c0] sm:$0xff] }
  0xfd   :  { %960 = vmatpush1.bf16.msra.mxu1 %v10139_v53  ;;  %991 = vmatprep.mubr.bf16.mxu1 %v12141_v1  ;;  %v10326_v1 = vcombine.high %v1178_v3, %v1182_v4  ;;  %v10229_v53 = vcombine.low %v1082_v38, %v1086_v39  ;;  %v1110_v63 = vld [vmem:[#allocation8 + $0x1e0] sm:$0xff] }
  0xfe   :  { %961 = vmatprep.subr.bf16.mxu1 %v10156_v56  ;;  %v10238_v56 = vcombine.high %v1090_v46, %v1094_v47  ;;  %v1242_v3 = vld [vmem:[#allocation8 + $0x600] sm:$0xff] }
  0xff   :  { %919 = vmatpush1.bf16.msra.mxu0 %v10153_v57  ;;  %v10365_v57 = vcombine.low %v1218_v41, %v1222_v42  ;;  %v1246_v4 = vld [vmem:[#allocation8 + $0x620] sm:$0xff] }
 0x100   :  { %920 = vmatprep.subr.bf16.mxu0 %v10170_v60  ;;  %v10374_v60 = vcombine.high %v1226_v50, %v1230_v51  ;;  %v1114_v7 = vld [vmem:[#allocation8 + $0x200] sm:$0xff] }
 0x101   :  { %962 = vmatpush1.bf16.msra.mxu1 %v10155_v61  ;;  %v10237_v61 = vcombine.low %v1090_v46, %v1094_v47  ;;  %v1118_v8 = vld [vmem:[#allocation8 + $0x220] sm:$0xff] }
 0x102   :  { %963 = vmatprep.subr.bf16.mxu1 %v10172_v0  ;;  %v10246_v0 = vcombine.high %v1098_v54, %v1102_v55  ;;  %v1250_v11 = vld [vmem:[#allocation8 + $0x640] sm:$0xff] }
 0x103   :  { %921 = vmatpush1.bf16.msra.mxu0 %v10169_v2  ;;  %v10373_v2 = vcombine.low %v1226_v50, %v1230_v51  ;;  %v1254_v12 = vld [vmem:[#allocation8 + $0x660] sm:$0xff]  ;;  %v12407_v50 = vld [vmem:[#allocation8 + $0x28] sm:$0xff] }
 0x104   :  { %922 = vmatprep.subr.bf16.mxu0 %v10186_v5  ;;  %v10382_v5 = vcombine.high %v1234_v58, %v1238_v59  ;;  %v1122_v14 = vld [vmem:[#allocation8 + $0x240] sm:$0xff] }
 0x105   :  { %964 = vmatpush1.bf16.msra.mxu1 %v10171_v6  ;;  %v10245_v6 = vcombine.low %v1098_v54, %v1102_v55  ;;  %v1126_v15 = vld [vmem:[#allocation8 + $0x260] sm:$0xff] }
 0x106   :  { %965 = vmatprep.subr.bf16.mxu1 %v10188_v9  ;;  %v10254_v9 = vcombine.high %v1106_v62, %v1110_v63  ;;  %v1258_v18 = vld [vmem:[#allocation8 + $0x680] sm:$0xff]  ;;  %v10269_v27 = vcombine.low %v1122_v14, %v1126_v15 }
 0x107   :  { %923 = vmatpush1.bf16.msra.mxu0 %v10185_v10  ;;  %v10381_v10 = vcombine.low %v1234_v58, %v1238_v59  ;;  %v1262_v19 = vld [vmem:[#allocation8 + $0x6a0] sm:$0xff] }
 0x108   :  { %7279 = vmatprep.subr.bf16.mxu0 %v10326_v1  ;;  %v10390_v1 = vcombine.high %v1242_v3, %v1246_v4  ;;  %v1130_v22 = vld [vmem:[#allocation8 + $0x280] sm:$0xff]  ;;  %v10406_v26 = vcombine.high %v1258_v18, %v1262_v19 }
 0x109   :  { %966 = vmatpush1.bf16.msra.mxu1 %v10187_v13  ;;  %v10253_v13 = vcombine.low %v1106_v62, %v1110_v63  ;;  %v1134_v23 = vld [vmem:[#allocation8 + $0x2a0] sm:$0xff] }
 0x10a   :  { %7236 = vmatprep.subr.bf16.mxu1 %v10198_v16  ;;  %10195 = vmatmul.mubr.msk.bf16.vlgmr.msra.gmra.mrb[12].mxu0 %vm654_vm0, %v12377_v44  ;;  %v10262_v16 = vcombine.high %v1114_v7, %v1118_v8  ;;  %v10277_v35 = vcombine.low %v1130_v22, %v1134_v23  ;;  %v1282_v42 = vld [vmem:[#allocation8 + $0x740] sm:$0xff] }
 0x10b   :  { %7280 = vmatpush1.bf16.msra.mxu0 %v10325_v17  ;;  %v10389_v17 = vcombine.low %v1242_v3, %v1246_v4  ;;  %v12401_v46 = vld [vmem:[#allocation8 + $0x800] sm:$0xff] }
 0x10c   :  { %10196 = vmatmul.mubr.msk.bf16.vlgmr.msra.gmra.mrb[12].mxu1 %vm654_vm0, %v12377_v44  ;;  %7281 = vmatprep.subr.bf16.mxu0 %v10334_v20  ;;  %v10222_v44 = vcombine.high %v1074_v30, %v1078_v31  ;;  %v10398_v20 = vcombine.high %v1250_v11, %v1254_v12  ;;  %v1270_v30 = vld [vmem:[#allocation8 + $0x6e0] sm:$0xff]  ;;  %v10278_v31 = vcombine.high %v1130_v22, %v1134_v23 }
 0x10d   :  { %7237 = vmatpush1.bf16.msra.mxu1 %v10197_v21  ;;  %v10261_v21 = vcombine.low %v1114_v7, %v1118_v8  ;;  %v12403_v47 = vld [vmem:[#allocation8 + $0x820] sm:$0xff] }
 0x10e   :  { %7238 = vmatprep.subr.bf16.mxu1 %v10206_v24  ;;  %v10270_v24 = vcombine.high %v1122_v14, %v1126_v15  ;;  %v10453_v54 = vcombine.low %v12401_v46, %v12403_v47  ;;  %v1290_v58 = vld [vmem:[#allocation8 + $0x780] sm:$0xff]  ;;  %v254_v15 = vlaneseq }
 0x10f   :  { %7282 = vmatpush1.bf16.msra.mxu0 %v10333_v25  ;;  %v10397_v25 = vcombine.low %v1250_v11, %v1254_v12  ;;  %v1294_v59 = vld [vmem:[#allocation8 + $0x7a0] sm:$0xff] }
 0x110   :  { %7283 = vmatprep.subr.bf16.mxu0 %v10342_v28  ;;  %v1138_v28 = vld [vmem:[#allocation8 + $0x2c0] sm:$0xff] }
 0x111   :  { %7239 = vmatpush1.bf16.msra.mxu1 %v10205_v29  ;;  %v1266_v29 = vld [vmem:[#allocation8 + $0x6c0] sm:$0xff] }
 0x112   :  { %7240 = vmatprep.subr.bf16.mxu1 %v10214_v32  ;;  %v1142_v32 = vld [vmem:[#allocation8 + $0x2e0] sm:$0xff]  ;;  %v10414_v34 = vcombine.high %v1266_v29, %v1270_v30  ;;  %v10413_v39 = vcombine.low %v1266_v29, %v1270_v30 }
 0x113   :  { %7284 = vmatpush1.bf16.msra.mxu0 %v10341_v33  ;;  %v10405_v33 = vcombine.low %v1258_v18, %v1262_v19  ;;  %v10286_v38 = vcombine.high %v1138_v28, %v1142_v32  ;;  %v1162_v62 = vld [vmem:[#allocation8 + $0x380] sm:$0xff]  ;;  %v12419_v18 = vld [vmem:[#allocation7] sm:$0xff] }
 0x114   :  { %7285 = vmatprep.subr.bf16.mxu0 %v10350_v36  ;;  %v1274_v36 = vld [vmem:[#allocation8 + $0x700] sm:$0xff] }
 0x115   :  { %7241 = vmatpush1.bf16.msra.mxu1 %v10213_v37  ;;  %v1278_v37 = vld [vmem:[#allocation8 + $0x720] sm:$0xff] }
 0x116   :  { %7242 = vmatprep.subr.bf16.mxu1 %v10222_v44  ;;  %v1146_v44 = vld [vmem:[#allocation8 + $0x300] sm:$0xff]  ;;  %v10422_v41 = vcombine.high %v1274_v36, %v1278_v37  ;;  %v10421_v51 = vcombine.low %v1274_v36, %v1278_v37 }
 0x117   :  { %7286 = vmatpush1.bf16.msra.mxu0 %v10349_v40  ;;  %v1150_v40 = vld [vmem:[#allocation8 + $0x320] sm:$0xff] }
 0x118   :  { %7287 = vmatprep.subr.bf16.mxu0 %v10358_v43  ;;  %v1286_v43 = vld [vmem:[#allocation8 + $0x760] sm:$0xff] }
 0x119   :  { %7243 = vmatpush1.bf16.msra.mxu1 %v10221_v45  ;;  %v10285_v45 = vcombine.low %v1138_v28, %v1142_v32  ;;  %v1166_v63 = vld [vmem:[#allocation8 + $0x3a0] sm:$0xff] }
 0x11a   :  { %7244 = vmatprep.subr.bf16.mxu1 %v10230_v48  ;;  %v12405_v48 = vld [vmem:[#allocation8 + $0x8] sm:$0xff]  ;;  %v1298_v3 = vld [vmem:[#allocation8 + $0x7c0] sm:$0xff] }
 0x11b   :  { %7288 = vmatpush1.bf16.msra.mxu0 %v10357_v49  ;;  %v10294_v49 = vcombine.high %v1146_v44, %v1150_v40  ;;  %v10199_v55 = vcombine.low %v12405_v48, %v12407_v50  ;;  %v1302_v4 = vld [vmem:[#allocation8 + $0x7e0] sm:$0xff]  ;;  %v10200_v14 = vcombine.high %v12405_v48, %v12407_v50  ;;  %v1079_v48 = vld [vmem:[#allocation8 + $0xe8] sm:$0xff] }
 0x11c   :  { %7289 = vmatprep.subr.bf16.mxu0 %v10366_v52  ;;  %v1154_v52 = vld [vmem:[#allocation8 + $0x340] sm:$0xff]  ;;  %v10445_v12 = vcombine.low %v1298_v3, %v1302_v4 }
 0x11d   :  { %7245 = vmatpush1.bf16.msra.mxu1 %v10229_v53  ;;  %v1158_v53 = vld [vmem:[#allocation8 + $0x360] sm:$0xff] }
 0x11e   :  { %7246 = vmatprep.subr.bf16.mxu1 %v10238_v56  ;;  %v10430_v56 = vcombine.high %v1282_v42, %v1286_v43  ;;  %v1170_v7 = vld [vmem:[#allocation8 + $0x3c0] sm:$0xff] }
 0x11f   :  { %7290 = vmatpush1.bf16.msra.mxu0 %v10365_v57  ;;  %v10293_v57 = vcombine.low %v1146_v44, %v1150_v40  ;;  %v1174_v8 = vld [vmem:[#allocation8 + $0x3e0] sm:$0xff] }
 0x120   :  { %7291 = vmatprep.subr.bf16.mxu0 %v10374_v60  ;;  %v10302_v60 = vcombine.high %v1154_v52, %v1158_v53  ;;  %v10318_v11 = vcombine.high %v1170_v7, %v1174_v8 }
 0x121   :  { %7247 = vmatpush1.bf16.msra.mxu1 %v10237_v61  ;;  %v10429_v61 = vcombine.low %v1282_v42, %v1286_v43 }
 0x122   :  { %7248 = vmatprep.subr.bf16.mxu1 %v10246_v0  ;;  %v10438_v0 = vcombine.high %v1290_v58, %v1294_v59 }
 0x123   :  { %7292 = vmatpush1.bf16.msra.mxu0 %v10373_v2  ;;  %v10301_v2 = vcombine.low %v1154_v52, %v1158_v53  ;;  %v1314_v53 = vld [vmem:[#allocation8 + $0x840] sm:$0xff] }
 0x124   :  { %7293 = vmatprep.subr.bf16.mxu0 %v10382_v5  ;;  %v10310_v5 = vcombine.high %v1162_v62, %v1166_v63 }
 0x125   :  { %7249 = vmatpush1.bf16.msra.mxu1 %v10245_v6  ;;  %v10437_v6 = vcombine.low %v1290_v58, %v1294_v59  ;;  %v1318_v58 = vld [vmem:[#allocation8 + $0x860] sm:$0xff]  ;;  %v1059_v59 = vld [vmem:[#allocation8 + $0x48] sm:$0xff] }
 0x126   :  { %7250 = vmatprep.subr.bf16.mxu1 %v10254_v9  ;;  %v10446_v9 = vcombine.high %v1298_v3, %v1302_v4  ;;  %v1067_v4 = vld [vmem:[#allocation8 + $0x88] sm:$0xff] }
 0x127   :  { %7294 = vmatpush1.bf16.msra.mxu0 %v10381_v10  ;;  %v10309_v10 = vcombine.low %v1162_v62, %v1166_v63 }
 0x128   :  { %7295 = vmatprep.subr.bf16.mxu0 %v10390_v1  ;;  %v10454_v1 = vcombine.high %v12401_v46, %v12403_v47 }
 0x129   :  { %7251 = vmatpush1.bf16.msra.mxu1 %v10253_v13  ;;  %v10317_v13 = vcombine.low %v1170_v7, %v1174_v8  ;;  %v1322_v7 = vld [vmem:[#allocation8 + $0x880] sm:$0xff] }
 0x12a   :  { %7252 = vmatprep.subr.bf16.mxu1 %v10262_v16  ;;  %v255_v16 = vshrl.u32 %v254_v15, 7  ;;  %v1326_v8 = vld [vmem:[#allocation8 + $0x8a0] sm:$0xff]  ;;  %v1075_v15 = vld [vmem:[#allocation8 + $0xc8] sm:$0xff] }
 0x12b   :  { %7296 = vmatpush1.bf16.msra.mxu0 %v10389_v17 }
 0x12c   :  { %7297 = vmatprep.subr.bf16.mxu0 %v10398_v20  ;;  %v12417_v17 = vsub.s32 0, %v255_v16  ;;  %v12421_v19 = vsub.s32 2, %v255_v16  ;;  %v12423_v20 = vsub.s32 1, %v255_v16 }
 0x12d   :  { %7253 = vmatpush1.bf16.msra.mxu1 %v10261_v21  ;;  %v12425_v21 = vsub.s32 3, %v255_v16 }
 0x12e   :  { %7254 = vmatprep.subr.bf16.mxu1 %v10270_v24  ;;  %v257_v22 = vrot.slane %v12419_v18, %v12417_v17  ;;  %v265_v23 = vrot.slane %v12419_v18, %v12421_v19  ;;  %v261_v24 = vrot.slane %v12419_v18, %v12423_v20 }
 0x12f   :  { %7298 = vmatpush1.bf16.msra.mxu0 %v10397_v25  ;;  %v269_v25 = vrot.slane %v12419_v18, %v12425_v21 }
 0x130   :  { %7299 = vmatprep.subr.bf16.mxu0 %v10406_v26 }
 0x131   :  { %7255 = vmatpush1.bf16.msra.mxu1 %v10269_v27 }
 0x132   :  { %7256 = vmatprep.subr.bf16.mxu1 %v10278_v31 }
 0x133   :  { %7300 = vmatpush1.bf16.msra.mxu0 %v10405_v33 }
 0x134   :  { %7301 = vmatprep.subr.bf16.mxu0 %v10414_v34 }
 0x135   :  { %7257 = vmatpush1.bf16.msra.mxu1 %v10277_v35 }
 0x136   :  { %7258 = vmatprep.subr.bf16.mxu1 %v10286_v38 }
 0x137   :  { %7302 = vmatpush1.bf16.msra.mxu0 %v10413_v39 }
 0x138   :  { %7303 = vmatprep.subr.bf16.mxu0 %v10422_v41 }
 0x139   :  { %7259 = vmatpush1.bf16.msra.mxu1 %v10285_v45 }
 0x13a   :  { %7260 = vmatprep.subr.bf16.mxu1 %v10294_v49 }
 0x13b   :  { %7304 = vmatpush1.bf16.msra.mxu0 %v10421_v51 }
 0x13c   :  { %7305 = vmatprep.subr.bf16.mxu0 %v10430_v56 }
 0x13d   :  { %7261 = vmatpush1.bf16.msra.mxu1 %v10293_v57 }
 0x13e   :  { %7262 = vmatprep.subr.bf16.mxu1 %v10302_v60  ;;  %v1063_v60 = vld [vmem:[#allocation8 + $0x68] sm:$0xff] }
 0x13f   :  { %7306 = vmatpush1.bf16.msra.mxu0 %v10429_v61  ;;  %v10208_v3 = vcombine.high %v1059_v59, %v1063_v60 }
 0x140   :  { %7307 = vmatprep.subr.bf16.mxu0 %v10438_v0  ;;  %v12443_v0 = vsub.s32 4, %v255_v16 }
 0x141   :  { %7263 = vmatpush1.bf16.msra.mxu1 %v10301_v2  ;;  %v10462_v2 = vcombine.high %v1314_v53, %v1318_v58 }
 0x142   :  { %7264 = vmatprep.subr.bf16.mxu1 %v10310_v5  ;;  %v1071_v5 = vld [vmem:[#allocation8 + $0xa8] sm:$0xff] }
 0x143   :  { %7308 = vmatpush1.bf16.msra.mxu0 %v10437_v6  ;;  %v12446_v6 = vsub.s32 5, %v255_v16  ;;  %v10215_v47 = vcombine.low %v1067_v4, %v1071_v5 }
 0x144   :  { %7309 = vmatprep.subr.bf16.mxu0 %v10446_v9  ;;  %v12450_v9 = vsub.s32 6, %v255_v16 }
 0x145   :  { %7265 = vmatpush1.bf16.msra.mxu1 %v10309_v10  ;;  %v10207_v10 = vcombine.low %v1059_v59, %v1063_v60  ;;  %v277_v50 = vrot.slane %v12419_v18, %v12446_v6  ;;  %v1095_v59 = vld [vmem:[#allocation8 + $0x168] sm:$0xff] }
 0x146   :  { %7266 = vmatprep.subr.bf16.mxu1 %v10318_v11  ;;  %v12456_v11 = vsub.s32 7, %v255_v16  ;;  %v1334_v16 = vld [vmem:[#allocation8 + $0x8e0] sm:$0xff]  ;;  %v281_v46 = vrot.slane %v12419_v18, %v12450_v9 }
 0x147   :  { %7310 = vmatpush1.bf16.msra.mxu0 %v10445_v12  ;;  %v10461_v12 = vcombine.low %v1314_v53, %v1318_v58  ;;  %v1091_v58 = vld [vmem:[#allocation8 + $0x148] sm:$0xff] }
 0x148   :  { %7322 = vmatprep.subr.bf16.mxu0 %v10454_v1  ;;  %v10216_v1 = vcombine.high %v1067_v4, %v1071_v5  ;;  %v1346_v4 = vld [vmem:[#allocation8 + $0x940] sm:$0xff] }
 0x149   :  { %7267 = vmatpush1.bf16.msra.mxu1 %v10317_v13  ;;  %v273_v13 = vrot.slane %v12419_v18, %v12443_v0  ;;  %v1350_v5 = vld [vmem:[#allocation8 + $0x960] sm:$0xff] }
 0x14a   :  { %7580 = vmatprep.subr.bf16.mxu1 %v10200_v14  ;;  %v10470_v14 = vcombine.high %v1322_v7, %v1326_v8 }
 0x1ad   :  { %v692_v26 = vpop.f32.mrb[0].mxu0  ;;  %v735_v28 = vpop.f32.mrb[0].mxu1 }
 0x1ae   :  { %v693_v27 = vadd.f32 %v692_v26, %v257_v22  ;;  %v694_v29 = vpop.f32.mrb[1].mxu0  ;;  %v736_v30 = vadd.f32 %v735_v28, %v265_v23  ;;  %v737_v32 = vpop.f32.mrb[1].mxu1  ;;  %v1083_v28 = vld [vmem:[#allocation8 + $0x108] sm:$0xff] }
 0x1af   :  { %v695_v31 = vadd.f32 %v694_v29, %v261_v24  ;;  %v696_v33 = vpop.f32.mrb[2].mxu0  ;;  %v738_v34 = vadd.f32 %v737_v32, %v269_v25  ;;  %v739_v36 = vpop.f32.mrb[2].mxu1  ;;  %v1087_v29 = vld [vmem:[#allocation8 + $0x128] sm:$0xff] }
 0x1b0   :  { %v697_v35 = vadd.f32 %v696_v33, %v257_v22  ;;  %v698_v37 = vpop.f32.mrb[3].mxu0  ;;  %v1004_v38 = vmax.f32 %v736_v30, 0.0  ;;  %v740_v39 = vadd.f32 %v739_v36, %v265_v23  ;;  %v741_v40 = vpop.f32.mrb[3].mxu1  ;;  %v1002_v41 = vmax.f32 %v693_v27, 0.0 }
 0x1b1   :  { %v699_v44 = vadd.f32 %v698_v37, %v261_v24  ;;  %v1005_v42 = vmax.f32 %v738_v34, 0.0  ;;  %v742_v45 = vadd.f32 %v741_v40, %v269_v25  ;;  %v1003_v49 = vmax.f32 %v695_v31, 0.0  ;;  %v1338_v34 = vld [vmem:[#allocation8 + $0x900] sm:$0xff] }
 0x1b2   :  { %v1018_v43 = vmax.f32 %v697_v35, 0.0  ;;  %v1020_v51 = vmax.f32 %v740_v39, 0.0  ;;  %v285_v22 = vrot.slane %v12419_v18, %v12456_v11  ;;  %v10469_v23 = vcombine.low %v1322_v7, %v1326_v8  ;;  %v1342_v35 = vld [vmem:[#allocation8 + $0x920] sm:$0xff] }
 0x1b3   :  { %v1019_v52 = vmax.f32 %v699_v44, 0.0  ;;  %v1021_v57 = vmax.f32 %v742_v45, 0.0  ;;  %v10224_v24 = vcombine.high %v1075_v15, %v1079_v48  ;;  %v10223_v44 = vcombine.low %v1075_v15, %v1079_v48 }
 0x1b4   :  { %v12435_v56 = vpack.c.bf16 %v1018_v43, %v1002_v41  ;;  %v12437_v61 = vpack.c.bf16 %v1020_v51, %v1004_v38  ;;  %v10232_v45 = vcombine.high %v1083_v28, %v1087_v29  ;;  %v10494_v48 = vcombine.high %v1346_v4, %v1350_v5 }
 0x1b5   :  { %v12439_v62 = vpack.c.bf16 %v1019_v52, %v1003_v49  ;;  %v12441_v63 = vpack.c.bf16 %v1021_v57, %v1005_v42  ;;  %v10486_v57 = vcombine.high %v1338_v34, %v1342_v35 }
 0x1b7   :  { %7268 = vmatprep.mubr.bf16.mxu1 %v12439_v62  ;;  %7311 = vmatprep.mubr.bf16.mxu0 %v12441_v63 }
 0x1b8   :  { %7269 = vmatmul.mubr.bf16.vlgmr.msra.gmra.mrb[16].mxu1 %v12435_v56  ;;  %7312 = vmatmul.mubr.bf16.vlgmr.msra.gmra.mrb[16].mxu0 %v12437_v61 }
 0x1b9   :  { %7581 = vmatpush1.bf16.msra.mxu1 %v10199_v55  ;;  %7323 = vmatpush1.bf16.msra.mxu0 %v10453_v54  ;;  %v1330_v55 = vld [vmem:[#allocation8 + $0x8c0] sm:$0xff] }
 0x1ba   :  { %7612 = vmatprep.mubr.bf16.mxu1 %v12439_v62  ;;  %7324 = vmatprep.subr.bf16.mxu0 %v10462_v2  ;;  %v10478_v27 = vcombine.high %v1330_v55, %v1334_v16  ;;  %v10477_v33 = vcombine.low %v1330_v55, %v1334_v16  ;;  %v1103_v55 = vld [vmem:[#allocation8 + $0x1a8] sm:$0xff] }
 0x1bb   :  { %7582 = vmatprep.subr.bf16.mxu1 %v10208_v3 }
 0x1bd   :  { %7583 = vmatpush1.bf16.msra.mxu1 %v10207_v10  ;;  %v778_v54 = vpop.f32.mrb[4].mxu0  ;;  %7325 = vmatpush1.bf16.msra.mxu0 %v10461_v12  ;;  %v10231_v10 = vcombine.low %v1083_v28, %v1087_v29  ;;  %v1362_v28 = vld [vmem:[#allocation8 + $0x9c0] sm:$0xff] }
 0x1be   :  { %7584 = vmatprep.subr.bf16.mxu1 %v10216_v1  ;;  %v779_v25 = vadd.f32 %v778_v54, %v273_v13  ;;  %v780_v26 = vpop.f32.mrb[5].mxu0  ;;  %7326 = vmatprep.subr.bf16.mxu0 %v10470_v14  ;;  %v10240_v14 = vcombine.high %v1091_v58, %v1095_v59  ;;  %v10239_v54 = vcombine.low %v1091_v58, %v1095_v59  ;;  %v1366_v29 = vld [vmem:[#allocation8 + $0x9e0] sm:$0xff]  ;;  %v1123_v58 = vld [vmem:[#allocation8 + $0x248] sm:$0xff] }
 0x1bf   :  { %v781_v30 = vadd.f32 %v780_v26, %v277_v50  ;;  %v782_v31 = vpop.f32.mrb[6].mxu0  ;;  %v821_v32 = vpop.f32.mrb[4].mxu1  ;;  %v1107_v26 = vld [vmem:[#allocation8 + $0x1c8] sm:$0xff] }
 0x1c0   :  { %v1006_v36 = vmax.f32 %v779_v25, 0.0  ;;  %v783_v37 = vadd.f32 %v782_v31, %v273_v13  ;;  %v784_v38 = vpop.f32.mrb[7].mxu0  ;;  %v822_v18 = vadd.f32 %v821_v32, %v281_v46  ;;  %v823_v39 = vpop.f32.mrb[5].mxu1  ;;  %v10485_v13 = vcombine.low %v1338_v34, %v1342_v35  ;;  %v1127_v59 = vld [vmem:[#allocation8 + $0x268] sm:$0xff] }
 0x1c1   :  { %7585 = vmatpush1.bf16.msra.mxu1 %v10215_v47  ;;  %v1007_v40 = vmax.f32 %v781_v30, 0.0  ;;  %v785_v41 = vadd.f32 %v784_v38, %v277_v50  ;;  %v824_v42 = vadd.f32 %v823_v39, %v285_v22  ;;  %v825_v43 = vpop.f32.mrb[6].mxu1  ;;  %7327 = vmatpush1.bf16.msra.mxu0 %v10469_v23  ;;  %v1099_v50 = vld [vmem:[#allocation8 + $0x188] sm:$0xff]  ;;  %v1358_v47 = vld [vmem:[#allocation8 + $0x9a0] sm:$0xff]  ;;  %v10493_v23 = vcombine.low %v1346_v4, %v1350_v5 }
 0x1c2   :  { %7586 = vmatprep.subr.bf16.mxu1 %v10224_v24  ;;  %v1022_v49 = vmax.f32 %v783_v37, 0.0  ;;  %v1008_v51 = vmax.f32 %v822_v18, 0.0  ;;  %v826_v52 = vadd.f32 %v825_v43, %v281_v46  ;;  %v827_v53 = vpop.f32.mrb[7].mxu1  ;;  %7328 = vmatprep.subr.bf16.mxu0 %v10478_v27  ;;  %v1354_v46 = vld [vmem:[#allocation8 + $0x980] sm:$0xff]  ;;  %v10248_v24 = vcombine.high %v1099_v50, %v1103_v55  ;;  %v1111_v27 = vld [vmem:[#allocation8 + $0x1e8] sm:$0xff] }
 0x1c3   :  { %v1023_v60 = vmax.f32 %v785_v41, 0.0  ;;  %v1009_v2 = vmax.f32 %v824_v42, 0.0  ;;  %v828_v3 = vadd.f32 %v827_v53, %v285_v22  ;;  %v12479_v22 = vld [vmem:[#allocation7 + $0x8] sm:$0xff]  ;;  %v10502_v25 = vcombine.high %v1354_v46, %v1358_v47  ;;  %v1119_v37 = vld [vmem:[#allocation8 + $0x228] sm:$0xff]  ;;  %v1370_v18 = vld [vmem:[#allocation8 + $0xa00] sm:$0xff] }
 0x1c4   :  { %v12470_v7 = vpack.c.bf16 %v1022_v49, %v1006_v36  ;;  %v1024_v8 = vmax.f32 %v826_v52, 0.0  ;;  %v297_v30 = vrot.slane %v12479_v22, %v12421_v19  ;;  %v10247_v31 = vcombine.low %v1099_v50, %v1103_v55  ;;  %v1115_v36 = vld [vmem:[#allocation8 + $0x208] sm:$0xff]  ;;  %v1374_v39 = vld [vmem:[#allocation8 + $0xa20] sm:$0xff] }
 0x1c5   :  { %7587 = vmatpush1.bf16.msra.mxu1 %v10223_v44  ;;  %v12472_v12 = vpack.c.bf16 %v1023_v60, %v1007_v40  ;;  %v1025_v1 = vmax.f32 %v828_v3, 0.0  ;;  %7329 = vmatpush1.bf16.msra.mxu0 %v10477_v33  ;;  %v301_v32 = vrot.slane %v12479_v22, %v12425_v21  ;;  %v10501_v33 = vcombine.low %v1354_v46, %v1358_v47  ;;  %v1378_v3 = vld [vmem:[#allocation8 + $0xa40] sm:$0xff]  ;;  %v1131_v50 = vld [vmem:[#allocation8 + $0x288] sm:$0xff] }
 0x1c6   :  { %7588 = vmatprep.subr.bf16.mxu1 %v10232_v45  ;;  %v12474_v15 = vpack.c.bf16 %v1024_v8, %v1008_v51  ;;  %7330 = vmatprep.subr.bf16.mxu0 %v10486_v57  ;;  %v10256_v34 = vcombine.high %v1107_v26, %v1111_v27  ;;  %v10510_v35 = vcombine.high %v1362_v28, %v1366_v29  ;;  %v1382_v4 = vld [vmem:[#allocation8 + $0xa60] sm:$0xff]  ;;  %v1135_v55 = vld [vmem:[#allocation8 + $0x2a8] sm:$0xff] }
 0x1c7   :  { %7354 = vmatprep.mubr.bf16.mxu0 %v12472_v12  ;;  %v12477_v16 = vpack.c.bf16 %v1025_v1, %v1009_v2  ;;  %v10255_v41 = vcombine.low %v1107_v26, %v1111_v27  ;;  %v10509_v45 = vcombine.low %v1362_v28, %v1366_v29  ;;  %v10264_v49 = vcombine.high %v1115_v36, %v1119_v37  ;;  %v1386_v47 = vld [vmem:[#allocation8 + $0xa80] sm:$0xff]  ;;  %v1139_v27 = vld [vmem:[#allocation8 + $0x2c8] sm:$0xff] }
 0x1c8   :  { %v10518_v57 = vcombine.high %v1370_v18, %v1374_v39  ;;  %v10263_v8 = vcombine.low %v1115_v36, %v1119_v37  ;;  %v10517_v1 = vcombine.low %v1370_v18, %v1374_v39  ;;  %v1143_v28 = vld [vmem:[#allocation8 + $0x2e8] sm:$0xff]  ;;  %v1394_v29 = vld [vmem:[#allocation8 + $0xac0] sm:$0xff] }
 0x1c9   :  { %7589 = vmatpush1.bf16.msra.mxu1 %v10231_v10  ;;  %7331 = vmatpush1.bf16.msra.mxu0 %v10485_v13  ;;  %v10272_v13 = vcombine.high %v1123_v58, %v1127_v59  ;;  %v1147_v37 = vld [vmem:[#allocation8 + $0x308] sm:$0xff]  ;;  %v1402_v39 = vld [vmem:[#allocation8 + $0xb00] sm:$0xff] }
 0x1ca   :  { %7590 = vmatprep.subr.bf16.mxu1 %v10240_v14  ;;  %7332 = vmatprep.subr.bf16.mxu0 %v10494_v48  ;;  %v10526_v48 = vcombine.high %v1378_v3, %v1382_v4 }
 0x1cd   :  { %7591 = vmatpush1.bf16.msra.mxu1 %v10239_v54  ;;  %7333 = vmatpush1.bf16.msra.mxu0 %v10493_v23  ;;  %v1390_v54 = vld [vmem:[#allocation8 + $0xaa0] sm:$0xff]  ;;  %v10271_v23 = vcombine.low %v1123_v58, %v1127_v59  ;;  %v1155_v59 = vld [vmem:[#allocation8 + $0x348] sm:$0xff] }
 0x1ce   :  { %7592 = vmatprep.subr.bf16.mxu1 %v10248_v24  ;;  %7334 = vmatprep.subr.bf16.mxu0 %v10502_v25  ;;  %v10525_v24 = vcombine.low %v1378_v3, %v1382_v4  ;;  %v10280_v25 = vcombine.high %v1131_v50, %v1135_v55  ;;  %v10534_v26 = vcombine.high %v1386_v47, %v1390_v54  ;;  %v1410_v4 = vld [vmem:[#allocation8 + $0xb40] sm:$0xff] }
 0x1cf   :  { %v907_v38 = vpop.f32.mrb[8].mxu1 }
 0x1d0   :  { %v908_v44 = vadd.f32 %v907_v38, %v297_v30  ;;  %v909_v40 = vpop.f32.mrb[9].mxu1  ;;  %v1151_v38 = vld [vmem:[#allocation8 + $0x328] sm:$0xff] }
 0x1d1   :  { %7593 = vmatpush1.bf16.msra.mxu1 %v10247_v31  ;;  %v910_v42 = vadd.f32 %v909_v40, %v301_v32  ;;  %v911_v43 = vpop.f32.mrb[10].mxu1  ;;  %7335 = vmatpush1.bf16.msra.mxu0 %v10501_v33  ;;  %v313_v31 = vrot.slane %v12479_v22, %v12450_v9  ;;  %v317_v33 = vrot.slane %v12479_v22, %v12456_v11 }
 0x1d2   :  { %7594 = vmatprep.subr.bf16.mxu1 %v10256_v34  ;;  %v1012_v51 = vmax.f32 %v908_v44, 0.0  ;;  %v912_v52 = vadd.f32 %v911_v43, %v297_v30  ;;  %v913_v53 = vpop.f32.mrb[11].mxu1  ;;  %7336 = vmatprep.subr.bf16.mxu0 %v10510_v35  ;;  %v1398_v30 = vld [vmem:[#allocation8 + $0xae0] sm:$0xff]  ;;  %v10533_v34 = vcombine.low %v1386_v47, %v1390_v54  ;;  %v10288_v35 = vcombine.high %v1139_v27, %v1143_v28  ;;  %v1163_v47 = vld [vmem:[#allocation8 + $0x388] sm:$0xff] }
 0x1d3   :  { %v1013_v60 = vmax.f32 %v910_v42, 0.0  ;;  %v914_v2 = vadd.f32 %v913_v53, %v301_v32  ;;  %v10279_v32 = vcombine.low %v1131_v50, %v1135_v55  ;;  %v10542_v36 = vcombine.high %v1394_v29, %v1398_v30  ;;  %v1406_v44 = vld [vmem:[#allocation8 + $0xb20] sm:$0xff]  ;;  %v1167_v54 = vld [vmem:[#allocation8 + $0x3a8] sm:$0xff] }
 0x1d4   :  { %v1028_v5 = vmax.f32 %v912_v52, 0.0  ;;  %v10287_v42 = vcombine.low %v1139_v27, %v1143_v28  ;;  %v10550_v58 = vcombine.high %v1402_v39, %v1406_v44  ;;  %v10312_v28 = vcombine.high %v1163_v47, %v1167_v54 }
 0x1d5   :  { %7595 = vmatpush1.bf16.msra.mxu1 %v10255_v41  ;;  %v1029_v10 = vmax.f32 %v914_v2, 0.0  ;;  %7337 = vmatpush1.bf16.msra.mxu0 %v10509_v45 }
 0x1d6   :  { %7596 = vmatprep.subr.bf16.mxu1 %v10264_v49  ;;  %v12485_v14 = vpack.c.bf16 %v1028_v5, %v1012_v51  ;;  %7338 = vmatprep.subr.bf16.mxu0 %v10518_v57  ;;  %v10541_v49 = vcombine.low %v1394_v29, %v1398_v30  ;;  %v10296_v51 = vcombine.high %v1147_v37, %v1151_v38  ;;  %v1414_v5 = vld [vmem:[#allocation8 + $0xb60] sm:$0xff]  ;;  %v1171_v30 = vld [vmem:[#allocation8 + $0x3c8] sm:$0xff] }
 0x1d7   :  { %v12487_v46 = vpack.c.bf16 %v1029_v10, %v1013_v60  ;;  %v1159_v60 = vld [vmem:[#allocation8 + $0x368] sm:$0xff]  ;;  %v10295_v10 = vcombine.low %v1147_v37, %v1151_v38  ;;  %v10558_v55 = vcombine.high %v1410_v4, %v1414_v5  ;;  %v10557_v27 = vcombine.low %v1410_v4, %v1414_v5 }
 0x1d9   :  { %7597 = vmatpush1.bf16.msra.mxu1 %v10263_v8  ;;  %7339 = vmatpush1.bf16.msra.mxu0 %v10517_v1 }
 0x1da   :  { %7598 = vmatprep.subr.bf16.mxu1 %v10272_v13  ;;  %7340 = vmatprep.subr.bf16.mxu0 %v10526_v48  ;;  %v10549_v13 = vcombine.low %v1402_v39, %v1406_v44  ;;  %v10304_v48 = vcombine.high %v1155_v59, %v1159_v60  ;;  %v293_v39 = vrot.slane %v12479_v22, %v12423_v20 }
 0x1dd   :  { %7599 = vmatpush1.bf16.msra.mxu1 %v10271_v23  ;;  %7341 = vmatpush1.bf16.msra.mxu0 %v10525_v24  ;;  %v1418_v24 = vld [vmem:[#allocation8 + $0xb80] sm:$0xff] }
 0x1de   :  { %7600 = vmatprep.subr.bf16.mxu1 %v10280_v25  ;;  %7342 = vmatprep.subr.bf16.mxu0 %v10534_v26  ;;  %v1422_v25 = vld [vmem:[#allocation8 + $0xba0] sm:$0xff]  ;;  %v10303_v26 = vcombine.low %v1155_v59, %v1159_v60 }
 0x1df   :  { %v993_v18 = vpop.f32.mrb[12].mxu1  ;;  %v10566_v29 = vcombine.high %v1418_v24, %v1422_v25  ;;  %v10565_v38 = vcombine.low %v1418_v24, %v1422_v25 }
 0x1e0   :  { %v994_v40 = vadd.f32 %v993_v18, %v313_v31  ;;  %v995_v41 = vpop.f32.mrb[13].mxu1 }
 0x1e1   :  { %7601 = vmatpush1.bf16.msra.mxu1 %v10279_v32  ;;  %v996_v43 = vadd.f32 %v995_v41, %v317_v33  ;;  %v997_v45 = vpop.f32.mrb[14].mxu1  ;;  %7343 = vmatpush1.bf16.msra.mxu0 %v10533_v34  ;;  %v289_v32 = vrot.slane %v12479_v22, %v12417_v17  ;;  %v1426_v34 = vld [vmem:[#allocation8 + $0xbc0] sm:$0xff]  ;;  %v1179_v41 = vld [vmem:[#allocation8 + $0x408] sm:$0xff] }
 0x1e2   :  { %7602 = vmatprep.subr.bf16.mxu1 %v10288_v35  ;;  %v1016_v52 = vmax.f32 %v994_v40, 0.0  ;;  %v998_v53 = vadd.f32 %v997_v45, %v313_v31  ;;  %v999_v57 = vpop.f32.mrb[15].mxu1  ;;  %7344 = vmatprep.subr.bf16.mxu0 %v10542_v36  ;;  %v1175_v31 = vld [vmem:[#allocation8 + $0x3e8] sm:$0xff]  ;;  %v1430_v35 = vld [vmem:[#allocation8 + $0xbe0] sm:$0xff]  ;;  %v10311_v36 = vcombine.low %v1163_v47, %v1167_v54 }
 0x1e3   :  { %v1017_v2 = vmax.f32 %v996_v43, 0.0  ;;  %v1000_v3 = vadd.f32 %v999_v57, %v317_v33  ;;  %v864_v33 = vpop.f32.mrb[8].mxu0  ;;  %v10320_v18 = vcombine.high %v1171_v30, %v1175_v31  ;;  %v10574_v40 = vcombine.high %v1426_v34, %v1430_v35  ;;  %v1434_v45 = vld [vmem:[#allocation8 + $0xc00] sm:$0xff] }
 0x1e4   :  { %v1032_v8 = vmax.f32 %v998_v53, 0.0  ;;  %v865_v37 = vadd.f32 %v864_v33, %v289_v32  ;;  %v866_v44 = vpop.f32.mrb[9].mxu0  ;;  %v10573_v60 = vcombine.low %v1426_v34, %v1430_v35  ;;  %v1203_v35 = vld [vmem:[#allocation8 + $0x4c8] sm:$0xff] }
 0x1e5   :  { %7603 = vmatpush1.bf16.msra.mxu1 %v10287_v42  ;;  %v1033_v1 = vmax.f32 %v1000_v3, 0.0  ;;  %7345 = vmatpush1.bf16.msra.mxu0 %v10541_v49  ;;  %v1183_v42 = vld [vmem:[#allocation8 + $0x428] sm:$0xff]  ;;  %v868_v43 = vpop.f32.mrb[10].mxu0  ;;  %v1438_v49 = vld [vmem:[#allocation8 + $0xc20] sm:$0xff] }
 0x1e6   :  { %7604 = vmatprep.subr.bf16.mxu1 %v10296_v51  ;;  %v12493_v50 = vpack.c.bf16 %v1032_v8, %v1016_v52  ;;  %7346 = vmatprep.subr.bf16.mxu0 %v10550_v58  ;;  %v1010_v51 = vmax.f32 %v865_v37, 0.0  ;;  %v867_v52 = vadd.f32 %v866_v44, %v293_v39  ;;  %v869_v53 = vadd.f32 %v868_v43, %v289_v32  ;;  %v870_v57 = vpop.f32.mrb[11].mxu0  ;;  %v1442_v8 = vld [vmem:[#allocation8 + $0xc40] sm:$0xff] }
 0x1e7   :  { %v12495_v23 = vpack.c.bf16 %v1033_v1, %v1017_v2  ;;  %v10319_v58 = vcombine.low %v1171_v30, %v1175_v31  ;;  %v871_v59 = vadd.f32 %v870_v57, %v293_v39  ;;  %v10328_v2 = vcombine.high %v1179_v41, %v1183_v42  ;;  %v1446_v1 = vld [vmem:[#allocation8 + $0xc60] sm:$0xff]  ;;  %v1219_v57 = vld [vmem:[#allocation8 + $0x548] sm:$0xff] }
 0x1e8   :  { %v1011_v3 = vmax.f32 %v867_v52, 0.0  ;;  %v1026_v4 = vmax.f32 %v869_v53, 0.0  ;;  %v10582_v5 = vcombine.high %v1434_v45, %v1438_v49  ;;  %v10327_v47 = vcombine.low %v1179_v41, %v1183_v42  ;;  %v1454_v30 = vld [vmem:[#allocation8 + $0xca0] sm:$0xff]  ;;  %v1211_v41 = vld [vmem:[#allocation8 + $0x508] sm:$0xff] }
 0x1e9   :  { %7605 = vmatpush1.bf16.msra.mxu1 %v10295_v10  ;;  %7347 = vmatpush1.bf16.msra.mxu0 %v10549_v13  ;;  %v1027_v10 = vmax.f32 %v871_v59, 0.0  ;;  %v1187_v13 = vld [vmem:[#allocation8 + $0x448] sm:$0xff]  ;;  %v10581_v24 = vcombine.low %v1434_v45, %v1438_v49  ;;  %v10590_v25 = vcombine.high %v1442_v8, %v1446_v1  ;;  %v10589_v32 = vcombine.low %v1442_v8, %v1446_v1  ;;  %v1458_v37 = vld [vmem:[#allocation8 + $0xcc0] sm:$0xff] }
 0x1ea   :  { %7606 = vmatprep.subr.bf16.mxu1 %v10304_v48  ;;  %7348 = vmatprep.subr.bf16.mxu0 %v10558_v55  ;;  %v1191_v48 = vld [vmem:[#allocation8 + $0x468] sm:$0xff]  ;;  %v12501_v55 = vpack.c.bf16 %v1026_v4, %v1010_v51  ;;  %v1466_v43 = vld [vmem:[#allocation8 + $0xd00] sm:$0xff] }
 0x1eb   :  { %v12503_v54 = vpack.c.bf16 %v1027_v10, %v1011_v3  ;;  %v10335_v31 = vcombine.low %v1187_v13, %v1191_v48  ;;  %v1215_v42 = vld [vmem:[#allocation8 + $0x528] sm:$0xff]  ;;  %v1470_v45 = vld [vmem:[#allocation8 + $0xd20] sm:$0xff] }
 0x1ec   :  { %v10360_v52 = vcombine.high %v1211_v41, %v1215_v42  ;;  %v10614_v53 = vcombine.high %v1466_v43, %v1470_v45  ;;  %v1474_v59 = vld [vmem:[#allocation8 + $0xd40] sm:$0xff]  ;;  %v10613_v3 = vcombine.low %v1466_v43, %v1470_v45  ;;  %v1227_v8 = vld [vmem:[#allocation8 + $0x588] sm:$0xff] }
 0x1ed   :  { %7607 = vmatpush1.bf16.msra.mxu1 %v10303_v26  ;;  %7349 = vmatpush1.bf16.msra.mxu0 %v10557_v27  ;;  %v10336_v26 = vcombine.high %v1187_v13, %v1191_v48  ;;  %v1195_v27 = vld [vmem:[#allocation8 + $0x488] sm:$0xff]  ;;  %v1482_v1 = vld [vmem:[#allocation8 + $0xd80] sm:$0xff] }
 0x1ee   :  { %7608 = vmatprep.subr.bf16.mxu1 %v10312_v28  ;;  %7350 = vmatprep.subr.bf16.mxu0 %v10566_v29  ;;  %v1199_v28 = vld [vmem:[#allocation8 + $0x4a8] sm:$0xff]  ;;  %v1450_v29 = vld [vmem:[#allocation8 + $0xc80] sm:$0xff] }
 0x1ef   :  { %v10344_v33 = vcombine.high %v1195_v27, %v1199_v28  ;;  %v10598_v34 = vcombine.high %v1450_v29, %v1454_v30  ;;  %v10597_v39 = vcombine.low %v1450_v29, %v1454_v30  ;;  %v1231_v10 = vld [vmem:[#allocation8 + $0x5a8] sm:$0xff]  ;;  %v1486_v13 = vld [vmem:[#allocation8 + $0xda0] sm:$0xff] }
 0x1f0   :  { %v1235_v29 = vld [vmem:[#allocation8 + $0x5c8] sm:$0xff] }
 0x1f1   :  { %7609 = vmatpush1.bf16.msra.mxu1 %v10311_v36  ;;  %7351 = vmatpush1.bf16.msra.mxu0 %v10565_v38  ;;  %v1207_v36 = vld [vmem:[#allocation8 + $0x4e8] sm:$0xff]  ;;  %v1462_v38 = vld [vmem:[#allocation8 + $0xce0] sm:$0xff] }
 0x1f2   :  { %7610 = vmatprep.subr.bf16.mxu1 %v10320_v18  ;;  %7352 = vmatprep.subr.bf16.mxu0 %v10574_v40  ;;  %v10343_v18 = vcombine.low %v1195_v27, %v1199_v28  ;;  %v10352_v44 = vcombine.high %v1203_v35, %v1207_v36  ;;  %v10606_v40 = vcombine.high %v1458_v37, %v1462_v38  ;;  %v1239_v30 = vld [vmem:[#allocation8 + $0x5e8] sm:$0xff] }
 0x1f3   :  { %v10351_v49 = vcombine.low %v1203_v35, %v1207_v36  ;;  %v10605_v51 = vcombine.low %v1458_v37, %v1462_v38  ;;  %v309_v27 = vrot.slane %v12479_v22, %v12446_v6  ;;  %v10630_v28 = vcombine.high %v1482_v1, %v1486_v13  ;;  %v1243_v43 = vld [vmem:[#allocation8 + $0x608] sm:$0xff] }
 0x1f4   :  { %v10629_v37 = vcombine.low %v1482_v1, %v1486_v13  ;;  %v10375_v38 = vcombine.low %v1227_v8, %v1231_v10  ;;  %v1247_v45 = vld [vmem:[#allocation8 + $0x628] sm:$0xff] }
 0x1f5   :  { %7611 = vmatpush1.bf16.msra.mxu1 %v10319_v58  ;;  %7353 = vmatpush1.bf16.msra.mxu0 %v10573_v60  ;;  %v1223_v58 = vld [vmem:[#allocation8 + $0x568] sm:$0xff]  ;;  %v1478_v60 = vld [vmem:[#allocation8 + $0xd60] sm:$0xff]  ;;  %v10391_v1 = vcombine.low %v1243_v43, %v1247_v45 }
 0x1f6   :  { %7623 = vmatprep.subr.bf16.mxu1 %v10328_v2  ;;  %7365 = vmatprep.subr.bf16.mxu0 %v10582_v5  ;;  %v10359_v2 = vcombine.low %v1211_v41, %v1215_v42  ;;  %v10368_v4 = vcombine.high %v1219_v57, %v1223_v58  ;;  %v10622_v5 = vcombine.high %v1474_v59, %v1478_v60 }
 0x1f7   :  { %v10621_v48 = vcombine.low %v1474_v59, %v1478_v60  ;;  %v10392_v60 = vcombine.high %v1243_v43, %v1247_v45 }
 0x1f8   :  { %7613 = vmatmul.mubr.bf16.vlgmr.msra.gmra.mrb[20].mxu1 %v12435_v56  ;;  %7355 = vmatmul.mubr.bf16.vlgmr.msra.gmra.mrb[16].mxu0 %v12470_v7 }
 0x1f9   :  { %7624 = vmatpush1.bf16.msra.mxu1 %v10327_v47  ;;  %7366 = vmatpush1.bf16.msra.mxu0 %v10581_v24  ;;  %v10367_v47 = vcombine.low %v1219_v57, %v1223_v58  ;;  %v10376_v24 = vcombine.high %v1227_v8, %v1231_v10  ;;  %v10383_v57 = vcombine.low %v1235_v29, %v1239_v30  ;;  %v1506_v8 = vld [vmem:[#allocation8 + $0xe40] sm:$0xff] }
 0x1fa   :  { %7655 = vmatprep.mubr.bf16.mxu1 %v12441_v63  ;;  %7367 = vmatprep.subr.bf16.mxu0 %v10590_v25  ;;  %v305_v25 = vrot.slane %v12479_v22, %v12443_v0  ;;  %v1510_v10 = vld [vmem:[#allocation8 + $0xe60] sm:$0xff] }
 0x1fb   :  { %7625 = vmatprep.subr.bf16.mxu1 %v10336_v26  ;;  %7397 = vmatprep.mubr.bf16.mxu0 %v12477_v16  ;;  %v950_v26 = vpop.f32.mrb[12].mxu0 }
 0x1fd   :  { %7626 = vmatpush1.bf16.msra.mxu1 %v10335_v31  ;;  %7368 = vmatpush1.bf16.msra.mxu0 %v10589_v32  ;;  %v952_v31 = vpop.f32.mrb[13].mxu0  ;;  %v1490_v32 = vld [vmem:[#allocation8 + $0xdc0] sm:$0xff] }
 0x1fe   :  { %7627 = vmatprep.subr.bf16.mxu1 %v10344_v33  ;;  %7369 = vmatprep.subr.bf16.mxu0 %v10598_v34  ;;  %v1494_v33 = vld [vmem:[#allocation8 + $0xde0] sm:$0xff]  ;;  %v951_v34 = vadd.f32 %v950_v26, %v305_v25  ;;  %v953_v35 = vadd.f32 %v952_v31, %v309_v27  ;;  %v954_v36 = vpop.f32.mrb[14].mxu0 }
 0x1ff   :  { %v10638_v42 = vcombine.high %v1490_v32, %v1494_v33  ;;  %v10637_v59 = vcombine.low %v1490_v32, %v1494_v33  ;;  %v1514_v26 = vld [vmem:[#allocation8 + $0xe80] sm:$0xff]  ;;  %v1267_v32 = vld [vmem:[#allocation8 + $0x6c8] sm:$0xff] }
 0x200   :  { %v1015_v22 = vmax.f32 %v953_v35, 0.0  ;;  %v1271_v33 = vld [vmem:[#allocation8 + $0x6e8] sm:$0xff]  ;;  %v1526_v35 = vld [vmem:[#allocation8 + $0xee0] sm:$0xff] }
 0x201   :  { %7628 = vmatpush1.bf16.msra.mxu1 %v10343_v18  ;;  %7370 = vmatpush1.bf16.msra.mxu0 %v10597_v39  ;;  %v955_v18 = vadd.f32 %v954_v36, %v305_v25  ;;  %v956_v39 = vpop.f32.mrb[15].mxu0  ;;  %v1263_v25 = vld [vmem:[#allocation8 + $0x6a8] sm:$0xff] }
 0x202   :  { %7629 = vmatprep.subr.bf16.mxu1 %v10352_v44  ;;  %7371 = vmatprep.subr.bf16.mxu0 %v10606_v40  ;;  %v10384_v44 = vcombine.high %v1235_v29, %v1239_v30  ;;  %v1014_v40 = vmax.f32 %v951_v34, 0.0  ;;  %v957_v41 = vadd.f32 %v956_v39, %v309_v27  ;;  %v1518_v27 = vld [vmem:[#allocation8 + $0xea0] sm:$0xff]  ;;  %v10653_v29 = vcombine.low %v1506_v8, %v1510_v10  ;;  %v1275_v39 = vld [vmem:[#allocation8 + $0x708] sm:$0xff] }
 0x203   :  { %v10662_v31 = vcombine.high %v1514_v26, %v1518_v27  ;;  %v1522_v34 = vld [vmem:[#allocation8 + $0xec0] sm:$0xff] }
 0x205   :  { %7630 = vmatpush1.bf16.msra.mxu1 %v10351_v49  ;;  %7372 = vmatpush1.bf16.msra.mxu0 %v10605_v51  ;;  %v1030_v49 = vmax.f32 %v955_v18, 0.0  ;;  %v1498_v51 = vld [vmem:[#allocation8 + $0xe00] sm:$0xff]  ;;  %v10670_v18 = vcombine.high %v1522_v34, %v1526_v35 }
 0x206   :  { %7631 = vmatprep.subr.bf16.mxu1 %v10360_v52  ;;  %7373 = vmatprep.subr.bf16.mxu0 %v10614_v53  ;;  %v1502_v52 = vld [vmem:[#allocation8 + $0xe20] sm:$0xff]  ;;  %v1031_v53 = vmax.f32 %v957_v41, 0.0  ;;  %v10415_v41 = vcombine.low %v1267_v32, %v1271_v33 }
 0x207   :  { %v12513_v58 = vpack.c.bf16 %v1030_v49, %v1014_v40  ;;  %v10645_v13 = vcombine.low %v1498_v51, %v1502_v52  ;;  %v1530_v40 = vld [vmem:[#allocation8 + $0xf00] sm:$0xff]  ;;  %v1283_v49 = vld [vmem:[#allocation8 + $0x748] sm:$0xff] }
 0x209   :  { %7632 = vmatpush1.bf16.msra.mxu1 %v10359_v2  ;;  %7374 = vmatpush1.bf16.msra.mxu0 %v10613_v3  ;;  %v12515_v2 = vpack.c.bf16 %v1031_v53, %v1015_v22  ;;  %v10646_v3 = vcombine.high %v1498_v51, %v1502_v52  ;;  %v1534_v22 = vld [vmem:[#allocation8 + $0xf20] sm:$0xff]  ;;  %v1287_v51 = vld [vmem:[#allocation8 + $0x768] sm:$0xff] }
 0x20a   :  { %7633 = vmatprep.subr.bf16.mxu1 %v10368_v4  ;;  %7375 = vmatprep.subr.bf16.mxu0 %v10622_v5  ;;  %v1251_v4 = vld [vmem:[#allocation8 + $0x648] sm:$0xff]  ;;  %v10678_v45 = vcombine.high %v1530_v40, %v1534_v22  ;;  %v1538_v52 = vld [vmem:[#allocation8 + $0xf40] sm:$0xff] }
 0x20b   :  { %v1255_v5 = vld [vmem:[#allocation8 + $0x668] sm:$0xff]  ;;  %v1542_v53 = vld [vmem:[#allocation8 + $0xf60] sm:$0xff] }
 0x20d   :  { %7634 = vmatpush1.bf16.msra.mxu1 %v10367_v47  ;;  %7376 = vmatpush1.bf16.msra.mxu0 %v10621_v48  ;;  %v10400_v48 = vcombine.high %v1251_v4, %v1255_v5  ;;  %v10654_v47 = vcombine.high %v1506_v8, %v1510_v10  ;;  %v1546_v8 = vld [vmem:[#allocation8 + $0xf80] sm:$0xff] }
 0x20e   :  { %7635 = vmatprep.subr.bf16.mxu1 %v10376_v24  ;;  %7377 = vmatprep.subr.bf16.mxu0 %v10630_v28  ;;  %v1259_v24 = vld [vmem:[#allocation8 + $0x688] sm:$0xff]  ;;  %v10399_v28 = vcombine.low %v1251_v4, %v1255_v5  ;;  %v1550_v10 = vld [vmem:[#allocation8 + $0xfa0] sm:$0xff] }
 0x20f   :  { %v10408_v30 = vcombine.high %v1259_v24, %v1263_v25  ;;  %v10407_v36 = vcombine.low %v1259_v24, %v1263_v25  ;;  %v1291_v4 = vld [vmem:[#allocation8 + $0x788] sm:$0xff] }
 0x210   :  { %v1295_v5 = vld [vmem:[#allocation8 + $0x7a8] sm:$0xff] }
 0x211   :  { %7636 = vmatpush1.bf16.msra.mxu1 %v10375_v38  ;;  %7378 = vmatpush1.bf16.msra.mxu0 %v10629_v37  ;;  %v10661_v37 = vcombine.low %v1514_v26, %v1518_v27  ;;  %v10416_v38 = vcombine.high %v1267_v32, %v1271_v33  ;;  %v1299_v24 = vld [vmem:[#allocation8 + $0x7c8] sm:$0xff]  ;;  %v1554_v26 = vld [vmem:[#allocation8 + $0xfc0] sm:$0xff] }
 0x212   :  { %7637 = vmatprep.subr.bf16.mxu1 %v10384_v44  ;;  %7379 = vmatprep.subr.bf16.mxu0 %v10638_v42  ;;  %v1279_v44 = vld [vmem:[#allocation8 + $0x728] sm:$0xff]  ;;  %v10669_v42 = vcombine.low %v1522_v34, %v1526_v35  ;;  %v1558_v27 = vld [vmem:[#allocation8 + $0xfe0] sm:$0xff] }
 0x213   :  { %v10424_v43 = vcombine.high %v1275_v39, %v1279_v44  ;;  %v1303_v25 = vld [vmem:[#allocation8 + $0x7e8] sm:$0xff]  ;;  %v1562_v34 = vld [vmem:[#allocation8 + $0x1000] sm:$0xff] }
 0x214   :  { %v1307_v32 = vld [vmem:[#allocation8 + $0x808] sm:$0xff]  ;;  %v1566_v35 = vld [vmem:[#allocation8 + $0x1020] sm:$0xff] }
 0x215   :  { %7638 = vmatpush1.bf16.msra.mxu1 %v10383_v57  ;;  %7380 = vmatpush1.bf16.msra.mxu0 %v10637_v59  ;;  %v10423_v57 = vcombine.low %v1275_v39, %v1279_v44  ;;  %v10677_v59 = vcombine.low %v1530_v40, %v1534_v22  ;;  %v1311_v33 = vld [vmem:[#allocation8 + $0x828] sm:$0xff]  ;;  %v1570_v39 = vld [vmem:[#allocation8 + $0x1040] sm:$0xff] }
 0x216   :  { %7639 = vmatprep.subr.bf16.mxu1 %v10392_v60  ;;  %7381 = vmatprep.subr.bf16.mxu0 %v10646_v3  ;;  %v10432_v60 = vcombine.high %v1283_v49, %v1287_v51  ;;  %v10686_v3 = vcombine.high %v1538_v52, %v1542_v53  ;;  %v1574_v44 = vld [vmem:[#allocation8 + $0x1060] sm:$0xff]  ;;  %v1315_v40 = vld [vmem:[#allocation8 + $0x848] sm:$0xff] }
 0x217   :  { %v1319_v22 = vld [vmem:[#allocation8 + $0x868] sm:$0xff] }
 0x219   :  { %7640 = vmatpush1.bf16.msra.mxu1 %v10391_v1  ;;  %7382 = vmatpush1.bf16.msra.mxu0 %v10645_v13  ;;  %v10431_v1 = vcombine.low %v1283_v49, %v1287_v51  ;;  %v10685_v13 = vcombine.low %v1538_v52, %v1542_v53  ;;  %v1323_v49 = vld [vmem:[#allocation8 + $0x888] sm:$0xff]  ;;  %v1578_v52 = vld [vmem:[#allocation8 + $0x1080] sm:$0xff] }
 0x21a   :  { %7641 = vmatprep.subr.bf16.mxu1 %v10400_v48  ;;  %7383 = vmatprep.subr.bf16.mxu0 %v10654_v47  ;;  %v10440_v48 = vcombine.high %v1291_v4, %v1295_v5  ;;  %v10694_v47 = vcombine.high %v1546_v8, %v1550_v10  ;;  %v1327_v51 = vld [vmem:[#allocation8 + $0x8a8] sm:$0xff]  ;;  %v1582_v53 = vld [vmem:[#allocation8 + $0x10a0] sm:$0xff] }
 0x21d   :  { %7642 = vmatpush1.bf16.msra.mxu1 %v10399_v28  ;;  %7384 = vmatpush1.bf16.msra.mxu0 %v10653_v29  ;;  %v10439_v28 = vcombine.low %v1291_v4, %v1295_v5  ;;  %v10693_v29 = vcombine.low %v1546_v8, %v1550_v10  ;;  %v1331_v4 = vld [vmem:[#allocation8 + $0x8c8] sm:$0xff]  ;;  %v1586_v8 = vld [vmem:[#allocation8 + $0x10c0] sm:$0xff] }
 0x21e   :  { %7643 = vmatprep.subr.bf16.mxu1 %v10408_v30  ;;  %7385 = vmatprep.subr.bf16.mxu0 %v10662_v31  ;;  %v10448_v30 = vcombine.high %v1299_v24, %v1303_v25  ;;  %v10702_v31 = vcombine.high %v1554_v26, %v1558_v27  ;;  %v1335_v5 = vld [vmem:[#allocation8 + $0x8e8] sm:$0xff]  ;;  %v1590_v10 = vld [vmem:[#allocation8 + $0x10e0] sm:$0xff] }
 0x221   :  { %7644 = vmatpush1.bf16.msra.mxu1 %v10407_v36  ;;  %7386 = vmatpush1.bf16.msra.mxu0 %v10661_v37  ;;  %v10447_v36 = vcombine.low %v1299_v24, %v1303_v25  ;;  %v10701_v37 = vcombine.low %v1554_v26, %v1558_v27  ;;  %v1339_v24 = vld [vmem:[#allocation8 + $0x908] sm:$0xff]  ;;  %v1594_v26 = vld [vmem:[#allocation8 + $0x1100] sm:$0xff] }
 0x222   :  { %7645 = vmatprep.subr.bf16.mxu1 %v10416_v38  ;;  %7387 = vmatprep.subr.bf16.mxu0 %v10670_v18  ;;  %v10456_v38 = vcombine.high %v1307_v32, %v1311_v33  ;;  %v10710_v18 = vcombine.high %v1562_v34, %v1566_v35  ;;  %v1343_v25 = vld [vmem:[#allocation8 + $0x928] sm:$0xff]  ;;  %v1598_v27 = vld [vmem:[#allocation8 + $0x1120] sm:$0xff] }
 0x225   :  { %7646 = vmatpush1.bf16.msra.mxu1 %v10415_v41  ;;  %7388 = vmatpush1.bf16.msra.mxu0 %v10669_v42  ;;  %v10455_v41 = vcombine.low %v1307_v32, %v1311_v33  ;;  %v10709_v42 = vcombine.low %v1562_v34, %v1566_v35  ;;  %v1347_v32 = vld [vmem:[#allocation8 + $0x948] sm:$0xff]  ;;  %v1602_v34 = vld [vmem:[#allocation8 + $0x1140] sm:$0xff] }
 0x226   :  { %7647 = vmatprep.subr.bf16.mxu1 %v10424_v43  ;;  %7389 = vmatprep.subr.bf16.mxu0 %v10678_v45  ;;  %v10718_v43 = vcombine.high %v1570_v39, %v1574_v44  ;;  %v10464_v45 = vcombine.high %v1315_v40, %v1319_v22  ;;  %v1351_v33 = vld [vmem:[#allocation8 + $0x968] sm:$0xff]  ;;  %v1606_v35 = vld [vmem:[#allocation8 + $0x1160] sm:$0xff] }
 0x229   :  { %7648 = vmatpush1.bf16.msra.mxu1 %v10423_v57  ;;  %7390 = vmatpush1.bf16.msra.mxu0 %v10677_v59  ;;  %v10463_v57 = vcombine.low %v1315_v40, %v1319_v22  ;;  %v10717_v59 = vcombine.low %v1570_v39, %v1574_v44  ;;  %v1355_v39 = vld [vmem:[#allocation8 + $0x988] sm:$0xff]  ;;  %v1610_v40 = vld [vmem:[#allocation8 + $0x1180] sm:$0xff] }
 0x22a   :  { %7649 = vmatprep.subr.bf16.mxu1 %v10432_v60  ;;  %7391 = vmatprep.subr.bf16.mxu0 %v10686_v3  ;;  %v10472_v60 = vcombine.high %v1323_v49, %v1327_v51  ;;  %v10726_v3 = vcombine.high %v1578_v52, %v1582_v53  ;;  %v1359_v44 = vld [vmem:[#allocation8 + $0x9a8] sm:$0xff]  ;;  %v1614_v22 = vld [vmem:[#allocation8 + $0x11a0] sm:$0xff] }
 0x22d   :  { %7650 = vmatpush1.bf16.msra.mxu1 %v10431_v1  ;;  %7392 = vmatpush1.bf16.msra.mxu0 %v10685_v13  ;;  %v10471_v1 = vcombine.low %v1323_v49, %v1327_v51  ;;  %v10725_v13 = vcombine.low %v1578_v52, %v1582_v53  ;;  %v1363_v49 = vld [vmem:[#allocation8 + $0x9c8] sm:$0xff]  ;;  %v1618_v52 = vld [vmem:[#allocation8 + $0x11c0] sm:$0xff] }
 0x22e   :  { %7651 = vmatprep.subr.bf16.mxu1 %v10440_v48  ;;  %7393 = vmatprep.subr.bf16.mxu0 %v10694_v47  ;;  %v10480_v48 = vcombine.high %v1331_v4, %v1335_v5  ;;  %v10734_v47 = vcombine.high %v1586_v8, %v1590_v10  ;;  %v1367_v51 = vld [vmem:[#allocation8 + $0x9e8] sm:$0xff]  ;;  %v1622_v53 = vld [vmem:[#allocation8 + $0x11e0] sm:$0xff] }
 0x231   :  { %7652 = vmatpush1.bf16.msra.mxu1 %v10439_v28  ;;  %7394 = vmatpush1.bf16.msra.mxu0 %v10693_v29  ;;  %v10479_v28 = vcombine.low %v1331_v4, %v1335_v5  ;;  %v10733_v29 = vcombine.low %v1586_v8, %v1590_v10  ;;  %v1371_v4 = vld [vmem:[#allocation8 + $0xa08] sm:$0xff]  ;;  %v1626_v8 = vld [vmem:[#allocation8 + $0x1200] sm:$0xff] }
 0x232   :  { %7653 = vmatprep.subr.bf16.mxu1 %v10448_v30  ;;  %7395 = vmatprep.subr.bf16.mxu0 %v10702_v31  ;;  %v10488_v30 = vcombine.high %v1339_v24, %v1343_v25  ;;  %v10742_v31 = vcombine.high %v1594_v26, %v1598_v27  ;;  %v1375_v5 = vld [vmem:[#allocation8 + $0xa28] sm:$0xff]  ;;  %v1630_v10 = vld [vmem:[#allocation8 + $0x1220] sm:$0xff] }
 0x235   :  { %7654 = vmatpush1.bf16.msra.mxu1 %v10447_v36  ;;  %7396 = vmatpush1.bf16.msra.mxu0 %v10701_v37  ;;  %v10487_v36 = vcombine.low %v1339_v24, %v1343_v25  ;;  %v10741_v37 = vcombine.low %v1594_v26, %v1598_v27  ;;  %v1379_v24 = vld [vmem:[#allocation8 + $0xa48] sm:$0xff]  ;;  %v1634_v26 = vld [vmem:[#allocation8 + $0x1240] sm:$0xff] }
 0x236   :  { %7666 = vmatprep.subr.bf16.mxu1 %v10456_v38  ;;  %7408 = vmatprep.subr.bf16.mxu0 %v10710_v18  ;;  %v10496_v38 = vcombine.high %v1347_v32, %v1351_v33  ;;  %v10750_v18 = vcombine.high %v1602_v34, %v1606_v35  ;;  %v1383_v25 = vld [vmem:[#allocation8 + $0xa68] sm:$0xff]  ;;  %v1638_v27 = vld [vmem:[#allocation8 + $0x1260] sm:$0xff] }
 0x238   :  { %7656 = vmatmul.mubr.bf16.vlgmr.msra.gmra.mrb[20].mxu1 %v12437_v61  ;;  %7398 = vmatmul.mubr.bf16.vlgmr.msra.gmra.mrb[16].mxu0 %v12474_v15 }
 0x239   :  { %7667 = vmatpush1.bf16.msra.mxu1 %v10455_v41  ;;  %7409 = vmatpush1.bf16.msra.mxu0 %v10709_v42  ;;  %v10495_v41 = vcombine.low %v1347_v32, %v1351_v33  ;;  %v10749_v42 = vcombine.low %v1602_v34, %v1606_v35  ;;  %v1387_v32 = vld [vmem:[#allocation8 + $0xa88] sm:$0xff]  ;;  %v1642_v34 = vld [vmem:[#allocation8 + $0x1280] sm:$0xff] }
 0x23a   :  { %7698 = vmatprep.mubr.bf16.mxu1 %v12472_v12  ;;  %7410 = vmatprep.subr.bf16.mxu0 %v10718_v43  ;;  %v10504_v43 = vcombine.high %v1355_v39, %v1359_v44  ;;  %v1391_v33 = vld [vmem:[#allocation8 + $0xaa8] sm:$0xff]  ;;  %v1646_v35 = vld [vmem:[#allocation8 + $0x12a0] sm:$0xff] }
 0x23b   :  { %7668 = vmatprep.subr.bf16.mxu1 %v10464_v45  ;;  %7440 = vmatprep.mubr.bf16.mxu0 %v12503_v54  ;;  %v10758_v45 = vcombine.high %v1610_v40, %v1614_v22 }
 0x23d   :  { %7669 = vmatpush1.bf16.msra.mxu1 %v10463_v57  ;;  %7411 = vmatpush1.bf16.msra.mxu0 %v10717_v59  ;;  %v10503_v57 = vcombine.low %v1355_v39, %v1359_v44  ;;  %v10757_v59 = vcombine.low %v1610_v40, %v1614_v22  ;;  %v1395_v39 = vld [vmem:[#allocation8 + $0xac8] sm:$0xff]  ;;  %v1650_v40 = vld [vmem:[#allocation8 + $0x12c0] sm:$0xff] }
 0x23e   :  { %7670 = vmatprep.subr.bf16.mxu1 %v10472_v60  ;;  %7412 = vmatprep.subr.bf16.mxu0 %v10726_v3  ;;  %v10512_v60 = vcombine.high %v1363_v49, %v1367_v51  ;;  %v10766_v3 = vcombine.high %v1618_v52, %v1622_v53  ;;  %v1399_v44 = vld [vmem:[#allocation8 + $0xae8] sm:$0xff]  ;;  %v1654_v22 = vld [vmem:[#allocation8 + $0x12e0] sm:$0xff] }
 0x241   :  { %7671 = vmatpush1.bf16.msra.mxu1 %v10471_v1  ;;  %7413 = vmatpush1.bf16.msra.mxu0 %v10725_v13  ;;  %v10511_v1 = vcombine.low %v1363_v49, %v1367_v51  ;;  %v10765_v13 = vcombine.low %v1618_v52, %v1622_v53  ;;  %v1403_v49 = vld [vmem:[#allocation8 + $0xb08] sm:$0xff]  ;;  %v1658_v52 = vld [vmem:[#allocation8 + $0x1300] sm:$0xff] }
 0x242   :  { %7672 = vmatprep.subr.bf16.mxu1 %v10480_v48  ;;  %7414 = vmatprep.subr.bf16.mxu0 %v10734_v47  ;;  %v10520_v48 = vcombine.high %v1371_v4, %v1375_v5  ;;  %v10774_v47 = vcombine.high %v1626_v8, %v1630_v10  ;;  %v1407_v51 = vld [vmem:[#allocation8 + $0xb28] sm:$0xff]  ;;  %v1662_v53 = vld [vmem:[#allocation8 + $0x1320] sm:$0xff] }
 0x245   :  { %7673 = vmatpush1.bf16.msra.mxu1 %v10479_v28  ;;  %7415 = vmatpush1.bf16.msra.mxu0 %v10733_v29  ;;  %v10519_v28 = vcombine.low %v1371_v4, %v1375_v5  ;;  %v10773_v29 = vcombine.low %v1626_v8, %v1630_v10  ;;  %v1411_v4 = vld [vmem:[#allocation8 + $0xb48] sm:$0xff]  ;;  %v1666_v8 = vld [vmem:[#allocation8 + $0x1340] sm:$0xff] }
 0x246   :  { %7674 = vmatprep.subr.bf16.mxu1 %v10488_v30  ;;  %7416 = vmatprep.subr.bf16.mxu0 %v10742_v31  ;;  %v10528_v30 = vcombine.high %v1379_v24, %v1383_v25  ;;  %v10782_v31 = vcombine.high %v1634_v26, %v1638_v27  ;;  %v1415_v5 = vld [vmem:[#allocation8 + $0xb68] sm:$0xff]  ;;  %v1670_v10 = vld [vmem:[#allocation8 + $0x1360] sm:$0xff] }
 0x249   :  { %7675 = vmatpush1.bf16.msra.mxu1 %v10487_v36  ;;  %7417 = vmatpush1.bf16.msra.mxu0 %v10741_v37  ;;  %v10527_v36 = vcombine.low %v1379_v24, %v1383_v25  ;;  %v10781_v37 = vcombine.low %v1634_v26, %v1638_v27  ;;  %v1419_v24 = vld [vmem:[#allocation8 + $0xb88] sm:$0xff]  ;;  %v1674_v26 = vld [vmem:[#allocation8 + $0x1380] sm:$0xff] }
 0x24a   :  { %7676 = vmatprep.subr.bf16.mxu1 %v10496_v38  ;;  %7418 = vmatprep.subr.bf16.mxu0 %v10750_v18  ;;  %v10536_v38 = vcombine.high %v1387_v32, %v1391_v33  ;;  %v10790_v18 = vcombine.high %v1642_v34, %v1646_v35  ;;  %v1423_v25 = vld [vmem:[#allocation8 + $0xba8] sm:$0xff]  ;;  %v1678_v27 = vld [vmem:[#allocation8 + $0x13a0] sm:$0xff] }
 0x24d   :  { %7677 = vmatpush1.bf16.msra.mxu1 %v10495_v41  ;;  %7419 = vmatpush1.bf16.msra.mxu0 %v10749_v42  ;;  %v10535_v41 = vcombine.low %v1387_v32, %v1391_v33  ;;  %v10789_v42 = vcombine.low %v1642_v34, %v1646_v35  ;;  %v1427_v32 = vld [vmem:[#allocation8 + $0xbc8] sm:$0xff]  ;;  %v1682_v34 = vld [vmem:[#allocation8 + $0x13c0] sm:$0xff] }
 0x24e   :  { %7678 = vmatprep.subr.bf16.mxu1 %v10504_v43  ;;  %7420 = vmatprep.subr.bf16.mxu0 %v10758_v45  ;;  %v10544_v43 = vcombine.high %v1395_v39, %v1399_v44  ;;  %v10798_v45 = vcombine.high %v1650_v40, %v1654_v22  ;;  %v1431_v33 = vld [vmem:[#allocation8 + $0xbe8] sm:$0xff]  ;;  %v1686_v35 = vld [vmem:[#allocation8 + $0x13e0] sm:$0xff] }
 0x251   :  { %7679 = vmatpush1.bf16.msra.mxu1 %v10503_v57  ;;  %7421 = vmatpush1.bf16.msra.mxu0 %v10757_v59  ;;  %v10543_v57 = vcombine.low %v1395_v39, %v1399_v44  ;;  %v10797_v59 = vcombine.low %v1650_v40, %v1654_v22  ;;  %v1435_v39 = vld [vmem:[#allocation8 + $0xc08] sm:$0xff]  ;;  %v1690_v40 = vld [vmem:[#allocation8 + $0x1400] sm:$0xff] }
 0x252   :  { %7680 = vmatprep.subr.bf16.mxu1 %v10512_v60  ;;  %7422 = vmatprep.subr.bf16.mxu0 %v10766_v3  ;;  %v10552_v60 = vcombine.high %v1403_v49, %v1407_v51  ;;  %v10806_v3 = vcombine.high %v1658_v52, %v1662_v53  ;;  %v1439_v44 = vld [vmem:[#allocation8 + $0xc28] sm:$0xff]  ;;  %v1694_v22 = vld [vmem:[#allocation8 + $0x1420] sm:$0xff] }
 0x255   :  { %7681 = vmatpush1.bf16.msra.mxu1 %v10511_v1  ;;  %7423 = vmatpush1.bf16.msra.mxu0 %v10765_v13  ;;  %v10551_v1 = vcombine.low %v1403_v49, %v1407_v51  ;;  %v10805_v13 = vcombine.low %v1658_v52, %v1662_v53  ;;  %v1698_v49 = vld [vmem:[#allocation8 + $0x1440] sm:$0xff]  ;;  %v10583_v52 = vcombine.low %v1435_v39, %v1439_v44  ;;  %v1443_v53 = vld [vmem:[#allocation8 + $0xc48] sm:$0xff] }
 0x256   :  { %7682 = vmatprep.subr.bf16.mxu1 %v10520_v48  ;;  %7424 = vmatprep.subr.bf16.mxu0 %v10774_v47  ;;  %v10560_v48 = vcombine.high %v1411_v4, %v1415_v5  ;;  %v10814_v47 = vcombine.high %v1666_v8, %v1670_v10  ;;  %v1702_v51 = vld [vmem:[#allocation8 + $0x1460] sm:$0xff] }
 0x259   :  { %7683 = vmatpush1.bf16.msra.mxu1 %v10519_v28  ;;  %7425 = vmatpush1.bf16.msra.mxu0 %v10773_v29  ;;  %v10559_v28 = vcombine.low %v1411_v4, %v1415_v5  ;;  %v10813_v29 = vcombine.low %v1666_v8, %v1670_v10  ;;  %v1455_v4 = vld [vmem:[#allocation8 + $0xca8] sm:$0xff]  ;;  %v1706_v8 = vld [vmem:[#allocation8 + $0x1480] sm:$0xff] }
 0x25a   :  { %7684 = vmatprep.subr.bf16.mxu1 %v10528_v30  ;;  %7426 = vmatprep.subr.bf16.mxu0 %v10782_v31  ;;  %v10568_v30 = vcombine.high %v1419_v24, %v1423_v25  ;;  %v10822_v31 = vcombine.high %v1674_v26, %v1678_v27  ;;  %v1710_v10 = vld [vmem:[#allocation8 + $0x14a0] sm:$0xff] }
 0x25d   :  { %7685 = vmatpush1.bf16.msra.mxu1 %v10527_v36  ;;  %7427 = vmatpush1.bf16.msra.mxu0 %v10781_v37  ;;  %v10567_v36 = vcombine.low %v1419_v24, %v1423_v25  ;;  %v10821_v37 = vcombine.low %v1674_v26, %v1678_v27  ;;  %v1459_v24 = vld [vmem:[#allocation8 + $0xcc8] sm:$0xff]  ;;  %v1714_v26 = vld [vmem:[#allocation8 + $0x14c0] sm:$0xff] }
 0x25e   :  { %7686 = vmatprep.subr.bf16.mxu1 %v10536_v38  ;;  %7428 = vmatprep.subr.bf16.mxu0 %v10790_v18  ;;  %v10576_v38 = vcombine.high %v1427_v32, %v1431_v33  ;;  %v10830_v18 = vcombine.high %v1682_v34, %v1686_v35  ;;  %v1463_v25 = vld [vmem:[#allocation8 + $0xce8] sm:$0xff]  ;;  %v1718_v27 = vld [vmem:[#allocation8 + $0x14e0] sm:$0xff] }
 0x261   :  { %7687 = vmatpush1.bf16.msra.mxu1 %v10535_v41  ;;  %7429 = vmatpush1.bf16.msra.mxu0 %v10789_v42  ;;  %v10575_v41 = vcombine.low %v1427_v32, %v1431_v33  ;;  %v10829_v42 = vcombine.low %v1682_v34, %v1686_v35  ;;  %v1467_v32 = vld [vmem:[#allocation8 + $0xd08] sm:$0xff]  ;;  %v1722_v34 = vld [vmem:[#allocation8 + $0x1500] sm:$0xff] }
 0x262   :  { %7688 = vmatprep.subr.bf16.mxu1 %v10544_v43  ;;  %7430 = vmatprep.subr.bf16.mxu0 %v10798_v45  ;;  %v10584_v43 = vcombine.high %v1435_v39, %v1439_v44  ;;  %v10838_v45 = vcombine.high %v1690_v40, %v1694_v22  ;;  %v1471_v33 = vld [vmem:[#allocation8 + $0xd28] sm:$0xff]  ;;  %v1726_v35 = vld [vmem:[#allocation8 + $0x1520] sm:$0xff] }
 0x263   :  { %v1475_v39 = vld [vmem:[#allocation8 + $0xd48] sm:$0xff] }
 0x264   :  { %v1479_v44 = vld [vmem:[#allocation8 + $0xd68] sm:$0xff] }
 0x265   :  { %7689 = vmatpush1.bf16.msra.mxu1 %v10543_v57  ;;  %7431 = vmatpush1.bf16.msra.mxu0 %v10797_v59  ;;  %v1447_v57 = vld [vmem:[#allocation8 + $0xc68] sm:$0xff]  ;;  %v10837_v59 = vcombine.low %v1690_v40, %v1694_v22  ;;  %v1730_v40 = vld [vmem:[#allocation8 + $0x1540] sm:$0xff] }
 0x266   :  { %7690 = vmatprep.subr.bf16.mxu1 %v10552_v60  ;;  %7432 = vmatprep.subr.bf16.mxu0 %v10806_v3  ;;  %v10846_v60 = vcombine.high %v1698_v49, %v1702_v51  ;;  %v1451_v3 = vld [vmem:[#allocation8 + $0xc88] sm:$0xff]  ;;  %v10592_v5 = vcombine.high %v1443_v53, %v1447_v57  ;;  %v1734_v22 = vld [vmem:[#allocation8 + $0x1560] sm:$0xff] }
 0x269   :  { %7691 = vmatpush1.bf16.msra.mxu1 %v10551_v1  ;;  %7433 = vmatpush1.bf16.msra.mxu0 %v10805_v13  ;;  %v10591_v1 = vcombine.low %v1443_v53, %v1447_v57  ;;  %v10845_v13 = vcombine.low %v1698_v49, %v1702_v51  ;;  %v1483_v49 = vld [vmem:[#allocation8 + $0xd88] sm:$0xff]  ;;  %v1742_v53 = vld [vmem:[#allocation8 + $0x15a0] sm:$0xff]  ;;  %v10623_v57 = vcombine.low %v1475_v39, %v1479_v44 }
 0x26a   :  { %7692 = vmatprep.subr.bf16.mxu1 %v10560_v48  ;;  %7434 = vmatprep.subr.bf16.mxu0 %v10814_v47  ;;  %v10600_v48 = vcombine.high %v1451_v3, %v1455_v4  ;;  %v10854_v47 = vcombine.high %v1706_v8, %v1710_v10  ;;  %v1487_v51 = vld [vmem:[#allocation8 + $0xda8] sm:$0xff] }
 0x26d   :  { %7693 = vmatpush1.bf16.msra.mxu1 %v10559_v28  ;;  %7435 = vmatpush1.bf16.msra.mxu0 %v10813_v29  ;;  %v10599_v28 = vcombine.low %v1451_v3, %v1455_v4  ;;  %v10853_v29 = vcombine.low %v1706_v8, %v1710_v10  ;;  %v1495_v8 = vld [vmem:[#allocation8 + $0xde8] sm:$0xff] }
 0x26e   :  { %7694 = vmatprep.subr.bf16.mxu1 %v10568_v30  ;;  %7436 = vmatprep.subr.bf16.mxu0 %v10822_v31  ;;  %v10608_v30 = vcombine.high %v1459_v24, %v1463_v25  ;;  %v10862_v31 = vcombine.high %v1714_v26, %v1718_v27 }
 0x271   :  { %7695 = vmatpush1.bf16.msra.mxu1 %v10567_v36  ;;  %7437 = vmatpush1.bf16.msra.mxu0 %v10821_v37  ;;  %v10607_v36 = vcombine.low %v1459_v24, %v1463_v25  ;;  %v10861_v37 = vcombine.low %v1714_v26, %v1718_v27 }
 0x272   :  { %7696 = vmatprep.subr.bf16.mxu1 %v10576_v38  ;;  %7438 = vmatprep.subr.bf16.mxu0 %v10830_v18  ;;  %v10616_v38 = vcombine.high %v1467_v32, %v1471_v33  ;;  %v10870_v18 = vcombine.high %v1722_v34, %v1726_v35 }
 0x275   :  { %7697 = vmatpush1.bf16.msra.mxu1 %v10575_v41  ;;  %7439 = vmatpush1.bf16.msra.mxu0 %v10829_v42  ;;  %v10615_v41 = vcombine.low %v1467_v32, %v1471_v33  ;;  %v10869_v42 = vcombine.low %v1722_v34, %v1726_v35 }
 0x276   :  { %7709 = vmatprep.subr.bf16.mxu1 %v10584_v43  ;;  %7451 = vmatprep.subr.bf16.mxu0 %v10838_v45  ;;  %v10624_v43 = vcombine.high %v1475_v39, %v1479_v44  ;;  %v10878_v45 = vcombine.high %v1730_v40, %v1734_v22 }
 0x278   :  { %7699 = vmatmul.mubr.bf16.vlgmr.msra.gmra.mrb[20].mxu1 %v12470_v7  ;;  %7441 = vmatmul.mubr.bf16.vlgmr.msra.gmra.mrb[16].mxu0 %v12501_v55 }
 0x279   :  { %7710 = vmatpush1.bf16.msra.mxu1 %v10583_v52  ;;  %7452 = vmatpush1.bf16.msra.mxu0 %v10837_v59  ;;  %v1738_v52 = vld [vmem:[#allocation8 + $0x1580] sm:$0xff]  ;;  %v10877_v59 = vcombine.low %v1730_v40, %v1734_v22 }
 0x27a   :  { %7483 = vmatprep.mubr.bf16.mxu0 %v12487_v46  ;;  %7741 = vmatprep.mubr.bf16.mxu1 %v12477_v16  ;;  %v10886_v4 = vcombine.high %v1738_v52, %v1742_v53  ;;  %v10885_v25 = vcombine.low %v1738_v52, %v1742_v53 }
 0x27b   :  { %7453 = vmatprep.subr.bf16.mxu0 %v10846_v60  ;;  %7711 = vmatprep.subr.bf16.mxu1 %v10592_v5  ;;  %v10632_v60 = vcombine.high %v1483_v49, %v1487_v51  ;;  %v1491_v5 = vld [vmem:[#allocation8 + $0xdc8] sm:$0xff] }
 0x27c   :  { %v10640_v26 = vcombine.high %v1491_v5, %v1495_v8  ;;  %v10639_v32 = vcombine.low %v1491_v5, %v1495_v8 }
 0x27d   :  { %7712 = vmatpush1.bf16.msra.mxu1 %v10591_v1  ;;  %7454 = vmatpush1.bf16.msra.mxu0 %v10845_v13  ;;  %v1746_v1 = vld [vmem:[#allocation8 + $0x15c0] sm:$0xff] }
 0x27e   :  { %7713 = vmatprep.subr.bf16.mxu1 %v10600_v48  ;;  %7455 = vmatprep.subr.bf16.mxu0 %v10854_v47  ;;  %v1750_v13 = vld [vmem:[#allocation8 + $0x15e0] sm:$0xff]  ;;  %v10631_v47 = vcombine.low %v1483_v49, %v1487_v51 }
 0x27f   :  { %v10894_v27 = vcombine.high %v1746_v1, %v1750_v13  ;;  %v10893_v33 = vcombine.low %v1746_v1, %v1750_v13 }
 0x281   :  { %7714 = vmatpush1.bf16.msra.mxu1 %v10599_v28  ;;  %7456 = vmatpush1.bf16.msra.mxu0 %v10853_v29  ;;  %v1499_v28 = vld [vmem:[#allocation8 + $0xe08] sm:$0xff] }
 0x282   :  { %7715 = vmatprep.subr.bf16.mxu1 %v10608_v30  ;;  %7457 = vmatprep.subr.bf16.mxu0 %v10862_v31  ;;  %v1503_v29 = vld [vmem:[#allocation8 + $0xe28] sm:$0xff]  ;;  %v1754_v30 = vld [vmem:[#allocation8 + $0x1600] sm:$0xff] }
 0x283   :  { %v1758_v31 = vld [vmem:[#allocation8 + $0x1620] sm:$0xff]  ;;  %v10648_v34 = vcombine.high %v1499_v28, %v1503_v29  ;;  %v10647_v39 = vcombine.low %v1499_v28, %v1503_v29 }
 0x284   :  { %v10902_v35 = vcombine.high %v1754_v30, %v1758_v31  ;;  %v10901_v44 = vcombine.low %v1754_v30, %v1758_v31 }
 0x285   :  { %7716 = vmatpush1.bf16.msra.mxu1 %v10607_v36  ;;  %7458 = vmatpush1.bf16.msra.mxu0 %v10861_v37  ;;  %v1507_v36 = vld [vmem:[#allocation8 + $0xe48] sm:$0xff] }
 0x286   :  { %7717 = vmatprep.subr.bf16.mxu1 %v10616_v38  ;;  %7459 = vmatprep.subr.bf16.mxu0 %v10870_v18  ;;  %v1511_v37 = vld [vmem:[#allocation8 + $0xe68] sm:$0xff]  ;;  %v1762_v38 = vld [vmem:[#allocation8 + $0x1640] sm:$0xff] }
 0x287   :  { %v1766_v18 = vld [vmem:[#allocation8 + $0x1660] sm:$0xff]  ;;  %v10656_v40 = vcombine.high %v1507_v36, %v1511_v37  ;;  %v10655_v49 = vcombine.low %v1507_v36, %v1511_v37 }
 0x288   :  { %v10910_v22 = vcombine.high %v1762_v38, %v1766_v18  ;;  %v10909_v51 = vcombine.low %v1762_v38, %v1766_v18 }
 0x289   :  { %7718 = vmatpush1.bf16.msra.mxu1 %v10615_v41  ;;  %7460 = vmatpush1.bf16.msra.mxu0 %v10869_v42  ;;  %v1515_v41 = vld [vmem:[#allocation8 + $0xe88] sm:$0xff] }
 0x28a   :  { %7719 = vmatprep.subr.bf16.mxu1 %v10624_v43  ;;  %7461 = vmatprep.subr.bf16.mxu0 %v10878_v45  ;;  %v1519_v42 = vld [vmem:[#allocation8 + $0xea8] sm:$0xff]  ;;  %v1770_v43 = vld [vmem:[#allocation8 + $0x1680] sm:$0xff] }
 0x28b   :  { %v12525_v3 = vpop.f32.mrb[16].mxu1  ;;  %v1774_v45 = vld [vmem:[#allocation8 + $0x16a0] sm:$0xff]  ;;  %v10664_v52 = vcombine.high %v1515_v41, %v1519_v42  ;;  %v10663_v5 = vcombine.low %v1515_v41, %v1519_v42 }
 0x28c   :  { %v12527_v10 = vpop.f32.mrb[17].mxu1  ;;  %v10918_v53 = vcombine.high %v1770_v43, %v1774_v45  ;;  %v10917_v8 = vcombine.low %v1770_v43, %v1774_v45 }
 0x28d   :  { %7720 = vmatpush1.bf16.msra.mxu1 %v10623_v57  ;;  %v12529_v48 = vpop.f32.mrb[18].mxu1  ;;  %7462 = vmatpush1.bf16.msra.mxu0 %v10877_v59  ;;  %v1523_v57 = vld [vmem:[#allocation8 + $0xec8] sm:$0xff] }
 0x28e   :  { %v12531_v24 = vpop.f32.mrb[19].mxu1  ;;  %7721 = vmatprep.subr.bf16.mxu1 %v10632_v60  ;;  %7463 = vmatprep.subr.bf16.mxu0 %v10886_v4  ;;  %v1527_v59 = vld [vmem:[#allocation8 + $0xee8] sm:$0xff]  ;;  %v1778_v60 = vld [vmem:[#allocation8 + $0x16c0] sm:$0xff] }
 0x28f   :  { %v1782_v4 = vld [vmem:[#allocation8 + $0x16e0] sm:$0xff]  ;;  %v10672_v1 = vcombine.high %v1523_v57, %v1527_v59  ;;  %v10671_v28 = vcombine.low %v1523_v57, %v1527_v59 }
 0x290   :  { %v10926_v13 = vcombine.high %v1778_v60, %v1782_v4  ;;  %v10925_v29 = vcombine.low %v1778_v60, %v1782_v4 }
 0x291   :  { %7722 = vmatpush1.bf16.msra.mxu1 %v10631_v47  ;;  %7464 = vmatpush1.bf16.msra.mxu0 %v10885_v25  ;;  %v1531_v47 = vld [vmem:[#allocation8 + $0xf08] sm:$0xff] }
 0x292   :  { %7723 = vmatprep.subr.bf16.mxu1 %v10640_v26  ;;  %7465 = vmatprep.subr.bf16.mxu0 %v10894_v27  ;;  %v1535_v25 = vld [vmem:[#allocation8 + $0xf28] sm:$0xff]  ;;  %v1786_v26 = vld [vmem:[#allocation8 + $0x1700] sm:$0xff] }
 0x293   :  { %v1790_v27 = vld [vmem:[#allocation8 + $0x1720] sm:$0xff]  ;;  %v10680_v30 = vcombine.high %v1531_v47, %v1535_v25  ;;  %v10679_v36 = vcombine.low %v1531_v47, %v1535_v25 }
 0x294   :  { %v10934_v31 = vcombine.high %v1786_v26, %v1790_v27  ;;  %v10933_v37 = vcombine.low %v1786_v26, %v1790_v27 }
 0x295   :  { %7724 = vmatpush1.bf16.msra.mxu1 %v10639_v32  ;;  %7466 = vmatpush1.bf16.msra.mxu0 %v10893_v33  ;;  %v1539_v32 = vld [vmem:[#allocation8 + $0xf48] sm:$0xff] }
 0x296   :  { %7725 = vmatprep.subr.bf16.mxu1 %v10648_v34  ;;  %7467 = vmatprep.subr.bf16.mxu0 %v10902_v35  ;;  %v1543_v33 = vld [vmem:[#allocation8 + $0xf68] sm:$0xff]  ;;  %v1794_v34 = vld [vmem:[#allocation8 + $0x1740] sm:$0xff] }
 0x297   :  { %v1798_v35 = vld [vmem:[#allocation8 + $0x1760] sm:$0xff]  ;;  %v10688_v38 = vcombine.high %v1539_v32, %v1543_v33  ;;  %v10687_v41 = vcombine.low %v1539_v32, %v1543_v33  ;;  %v1575_v32 = vld [vmem:[#allocation8 + $0x1068] sm:$0xff] }
 0x298   :  { %v10942_v18 = vcombine.high %v1794_v34, %v1798_v35  ;;  %v10941_v42 = vcombine.low %v1794_v34, %v1798_v35  ;;  %v1579_v35 = vld [vmem:[#allocation8 + $0x1088] sm:$0xff] }
 0x299   :  { %7726 = vmatpush1.bf16.msra.mxu1 %v10647_v39  ;;  %7468 = vmatpush1.bf16.msra.mxu0 %v10901_v44  ;;  %v1547_v39 = vld [vmem:[#allocation8 + $0xf88] sm:$0xff] }
 0x29a   :  { %7727 = vmatprep.subr.bf16.mxu1 %v10656_v40  ;;  %7469 = vmatprep.subr.bf16.mxu0 %v10910_v22  ;;  %v1551_v44 = vld [vmem:[#allocation8 + $0xfa8] sm:$0xff]  ;;  %v1802_v40 = vld [vmem:[#allocation8 + $0x1780] sm:$0xff] }
 0x29b   :  { %v1806_v22 = vld [vmem:[#allocation8 + $0x17a0] sm:$0xff]  ;;  %v10696_v43 = vcombine.high %v1547_v39, %v1551_v44  ;;  %v10695_v57 = vcombine.low %v1547_v39, %v1551_v44 }
 0x29c   :  { %v10950_v45 = vcombine.high %v1802_v40, %v1806_v22  ;;  %v10949_v59 = vcombine.low %v1802_v40, %v1806_v22 }
 0x29d   :  { %7728 = vmatpush1.bf16.msra.mxu1 %v10655_v49  ;;  %7470 = vmatpush1.bf16.msra.mxu0 %v10909_v51  ;;  %v1555_v49 = vld [vmem:[#allocation8 + $0xfc8] sm:$0xff] }
 0x29e   :  { %7729 = vmatprep.subr.bf16.mxu1 %v10664_v52  ;;  %7471 = vmatprep.subr.bf16.mxu0 %v10918_v53  ;;  %v1559_v51 = vld [vmem:[#allocation8 + $0xfe8] sm:$0xff]  ;;  %v1810_v52 = vld [vmem:[#allocation8 + $0x17c0] sm:$0xff] }
 0x29f   :  { %v1814_v53 = vld [vmem:[#allocation8 + $0x17e0] sm:$0xff]  ;;  %v10704_v60 = vcombine.high %v1555_v49, %v1559_v51  ;;  %v10703_v47 = vcombine.low %v1555_v49, %v1559_v51 }
 0x2a0   :  { %v10958_v4 = vcombine.high %v1810_v52, %v1814_v53  ;;  %v10957_v25 = vcombine.low %v1810_v52, %v1814_v53 }
 0x2a1   :  { %7730 = vmatpush1.bf16.msra.mxu1 %v10663_v5  ;;  %7472 = vmatpush1.bf16.msra.mxu0 %v10917_v8  ;;  %v1563_v5 = vld [vmem:[#allocation8 + $0x1008] sm:$0xff] }
 0x2a2   :  { %7731 = vmatprep.subr.bf16.mxu1 %v10672_v1  ;;  %7473 = vmatprep.subr.bf16.mxu0 %v10926_v13  ;;  %v1567_v8 = vld [vmem:[#allocation8 + $0x1028] sm:$0xff]  ;;  %v1818_v1 = vld [vmem:[#allocation8 + $0x1800] sm:$0xff] }
 0x2a3   :  { %v1822_v13 = vld [vmem:[#allocation8 + $0x1820] sm:$0xff]  ;;  %v10712_v26 = vcombine.high %v1563_v5, %v1567_v8 }
 0x2a4   :  { %v10966_v27 = vcombine.high %v1818_v1, %v1822_v13  ;;  %v10965_v33 = vcombine.low %v1818_v1, %v1822_v13 }
 0x2a5   :  { %7732 = vmatpush1.bf16.msra.mxu1 %v10671_v28  ;;  %7474 = vmatpush1.bf16.msra.mxu0 %v10925_v29  ;;  %v1826_v28 = vld [vmem:[#allocation8 + $0x1840] sm:$0xff] }
 0x2a6   :  { %7733 = vmatprep.subr.bf16.mxu1 %v10680_v30  ;;  %7475 = vmatprep.subr.bf16.mxu0 %v10934_v31  ;;  %v1830_v29 = vld [vmem:[#allocation8 + $0x1860] sm:$0xff]  ;;  %v10711_v30 = vcombine.low %v1563_v5, %v1567_v8  ;;  %v1571_v31 = vld [vmem:[#allocation8 + $0x1048] sm:$0xff] }
 0x2a7   :  { %v10974_v34 = vcombine.high %v1826_v28, %v1830_v29  ;;  %v10719_v39 = vcombine.low %v1571_v31, %v1575_v32  ;;  %v10973_v44 = vcombine.low %v1826_v28, %v1830_v29 }
 0x2a9   :  { %7734 = vmatpush1.bf16.msra.mxu1 %v10679_v36  ;;  %7476 = vmatpush1.bf16.msra.mxu0 %v10933_v37  ;;  %v1583_v36 = vld [vmem:[#allocation8 + $0x10a8] sm:$0xff]  ;;  %v10720_v37 = vcombine.high %v1571_v31, %v1575_v32 }
 0x2aa   :  { %7735 = vmatprep.subr.bf16.mxu1 %v10688_v38  ;;  %7477 = vmatprep.subr.bf16.mxu0 %v10942_v18  ;;  %v1834_v38 = vld [vmem:[#allocation8 + $0x1880] sm:$0xff]  ;;  %v10728_v40 = vcombine.high %v1579_v35, %v1583_v36  ;;  %v10727_v49 = vcombine.low %v1579_v35, %v1583_v36  ;;  %v1611_v32 = vld [vmem:[#allocation8 + $0x1188] sm:$0xff] }
 0x2ab   :  { %v1838_v18 = vld [vmem:[#allocation8 + $0x18a0] sm:$0xff] }
 0x2ac   :  { %v10982_v22 = vcombine.high %v1834_v38, %v1838_v18  ;;  %v10981_v51 = vcombine.low %v1834_v38, %v1838_v18  ;;  %v1870_v35 = vld [vmem:[#allocation8 + $0x19a0] sm:$0xff] }
 0x2ad   :  { %7736 = vmatpush1.bf16.msra.mxu1 %v10687_v41  ;;  %7478 = vmatpush1.bf16.msra.mxu0 %v10941_v42  ;;  %v1587_v41 = vld [vmem:[#allocation8 + $0x10c8] sm:$0xff] }
 0x2ae   :  { %7737 = vmatprep.subr.bf16.mxu1 %v10696_v43  ;;  %7479 = vmatprep.subr.bf16.mxu0 %v10950_v45  ;;  %v1591_v42 = vld [vmem:[#allocation8 + $0x10e8] sm:$0xff]  ;;  %v1842_v43 = vld [vmem:[#allocation8 + $0x18c0] sm:$0xff] }
 0x2af   :  { %v1846_v45 = vld [vmem:[#allocation8 + $0x18e0] sm:$0xff]  ;;  %v10736_v52 = vcombine.high %v1587_v41, %v1591_v42  ;;  %v10735_v5 = vcombine.low %v1587_v41, %v1591_v42 }
 0x2b0   :  { %v10990_v53 = vcombine.high %v1842_v43, %v1846_v45  ;;  %v10989_v8 = vcombine.low %v1842_v43, %v1846_v45 }
 0x2b1   :  { %7738 = vmatpush1.bf16.msra.mxu1 %v10695_v57  ;;  %7480 = vmatpush1.bf16.msra.mxu0 %v10949_v59  ;;  %v1595_v57 = vld [vmem:[#allocation8 + $0x1108] sm:$0xff] }
 0x2b2   :  { %7739 = vmatprep.subr.bf16.mxu1 %v10704_v60  ;;  %7481 = vmatprep.subr.bf16.mxu0 %v10958_v4  ;;  %v1599_v59 = vld [vmem:[#allocation8 + $0x1128] sm:$0xff]  ;;  %v1850_v60 = vld [vmem:[#allocation8 + $0x1900] sm:$0xff] }
 0x2b3   :  { %v1854_v4 = vld [vmem:[#allocation8 + $0x1920] sm:$0xff]  ;;  %v10744_v1 = vcombine.high %v1595_v57, %v1599_v59  ;;  %v10743_v28 = vcombine.low %v1595_v57, %v1599_v59 }
 0x2b4   :  { %v10998_v13 = vcombine.high %v1850_v60, %v1854_v4  ;;  %v10997_v29 = vcombine.low %v1850_v60, %v1854_v4 }
 0x2b5   :  { %7740 = vmatpush1.bf16.msra.mxu1 %v10703_v47  ;;  %7482 = vmatpush1.bf16.msra.mxu0 %v10957_v25  ;;  %v1603_v47 = vld [vmem:[#allocation8 + $0x1148] sm:$0xff] }
 0x2b6   :  { %7752 = vmatprep.subr.bf16.mxu1 %v10712_v26  ;;  %7494 = vmatprep.subr.bf16.mxu0 %v10966_v27  ;;  %v1607_v25 = vld [vmem:[#allocation8 + $0x1168] sm:$0xff]  ;;  %v1858_v26 = vld [vmem:[#allocation8 + $0x1940] sm:$0xff] }
 0x2b7   :  { %v1862_v27 = vld [vmem:[#allocation8 + $0x1960] sm:$0xff]  ;;  %v10751_v36 = vcombine.low %v1603_v47, %v1607_v25 }
 0x2b8   :  { %7742 = vmatmul.mubr.bf16.vlgmr.msra.gmra.mrb[20].mxu1 %v12474_v15  ;;  %7484 = vmatmul.mubr.bf16.vlgmr.msra.gmra.mrb[16].mxu0 %v12485_v14  ;;  %v11006_v31 = vcombine.high %v1858_v26, %v1862_v27 }
 0x2b9   :  { %7753 = vmatpush1.bf16.msra.mxu1 %v10711_v30  ;;  %7495 = vmatpush1.bf16.msra.mxu0 %v10965_v33  ;;  %v10752_v30 = vcombine.high %v1603_v47, %v1607_v25  ;;  %v1615_v33 = vld [vmem:[#allocation8 + $0x11a8] sm:$0xff] }
 0x2ba   :  { %7526 = vmatprep.mubr.bf16.mxu0 %v12515_v2  ;;  %7784 = vmatprep.mubr.bf16.mxu1 %v12503_v54  ;;  %v10760_v38 = vcombine.high %v1611_v32, %v1615_v33  ;;  %v10759_v41 = vcombine.low %v1611_v32, %v1615_v33 }
 0x2bb   :  { %7496 = vmatprep.subr.bf16.mxu0 %v10974_v34  ;;  %7754 = vmatprep.subr.bf16.mxu1 %v10720_v37  ;;  %v1866_v34 = vld [vmem:[#allocation8 + $0x1980] sm:$0xff]  ;;  %v11005_v37 = vcombine.low %v1858_v26, %v1862_v27 }
 0x2bc   :  { %v11014_v18 = vcombine.high %v1866_v34, %v1870_v35  ;;  %v11013_v42 = vcombine.low %v1866_v34, %v1870_v35 }
 0x2bd   :  { %7755 = vmatpush1.bf16.msra.mxu1 %v10719_v39  ;;  %7497 = vmatpush1.bf16.msra.mxu0 %v10973_v44  ;;  %v1619_v39 = vld [vmem:[#allocation8 + $0x11c8] sm:$0xff] }
 0x2be   :  { %7756 = vmatprep.subr.bf16.mxu1 %v10728_v40  ;;  %7498 = vmatprep.subr.bf16.mxu0 %v10982_v22  ;;  %v1623_v44 = vld [vmem:[#allocation8 + $0x11e8] sm:$0xff]  ;;  %v1874_v40 = vld [vmem:[#allocation8 + $0x19c0] sm:$0xff] }
 0x2bf   :  { %v1878_v22 = vld [vmem:[#allocation8 + $0x19e0] sm:$0xff]  ;;  %v10768_v43 = vcombine.high %v1619_v39, %v1623_v44  ;;  %v10767_v57 = vcombine.low %v1619_v39, %v1623_v44 }
 0x2c0   :  { %v11022_v45 = vcombine.high %v1874_v40, %v1878_v22  ;;  %v11021_v59 = vcombine.low %v1874_v40, %v1878_v22 }
 0x2c1   :  { %7757 = vmatpush1.bf16.msra.mxu1 %v10727_v49  ;;  %7499 = vmatpush1.bf16.msra.mxu0 %v10981_v51  ;;  %v1627_v49 = vld [vmem:[#allocation8 + $0x1208] sm:$0xff] }
 0x2c2   :  { %7758 = vmatprep.subr.bf16.mxu1 %v10736_v52  ;;  %7500 = vmatprep.subr.bf16.mxu0 %v10990_v53  ;;  %v1631_v51 = vld [vmem:[#allocation8 + $0x1228] sm:$0xff]  ;;  %v1882_v52 = vld [vmem:[#allocation8 + $0x1a00] sm:$0xff] }
 0x2c3   :  { %v1886_v53 = vld [vmem:[#allocation8 + $0x1a20] sm:$0xff]  ;;  %v10776_v60 = vcombine.high %v1627_v49, %v1631_v51  ;;  %v10775_v47 = vcombine.low %v1627_v49, %v1631_v51 }
 0x2c4   :  { %v11030_v4 = vcombine.high %v1882_v52, %v1886_v53  ;;  %v11029_v25 = vcombine.low %v1882_v52, %v1886_v53 }
 0x2c5   :  { %7759 = vmatpush1.bf16.msra.mxu1 %v10735_v5  ;;  %7501 = vmatpush1.bf16.msra.mxu0 %v10989_v8  ;;  %v1635_v5 = vld [vmem:[#allocation8 + $0x1248] sm:$0xff] }
 0x2c6   :  { %7760 = vmatprep.subr.bf16.mxu1 %v10744_v1  ;;  %7502 = vmatprep.subr.bf16.mxu0 %v10998_v13  ;;  %v1639_v8 = vld [vmem:[#allocation8 + $0x1268] sm:$0xff]  ;;  %v1890_v1 = vld [vmem:[#allocation8 + $0x1a40] sm:$0xff] }
 0x2c7   :  { %v1894_v13 = vld [vmem:[#allocation8 + $0x1a60] sm:$0xff]  ;;  %v10784_v26 = vcombine.high %v1635_v5, %v1639_v8  ;;  %v10783_v32 = vcombine.low %v1635_v5, %v1639_v8 }
 0x2c8   :  { %v11038_v27 = vcombine.high %v1890_v1, %v1894_v13  ;;  %v11037_v33 = vcombine.low %v1890_v1, %v1894_v13 }
 0x2c9   :  { %7761 = vmatpush1.bf16.msra.mxu1 %v10743_v28  ;;  %7503 = vmatpush1.bf16.msra.mxu0 %v10997_v29  ;;  %v1643_v28 = vld [vmem:[#allocation8 + $0x1288] sm:$0xff] }
 0x2ca   :  { %7762 = vmatprep.subr.bf16.mxu1 %v10752_v30  ;;  %7504 = vmatprep.subr.bf16.mxu0 %v11006_v31  ;;  %v1647_v29 = vld [vmem:[#allocation8 + $0x12a8] sm:$0xff]  ;;  %v1898_v30 = vld [vmem:[#allocation8 + $0x1a80] sm:$0xff] }
 0x2cb   :  { %v1902_v31 = vld [vmem:[#allocation8 + $0x1aa0] sm:$0xff]  ;;  %v10792_v34 = vcombine.high %v1643_v28, %v1647_v29  ;;  %v10791_v39 = vcombine.low %v1643_v28, %v1647_v29 }
 0x2cc   :  { %v11046_v35 = vcombine.high %v1898_v30, %v1902_v31  ;;  %v11045_v44 = vcombine.low %v1898_v30, %v1902_v31 }
 0x2cd   :  { %7763 = vmatpush1.bf16.msra.mxu1 %v10751_v36  ;;  %7505 = vmatpush1.bf16.msra.mxu0 %v11005_v37  ;;  %v1651_v36 = vld [vmem:[#allocation8 + $0x12c8] sm:$0xff] }
 0x2ce   :  { %7764 = vmatprep.subr.bf16.mxu1 %v10760_v38  ;;  %7506 = vmatprep.subr.bf16.mxu0 %v11014_v18  ;;  %v1655_v37 = vld [vmem:[#allocation8 + $0x12e8] sm:$0xff]  ;;  %v1906_v38 = vld [vmem:[#allocation8 + $0x1ac0] sm:$0xff] }
 0x2cf   :  { %v1910_v18 = vld [vmem:[#allocation8 + $0x1ae0] sm:$0xff]  ;;  %v10800_v40 = vcombine.high %v1651_v36, %v1655_v37  ;;  %v10799_v49 = vcombine.low %v1651_v36, %v1655_v37 }
 0x2d0   :  { %v11054_v22 = vcombine.high %v1906_v38, %v1910_v18  ;;  %v11053_v51 = vcombine.low %v1906_v38, %v1910_v18 }
 0x2d1   :  { %7765 = vmatpush1.bf16.msra.mxu1 %v10759_v41  ;;  %7507 = vmatpush1.bf16.msra.mxu0 %v11013_v42  ;;  %v1659_v41 = vld [vmem:[#allocation8 + $0x1308] sm:$0xff] }
 0x2d2   :  { %7766 = vmatprep.subr.bf16.mxu1 %v10768_v43  ;;  %7508 = vmatprep.subr.bf16.mxu0 %v11022_v45  ;;  %v1663_v42 = vld [vmem:[#allocation8 + $0x1328] sm:$0xff]  ;;  %v1914_v43 = vld [vmem:[#allocation8 + $0x1b00] sm:$0xff] }
 0x2d3   :  { %v1918_v45 = vld [vmem:[#allocation8 + $0x1b20] sm:$0xff]  ;;  %v10808_v52 = vcombine.high %v1659_v41, %v1663_v42  ;;  %v10807_v5 = vcombine.low %v1659_v41, %v1663_v42 }
 0x2d4   :  { %v11062_v53 = vcombine.high %v1914_v43, %v1918_v45  ;;  %v11061_v8 = vcombine.low %v1914_v43, %v1918_v45 }
 0x2d5   :  { %7767 = vmatpush1.bf16.msra.mxu1 %v10767_v57  ;;  %7509 = vmatpush1.bf16.msra.mxu0 %v11021_v59  ;;  %v1667_v57 = vld [vmem:[#allocation8 + $0x1348] sm:$0xff] }
 0x2d6   :  { %7768 = vmatprep.subr.bf16.mxu1 %v10776_v60  ;;  %7510 = vmatprep.subr.bf16.mxu0 %v11030_v4  ;;  %v1671_v59 = vld [vmem:[#allocation8 + $0x1368] sm:$0xff]  ;;  %v1922_v60 = vld [vmem:[#allocation8 + $0x1b40] sm:$0xff] }
 0x2d7   :  { %v1926_v4 = vld [vmem:[#allocation8 + $0x1b60] sm:$0xff]  ;;  %v10816_v1 = vcombine.high %v1667_v57, %v1671_v59  ;;  %v10815_v28 = vcombine.low %v1667_v57, %v1671_v59  ;;  %v1703_v57 = vld [vmem:[#allocation8 + $0x1468] sm:$0xff] }
 0x2d8   :  { %v11070_v13 = vcombine.high %v1922_v60, %v1926_v4  ;;  %v11069_v29 = vcombine.low %v1922_v60, %v1926_v4  ;;  %v1707_v4 = vld [vmem:[#allocation8 + $0x1488] sm:$0xff] }
 0x2d9   :  { %7769 = vmatpush1.bf16.msra.mxu1 %v10775_v47  ;;  %7511 = vmatpush1.bf16.msra.mxu0 %v11029_v25  ;;  %v1675_v47 = vld [vmem:[#allocation8 + $0x1388] sm:$0xff] }
 0x2da   :  { %7770 = vmatprep.subr.bf16.mxu1 %v10784_v26  ;;  %7512 = vmatprep.subr.bf16.mxu0 %v11038_v27  ;;  %v1679_v25 = vld [vmem:[#allocation8 + $0x13a8] sm:$0xff]  ;;  %v1930_v26 = vld [vmem:[#allocation8 + $0x1b80] sm:$0xff] }
 0x2db   :  { %v1934_v27 = vld [vmem:[#allocation8 + $0x1ba0] sm:$0xff]  ;;  %v10824_v30 = vcombine.high %v1675_v47, %v1679_v25  ;;  %v10823_v36 = vcombine.low %v1675_v47, %v1679_v25 }
 0x2dc   :  { %v11078_v31 = vcombine.high %v1930_v26, %v1934_v27  ;;  %v11077_v37 = vcombine.low %v1930_v26, %v1934_v27 }
 0x2dd   :  { %7771 = vmatpush1.bf16.msra.mxu1 %v10783_v32  ;;  %7513 = vmatpush1.bf16.msra.mxu0 %v11037_v33  ;;  %v1683_v32 = vld [vmem:[#allocation8 + $0x13c8] sm:$0xff] }
 0x2de   :  { %7772 = vmatprep.subr.bf16.mxu1 %v10792_v34  ;;  %7514 = vmatprep.subr.bf16.mxu0 %v11046_v35  ;;  %v1687_v33 = vld [vmem:[#allocation8 + $0x13e8] sm:$0xff]  ;;  %v1938_v34 = vld [vmem:[#allocation8 + $0x1bc0] sm:$0xff] }
 0x2df   :  { %v1942_v35 = vld [vmem:[#allocation8 + $0x1be0] sm:$0xff]  ;;  %v10832_v38 = vcombine.high %v1683_v32, %v1687_v33  ;;  %v10831_v41 = vcombine.low %v1683_v32, %v1687_v33 }
 0x2e0   :  { %v11086_v18 = vcombine.high %v1938_v34, %v1942_v35  ;;  %v11085_v42 = vcombine.low %v1938_v34, %v1942_v35 }
 0x2e1   :  { %7773 = vmatpush1.bf16.msra.mxu1 %v10791_v39  ;;  %7515 = vmatpush1.bf16.msra.mxu0 %v11045_v44  ;;  %v1691_v39 = vld [vmem:[#allocation8 + $0x1408] sm:$0xff] }
 0x2e2   :  { %7774 = vmatprep.subr.bf16.mxu1 %v10800_v40  ;;  %7516 = vmatprep.subr.bf16.mxu0 %v11054_v22  ;;  %v1695_v44 = vld [vmem:[#allocation8 + $0x1428] sm:$0xff]  ;;  %v1946_v40 = vld [vmem:[#allocation8 + $0x1c00] sm:$0xff] }
 0x2e3   :  { %v1950_v22 = vld [vmem:[#allocation8 + $0x1c20] sm:$0xff]  ;;  %v10840_v43 = vcombine.high %v1691_v39, %v1695_v44 }
 0x2e4   :  { %v11094_v45 = vcombine.high %v1946_v40, %v1950_v22  ;;  %v11093_v59 = vcombine.low %v1946_v40, %v1950_v22 }
 0x2e5   :  { %7775 = vmatpush1.bf16.msra.mxu1 %v10799_v49  ;;  %7517 = vmatpush1.bf16.msra.mxu0 %v11053_v51  ;;  %v1954_v49 = vld [vmem:[#allocation8 + $0x1c40] sm:$0xff] }
 0x2e6   :  { %7776 = vmatprep.subr.bf16.mxu1 %v10808_v52  ;;  %7518 = vmatprep.subr.bf16.mxu0 %v11062_v53  ;;  %v1958_v51 = vld [vmem:[#allocation8 + $0x1c60] sm:$0xff]  ;;  %v10839_v52 = vcombine.low %v1691_v39, %v1695_v44  ;;  %v1699_v53 = vld [vmem:[#allocation8 + $0x1448] sm:$0xff] }
 0x2e7   :  { %v11102_v60 = vcombine.high %v1954_v49, %v1958_v51  ;;  %v10847_v47 = vcombine.low %v1699_v53, %v1703_v57  ;;  %v11101_v25 = vcombine.low %v1954_v49, %v1958_v51 }
 0x2e9   :  { %7777 = vmatpush1.bf16.msra.mxu1 %v10807_v5  ;;  %7519 = vmatpush1.bf16.msra.mxu0 %v11061_v8  ;;  %v1711_v5 = vld [vmem:[#allocation8 + $0x14a8] sm:$0xff]  ;;  %v10848_v8 = vcombine.high %v1699_v53, %v1703_v57 }
 0x2ea   :  { %7778 = vmatprep.subr.bf16.mxu1 %v10816_v1  ;;  %7520 = vmatprep.subr.bf16.mxu0 %v11070_v13  ;;  %v1962_v1 = vld [vmem:[#allocation8 + $0x1c80] sm:$0xff]  ;;  %v10856_v26 = vcombine.high %v1707_v4, %v1711_v5  ;;  %v10855_v32 = vcombine.low %v1707_v4, %v1711_v5  ;;  %v1739_v57 = vld [vmem:[#allocation8 + $0x1588] sm:$0xff] }
 0x2eb   :  { %v1966_v13 = vld [vmem:[#allocation8 + $0x1ca0] sm:$0xff] }
 0x2ec   :  { %v11110_v27 = vcombine.high %v1962_v1, %v1966_v13  ;;  %v11109_v33 = vcombine.low %v1962_v1, %v1966_v13  ;;  %v1998_v4 = vld [vmem:[#allocation8 + $0x1da0] sm:$0xff] }
 0x2ed   :  { %7779 = vmatpush1.bf16.msra.mxu1 %v10815_v28  ;;  %7521 = vmatpush1.bf16.msra.mxu0 %v11069_v29  ;;  %v1715_v28 = vld [vmem:[#allocation8 + $0x14c8] sm:$0xff] }
 0x2ee   :  { %7780 = vmatprep.subr.bf16.mxu1 %v10824_v30  ;;  %7522 = vmatprep.subr.bf16.mxu0 %v11078_v31  ;;  %v1719_v29 = vld [vmem:[#allocation8 + $0x14e8] sm:$0xff]  ;;  %v1970_v30 = vld [vmem:[#allocation8 + $0x1cc0] sm:$0xff] }
 0x2ef   :  { %v1974_v31 = vld [vmem:[#allocation8 + $0x1ce0] sm:$0xff]  ;;  %v10864_v34 = vcombine.high %v1715_v28, %v1719_v29  ;;  %v10863_v39 = vcombine.low %v1715_v28, %v1719_v29 }
 0x2f0   :  { %v11118_v35 = vcombine.high %v1970_v30, %v1974_v31  ;;  %v11117_v44 = vcombine.low %v1970_v30, %v1974_v31 }
 0x2f1   :  { %7781 = vmatpush1.bf16.msra.mxu1 %v10823_v36  ;;  %7523 = vmatpush1.bf16.msra.mxu0 %v11077_v37  ;;  %v1723_v36 = vld [vmem:[#allocation8 + $0x1508] sm:$0xff] }
 0x2f2   :  { %7782 = vmatprep.subr.bf16.mxu1 %v10832_v38  ;;  %7524 = vmatprep.subr.bf16.mxu0 %v11086_v18  ;;  %v1727_v37 = vld [vmem:[#allocation8 + $0x1528] sm:$0xff]  ;;  %v1978_v38 = vld [vmem:[#allocation8 + $0x1d00] sm:$0xff] }
 0x2f3   :  { %v1982_v18 = vld [vmem:[#allocation8 + $0x1d20] sm:$0xff]  ;;  %v10872_v40 = vcombine.high %v1723_v36, %v1727_v37  ;;  %v10871_v49 = vcombine.low %v1723_v36, %v1727_v37 }
 0x2f4   :  { %v11126_v22 = vcombine.high %v1978_v38, %v1982_v18  ;;  %v11125_v51 = vcombine.low %v1978_v38, %v1982_v18 }
 0x2f5   :  { %7783 = vmatpush1.bf16.msra.mxu1 %v10831_v41  ;;  %7525 = vmatpush1.bf16.msra.mxu0 %v11085_v42  ;;  %v1731_v41 = vld [vmem:[#allocation8 + $0x1548] sm:$0xff] }
 0x2f6   :  { %7795 = vmatprep.subr.bf16.mxu1 %v10840_v43  ;;  %7537 = vmatprep.subr.bf16.mxu0 %v11094_v45  ;;  %v1735_v42 = vld [vmem:[#allocation8 + $0x1568] sm:$0xff]  ;;  %v1986_v43 = vld [vmem:[#allocation8 + $0x1d40] sm:$0xff] }
 0x2f7   :  { %v1990_v45 = vld [vmem:[#allocation8 + $0x1d60] sm:$0xff]  ;;  %v10879_v5 = vcombine.low %v1731_v41, %v1735_v42 }
 0x2f8   :  { %7785 = vmatmul.mubr.bf16.vlgmr.msra.gmra.mrb[20].mxu1 %v12501_v55  ;;  %7527 = vmatmul.mubr.bf16.vlgmr.msra.gmra.mrb[16].mxu0 %v12513_v58  ;;  %v11134_v53 = vcombine.high %v1986_v43, %v1990_v45 }
 0x2f9   :  { %7796 = vmatpush1.bf16.msra.mxu1 %v10839_v52  ;;  %7538 = vmatpush1.bf16.msra.mxu0 %v11093_v59  ;;  %v10880_v52 = vcombine.high %v1731_v41, %v1735_v42  ;;  %v1743_v59 = vld [vmem:[#allocation8 + $0x15a8] sm:$0xff] }
 0x2fa   :  { %7569 = vmatprep.mubr.bf16.mxu0 %v12495_v23  ;;  %7827 = vmatprep.mubr.bf16.mxu1 %v12487_v46  ;;  %v10888_v1 = vcombine.high %v1739_v57, %v1743_v59  ;;  %v10887_v28 = vcombine.low %v1739_v57, %v1743_v59 }
 0x2fb   :  { %7539 = vmatprep.subr.bf16.mxu0 %v11102_v60  ;;  %7797 = vmatprep.subr.bf16.mxu1 %v10848_v8  ;;  %v1994_v60 = vld [vmem:[#allocation8 + $0x1d80] sm:$0xff]  ;;  %v11133_v8 = vcombine.low %v1986_v43, %v1990_v45 }
 0x2fc   :  { %v11142_v13 = vcombine.high %v1994_v60, %v1998_v4  ;;  %v11141_v29 = vcombine.low %v1994_v60, %v1998_v4 }
 0x2fd   :  { %7798 = vmatpush1.bf16.msra.mxu1 %v10847_v47  ;;  %7540 = vmatpush1.bf16.msra.mxu0 %v11101_v25  ;;  %v1747_v47 = vld [vmem:[#allocation8 + $0x15c8] sm:$0xff] }
 0x2fe   :  { %7799 = vmatprep.subr.bf16.mxu1 %v10856_v26  ;;  %7541 = vmatprep.subr.bf16.mxu0 %v11110_v27  ;;  %v1751_v25 = vld [vmem:[#allocation8 + $0x15e8] sm:$0xff]  ;;  %v2002_v26 = vld [vmem:[#allocation8 + $0x1dc0] sm:$0xff] }
 0x2ff   :  { %v2006_v27 = vld [vmem:[#allocation8 + $0x1de0] sm:$0xff]  ;;  %v10896_v30 = vcombine.high %v1747_v47, %v1751_v25  ;;  %v10895_v36 = vcombine.low %v1747_v47, %v1751_v25 }
 0x300   :  { %v11150_v31 = vcombine.high %v2002_v26, %v2006_v27  ;;  %v11149_v37 = vcombine.low %v2002_v26, %v2006_v27 }
 0x301   :  { %7800 = vmatpush1.bf16.msra.mxu1 %v10855_v32  ;;  %7542 = vmatpush1.bf16.msra.mxu0 %v11109_v33  ;;  %v1755_v32 = vld [vmem:[#allocation8 + $0x1608] sm:$0xff] }
 0x302   :  { %7801 = vmatprep.subr.bf16.mxu1 %v10864_v34  ;;  %7543 = vmatprep.subr.bf16.mxu0 %v11118_v35  ;;  %v1759_v33 = vld [vmem:[#allocation8 + $0x1628] sm:$0xff]  ;;  %v2010_v34 = vld [vmem:[#allocation8 + $0x1e00] sm:$0xff] }
 0x303   :  { %v2014_v35 = vld [vmem:[#allocation8 + $0x1e20] sm:$0xff]  ;;  %v10904_v38 = vcombine.high %v1755_v32, %v1759_v33  ;;  %v10903_v41 = vcombine.low %v1755_v32, %v1759_v33 }
 0x304   :  { %v11158_v18 = vcombine.high %v2010_v34, %v2014_v35  ;;  %v11157_v42 = vcombine.low %v2010_v34, %v2014_v35 }
 0x305   :  { %7802 = vmatpush1.bf16.msra.mxu1 %v10863_v39  ;;  %7544 = vmatpush1.bf16.msra.mxu0 %v11117_v44  ;;  %v1763_v39 = vld [vmem:[#allocation8 + $0x1648] sm:$0xff] }
 0x306   :  { %7803 = vmatprep.subr.bf16.mxu1 %v10872_v40  ;;  %7545 = vmatprep.subr.bf16.mxu0 %v11126_v22  ;;  %v1767_v44 = vld [vmem:[#allocation8 + $0x1668] sm:$0xff]  ;;  %v2018_v40 = vld [vmem:[#allocation8 + $0x1e40] sm:$0xff] }
 0x307   :  { %v2022_v22 = vld [vmem:[#allocation8 + $0x1e60] sm:$0xff]  ;;  %v10912_v43 = vcombine.high %v1763_v39, %v1767_v44  ;;  %v10911_v57 = vcombine.low %v1763_v39, %v1767_v44 }
 0x308   :  { %v11166_v45 = vcombine.high %v2018_v40, %v2022_v22  ;;  %v11165_v59 = vcombine.low %v2018_v40, %v2022_v22 }
 0x309   :  { %7804 = vmatpush1.bf16.msra.mxu1 %v10871_v49  ;;  %7546 = vmatpush1.bf16.msra.mxu0 %v11125_v51  ;;  %v1771_v49 = vld [vmem:[#allocation8 + $0x1688] sm:$0xff] }
 0x30a   :  { %7805 = vmatprep.subr.bf16.mxu1 %v10880_v52  ;;  %7547 = vmatprep.subr.bf16.mxu0 %v11134_v53  ;;  %v1775_v51 = vld [vmem:[#allocation8 + $0x16a8] sm:$0xff]  ;;  %v2026_v52 = vld [vmem:[#allocation8 + $0x1e80] sm:$0xff] }
 0x30b   :  { %v2030_v53 = vld [vmem:[#allocation8 + $0x1ea0] sm:$0xff]  ;;  %v10920_v60 = vcombine.high %v1771_v49, %v1775_v51  ;;  %v10919_v47 = vcombine.low %v1771_v49, %v1775_v51 }
 0x30c   :  { %v11174_v4 = vcombine.high %v2026_v52, %v2030_v53  ;;  %v11173_v25 = vcombine.low %v2026_v52, %v2030_v53 }
 0x30d   :  { %7806 = vmatpush1.bf16.msra.mxu1 %v10879_v5  ;;  %7548 = vmatpush1.bf16.msra.mxu0 %v11133_v8  ;;  %v1779_v5 = vld [vmem:[#allocation8 + $0x16c8] sm:$0xff] }
 0x30e   :  { %7807 = vmatprep.subr.bf16.mxu1 %v10888_v1  ;;  %7549 = vmatprep.subr.bf16.mxu0 %v11142_v13  ;;  %v1783_v8 = vld [vmem:[#allocation8 + $0x16e8] sm:$0xff]  ;;  %v2034_v1 = vld [vmem:[#allocation8 + $0x1ec0] sm:$0xff] }
 0x30f   :  { %v2038_v13 = vld [vmem:[#allocation8 + $0x1ee0] sm:$0xff]  ;;  %v10928_v26 = vcombine.high %v1779_v5, %v1783_v8  ;;  %v10927_v32 = vcombine.low %v1779_v5, %v1783_v8 }
 0x310   :  { %v11182_v27 = vcombine.high %v2034_v1, %v2038_v13  ;;  %v11181_v33 = vcombine.low %v2034_v1, %v2038_v13 }
 0x311   :  { %7808 = vmatpush1.bf16.msra.mxu1 %v10887_v28  ;;  %7550 = vmatpush1.bf16.msra.mxu0 %v11141_v29  ;;  %v1787_v28 = vld [vmem:[#allocation8 + $0x1708] sm:$0xff] }
 0x312   :  { %7809 = vmatprep.subr.bf16.mxu1 %v10896_v30  ;;  %7551 = vmatprep.subr.bf16.mxu0 %v11150_v31  ;;  %v1791_v29 = vld [vmem:[#allocation8 + $0x1728] sm:$0xff]  ;;  %v2042_v30 = vld [vmem:[#allocation8 + $0x1f00] sm:$0xff] }
 0x313   :  { %v2046_v31 = vld [vmem:[#allocation8 + $0x1f20] sm:$0xff]  ;;  %v10936_v34 = vcombine.high %v1787_v28, %v1791_v29  ;;  %v10935_v39 = vcombine.low %v1787_v28, %v1791_v29 }
 0x314   :  { %v11190_v35 = vcombine.high %v2042_v30, %v2046_v31  ;;  %v11189_v44 = vcombine.low %v2042_v30, %v2046_v31 }
 0x315   :  { %7810 = vmatpush1.bf16.msra.mxu1 %v10895_v36  ;;  %7552 = vmatpush1.bf16.msra.mxu0 %v11149_v37  ;;  %v1795_v36 = vld [vmem:[#allocation8 + $0x1748] sm:$0xff] }
 0x316   :  { %7811 = vmatprep.subr.bf16.mxu1 %v10904_v38  ;;  %7553 = vmatprep.subr.bf16.mxu0 %v11158_v18  ;;  %v1799_v37 = vld [vmem:[#allocation8 + $0x1768] sm:$0xff]  ;;  %v2050_v38 = vld [vmem:[#allocation8 + $0x1f40] sm:$0xff] }
 0x317   :  { %v2054_v18 = vld [vmem:[#allocation8 + $0x1f60] sm:$0xff]  ;;  %v10944_v40 = vcombine.high %v1795_v36, %v1799_v37  ;;  %v10943_v49 = vcombine.low %v1795_v36, %v1799_v37  ;;  %v1064_v36 = vld [vmem:[#allocation8 + $0x70] sm:$0xff] }
 0x318   :  { %v11198_v22 = vcombine.high %v2050_v38, %v2054_v18  ;;  %v11197_v51 = vcombine.low %v2050_v38, %v2054_v18  ;;  %v1835_v18 = vld [vmem:[#allocation8 + $0x1888] sm:$0xff] }
 0x319   :  { %7812 = vmatpush1.bf16.msra.mxu1 %v10903_v41  ;;  %7554 = vmatpush1.bf16.msra.mxu0 %v11157_v42  ;;  %v1803_v41 = vld [vmem:[#allocation8 + $0x1788] sm:$0xff] }
 0x31a   :  { %7813 = vmatprep.subr.bf16.mxu1 %v10912_v43  ;;  %7555 = vmatprep.subr.bf16.mxu0 %v11166_v45  ;;  %v1807_v42 = vld [vmem:[#allocation8 + $0x17a8] sm:$0xff]  ;;  %v2058_v43 = vld [vmem:[#allocation8 + $0x1f80] sm:$0xff] }
 0x31b   :  { %v2062_v45 = vld [vmem:[#allocation8 + $0x1fa0] sm:$0xff]  ;;  %v10952_v52 = vcombine.high %v1803_v41, %v1807_v42  ;;  %v10951_v5 = vcombine.low %v1803_v41, %v1807_v42 }
 0x31c   :  { %v11206_v53 = vcombine.high %v2058_v43, %v2062_v45  ;;  %v11205_v8 = vcombine.low %v2058_v43, %v2062_v45 }
 0x31d   :  { %7814 = vmatpush1.bf16.msra.mxu1 %v10911_v57  ;;  %7556 = vmatpush1.bf16.msra.mxu0 %v11165_v59  ;;  %v1811_v57 = vld [vmem:[#allocation8 + $0x17c8] sm:$0xff] }
 0x31e   :  { %7815 = vmatprep.subr.bf16.mxu1 %v10920_v60  ;;  %7557 = vmatprep.subr.bf16.mxu0 %v11174_v4  ;;  %v1815_v59 = vld [vmem:[#allocation8 + $0x17e8] sm:$0xff]  ;;  %v2066_v60 = vld [vmem:[#allocation8 + $0x1fc0] sm:$0xff] }
 0x31f   :  { %v2070_v4 = vld [vmem:[#allocation8 + $0x1fe0] sm:$0xff]  ;;  %v10960_v1 = vcombine.high %v1811_v57, %v1815_v59  ;;  %v10959_v28 = vcombine.low %v1811_v57, %v1815_v59 }
 0x320   :  { %v11214_v13 = vcombine.high %v2066_v60, %v2070_v4  ;;  %v11213_v29 = vcombine.low %v2066_v60, %v2070_v4 }
 0x321   :  { %7816 = vmatpush1.bf16.msra.mxu1 %v10919_v47  ;;  %7558 = vmatpush1.bf16.msra.mxu0 %v11173_v25  ;;  %v1819_v47 = vld [vmem:[#allocation8 + $0x1808] sm:$0xff] }
 0x322   :  { %7817 = vmatprep.subr.bf16.mxu1 %v10928_v26  ;;  %7559 = vmatprep.subr.bf16.mxu0 %v11182_v27  ;;  %v1823_v25 = vld [vmem:[#allocation8 + $0x1828] sm:$0xff]  ;;  %v1052_v26 = vld [vmem:[#allocation8 + $0x10] sm:$0xff] }
 0x323   :  { %v1056_v27 = vld [vmem:[#allocation8 + $0x30] sm:$0xff]  ;;  %v10968_v30 = vcombine.high %v1819_v47, %v1823_v25 }
 0x324   :  { %v10202_v31 = vcombine.high %v1052_v26, %v1056_v27  ;;  %v10201_v37 = vcombine.low %v1052_v26, %v1056_v27 }
 0x325   :  { %7818 = vmatpush1.bf16.msra.mxu1 %v10927_v32  ;;  %7560 = vmatpush1.bf16.msra.mxu0 %v11181_v33  ;;  %v1827_v32 = vld [vmem:[#allocation8 + $0x1848] sm:$0xff] }
 0x326   :  { %7819 = vmatprep.subr.bf16.mxu1 %v10936_v34  ;;  %7561 = vmatprep.subr.bf16.mxu0 %v11190_v35  ;;  %v1831_v33 = vld [vmem:[#allocation8 + $0x1868] sm:$0xff]  ;;  %v10967_v34 = vcombine.low %v1819_v47, %v1823_v25  ;;  %v1060_v35 = vld [vmem:[#allocation8 + $0x50] sm:$0xff] }
 0x327   :  { %v10976_v38 = vcombine.high %v1827_v32, %v1831_v33  ;;  %v10975_v41 = vcombine.low %v1827_v32, %v1831_v33  ;;  %v10209_v42 = vcombine.low %v1060_v35, %v1064_v36 }
 0x329   :  { %7820 = vmatpush1.bf16.msra.mxu1 %v10935_v39  ;;  %7562 = vmatpush1.bf16.msra.mxu0 %v11189_v44  ;;  %v1839_v39 = vld [vmem:[#allocation8 + $0x18a8] sm:$0xff]  ;;  %v10210_v44 = vcombine.high %v1060_v35, %v1064_v36 }
 0x32a   :  { %7821 = vmatprep.subr.bf16.mxu1 %v10944_v40  ;;  %7563 = vmatprep.subr.bf16.mxu0 %v11198_v22  ;;  %v1068_v40 = vld [vmem:[#allocation8 + $0x90] sm:$0xff]  ;;  %v10984_v43 = vcombine.high %v1835_v18, %v1839_v39  ;;  %v10983_v57 = vcombine.low %v1835_v18, %v1839_v39  ;;  %v1867_v36 = vld [vmem:[#allocation8 + $0x1988] sm:$0xff] }
 0x32b   :  { %v1072_v22 = vld [vmem:[#allocation8 + $0xb0] sm:$0xff] }
 0x32c   :  { %v10218_v45 = vcombine.high %v1068_v40, %v1072_v22  ;;  %v10217_v59 = vcombine.low %v1068_v40, %v1072_v22  ;;  %v1104_v18 = vld [vmem:[#allocation8 + $0x1b0] sm:$0xff] }
 0x32d   :  { %7822 = vmatpush1.bf16.msra.mxu1 %v10943_v49  ;;  %7564 = vmatpush1.bf16.msra.mxu0 %v11197_v51  ;;  %v1843_v49 = vld [vmem:[#allocation8 + $0x18c8] sm:$0xff] }
 0x32e   :  { %7823 = vmatprep.subr.bf16.mxu1 %v10952_v52  ;;  %7565 = vmatprep.subr.bf16.mxu0 %v11206_v53  ;;  %v1847_v51 = vld [vmem:[#allocation8 + $0x18e8] sm:$0xff]  ;;  %v1076_v52 = vld [vmem:[#allocation8 + $0xd0] sm:$0xff] }
 0x32f   :  { %v1080_v53 = vld [vmem:[#allocation8 + $0xf0] sm:$0xff]  ;;  %v10992_v60 = vcombine.high %v1843_v49, %v1847_v51  ;;  %v10991_v47 = vcombine.low %v1843_v49, %v1847_v51 }
 0x330   :  { %v10226_v4 = vcombine.high %v1076_v52, %v1080_v53  ;;  %v10225_v25 = vcombine.low %v1076_v52, %v1080_v53 }
 0x331   :  { %7824 = vmatpush1.bf16.msra.mxu1 %v10951_v5  ;;  %7566 = vmatpush1.bf16.msra.mxu0 %v11205_v8  ;;  %v1851_v5 = vld [vmem:[#allocation8 + $0x1908] sm:$0xff] }
 0x332   :  { %7825 = vmatprep.subr.bf16.mxu1 %v10960_v1  ;;  %7567 = vmatprep.subr.bf16.mxu0 %v11214_v13  ;;  %v1855_v8 = vld [vmem:[#allocation8 + $0x1928] sm:$0xff]  ;;  %v1084_v1 = vld [vmem:[#allocation8 + $0x110] sm:$0xff] }
 0x333   :  { %v1088_v13 = vld [vmem:[#allocation8 + $0x130] sm:$0xff]  ;;  %v11000_v26 = vcombine.high %v1851_v5, %v1855_v8  ;;  %v10999_v32 = vcombine.low %v1851_v5, %v1855_v8 }
 0x334   :  { %v10234_v27 = vcombine.high %v1084_v1, %v1088_v13  ;;  %v10233_v33 = vcombine.low %v1084_v1, %v1088_v13 }
 0x335   :  { %7826 = vmatpush1.bf16.msra.mxu1 %v10959_v28  ;;  %7568 = vmatpush1.bf16.msra.mxu0 %v11213_v29  ;;  %v1859_v28 = vld [vmem:[#allocation8 + $0x1948] sm:$0xff] }
 0x336   :  { %7838 = vmatprep.subr.bf16.mxu1 %v10968_v30  ;;  %7924 = vmatprep.subr.bf16.mxu0 %v10202_v31  ;;  %v1863_v29 = vld [vmem:[#allocation8 + $0x1968] sm:$0xff]  ;;  %v1092_v30 = vld [vmem:[#allocation8 + $0x150] sm:$0xff] }
 0x337   :  { %v1096_v31 = vld [vmem:[#allocation8 + $0x170] sm:$0xff]  ;;  %v11007_v39 = vcombine.low %v1859_v28, %v1863_v29 }
 0x338   :  { %7828 = vmatmul.mubr.bf16.vlgmr.msra.gmra.mrb[20].mxu1 %v12485_v14  ;;  %7570 = vmatmul.mubr.bf16.vlgmr.msra.gmra.mrb[16].mxu0 %v12493_v50  ;;  %v10242_v35 = vcombine.high %v1092_v30, %v1096_v31 }
 0x339   :  { %7839 = vmatpush1.bf16.msra.mxu1 %v10967_v34  ;;  %7870 = vmatprep.mubr.bf16.mxu1 %v12515_v2  ;;  %v11008_v34 = vcombine.high %v1859_v28, %v1863_v29 }
 0x33a   :  { %7925 = vmatpush1.bf16.msra.mxu0 %v10201_v37  ;;  %7956 = vmatprep.mubr.bf16.mxu0 %v12439_v62  ;;  %v1871_v37 = vld [vmem:[#allocation8 + $0x19a8] sm:$0xff] }
 0x33b   :  { %7840 = vmatprep.subr.bf16.mxu1 %v10976_v38  ;;  %7926 = vmatprep.subr.bf16.mxu0 %v10210_v44  ;;  %v1100_v38 = vld [vmem:[#allocation8 + $0x190] sm:$0xff]  ;;  %v10241_v44 = vcombine.low %v1092_v30, %v1096_v31  ;;  %v11016_v40 = vcombine.high %v1867_v36, %v1871_v37  ;;  %v11015_v49 = vcombine.low %v1867_v36, %v1871_v37 }
 0x33c   :  { %v10250_v22 = vcombine.high %v1100_v38, %v1104_v18  ;;  %v10249_v51 = vcombine.low %v1100_v38, %v1104_v18 }
 0x33d   :  { %7841 = vmatpush1.bf16.msra.mxu1 %v10975_v41  ;;  %v1875_v41 = vld [vmem:[#allocation8 + $0x19c8] sm:$0xff] }
 0x33e   :  { %7927 = vmatpush1.bf16.msra.mxu0 %v10209_v42  ;;  %7842 = vmatprep.subr.bf16.mxu1 %v10984_v43  ;;  %v1879_v42 = vld [vmem:[#allocation8 + $0x19e8] sm:$0xff]  ;;  %v1108_v43 = vld [vmem:[#allocation8 + $0x1d0] sm:$0xff] }
 0x33f   :  { %7928 = vmatprep.subr.bf16.mxu0 %v10218_v45  ;;  %v1112_v45 = vld [vmem:[#allocation8 + $0x1f0] sm:$0xff]  ;;  %v11024_v52 = vcombine.high %v1875_v41, %v1879_v42  ;;  %v11023_v5 = vcombine.low %v1875_v41, %v1879_v42 }
 0x340   :  { %v10258_v53 = vcombine.high %v1108_v43, %v1112_v45  ;;  %v10257_v8 = vcombine.low %v1108_v43, %v1112_v45 }
 0x341   :  { %7843 = vmatpush1.bf16.msra.mxu1 %v10983_v57  ;;  %v1883_v57 = vld [vmem:[#allocation8 + $0x1a08] sm:$0xff] }
 0x342   :  { %7929 = vmatpush1.bf16.msra.mxu0 %v10217_v59  ;;  %7844 = vmatprep.subr.bf16.mxu1 %v10992_v60  ;;  %v1887_v59 = vld [vmem:[#allocation8 + $0x1a28] sm:$0xff]  ;;  %v1116_v60 = vld [vmem:[#allocation8 + $0x210] sm:$0xff] }
 0x343   :  { %7930 = vmatprep.subr.bf16.mxu0 %v10226_v4  ;;  %v1120_v4 = vld [vmem:[#allocation8 + $0x230] sm:$0xff]  ;;  %v11032_v1 = vcombine.high %v1883_v57, %v1887_v59  ;;  %v11031_v28 = vcombine.low %v1883_v57, %v1887_v59 }
 0x344   :  { %v10266_v13 = vcombine.high %v1116_v60, %v1120_v4  ;;  %v10265_v29 = vcombine.low %v1116_v60, %v1120_v4 }
 0x345   :  { %7845 = vmatpush1.bf16.msra.mxu1 %v10991_v47  ;;  %v1891_v47 = vld [vmem:[#allocation8 + $0x1a48] sm:$0xff] }
 0x346   :  { %7931 = vmatpush1.bf16.msra.mxu0 %v10225_v25  ;;  %7846 = vmatprep.subr.bf16.mxu1 %v11000_v26  ;;  %v1895_v25 = vld [vmem:[#allocation8 + $0x1a68] sm:$0xff]  ;;  %v1124_v26 = vld [vmem:[#allocation8 + $0x250] sm:$0xff] }
 0x347   :  { %7932 = vmatprep.subr.bf16.mxu0 %v10234_v27  ;;  %v1128_v27 = vld [vmem:[#allocation8 + $0x270] sm:$0xff]  ;;  %v11040_v30 = vcombine.high %v1891_v47, %v1895_v25  ;;  %v11039_v36 = vcombine.low %v1891_v47, %v1895_v25 }
 0x348   :  { %v10274_v31 = vcombine.high %v1124_v26, %v1128_v27  ;;  %v10273_v37 = vcombine.low %v1124_v26, %v1128_v27 }
 0x349   :  { %7847 = vmatpush1.bf16.msra.mxu1 %v10999_v32  ;;  %v1899_v32 = vld [vmem:[#allocation8 + $0x1a88] sm:$0xff] }
 0x34a   :  { %7933 = vmatpush1.bf16.msra.mxu0 %v10233_v33  ;;  %7848 = vmatprep.subr.bf16.mxu1 %v11008_v34  ;;  %v1903_v33 = vld [vmem:[#allocation8 + $0x1aa8] sm:$0xff]  ;;  %v1132_v34 = vld [vmem:[#allocation8 + $0x290] sm:$0xff] }
 0x34b   :  { %7934 = vmatprep.subr.bf16.mxu0 %v10242_v35  ;;  %v1136_v35 = vld [vmem:[#allocation8 + $0x2b0] sm:$0xff]  ;;  %v11048_v38 = vcombine.high %v1899_v32, %v1903_v33  ;;  %v11047_v41 = vcombine.low %v1899_v32, %v1903_v33 }
 0x34c   :  { %v10282_v18 = vcombine.high %v1132_v34, %v1136_v35  ;;  %v10281_v42 = vcombine.low %v1132_v34, %v1136_v35 }
 0x34d   :  { %7849 = vmatpush1.bf16.msra.mxu1 %v11007_v39  ;;  %v1907_v39 = vld [vmem:[#allocation8 + $0x1ac8] sm:$0xff] }
 0x34e   :  { %7935 = vmatpush1.bf16.msra.mxu0 %v10241_v44  ;;  %7850 = vmatprep.subr.bf16.mxu1 %v11016_v40  ;;  %v1911_v44 = vld [vmem:[#allocation8 + $0x1ae8] sm:$0xff]  ;;  %v1140_v40 = vld [vmem:[#allocation8 + $0x2d0] sm:$0xff] }
 0x34f   :  { %7936 = vmatprep.subr.bf16.mxu0 %v10250_v22  ;;  %v1144_v22 = vld [vmem:[#allocation8 + $0x2f0] sm:$0xff]  ;;  %v11056_v43 = vcombine.high %v1907_v39, %v1911_v44  ;;  %v11055_v57 = vcombine.low %v1907_v39, %v1911_v44 }
 0x350   :  { %v10290_v45 = vcombine.high %v1140_v40, %v1144_v22  ;;  %v10289_v59 = vcombine.low %v1140_v40, %v1144_v22 }
 0x351   :  { %7851 = vmatpush1.bf16.msra.mxu1 %v11015_v49  ;;  %v1915_v49 = vld [vmem:[#allocation8 + $0x1b08] sm:$0xff] }
 0x352   :  { %7937 = vmatpush1.bf16.msra.mxu0 %v10249_v51  ;;  %7852 = vmatprep.subr.bf16.mxu1 %v11024_v52  ;;  %v1919_v51 = vld [vmem:[#allocation8 + $0x1b28] sm:$0xff]  ;;  %v1148_v52 = vld [vmem:[#allocation8 + $0x310] sm:$0xff] }
 0x353   :  { %7938 = vmatprep.subr.bf16.mxu0 %v10258_v53  ;;  %v1152_v53 = vld [vmem:[#allocation8 + $0x330] sm:$0xff]  ;;  %v11064_v60 = vcombine.high %v1915_v49, %v1919_v51  ;;  %v11063_v47 = vcombine.low %v1915_v49, %v1919_v51 }
 0x354   :  { %v10298_v4 = vcombine.high %v1148_v52, %v1152_v53  ;;  %v10297_v25 = vcombine.low %v1148_v52, %v1152_v53 }
 0x355   :  { %7853 = vmatpush1.bf16.msra.mxu1 %v11023_v5  ;;  %v1923_v5 = vld [vmem:[#allocation8 + $0x1b48] sm:$0xff] }
 0x356   :  { %7939 = vmatpush1.bf16.msra.mxu0 %v10257_v8  ;;  %7854 = vmatprep.subr.bf16.mxu1 %v11032_v1  ;;  %v1927_v8 = vld [vmem:[#allocation8 + $0x1b68] sm:$0xff]  ;;  %v1156_v1 = vld [vmem:[#allocation8 + $0x350] sm:$0xff] }
 0x357   :  { %7940 = vmatprep.subr.bf16.mxu0 %v10266_v13  ;;  %v1160_v13 = vld [vmem:[#allocation8 + $0x370] sm:$0xff]  ;;  %v11072_v26 = vcombine.high %v1923_v5, %v1927_v8  ;;  %v11071_v32 = vcombine.low %v1923_v5, %v1927_v8 }
 0x358   :  { %v10306_v27 = vcombine.high %v1156_v1, %v1160_v13  ;;  %v10305_v33 = vcombine.low %v1156_v1, %v1160_v13  ;;  %v1192_v5 = vld [vmem:[#allocation8 + $0x470] sm:$0xff]  ;;  %v1963_v13 = vld [vmem:[#allocation8 + $0x1c88] sm:$0xff] }
 0x359   :  { %7855 = vmatpush1.bf16.msra.mxu1 %v11031_v28  ;;  %v1931_v28 = vld [vmem:[#allocation8 + $0x1b88] sm:$0xff] }
 0x35a   :  { %7941 = vmatpush1.bf16.msra.mxu0 %v10265_v29  ;;  %7856 = vmatprep.subr.bf16.mxu1 %v11040_v30  ;;  %v1935_v29 = vld [vmem:[#allocation8 + $0x1ba8] sm:$0xff]  ;;  %v1164_v30 = vld [vmem:[#allocation8 + $0x390] sm:$0xff] }
 0x35b   :  { %7942 = vmatprep.subr.bf16.mxu0 %v10274_v31  ;;  %v1168_v31 = vld [vmem:[#allocation8 + $0x3b0] sm:$0xff]  ;;  %v11080_v34 = vcombine.high %v1931_v28, %v1935_v29  ;;  %v11079_v39 = vcombine.low %v1931_v28, %v1935_v29 }
 0x35c   :  { %v10314_v35 = vcombine.high %v1164_v30, %v1168_v31  ;;  %v10313_v44 = vcombine.low %v1164_v30, %v1168_v31 }
 0x35d   :  { %7857 = vmatpush1.bf16.msra.mxu1 %v11039_v36  ;;  %v1939_v36 = vld [vmem:[#allocation8 + $0x1bc8] sm:$0xff] }
 0x35e   :  { %7943 = vmatpush1.bf16.msra.mxu0 %v10273_v37  ;;  %7858 = vmatprep.subr.bf16.mxu1 %v11048_v38  ;;  %v1943_v37 = vld [vmem:[#allocation8 + $0x1be8] sm:$0xff]  ;;  %v1172_v38 = vld [vmem:[#allocation8 + $0x3d0] sm:$0xff] }
 0x35f   :  { %7944 = vmatprep.subr.bf16.mxu0 %v10282_v18  ;;  %v1176_v18 = vld [vmem:[#allocation8 + $0x3f0] sm:$0xff]  ;;  %v11088_v40 = vcombine.high %v1939_v36, %v1943_v37  ;;  %v11087_v49 = vcombine.low %v1939_v36, %v1943_v37 }
 0x360   :  { %v10322_v22 = vcombine.high %v1172_v38, %v1176_v18  ;;  %v10321_v51 = vcombine.low %v1172_v38, %v1176_v18 }
 0x361   :  { %7859 = vmatpush1.bf16.msra.mxu1 %v11047_v41  ;;  %v1947_v41 = vld [vmem:[#allocation8 + $0x1c08] sm:$0xff] }
 0x362   :  { %7945 = vmatpush1.bf16.msra.mxu0 %v10281_v42  ;;  %7860 = vmatprep.subr.bf16.mxu1 %v11056_v43  ;;  %v1951_v42 = vld [vmem:[#allocation8 + $0x1c28] sm:$0xff]  ;;  %v1180_v43 = vld [vmem:[#allocation8 + $0x410] sm:$0xff] }
 0x363   :  { %7946 = vmatprep.subr.bf16.mxu0 %v10290_v45  ;;  %v1184_v45 = vld [vmem:[#allocation8 + $0x430] sm:$0xff]  ;;  %v11096_v52 = vcombine.high %v1947_v41, %v1951_v42 }
 0x364   :  { %v10330_v53 = vcombine.high %v1180_v43, %v1184_v45  ;;  %v10329_v8 = vcombine.low %v1180_v43, %v1184_v45 }
 0x365   :  { %7861 = vmatpush1.bf16.msra.mxu1 %v11055_v57  ;;  %v1955_v57 = vld [vmem:[#allocation8 + $0x1c48] sm:$0xff] }
 0x366   :  { %7947 = vmatpush1.bf16.msra.mxu0 %v10289_v59  ;;  %7862 = vmatprep.subr.bf16.mxu1 %v11064_v60  ;;  %v1959_v59 = vld [vmem:[#allocation8 + $0x1c68] sm:$0xff]  ;;  %v11095_v60 = vcombine.low %v1947_v41, %v1951_v42 }
 0x367   :  { %7948 = vmatprep.subr.bf16.mxu0 %v10298_v4  ;;  %v1188_v4 = vld [vmem:[#allocation8 + $0x450] sm:$0xff]  ;;  %v11104_v1 = vcombine.high %v1955_v57, %v1959_v59  ;;  %v11103_v28 = vcombine.low %v1955_v57, %v1959_v59 }
 0x368   :  { %v10337_v29 = vcombine.low %v1188_v4, %v1192_v5 }
 0x369   :  { %7863 = vmatpush1.bf16.msra.mxu1 %v11063_v47  ;;  %v1967_v47 = vld [vmem:[#allocation8 + $0x1ca8] sm:$0xff] }
 0x36a   :  { %7949 = vmatpush1.bf16.msra.mxu0 %v10297_v25  ;;  %7864 = vmatprep.subr.bf16.mxu1 %v11072_v26  ;;  %v10338_v25 = vcombine.high %v1188_v4, %v1192_v5  ;;  %v1196_v26 = vld [vmem:[#allocation8 + $0x490] sm:$0xff]  ;;  %v11112_v30 = vcombine.high %v1963_v13, %v1967_v47  ;;  %v11111_v36 = vcombine.low %v1963_v13, %v1967_v47  ;;  %v1995_v5 = vld [vmem:[#allocation8 + $0x1d88] sm:$0xff] }
 0x36b   :  { %7950 = vmatprep.subr.bf16.mxu0 %v10306_v27  ;;  %v1200_v27 = vld [vmem:[#allocation8 + $0x4b0] sm:$0xff] }
 0x36c   :  { %v10346_v31 = vcombine.high %v1196_v26, %v1200_v27  ;;  %v10345_v37 = vcombine.low %v1196_v26, %v1200_v27  ;;  %v1232_v13 = vld [vmem:[#allocation8 + $0x5b0] sm:$0xff] }
 0x36d   :  { %7865 = vmatpush1.bf16.msra.mxu1 %v11071_v32  ;;  %v1971_v32 = vld [vmem:[#allocation8 + $0x1cc8] sm:$0xff] }
 0x36e   :  { %7951 = vmatpush1.bf16.msra.mxu0 %v10305_v33  ;;  %7866 = vmatprep.subr.bf16.mxu1 %v11080_v34  ;;  %v1975_v33 = vld [vmem:[#allocation8 + $0x1ce8] sm:$0xff]  ;;  %v1204_v34 = vld [vmem:[#allocation8 + $0x4d0] sm:$0xff] }
 0x36f   :  { %7952 = vmatprep.subr.bf16.mxu0 %v10314_v35  ;;  %v1208_v35 = vld [vmem:[#allocation8 + $0x4f0] sm:$0xff]  ;;  %v11120_v38 = vcombine.high %v1971_v32, %v1975_v33  ;;  %v11119_v41 = vcombine.low %v1971_v32, %v1975_v33 }
 0x370   :  { %v10354_v18 = vcombine.high %v1204_v34, %v1208_v35  ;;  %v10353_v42 = vcombine.low %v1204_v34, %v1208_v35 }
 0x371   :  { %7867 = vmatpush1.bf16.msra.mxu1 %v11079_v39  ;;  %v1979_v39 = vld [vmem:[#allocation8 + $0x1d08] sm:$0xff] }
 0x372   :  { %7953 = vmatpush1.bf16.msra.mxu0 %v10313_v44  ;;  %7868 = vmatprep.subr.bf16.mxu1 %v11088_v40  ;;  %v1983_v44 = vld [vmem:[#allocation8 + $0x1d28] sm:$0xff]  ;;  %v1212_v40 = vld [vmem:[#allocation8 + $0x510] sm:$0xff] }
 0x373   :  { %7954 = vmatprep.subr.bf16.mxu0 %v10322_v22  ;;  %v1216_v22 = vld [vmem:[#allocation8 + $0x530] sm:$0xff]  ;;  %v11128_v43 = vcombine.high %v1979_v39, %v1983_v44  ;;  %v11127_v57 = vcombine.low %v1979_v39, %v1983_v44 }
 0x374   :  { %v10362_v45 = vcombine.high %v1212_v40, %v1216_v22  ;;  %v10361_v59 = vcombine.low %v1212_v40, %v1216_v22 }
 0x375   :  { %7869 = vmatpush1.bf16.msra.mxu1 %v11087_v49  ;;  %v1987_v49 = vld [vmem:[#allocation8 + $0x1d48] sm:$0xff] }
 0x376   :  { %7955 = vmatpush1.bf16.msra.mxu0 %v10321_v51  ;;  %7881 = vmatprep.subr.bf16.mxu1 %v11096_v52  ;;  %v1991_v51 = vld [vmem:[#allocation8 + $0x1d68] sm:$0xff]  ;;  %v1220_v52 = vld [vmem:[#allocation8 + $0x550] sm:$0xff] }
 0x377   :  { %7967 = vmatprep.subr.bf16.mxu0 %v10330_v53  ;;  %v1224_v53 = vld [vmem:[#allocation8 + $0x570] sm:$0xff]  ;;  %v11135_v47 = vcombine.low %v1987_v49, %v1991_v51 }
 0x378   :  { %7871 = vmatmul.mubr.bf16.vlgmr.msra.gmra.mrb[20].mxu1 %v12513_v58  ;;  %v10370_v4 = vcombine.high %v1220_v52, %v1224_v53 }
 0x379   :  { %7957 = vmatmul.mubr.bf16.vlgmr.msra.gmra.mrb[20].mxu0 %v12435_v56  ;;  %7882 = vmatpush1.bf16.msra.mxu1 %v11095_v60  ;;  %v11136_v60 = vcombine.high %v1987_v49, %v1991_v51 }
 0x37a   :  { %7913 = vmatprep.mubr.bf16.mxu1 %v12495_v23  ;;  %7968 = vmatpush1.bf16.msra.mxu0 %v10329_v8  ;;  %v1999_v8 = vld [vmem:[#allocation8 + $0x1da8] sm:$0xff] }
 0x37b   :  { %7999 = vmatprep.mubr.bf16.mxu0 %v12441_v63  ;;  %7883 = vmatprep.subr.bf16.mxu1 %v11104_v1  ;;  %v1228_v1 = vld [vmem:[#allocation8 + $0x590] sm:$0xff]  ;;  %v11144_v26 = vcombine.high %v1995_v5, %v1999_v8  ;;  %v11143_v32 = vcombine.low %v1995_v5, %v1999_v8 }
 0x37c   :  { %7969 = vmatprep.subr.bf16.mxu0 %v10338_v25  ;;  %v10369_v25 = vcombine.low %v1220_v52, %v1224_v53  ;;  %v10378_v27 = vcombine.high %v1228_v1, %v1232_v13  ;;  %v10377_v33 = vcombine.low %v1228_v1, %v1232_v13 }
 0x37d   :  { %7884 = vmatpush1.bf16.msra.mxu1 %v11103_v28  ;;  %v2003_v28 = vld [vmem:[#allocation8 + $0x1dc8] sm:$0xff] }
 0x37e   :  { %7970 = vmatpush1.bf16.msra.mxu0 %v10337_v29  ;;  %7885 = vmatprep.subr.bf16.mxu1 %v11112_v30  ;;  %v2007_v29 = vld [vmem:[#allocation8 + $0x1de8] sm:$0xff]  ;;  %v1236_v30 = vld [vmem:[#allocation8 + $0x5d0] sm:$0xff] }
 0x37f   :  { %7971 = vmatprep.subr.bf16.mxu0 %v10346_v31  ;;  %v1240_v31 = vld [vmem:[#allocation8 + $0x5f0] sm:$0xff]  ;;  %v11152_v34 = vcombine.high %v2003_v28, %v2007_v29  ;;  %v11151_v39 = vcombine.low %v2003_v28, %v2007_v29 }
 0x380   :  { %v10386_v35 = vcombine.high %v1236_v30, %v1240_v31  ;;  %v10385_v44 = vcombine.low %v1236_v30, %v1240_v31 }
 0x381   :  { %7886 = vmatpush1.bf16.msra.mxu1 %v11111_v36  ;;  %v2011_v36 = vld [vmem:[#allocation8 + $0x1e08] sm:$0xff] }
 0x382   :  { %7972 = vmatpush1.bf16.msra.mxu0 %v10345_v37  ;;  %7887 = vmatprep.subr.bf16.mxu1 %v11120_v38  ;;  %v2015_v37 = vld [vmem:[#allocation8 + $0x1e28] sm:$0xff]  ;;  %v1244_v38 = vld [vmem:[#allocation8 + $0x610] sm:$0xff] }
 0x383   :  { %7973 = vmatprep.subr.bf16.mxu0 %v10354_v18  ;;  %v1248_v18 = vld [vmem:[#allocation8 + $0x630] sm:$0xff]  ;;  %v11160_v40 = vcombine.high %v2011_v36, %v2015_v37  ;;  %v11159_v49 = vcombine.low %v2011_v36, %v2015_v37 }
 0x384   :  { %v10394_v22 = vcombine.high %v1244_v38, %v1248_v18  ;;  %v10393_v51 = vcombine.low %v1244_v38, %v1248_v18 }
 0x385   :  { %7888 = vmatpush1.bf16.msra.mxu1 %v11119_v41  ;;  %v2019_v41 = vld [vmem:[#allocation8 + $0x1e48] sm:$0xff] }
 0x386   :  { %7974 = vmatpush1.bf16.msra.mxu0 %v10353_v42  ;;  %7889 = vmatprep.subr.bf16.mxu1 %v11128_v43  ;;  %v2023_v42 = vld [vmem:[#allocation8 + $0x1e68] sm:$0xff]  ;;  %v1252_v43 = vld [vmem:[#allocation8 + $0x650] sm:$0xff] }
 0x387   :  { %7975 = vmatprep.subr.bf16.mxu0 %v10362_v45  ;;  %v1256_v45 = vld [vmem:[#allocation8 + $0x670] sm:$0xff]  ;;  %v11168_v52 = vcombine.high %v2019_v41, %v2023_v42  ;;  %v11167_v5 = vcombine.low %v2019_v41, %v2023_v42 }
 0x388   :  { %v10402_v53 = vcombine.high %v1252_v43, %v1256_v45  ;;  %v10401_v8 = vcombine.low %v1252_v43, %v1256_v45 }
 0x389   :  { %7890 = vmatpush1.bf16.msra.mxu1 %v11127_v57  ;;  %v2027_v57 = vld [vmem:[#allocation8 + $0x1e88] sm:$0xff] }
 0x38a   :  { %7976 = vmatpush1.bf16.msra.mxu0 %v10361_v59  ;;  %7891 = vmatprep.subr.bf16.mxu1 %v11136_v60  ;;  %v2031_v59 = vld [vmem:[#allocation8 + $0x1ea8] sm:$0xff]  ;;  %v1260_v60 = vld [vmem:[#allocation8 + $0x690] sm:$0xff] }
 0x38b   :  { %7977 = vmatprep.subr.bf16.mxu0 %v10370_v4  ;;  %v1264_v4 = vld [vmem:[#allocation8 + $0x6b0] sm:$0xff]  ;;  %v11176_v1 = vcombine.high %v2027_v57, %v2031_v59  ;;  %v11175_v28 = vcombine.low %v2027_v57, %v2031_v59 }
 0x38c   :  { %v10410_v13 = vcombine.high %v1260_v60, %v1264_v4  ;;  %v10409_v29 = vcombine.low %v1260_v60, %v1264_v4 }
 0x38d   :  { %7892 = vmatpush1.bf16.msra.mxu1 %v11135_v47  ;;  %v2035_v47 = vld [vmem:[#allocation8 + $0x1ec8] sm:$0xff] }
 0x38e   :  { %7978 = vmatpush1.bf16.msra.mxu0 %v10369_v25  ;;  %7893 = vmatprep.subr.bf16.mxu1 %v11144_v26  ;;  %v2039_v25 = vld [vmem:[#allocation8 + $0x1ee8] sm:$0xff]  ;;  %v1268_v26 = vld [vmem:[#allocation8 + $0x6d0] sm:$0xff] }
 0x38f   :  { %7979 = vmatprep.subr.bf16.mxu0 %v10378_v27  ;;  %v1272_v27 = vld [vmem:[#allocation8 + $0x6f0] sm:$0xff]  ;;  %v11184_v30 = vcombine.high %v2035_v47, %v2039_v25  ;;  %v11183_v36 = vcombine.low %v2035_v47, %v2039_v25 }
 0x390   :  { %v10418_v31 = vcombine.high %v1268_v26, %v1272_v27  ;;  %v10417_v37 = vcombine.low %v1268_v26, %v1272_v27 }
 0x391   :  { %7894 = vmatpush1.bf16.msra.mxu1 %v11143_v32  ;;  %v2043_v32 = vld [vmem:[#allocation8 + $0x1f08] sm:$0xff] }
 0x392   :  { %7980 = vmatpush1.bf16.msra.mxu0 %v10377_v33  ;;  %7895 = vmatprep.subr.bf16.mxu1 %v11152_v34  ;;  %v2047_v33 = vld [vmem:[#allocation8 + $0x1f28] sm:$0xff]  ;;  %v1276_v34 = vld [vmem:[#allocation8 + $0x710] sm:$0xff] }
 0x393   :  { %7981 = vmatprep.subr.bf16.mxu0 %v10386_v35  ;;  %v1280_v35 = vld [vmem:[#allocation8 + $0x730] sm:$0xff]  ;;  %v11192_v38 = vcombine.high %v2043_v32, %v2047_v33  ;;  %v11191_v41 = vcombine.low %v2043_v32, %v2047_v33 }
 0x394   :  { %v10426_v18 = vcombine.high %v1276_v34, %v1280_v35  ;;  %v10425_v42 = vcombine.low %v1276_v34, %v1280_v35 }
 0x395   :  { %7896 = vmatpush1.bf16.msra.mxu1 %v11151_v39  ;;  %v2051_v39 = vld [vmem:[#allocation8 + $0x1f48] sm:$0xff] }
 0x396   :  { %7982 = vmatpush1.bf16.msra.mxu0 %v10385_v44  ;;  %7897 = vmatprep.subr.bf16.mxu1 %v11160_v40  ;;  %v2055_v44 = vld [vmem:[#allocation8 + $0x1f68] sm:$0xff]  ;;  %v1284_v40 = vld [vmem:[#allocation8 + $0x750] sm:$0xff] }
 0x397   :  { %7983 = vmatprep.subr.bf16.mxu0 %v10394_v22  ;;  %v1288_v22 = vld [vmem:[#allocation8 + $0x770] sm:$0xff]  ;;  %v11200_v43 = vcombine.high %v2051_v39, %v2055_v44  ;;  %v11199_v57 = vcombine.low %v2051_v39, %v2055_v44  ;;  %v1065_v39 = vld [vmem:[#allocation8 + $0x78] sm:$0xff] }
 0x398   :  { %v10434_v45 = vcombine.high %v1284_v40, %v1288_v22  ;;  %v10433_v59 = vcombine.low %v1284_v40, %v1288_v22  ;;  %v1069_v22 = vld [vmem:[#allocation8 + $0x98] sm:$0xff] }
 0x399   :  { %7898 = vmatpush1.bf16.msra.mxu1 %v11159_v49  ;;  %v2059_v49 = vld [vmem:[#allocation8 + $0x1f88] sm:$0xff] }
 0x39a   :  { %7984 = vmatpush1.bf16.msra.mxu0 %v10393_v51  ;;  %7899 = vmatprep.subr.bf16.mxu1 %v11168_v52  ;;  %v2063_v51 = vld [vmem:[#allocation8 + $0x1fa8] sm:$0xff]  ;;  %v1292_v52 = vld [vmem:[#allocation8 + $0x790] sm:$0xff] }
 0x39b   :  { %7985 = vmatprep.subr.bf16.mxu0 %v10402_v53  ;;  %v1296_v53 = vld [vmem:[#allocation8 + $0x7b0] sm:$0xff]  ;;  %v11208_v60 = vcombine.high %v2059_v49, %v2063_v51  ;;  %v11207_v47 = vcombine.low %v2059_v49, %v2063_v51 }
 0x39c   :  { %v10442_v4 = vcombine.high %v1292_v52, %v1296_v53  ;;  %v10441_v25 = vcombine.low %v1292_v52, %v1296_v53 }
 0x39d   :  { %7900 = vmatpush1.bf16.msra.mxu1 %v11167_v5  ;;  %v2067_v5 = vld [vmem:[#allocation8 + $0x1fc8] sm:$0xff] }
 0x39e   :  { %7986 = vmatpush1.bf16.msra.mxu0 %v10401_v8  ;;  %7901 = vmatprep.subr.bf16.mxu1 %v11176_v1  ;;  %v2071_v8 = vld [vmem:[#allocation8 + $0x1fe8] sm:$0xff]  ;;  %v1300_v1 = vld [vmem:[#allocation8 + $0x7d0] sm:$0xff] }
 0x39f   :  { %7987 = vmatprep.subr.bf16.mxu0 %v10410_v13  ;;  %v1304_v13 = vld [vmem:[#allocation8 + $0x7f0] sm:$0xff]  ;;  %v11216_v26 = vcombine.high %v2067_v5, %v2071_v8  ;;  %v11215_v32 = vcombine.low %v2067_v5, %v2071_v8 }
 0x3a0   :  { %v10450_v27 = vcombine.high %v1300_v1, %v1304_v13  ;;  %v10449_v33 = vcombine.low %v1300_v1, %v1304_v13 }
 0x3a1   :  { %7902 = vmatpush1.bf16.msra.mxu1 %v11175_v28  ;;  %v1053_v28 = vld [vmem:[#allocation8 + $0x18] sm:$0xff] }
 0x3a2   :  { %7988 = vmatpush1.bf16.msra.mxu0 %v10409_v29  ;;  %7903 = vmatprep.subr.bf16.mxu1 %v11184_v30  ;;  %v1057_v29 = vld [vmem:[#allocation8 + $0x38] sm:$0xff]  ;;  %v1308_v30 = vld [vmem:[#allocation8 + $0x810] sm:$0xff] }
 0x3a3   :  { %7989 = vmatprep.subr.bf16.mxu0 %v10418_v31  ;;  %v1312_v31 = vld [vmem:[#allocation8 + $0x830] sm:$0xff]  ;;  %v10204_v34 = vcombine.high %v1053_v28, %v1057_v29 }
 0x3a4   :  { %v10458_v35 = vcombine.high %v1308_v30, %v1312_v31  ;;  %v10457_v44 = vcombine.low %v1308_v30, %v1312_v31  ;;  %v1093_v31 = vld [vmem:[#allocation8 + $0x158] sm:$0xff] }
 0x3a5   :  { %7904 = vmatpush1.bf16.msra.mxu1 %v11183_v36  ;;  %v1316_v36 = vld [vmem:[#allocation8 + $0x850] sm:$0xff] }
 0x3a6   :  { %7990 = vmatpush1.bf16.msra.mxu0 %v10417_v37  ;;  %7905 = vmatprep.subr.bf16.mxu1 %v11192_v38  ;;  %v1320_v37 = vld [vmem:[#allocation8 + $0x870] sm:$0xff]  ;;  %v10203_v38 = vcombine.low %v1053_v28, %v1057_v29 }
 0x3a7   :  { %7991 = vmatprep.subr.bf16.mxu0 %v10426_v18  ;;  %v1061_v18 = vld [vmem:[#allocation8 + $0x58] sm:$0xff]  ;;  %v10466_v40 = vcombine.high %v1316_v36, %v1320_v37  ;;  %v10465_v51 = vcombine.low %v1316_v36, %v1320_v37 }
 0x3a8   :  { %v10211_v49 = vcombine.low %v1061_v18, %v1065_v39 }
 0x3a9   :  { %7906 = vmatpush1.bf16.msra.mxu1 %v11191_v41  ;;  %v1073_v41 = vld [vmem:[#allocation8 + $0xb8] sm:$0xff] }
 0x3aa   :  { %7992 = vmatpush1.bf16.msra.mxu0 %v10425_v42  ;;  %7907 = vmatprep.subr.bf16.mxu1 %v11200_v43  ;;  %v10212_v42 = vcombine.high %v1061_v18, %v1065_v39  ;;  %v1324_v43 = vld [vmem:[#allocation8 + $0x890] sm:$0xff]  ;;  %v10220_v52 = vcombine.high %v1069_v22, %v1073_v41  ;;  %v10219_v5 = vcombine.low %v1069_v22, %v1073_v41  ;;  %v1101_v18 = vld [vmem:[#allocation8 + $0x198] sm:$0xff] }
 0x3ab   :  { %7993 = vmatprep.subr.bf16.mxu0 %v10434_v45  ;;  %v1328_v45 = vld [vmem:[#allocation8 + $0x8b0] sm:$0xff]  ;;  %v1105_v39 = vld [vmem:[#allocation8 + $0x1b8] sm:$0xff] }
 0x3ac   :  { %v10474_v53 = vcombine.high %v1324_v43, %v1328_v45  ;;  %v10473_v8 = vcombine.low %v1324_v43, %v1328_v45  ;;  %v1109_v45 = vld [vmem:[#allocation8 + $0x1d8] sm:$0xff] }
 0x3ad   :  { %7908 = vmatpush1.bf16.msra.mxu1 %v11199_v57  ;;  %v1077_v57 = vld [vmem:[#allocation8 + $0xd8] sm:$0xff] }
 0x3ae   :  { %7994 = vmatpush1.bf16.msra.mxu0 %v10433_v59  ;;  %7909 = vmatprep.subr.bf16.mxu1 %v11208_v60  ;;  %v1081_v59 = vld [vmem:[#allocation8 + $0xf8] sm:$0xff]  ;;  %v1332_v60 = vld [vmem:[#allocation8 + $0x8d0] sm:$0xff] }
 0x3af   :  { %7995 = vmatprep.subr.bf16.mxu0 %v10442_v4  ;;  %v1336_v4 = vld [vmem:[#allocation8 + $0x8f0] sm:$0xff]  ;;  %v10228_v1 = vcombine.high %v1077_v57, %v1081_v59 }
 0x3b0   :  { %v10482_v13 = vcombine.high %v1332_v60, %v1336_v4  ;;  %v10481_v28 = vcombine.low %v1332_v60, %v1336_v4  ;;  %v1117_v4 = vld [vmem:[#allocation8 + $0x218] sm:$0xff] }
 0x3b1   :  { %7910 = vmatpush1.bf16.msra.mxu1 %v11207_v47  ;;  %v1085_v47 = vld [vmem:[#allocation8 + $0x118] sm:$0xff] }
 0x3b2   :  { %7996 = vmatpush1.bf16.msra.mxu0 %v10441_v25  ;;  %7911 = vmatprep.subr.bf16.mxu1 %v11216_v26  ;;  %v1089_v25 = vld [vmem:[#allocation8 + $0x138] sm:$0xff]  ;;  %v1340_v26 = vld [vmem:[#allocation8 + $0x910] sm:$0xff] }
 0x3b3   :  { %7997 = vmatprep.subr.bf16.mxu0 %v10450_v27  ;;  %v1344_v27 = vld [vmem:[#allocation8 + $0x930] sm:$0xff]  ;;  %v10236_v29 = vcombine.high %v1085_v47, %v1089_v25 }
 0x3b4   :  { %v10490_v30 = vcombine.high %v1340_v26, %v1344_v27  ;;  %v10489_v36 = vcombine.low %v1340_v26, %v1344_v27  ;;  %v1125_v27 = vld [vmem:[#allocation8 + $0x258] sm:$0xff] }
 0x3b5   :  { %7912 = vmatpush1.bf16.msra.mxu1 %v11215_v32  ;;  %v1097_v32 = vld [vmem:[#allocation8 + $0x178] sm:$0xff] }
 0x3b6   :  { %7998 = vmatpush1.bf16.msra.mxu0 %v10449_v33  ;;  %8268 = vmatprep.subr.bf16.mxu1 %v10204_v34  ;;  %v1348_v33 = vld [vmem:[#allocation8 + $0x950] sm:$0xff]  ;;  %v10244_v37 = vcombine.high %v1093_v31, %v1097_v32  ;;  %v10243_v22 = vcombine.low %v1093_v31, %v1097_v32 }
 0x3b7   :  { %8010 = vmatprep.subr.bf16.mxu0 %v10458_v35  ;;  %v1352_v34 = vld [vmem:[#allocation8 + $0x970] sm:$0xff]  ;;  %v10235_v35 = vcombine.low %v1085_v47, %v1089_v25 }
 0x3b8   :  { %7914 = vmatmul.mubr.bf16.vlgmr.msra.gmra.mrb[20].mxu1 %v12493_v50  ;;  %v10497_v41 = vcombine.low %v1348_v33, %v1352_v34 }
 0x3b9   :  { %8000 = vmatmul.mubr.bf16.vlgmr.msra.gmra.mrb[20].mxu0 %v12437_v61  ;;  %8269 = vmatpush1.bf16.msra.mxu1 %v10203_v38  ;;  %v10498_v38 = vcombine.high %v1348_v33, %v1352_v34  ;;  %v1133_v34 = vld [vmem:[#allocation8 + $0x298] sm:$0xff] }
 0x3ba   :  { %8011 = vmatpush1.bf16.msra.mxu0 %v10457_v44  ;;  %8042 = vmatprep.mubr.bf16.mxu0 %v12472_v12  ;;  %v1356_v44 = vld [vmem:[#allocation8 + $0x990] sm:$0xff] }
 0x3bb   :  { %8300 = vmatprep.mubr.bf16.mxu1 %v12439_v62  ;;  %8012 = vmatprep.subr.bf16.mxu0 %v10466_v40  ;;  %v10227_v62 = vcombine.low %v1077_v57, %v1081_v59  ;;  %v1360_v40 = vld [vmem:[#allocation8 + $0x9b0] sm:$0xff] }
 0x3bc   :  { %8270 = vmatprep.subr.bf16.mxu1 %v10212_v42  ;;  %v10252_v42 = vcombine.high %v1101_v18, %v1105_v39  ;;  %v10506_v43 = vcombine.high %v1356_v44, %v1360_v40  ;;  %v10505_v57 = vcombine.low %v1356_v44, %v1360_v40  ;;  %v1141_v40 = vld [vmem:[#allocation8 + $0x2d8] sm:$0xff] }
 0x3bd   :  { %8271 = vmatpush1.bf16.msra.mxu1 %v10211_v49  ;;  %v1113_v49 = vld [vmem:[#allocation8 + $0x1f8] sm:$0xff] }
 0x3be   :  { %8013 = vmatpush1.bf16.msra.mxu0 %v10465_v51  ;;  %8272 = vmatprep.subr.bf16.mxu1 %v10220_v52  ;;  %v1364_v51 = vld [vmem:[#allocation8 + $0x9d0] sm:$0xff]  ;;  %v10260_v59 = vcombine.high %v1109_v45, %v1113_v49 }
 0x3bf   :  { %8014 = vmatprep.subr.bf16.mxu0 %v10474_v53  ;;  %v1368_v52 = vld [vmem:[#allocation8 + $0x9f0] sm:$0xff]  ;;  %v10251_v53 = vcombine.low %v1101_v18, %v1105_v39 }
 0x3c0   :  { %v10514_v60 = vcombine.high %v1364_v51, %v1368_v52  ;;  %v10513_v47 = vcombine.low %v1364_v51, %v1368_v52  ;;  %v1149_v52 = vld [vmem:[#allocation8 + $0x318] sm:$0xff] }
 0x3c1   :  { %8273 = vmatpush1.bf16.msra.mxu1 %v10219_v5  ;;  %v1121_v5 = vld [vmem:[#allocation8 + $0x238] sm:$0xff] }
 0x3c2   :  { %8015 = vmatpush1.bf16.msra.mxu0 %v10473_v8  ;;  %8274 = vmatprep.subr.bf16.mxu1 %v10228_v1  ;;  %v1372_v8 = vld [vmem:[#allocation8 + $0xa10] sm:$0xff]  ;;  %v10268_v25 = vcombine.high %v1117_v4, %v1121_v5 }
 0x3c3   :  { %8016 = vmatprep.subr.bf16.mxu0 %v10482_v13  ;;  %v1376_v1 = vld [vmem:[#allocation8 + $0xa30] sm:$0xff]  ;;  %v10259_v13 = vcombine.low %v1109_v45, %v1113_v49 }
 0x3c4   :  { %v10522_v26 = vcombine.high %v1372_v8, %v1376_v1  ;;  %v10521_v31 = vcombine.low %v1372_v8, %v1376_v1  ;;  %v1157_v1 = vld [vmem:[#allocation8 + $0x358] sm:$0xff] }
 0x3c5   :  { %8275 = vmatpush1.bf16.msra.mxu1 %v10227_v62  ;;  %v1129_v62 = vld [vmem:[#allocation8 + $0x278] sm:$0xff] }
 0x3c6   :  { %8017 = vmatpush1.bf16.msra.mxu0 %v10481_v28  ;;  %8276 = vmatprep.subr.bf16.mxu1 %v10236_v29  ;;  %v1380_v28 = vld [vmem:[#allocation8 + $0xa50] sm:$0xff]  ;;  %v10276_v32 = vcombine.high %v1125_v27, %v1129_v62 }
 0x3c7   :  { %8018 = vmatprep.subr.bf16.mxu0 %v10490_v30  ;;  %v1384_v29 = vld [vmem:[#allocation8 + $0xa70] sm:$0xff]  ;;  %v10267_v30 = vcombine.low %v1117_v4, %v1121_v5 }
 0x3c8   :  { %v10530_v33 = vcombine.high %v1380_v28, %v1384_v29  ;;  %v10529_v18 = vcombine.low %v1380_v28, %v1384_v29  ;;  %v1165_v29 = vld [vmem:[#allocation8 + $0x398] sm:$0xff] }
 0x3c9   :  { %8277 = vmatpush1.bf16.msra.mxu1 %v10235_v35  ;;  %v1137_v35 = vld [vmem:[#allocation8 + $0x2b8] sm:$0xff] }
 0x3ca   :  { %8019 = vmatpush1.bf16.msra.mxu0 %v10489_v36  ;;  %8278 = vmatprep.subr.bf16.mxu1 %v10244_v37  ;;  %v1388_v36 = vld [vmem:[#allocation8 + $0xa90] sm:$0xff]  ;;  %v10284_v39 = vcombine.high %v1133_v34, %v1137_v35 }
 0x3cb   :  { %8020 = vmatprep.subr.bf16.mxu0 %v10498_v38  ;;  %v1392_v37 = vld [vmem:[#allocation8 + $0xab0] sm:$0xff]  ;;  %v10275_v38 = vcombine.low %v1125_v27, %v1129_v62 }
 0x3cc   :  { %v10538_v44 = vcombine.high %v1388_v36, %v1392_v37  ;;  %v10537_v45 = vcombine.low %v1388_v36, %v1392_v37  ;;  %v1173_v37 = vld [vmem:[#allocation8 + $0x3d8] sm:$0xff] }
 0x3cd   :  { %8279 = vmatpush1.bf16.msra.mxu1 %v10243_v22  ;;  %v1145_v22 = vld [vmem:[#allocation8 + $0x2f8] sm:$0xff] }
 0x3ce   :  { %8021 = vmatpush1.bf16.msra.mxu0 %v10497_v41  ;;  %8280 = vmatprep.subr.bf16.mxu1 %v10252_v42  ;;  %v1396_v41 = vld [vmem:[#allocation8 + $0xad0] sm:$0xff]  ;;  %v10292_v49 = vcombine.high %v1141_v40, %v1145_v22 }
 0x3cf   :  { %8022 = vmatprep.subr.bf16.mxu0 %v10506_v43  ;;  %v1400_v42 = vld [vmem:[#allocation8 + $0xaf0] sm:$0xff]  ;;  %v10283_v43 = vcombine.low %v1133_v34, %v1137_v35 }
 0x3d0   :  { %v10546_v51 = vcombine.high %v1396_v41, %v1400_v42  ;;  %v10545_v4 = vcombine.low %v1396_v41, %v1400_v42  ;;  %v1181_v42 = vld [vmem:[#allocation8 + $0x418] sm:$0xff] }
 0x3d1   :  { %8281 = vmatpush1.bf16.msra.mxu1 %v10251_v53  ;;  %v1153_v53 = vld [vmem:[#allocation8 + $0x338] sm:$0xff] }
 0x3d2   :  { %8023 = vmatpush1.bf16.msra.mxu0 %v10505_v57  ;;  %8282 = vmatprep.subr.bf16.mxu1 %v10260_v59  ;;  %v1404_v57 = vld [vmem:[#allocation8 + $0xb10] sm:$0xff]  ;;  %v10300_v5 = vcombine.high %v1149_v52, %v1153_v53 }
 0x3d3   :  { %8024 = vmatprep.subr.bf16.mxu0 %v10514_v60  ;;  %v1408_v59 = vld [vmem:[#allocation8 + $0xb30] sm:$0xff]  ;;  %v10291_v60 = vcombine.low %v1141_v40, %v1145_v22 }
 0x3d4   :  { %v10554_v8 = vcombine.high %v1404_v57, %v1408_v59  ;;  %v10553_v27 = vcombine.low %v1404_v57, %v1408_v59  ;;  %v1444_v59 = vld [vmem:[#allocation8 + $0xc50] sm:$0xff] }
 0x3d5   :  { %8283 = vmatpush1.bf16.msra.mxu1 %v10259_v13  ;;  %v1161_v13 = vld [vmem:[#allocation8 + $0x378] sm:$0xff] }
 0x3d6   :  { %8025 = vmatpush1.bf16.msra.mxu0 %v10513_v47  ;;  %8284 = vmatprep.subr.bf16.mxu1 %v10268_v25  ;;  %v1412_v47 = vld [vmem:[#allocation8 + $0xb50] sm:$0xff]  ;;  %v10308_v62 = vcombine.high %v1157_v1, %v1161_v13 }
 0x3d7   :  { %8026 = vmatprep.subr.bf16.mxu0 %v10522_v26  ;;  %v1416_v25 = vld [vmem:[#allocation8 + $0xb70] sm:$0xff]  ;;  %v10299_v26 = vcombine.low %v1149_v52, %v1153_v53 }
 0x3d8   :  { %v10562_v28 = vcombine.high %v1412_v47, %v1416_v25  ;;  %v10561_v34 = vcombine.low %v1412_v47, %v1416_v25  ;;  %v1197_v47 = vld [vmem:[#allocation8 + $0x498] sm:$0xff] }
 0x3d9   :  { %8285 = vmatpush1.bf16.msra.mxu1 %v10267_v30  ;;  %v1169_v30 = vld [vmem:[#allocation8 + $0x3b8] sm:$0xff] }
 0x3da   :  { %8027 = vmatpush1.bf16.msra.mxu0 %v10521_v31  ;;  %8286 = vmatprep.subr.bf16.mxu1 %v10276_v32  ;;  %v1420_v31 = vld [vmem:[#allocation8 + $0xb90] sm:$0xff]  ;;  %v10316_v35 = vcombine.high %v1165_v29, %v1169_v30  ;;  %v1201_v25 = vld [vmem:[#allocation8 + $0x4b8] sm:$0xff] }
 0x3db   :  { %8028 = vmatprep.subr.bf16.mxu0 %v10530_v33  ;;  %v1424_v32 = vld [vmem:[#allocation8 + $0xbb0] sm:$0xff]  ;;  %v10307_v33 = vcombine.low %v1157_v1, %v1161_v13 }
 0x3dc   :  { %v10570_v36 = vcombine.high %v1420_v31, %v1424_v32  ;;  %v10569_v40 = vcombine.low %v1420_v31, %v1424_v32  ;;  %v1205_v32 = vld [vmem:[#allocation8 + $0x4d8] sm:$0xff] }
 0x3dd   :  { %8287 = vmatpush1.bf16.msra.mxu1 %v10275_v38  ;;  %v1177_v38 = vld [vmem:[#allocation8 + $0x3f8] sm:$0xff] }
 0x3de   :  { %8029 = vmatpush1.bf16.msra.mxu0 %v10529_v18  ;;  %8288 = vmatprep.subr.bf16.mxu1 %v10284_v39  ;;  %v1428_v18 = vld [vmem:[#allocation8 + $0xbd0] sm:$0xff]  ;;  %v10324_v22 = vcombine.high %v1173_v37, %v1177_v38 }
 0x3df   :  { %8030 = vmatprep.subr.bf16.mxu0 %v10538_v44  ;;  %v1432_v39 = vld [vmem:[#allocation8 + $0xbf0] sm:$0xff]  ;;  %v10315_v44 = vcombine.low %v1165_v29, %v1169_v30  ;;  %v10348_v30 = vcombine.high %v1197_v47, %v1201_v25 }
 0x3e0   :  { %v10578_v41 = vcombine.high %v1428_v18, %v1432_v39  ;;  %v10577_v52 = vcombine.low %v1428_v18, %v1432_v39  ;;  %v1213_v18 = vld [vmem:[#allocation8 + $0x518] sm:$0xff] }
 0x3e1   :  { %8289 = vmatpush1.bf16.msra.mxu1 %v10283_v43  ;;  %v1185_v43 = vld [vmem:[#allocation8 + $0x438] sm:$0xff] }
 0x3e2   :  { %8031 = vmatpush1.bf16.msra.mxu0 %v10537_v45  ;;  %8290 = vmatprep.subr.bf16.mxu1 %v10292_v49  ;;  %v1436_v45 = vld [vmem:[#allocation8 + $0xc10] sm:$0xff]  ;;  %v10332_v53 = vcombine.high %v1181_v42, %v1185_v43  ;;  %v1217_v39 = vld [vmem:[#allocation8 + $0x538] sm:$0xff] }
 0x3e3   :  { %8032 = vmatprep.subr.bf16.mxu0 %v10546_v51  ;;  %v1440_v49 = vld [vmem:[#allocation8 + $0xc30] sm:$0xff]  ;;  %v10323_v51 = vcombine.low %v1173_v37, %v1177_v38 }
 0x3e4   :  { %v10586_v57 = vcombine.high %v1436_v45, %v1440_v49  ;;  %v10585_v1 = vcombine.low %v1436_v45, %v1440_v49  ;;  %v1225_v45 = vld [vmem:[#allocation8 + $0x578] sm:$0xff]  ;;  %v12557_v49 = vld [vmem:[#allocation10] sm:$0xff] }
 0x3e5   :  { %8291 = vmatpush1.bf16.msra.mxu1 %v10291_v60  ;;  %v1448_v60 = vld [vmem:[#allocation8 + $0xc70] sm:$0xff] }
 0x3e6   :  { %8033 = vmatpush1.bf16.msra.mxu0 %v10545_v4  ;;  %8292 = vmatprep.subr.bf16.mxu1 %v10300_v5  ;;  %v10331_v4 = vcombine.low %v1181_v42, %v1185_v43  ;;  %v1189_v5 = vld [vmem:[#allocation8 + $0x458] sm:$0xff]  ;;  %v10594_v13 = vcombine.high %v1444_v59, %v1448_v60  ;;  %v10593_v29 = vcombine.low %v1444_v59, %v1448_v60 }
 0x3e7   :  { %8034 = vmatprep.subr.bf16.mxu0 %v10554_v8  ;;  %v1193_v8 = vld [vmem:[#allocation8 + $0x478] sm:$0xff]  ;;  %v2079_v60 = vrot.slane %v12557_v49, %v12417_v17 }
 0x3e8   :  { %v1221_v43 = vld [vmem:[#allocation8 + $0x558] sm:$0xff] }
 0x3e9   :  { %8293 = vmatpush1.bf16.msra.mxu1 %v10299_v26  ;;  %v10340_v26 = vcombine.high %v1189_v5, %v1193_v8  ;;  %v10372_v59 = vcombine.high %v1221_v43, %v1225_v45 }
 0x3ea   :  { %8035 = vmatpush1.bf16.msra.mxu0 %v10553_v27  ;;  %8294 = vmatprep.subr.bf16.mxu1 %v10308_v62  ;;  %v1452_v27 = vld [vmem:[#allocation8 + $0xc90] sm:$0xff] }
 0x3eb   :  { %8036 = vmatprep.subr.bf16.mxu0 %v10562_v28  ;;  %v1456_v62 = vld [vmem:[#allocation8 + $0xcb0] sm:$0xff]  ;;  %v10339_v28 = vcombine.low %v1189_v5, %v1193_v8  ;;  %v1229_v5 = vld [vmem:[#allocation8 + $0x598] sm:$0xff] }
 0x3ec   :  { %v10602_v31 = vcombine.high %v1452_v27, %v1456_v62  ;;  %v1233_v8 = vld [vmem:[#allocation8 + $0x5b8] sm:$0xff] }
 0x3ed   :  { %8295 = vmatpush1.bf16.msra.mxu1 %v10307_v33  ;;  %v1209_v33 = vld [vmem:[#allocation8 + $0x4f8] sm:$0xff] }
 0x3ee   :  { %8037 = vmatpush1.bf16.msra.mxu0 %v10561_v34  ;;  %8296 = vmatprep.subr.bf16.mxu1 %v10316_v35  ;;  %v1464_v34 = vld [vmem:[#allocation8 + $0xcf0] sm:$0xff]  ;;  %v10347_v35 = vcombine.low %v1197_v47, %v1201_v25  ;;  %v10356_v37 = vcombine.high %v1205_v32, %v1209_v33  ;;  %v10371_v25 = vcombine.low %v1221_v43, %v1225_v45 }
 0x3ef   :  { %8038 = vmatprep.subr.bf16.mxu0 %v10570_v36  ;;  %v10601_v36 = vcombine.low %v1452_v27, %v1456_v62  ;;  %v1488_v47 = vld [vmem:[#allocation8 + $0xdb0] sm:$0xff]  ;;  %v10380_v27 = vcombine.high %v1229_v5, %v1233_v8  ;;  %v7271_v62 = vadd.f32 %v12525_v3, %v2079_v60 }
 0x3f0   :  { %v1504_v43 = vld [vmem:[#allocation8 + $0xe30] sm:$0xff] }
 0x3f1   :  { %8297 = vmatpush1.bf16.msra.mxu1 %v10315_v44  ;;  %v1468_v44 = vld [vmem:[#allocation8 + $0xd10] sm:$0xff] }
 0x3f2   :  { %8039 = vmatpush1.bf16.msra.mxu0 %v10569_v40  ;;  %8298 = vmatprep.subr.bf16.mxu1 %v10324_v22  ;;  %v1472_v40 = vld [vmem:[#allocation8 + $0xd30] sm:$0xff] }
 0x3f3   :  { %8040 = vmatprep.subr.bf16.mxu0 %v10578_v41  ;;  %v10364_v41 = vcombine.high %v1213_v18, %v1217_v39  ;;  %v10618_v42 = vcombine.high %v1468_v44, %v1472_v40 }
 0x3f5   :  { %8299 = vmatpush1.bf16.msra.mxu1 %v10323_v51  ;;  %v1476_v51 = vld [vmem:[#allocation8 + $0xd50] sm:$0xff] }
 0x3f6   :  { %8041 = vmatpush1.bf16.msra.mxu0 %v10577_v52  ;;  %8311 = vmatprep.subr.bf16.mxu1 %v10332_v53  ;;  %v1480_v52 = vld [vmem:[#allocation8 + $0xd70] sm:$0xff]  ;;  %v10363_v53 = vcombine.low %v1213_v18, %v1217_v39 }
 0x3f7   :  { %8053 = vmatprep.subr.bf16.mxu0 %v10586_v57  ;;  %v10617_v57 = vcombine.low %v1468_v44, %v1472_v40 }
 0x3f8   :  { %8301 = vmatmul.mubr.bf16.vlgmr.msra.gmra.mrb[24].mxu1 %v12435_v56  ;;  %v1460_v56 = vld [vmem:[#allocation8 + $0xcd0] sm:$0xff] }
 0x3f9   :  { %8043 = vmatmul.mubr.bf16.vlgmr.msra.gmra.mrb[20].mxu0 %v12470_v7  ;;  %8312 = vmatpush1.bf16.msra.mxu1 %v10331_v4  ;;  %v10610_v38 = vcombine.high %v1460_v56, %v1464_v34  ;;  %v10609_v22 = vcombine.low %v1460_v56, %v1464_v34  ;;  %v10626_v4 = vcombine.high %v1476_v51, %v1480_v52  ;;  %v1496_v56 = vld [vmem:[#allocation8 + $0xdf0] sm:$0xff] }
 0x3fa   :  { %8054 = vmatpush1.bf16.msra.mxu0 %v10585_v1  ;;  %8085 = vmatprep.mubr.bf16.mxu0 %v12477_v16  ;;  %v2083_v1 = vrot.slane %v12557_v49, %v12423_v20  ;;  %v7275_v34 = vadd.f32 %v12529_v48, %v2079_v60  ;;  %v1500_v48 = vld [vmem:[#allocation8 + $0xe10] sm:$0xff] }
 0x3fb   :  { %8343 = vmatprep.mubr.bf16.mxu1 %v12441_v63  ;;  %8055 = vmatprep.subr.bf16.mxu0 %v10594_v13  ;;  %v10355_v63 = vcombine.low %v1205_v32, %v1209_v33  ;;  %v1484_v13 = vld [vmem:[#allocation8 + $0xd90] sm:$0xff] }
 0x3fc   :  { %8313 = vmatprep.subr.bf16.mxu1 %v10340_v26  ;;  %v10625_v26 = vcombine.low %v1476_v51, %v1480_v52  ;;  %v1492_v33 = vld [vmem:[#allocation8 + $0xdd0] sm:$0xff]  ;;  %v10633_v3 = vcombine.low %v1484_v13, %v1488_v47 }
 0x3fd   :  { %8314 = vmatpush1.bf16.msra.mxu1 %v10339_v28  ;;  %v10634_v28 = vcombine.high %v1484_v13, %v1488_v47  ;;  %v1508_v13 = vld [vmem:[#allocation8 + $0xe50] sm:$0xff] }
 0x3fe   :  { %8056 = vmatpush1.bf16.msra.mxu0 %v10593_v29  ;;  %8315 = vmatprep.subr.bf16.mxu1 %v10348_v30  ;;  %v1237_v29 = vld [vmem:[#allocation8 + $0x5d8] sm:$0xff]  ;;  %v1512_v47 = vld [vmem:[#allocation8 + $0xe70] sm:$0xff] }
 0x3ff   :  { %8057 = vmatprep.subr.bf16.mxu0 %v10602_v31  ;;  %v1241_v30 = vld [vmem:[#allocation8 + $0x5f8] sm:$0xff]  ;;  %v7273_v31 = vadd.f32 %v12527_v10, %v2083_v1  ;;  %v10642_v10 = vcombine.high %v1492_v33, %v1496_v56 }
 0x400   :  { %v10388_v44 = vcombine.high %v1237_v29, %v1241_v30  ;;  %v10387_v51 = vcombine.low %v1237_v29, %v1241_v30  ;;  %v1265_v29 = vld [vmem:[#allocation8 + $0x6b8] sm:$0xff]  ;;  %v1516_v30 = vld [vmem:[#allocation8 + $0xe90] sm:$0xff] }
 0x401   :  { %8316 = vmatpush1.bf16.msra.mxu1 %v10347_v35  ;;  %v7277_v35 = vadd.f32 %v12531_v24, %v2083_v1 }
 0x402   :  { %8058 = vmatpush1.bf16.msra.mxu0 %v10601_v36  ;;  %8317 = vmatprep.subr.bf16.mxu1 %v10356_v37 }
 0x403   :  { %8059 = vmatprep.subr.bf16.mxu0 %v10610_v38  ;;  %v10379_v38 = vcombine.low %v1229_v5, %v1233_v8  ;;  %v1253_v5 = vld [vmem:[#allocation8 + $0x658] sm:$0xff] }
 0x404   :  { %v1257_v8 = vld [vmem:[#allocation8 + $0x678] sm:$0xff] }
 0x405   :  { %8318 = vmatpush1.bf16.msra.mxu1 %v10355_v63 }
 0x406   :  { %8060 = vmatpush1.bf16.msra.mxu0 %v10609_v22  ;;  %8319 = vmatprep.subr.bf16.mxu1 %v10364_v41  ;;  %v1245_v22 = vld [vmem:[#allocation8 + $0x618] sm:$0xff] }
 0x407   :  { %8061 = vmatprep.subr.bf16.mxu0 %v10618_v42  ;;  %v1249_v41 = vld [vmem:[#allocation8 + $0x638] sm:$0xff] }
 0x409   :  { %8320 = vmatpush1.bf16.msra.mxu1 %v10363_v53 }
 0x40a   :  { %8062 = vmatpush1.bf16.msra.mxu0 %v10617_v57  ;;  %8321 = vmatprep.subr.bf16.mxu1 %v10372_v59  ;;  %v10641_v57 = vcombine.low %v1492_v33, %v1496_v56  ;;  %v10396_v59 = vcombine.high %v1245_v22, %v1249_v41  ;;  %v10657_v33 = vcombine.low %v1508_v13, %v1512_v47 }
 0x40b   :  { %8063 = vmatprep.subr.bf16.mxu0 %v10626_v4  ;;  %v7571_v32 = vpop.f32.mrb[16].mxu0  ;;  %v10650_v4 = vcombine.high %v1500_v48, %v1504_v43 }
 0x40c   :  { %v11416_v36 = vadd.f32 %v7571_v32, %v7271_v62  ;;  %v7573_v37 = vpop.f32.mrb[17].mxu0  ;;  %v10658_v62 = vcombine.high %v1508_v13, %v1512_v47  ;;  %v10403_v32 = vcombine.low %v1253_v5, %v1257_v8  ;;  %v1548_v13 = vld [vmem:[#allocation8 + $0xf90] sm:$0xff] }
 0x40d   :  { %8322 = vmatpush1.bf16.msra.mxu1 %v10371_v25  ;;  %v11418_v18 = vadd.f32 %v7573_v37, %v7273_v31  ;;  %v7575_v39 = vpop.f32.mrb[18].mxu0  ;;  %v10395_v25 = vcombine.low %v1245_v22, %v1249_v41  ;;  %v1520_v31 = vld [vmem:[#allocation8 + $0xeb0] sm:$0xff] }
 0x40e   :  { %8064 = vmatpush1.bf16.msra.mxu0 %v10625_v26  ;;  %8323 = vmatprep.subr.bf16.mxu1 %v10380_v27  ;;  %v11420_v40 = vadd.f32 %v7575_v39, %v7275_v34  ;;  %v7577_v63 = vpop.f32.mrb[19].mxu0  ;;  %v8612_v24 = vmax.f32 %v11416_v36, 0.0  ;;  %v10649_v26 = vcombine.low %v1500_v48, %v1504_v43  ;;  %v10404_v27 = vcombine.high %v1253_v5, %v1257_v8  ;;  %v1273_v36 = vld [vmem:[#allocation8 + $0x6f8] sm:$0xff]  ;;  %v1524_v37 = vld [vmem:[#allocation8 + $0xed0] sm:$0xff] }
 0x40f   :  { %8065 = vmatprep.subr.bf16.mxu0 %v10634_v28  ;;  %v11422_v42 = vadd.f32 %v7577_v63, %v7277_v35  ;;  %v8613_v52 = vmax.f32 %v11418_v18, 0.0  ;;  %v1261_v28 = vld [vmem:[#allocation8 + $0x698] sm:$0xff]  ;;  %v10666_v34 = vcombine.high %v1516_v30, %v1520_v31  ;;  %v10665_v39 = vcombine.low %v1516_v30, %v1520_v31  ;;  %v1536_v22 = vld [vmem:[#allocation8 + $0xf30] sm:$0xff] }
 0x410   :  { %v8620_v45 = vmax.f32 %v11420_v40, 0.0  ;;  %v10412_v56 = vcombine.high %v1261_v28, %v1265_v29  ;;  %v1269_v35 = vld [vmem:[#allocation8 + $0x6d8] sm:$0xff]  ;;  %v10411_v18 = vcombine.low %v1261_v28, %v1265_v29  ;;  %v1552_v47 = vld [vmem:[#allocation8 + $0xfb0] sm:$0xff] }
 0x411   :  { %8324 = vmatpush1.bf16.msra.mxu1 %v10379_v38  ;;  %v8621_v53 = vmax.f32 %v11422_v42, 0.0  ;;  %v1528_v38 = vld [vmem:[#allocation8 + $0xef0] sm:$0xff]  ;;  %v1277_v40 = vld [vmem:[#allocation8 + $0x718] sm:$0xff]  ;;  %v10419_v41 = vcombine.low %v1269_v35, %v1273_v36 }
 0x412   :  { %8066 = vmatpush1.bf16.msra.mxu0 %v10633_v3  ;;  %8325 = vmatprep.subr.bf16.mxu1 %v10388_v44  ;;  %v12567_v60 = vpack.c.bf16 %v8620_v45, %v8612_v24  ;;  %v10420_v3 = vcombine.high %v1269_v35, %v1273_v36  ;;  %v10674_v44 = vcombine.high %v1524_v37, %v1528_v38  ;;  %v1281_v63 = vld [vmem:[#allocation8 + $0x738] sm:$0xff]  ;;  %v1556_v30 = vld [vmem:[#allocation8 + $0xfd0] sm:$0xff] }
 0x413   :  { %8067 = vmatprep.subr.bf16.mxu0 %v10642_v10  ;;  %v12569_v1 = vpack.c.bf16 %v8621_v53, %v8613_v52  ;;  %v1532_v10 = vld [vmem:[#allocation8 + $0xf10] sm:$0xff]  ;;  %v10673_v42 = vcombine.low %v1524_v37, %v1528_v38  ;;  %v10428_v48 = vcombine.high %v1277_v40, %v1281_v63  ;;  %v1285_v24 = vld [vmem:[#allocation8 + $0x758] sm:$0xff]  ;;  %v10427_v53 = vcombine.low %v1277_v40, %v1281_v63 }
 0x414   :  { %v10682_v43 = vcombine.high %v1532_v10, %v1536_v22  ;;  %v1289_v45 = vld [vmem:[#allocation8 + $0x778] sm:$0xff]  ;;  %v1544_v52 = vld [vmem:[#allocation8 + $0xf70] sm:$0xff] }
 0x415   :  { %8326 = vmatpush1.bf16.msra.mxu1 %v10387_v51  ;;  %v1540_v51 = vld [vmem:[#allocation8 + $0xf50] sm:$0xff]  ;;  %v1293_v5 = vld [vmem:[#allocation8 + $0x798] sm:$0xff] }
 0x416   :  { %8068 = vmatpush1.bf16.msra.mxu0 %v10641_v57  ;;  %8327 = vmatprep.subr.bf16.mxu1 %v10396_v59  ;;  %v10681_v57 = vcombine.low %v1532_v10, %v1536_v22  ;;  %v10436_v59 = vcombine.high %v1285_v24, %v1289_v45  ;;  %v1297_v8 = vld [vmem:[#allocation8 + $0x7b8] sm:$0xff]  ;;  %v1560_v31 = vld [vmem:[#allocation8 + $0xff0] sm:$0xff] }
 0x417   :  { %8069 = vmatprep.subr.bf16.mxu0 %v10650_v4  ;;  %v10690_v4 = vcombine.high %v1540_v51, %v1544_v52  ;;  %v1301_v28 = vld [vmem:[#allocation8 + $0x7d8] sm:$0xff]  ;;  %v1564_v37 = vld [vmem:[#allocation8 + $0x1010] sm:$0xff] }
 0x418   :  { %v1305_v29 = vld [vmem:[#allocation8 + $0x7f8] sm:$0xff]  ;;  %v1568_v38 = vld [vmem:[#allocation8 + $0x1030] sm:$0xff] }
 0x419   :  { %8328 = vmatpush1.bf16.msra.mxu1 %v10395_v25  ;;  %v10435_v25 = vcombine.low %v1285_v24, %v1289_v45  ;;  %v1309_v35 = vld [vmem:[#allocation8 + $0x818] sm:$0xff]  ;;  %v1572_v40 = vld [vmem:[#allocation8 + $0x1050] sm:$0xff] }
 0x41a   :  { %8070 = vmatpush1.bf16.msra.mxu0 %v10649_v26  ;;  %8329 = vmatprep.subr.bf16.mxu1 %v10404_v27  ;;  %v10689_v26 = vcombine.low %v1540_v51, %v1544_v52  ;;  %v10444_v27 = vcombine.high %v1293_v5, %v1297_v8  ;;  %v1313_v36 = vld [vmem:[#allocation8 + $0x838] sm:$0xff]  ;;  %v1576_v63 = vld [vmem:[#allocation8 + $0x1070] sm:$0xff] }
 0x41b   :  { %8071 = vmatprep.subr.bf16.mxu0 %v10658_v62  ;;  %v10698_v62 = vcombine.high %v1548_v13, %v1552_v47  ;;  %v10459_v10 = vcombine.low %v1309_v35, %v1313_v36  ;;  %v1317_v22 = vld [vmem:[#allocation8 + $0x858] sm:$0xff]  ;;  %v1580_v51 = vld [vmem:[#allocation8 + $0x1090] sm:$0xff] }
 0x41c   :  { %v1329_v24 = vld [vmem:[#allocation8 + $0x8b8] sm:$0xff]  ;;  %v1584_v52 = vld [vmem:[#allocation8 + $0x10b0] sm:$0xff] }
 0x41d   :  { %8330 = vmatpush1.bf16.msra.mxu1 %v10403_v32  ;;  %v10443_v32 = vcombine.low %v1293_v5, %v1297_v8  ;;  %v1333_v5 = vld [vmem:[#allocation8 + $0x8d8] sm:$0xff] }
 0x41e   :  { %8072 = vmatpush1.bf16.msra.mxu0 %v10657_v33  ;;  %8331 = vmatprep.subr.bf16.mxu1 %v10412_v56  ;;  %v10697_v33 = vcombine.low %v1548_v13, %v1552_v47  ;;  %v10452_v56 = vcombine.high %v1301_v28, %v1305_v29  ;;  %v1337_v8 = vld [vmem:[#allocation8 + $0x8f8] sm:$0xff]  ;;  %v1592_v13 = vld [vmem:[#allocation8 + $0x10f0] sm:$0xff] }
 0x41f   :  { %8073 = vmatprep.subr.bf16.mxu0 %v10666_v34  ;;  %v10706_v34 = vcombine.high %v1556_v30, %v1560_v31 }
 0x421   :  { %8332 = vmatpush1.bf16.msra.mxu1 %v10411_v18  ;;  %v10451_v18 = vcombine.low %v1301_v28, %v1305_v29  ;;  %v1345_v28 = vld [vmem:[#allocation8 + $0x938] sm:$0xff]  ;;  %v1596_v29 = vld [vmem:[#allocation8 + $0x1110] sm:$0xff] }
 0x422   :  { %8074 = vmatpush1.bf16.msra.mxu0 %v10665_v39  ;;  %8333 = vmatprep.subr.bf16.mxu1 %v10420_v3  ;;  %v10705_v39 = vcombine.low %v1556_v30, %v1560_v31  ;;  %v10460_v3 = vcombine.high %v1309_v35, %v1313_v36  ;;  %v1600_v30 = vld [vmem:[#allocation8 + $0x1130] sm:$0xff] }
 0x423   :  { %8075 = vmatprep.subr.bf16.mxu0 %v10674_v44  ;;  %v10714_v44 = vcombine.high %v1564_v37, %v1568_v38  ;;  %v1604_v35 = vld [vmem:[#allocation8 + $0x1150] sm:$0xff] }
 0x424   :  { %v1608_v36 = vld [vmem:[#allocation8 + $0x1170] sm:$0xff] }
 0x425   :  { %8334 = vmatpush1.bf16.msra.mxu1 %v10419_v41  ;;  %v1321_v41 = vld [vmem:[#allocation8 + $0x878] sm:$0xff] }
 0x426   :  { %8076 = vmatpush1.bf16.msra.mxu0 %v10673_v42  ;;  %8335 = vmatprep.subr.bf16.mxu1 %v10428_v48  ;;  %v10713_v42 = vcombine.low %v1564_v37, %v1568_v38  ;;  %v10722_v48 = vcombine.high %v1572_v40, %v1576_v63  ;;  %v10468_v45 = vcombine.high %v1317_v22, %v1321_v41 }
 0x427   :  { %8077 = vmatprep.subr.bf16.mxu0 %v10682_v43  ;;  %v1325_v43 = vld [vmem:[#allocation8 + $0x898] sm:$0xff]  ;;  %v10745_v38 = vcombine.low %v1596_v29, %v1600_v30 }
 0x428   :  { %v10475_v47 = vcombine.low %v1325_v43, %v1329_v24 }
 0x429   :  { %8336 = vmatpush1.bf16.msra.mxu1 %v10427_v53  ;;  %v10467_v53 = vcombine.low %v1317_v22, %v1321_v41  ;;  %v10753_v22 = vcombine.low %v1604_v35, %v1608_v36 }
 0x42a   :  { %8078 = vmatpush1.bf16.msra.mxu0 %v10681_v57  ;;  %8337 = vmatprep.subr.bf16.mxu1 %v10436_v59  ;;  %v10721_v57 = vcombine.low %v1572_v40, %v1576_v63  ;;  %v10476_v59 = vcombine.high %v1325_v43, %v1329_v24  ;;  %v1612_v40 = vld [vmem:[#allocation8 + $0x1190] sm:$0xff]  ;;  %v1369_v43 = vld [vmem:[#allocation8 + $0x9f8] sm:$0xff] }
 0x42b   :  { %8079 = vmatprep.subr.bf16.mxu0 %v10690_v4  ;;  %v10730_v4 = vcombine.high %v1580_v51, %v1584_v52  ;;  %v1616_v63 = vld [vmem:[#allocation8 + $0x11b0] sm:$0xff] }
 0x42c   :  { %v1620_v24 = vld [vmem:[#allocation8 + $0x11d0] sm:$0xff] }
 0x42d   :  { %8338 = vmatpush1.bf16.msra.mxu1 %v10435_v25  ;;  %v10729_v25 = vcombine.low %v1580_v51, %v1584_v52  ;;  %v10761_v52 = vcombine.low %v1612_v40, %v1616_v63 }
 0x42e   :  { %8080 = vmatpush1.bf16.msra.mxu0 %v10689_v26  ;;  %8339 = vmatprep.subr.bf16.mxu1 %v10444_v27  ;;  %v10484_v26 = vcombine.high %v1333_v5, %v1337_v8 }
 0x42f   :  { %8081 = vmatprep.subr.bf16.mxu0 %v10698_v62  ;;  %v1341_v62 = vld [vmem:[#allocation8 + $0x918] sm:$0xff] }
 0x430   :  { %v10491_v37 = vcombine.low %v1341_v62, %v1345_v28 }
 0x431   :  { %8340 = vmatpush1.bf16.msra.mxu1 %v10443_v32  ;;  %v10492_v32 = vcombine.high %v1341_v62, %v1345_v28  ;;  %v1636_v62 = vld [vmem:[#allocation8 + $0x1250] sm:$0xff] }
 0x432   :  { %8082 = vmatpush1.bf16.msra.mxu0 %v10697_v33  ;;  %8341 = vmatprep.subr.bf16.mxu1 %v10452_v56  ;;  %v10746_v33 = vcombine.high %v1596_v29, %v1600_v30  ;;  %v1349_v56 = vld [vmem:[#allocation8 + $0x958] sm:$0xff]  ;;  %v1640_v28 = vld [vmem:[#allocation8 + $0x1270] sm:$0xff] }
 0x433   :  { %8083 = vmatprep.subr.bf16.mxu0 %v10706_v34  ;;  %v1353_v34 = vld [vmem:[#allocation8 + $0x978] sm:$0xff] }
 0x435   :  { %8342 = vmatpush1.bf16.msra.mxu1 %v10451_v18  ;;  %v10500_v18 = vcombine.high %v1349_v56, %v1353_v34 }
 0x436   :  { %8084 = vmatpush1.bf16.msra.mxu0 %v10705_v39  ;;  %8354 = vmatprep.subr.bf16.mxu1 %v10460_v3  ;;  %v10754_v39 = vcombine.high %v1604_v35, %v1608_v36  ;;  %v1357_v3 = vld [vmem:[#allocation8 + $0x998] sm:$0xff]  ;;  %v10785_v36 = vcombine.low %v1636_v62, %v1640_v28 }
 0x437   :  { %8096 = vmatprep.subr.bf16.mxu0 %v10714_v44  ;;  %v1361_v44 = vld [vmem:[#allocation8 + $0x9b8] sm:$0xff] }
 0x438   :  { %8344 = vmatmul.mubr.bf16.vlgmr.msra.gmra.mrb[24].mxu1 %v12437_v61  ;;  %v1588_v61 = vld [vmem:[#allocation8 + $0x10d0] sm:$0xff]  ;;  %v10508_v41 = vcombine.high %v1357_v3, %v1361_v44  ;;  %v10507_v51 = vcombine.low %v1357_v3, %v1361_v44 }
 0x439   :  { %8086 = vmatmul.mubr.bf16.vlgmr.msra.gmra.mrb[20].mxu0 %v12474_v15  ;;  %8355 = vmatpush1.bf16.msra.mxu1 %v10459_v10  ;;  %v10738_v27 = vcombine.high %v1588_v61, %v1592_v13  ;;  %v10737_v31 = vcombine.low %v1588_v61, %v1592_v13  ;;  %v10499_v10 = vcombine.low %v1349_v56, %v1353_v34  ;;  %v1644_v56 = vld [vmem:[#allocation8 + $0x1290] sm:$0xff] }
 0x43a   :  { %8097 = vmatpush1.bf16.msra.mxu0 %v10713_v42  ;;  %8128 = vmatprep.mubr.bf16.mxu0 %v12503_v54  ;;  %v10762_v42 = vcombine.high %v1612_v40, %v1616_v63  ;;  %v1648_v34 = vld [vmem:[#allocation8 + $0x12b0] sm:$0xff] }
 0x43b   :  { %8386 = vmatprep.mubr.bf16.mxu1 %v12472_v12  ;;  %8098 = vmatprep.subr.bf16.mxu0 %v10722_v48  ;;  %v10483_v12 = vcombine.low %v1333_v5, %v1337_v8  ;;  %v1365_v48 = vld [vmem:[#allocation8 + $0x9d8] sm:$0xff]  ;;  %v1628_v5 = vld [vmem:[#allocation8 + $0x1210] sm:$0xff]  ;;  %v10793_v63 = vcombine.low %v1644_v56, %v1648_v34 }
 0x43c   :  { %8356 = vmatprep.subr.bf16.mxu1 %v10468_v45  ;;  %v1624_v45 = vld [vmem:[#allocation8 + $0x11f0] sm:$0xff]  ;;  %v10515_v61 = vcombine.low %v1365_v48, %v1369_v43 }
 0x43d   :  { %8357 = vmatpush1.bf16.msra.mxu1 %v10467_v53  ;;  %v10516_v53 = vcombine.high %v1365_v48, %v1369_v43  ;;  %v1632_v8 = vld [vmem:[#allocation8 + $0x1230] sm:$0xff]  ;;  %v10769_v13 = vcombine.low %v1620_v24, %v1624_v45 }
 0x43e   :  { %8099 = vmatpush1.bf16.msra.mxu0 %v10721_v57  ;;  %8358 = vmatprep.subr.bf16.mxu1 %v10476_v59  ;;  %v10770_v57 = vcombine.high %v1620_v24, %v1624_v45  ;;  %v1373_v59 = vld [vmem:[#allocation8 + $0xa18] sm:$0xff]  ;;  %v10777_v30 = vcombine.low %v1628_v5, %v1632_v8  ;;  %v1652_v3 = vld [vmem:[#allocation8 + $0x12d0] sm:$0xff] }
 0x43f   :  { %8100 = vmatprep.subr.bf16.mxu0 %v10730_v4  ;;  %v1377_v4 = vld [vmem:[#allocation8 + $0xa38] sm:$0xff]  ;;  %v1656_v44 = vld [vmem:[#allocation8 + $0x12f0] sm:$0xff] }
 0x440   :  { %v10523_v29 = vcombine.low %v1373_v59, %v1377_v4  ;;  %v1660_v48 = vld [vmem:[#allocation8 + $0x1310] sm:$0xff]  ;;  %v10801_v45 = vcombine.low %v1652_v3, %v1656_v44 }
 0x441   :  { %8359 = vmatpush1.bf16.msra.mxu1 %v10475_v47  ;;  %v10524_v47 = vcombine.high %v1373_v59, %v1377_v4  ;;  %v1664_v43 = vld [vmem:[#allocation8 + $0x1330] sm:$0xff] }
 0x442   :  { %8101 = vmatpush1.bf16.msra.mxu0 %v10729_v25  ;;  %8360 = vmatprep.subr.bf16.mxu1 %v10484_v26  ;;  %v10778_v25 = vcombine.high %v1628_v5, %v1632_v8  ;;  %v1381_v26 = vld [vmem:[#allocation8 + $0xa58] sm:$0xff]  ;;  %v1668_v59 = vld [vmem:[#allocation8 + $0x1350] sm:$0xff]  ;;  %v10809_v8 = vcombine.low %v1660_v48, %v1664_v43 }
 0x443   :  { %8102 = vmatprep.subr.bf16.mxu0 %v10738_v27  ;;  %v1385_v27 = vld [vmem:[#allocation8 + $0xa78] sm:$0xff]  ;;  %v1672_v4 = vld [vmem:[#allocation8 + $0x1370] sm:$0xff] }
 0x444   :  { %v10531_v35 = vcombine.low %v1381_v26, %v1385_v27 }
 0x445   :  { %8361 = vmatpush1.bf16.msra.mxu1 %v10483_v12  ;;  %v10532_v12 = vcombine.high %v1381_v26, %v1385_v27  ;;  %v1676_v26 = vld [vmem:[#allocation8 + $0x1390] sm:$0xff] }
 0x446   :  { %8103 = vmatpush1.bf16.msra.mxu0 %v10737_v31  ;;  %8362 = vmatprep.subr.bf16.mxu1 %v10492_v32  ;;  %v10786_v31 = vcombine.high %v1636_v62, %v1640_v28  ;;  %v1389_v32 = vld [vmem:[#allocation8 + $0xa98] sm:$0xff]  ;;  %v1680_v27 = vld [vmem:[#allocation8 + $0x13b0] sm:$0xff]  ;;  %v10817_v28 = vcombine.low %v1668_v59, %v1672_v4 }
 0x447   :  { %8104 = vmatprep.subr.bf16.mxu0 %v10746_v33  ;;  %v1393_v33 = vld [vmem:[#allocation8 + $0xab8] sm:$0xff] }
 0x448   :  { %v10539_v40 = vcombine.low %v1389_v32, %v1393_v33 }
 0x449   :  { %8363 = vmatpush1.bf16.msra.mxu1 %v10491_v37  ;;  %v10540_v37 = vcombine.high %v1389_v32, %v1393_v33  ;;  %v1684_v32 = vld [vmem:[#allocation8 + $0x13d0] sm:$0xff] }
 0x44a   :  { %8105 = vmatpush1.bf16.msra.mxu0 %v10745_v38  ;;  %8364 = vmatprep.subr.bf16.mxu1 %v10500_v18  ;;  %v10794_v38 = vcombine.high %v1644_v56, %v1648_v34  ;;  %v1397_v18 = vld [vmem:[#allocation8 + $0xad8] sm:$0xff]  ;;  %v1688_v33 = vld [vmem:[#allocation8 + $0x13f0] sm:$0xff]  ;;  %v10825_v34 = vcombine.low %v1676_v26, %v1680_v27 }
 0x44b   :  { %8106 = vmatprep.subr.bf16.mxu0 %v10754_v39  ;;  %v1401_v39 = vld [vmem:[#allocation8 + $0xaf8] sm:$0xff] }
 0x44c   :  { %v10547_v24 = vcombine.low %v1397_v18, %v1401_v39 }
 0x44d   :  { %8365 = vmatpush1.bf16.msra.mxu1 %v10499_v10  ;;  %v10548_v10 = vcombine.high %v1397_v18, %v1401_v39  ;;  %v1692_v18 = vld [vmem:[#allocation8 + $0x1410] sm:$0xff] }
 0x44e   :  { %8107 = vmatpush1.bf16.msra.mxu0 %v10753_v22  ;;  %8366 = vmatprep.subr.bf16.mxu1 %v10508_v41  ;;  %v10802_v22 = vcombine.high %v1652_v3, %v1656_v44  ;;  %v1405_v41 = vld [vmem:[#allocation8 + $0xb18] sm:$0xff]  ;;  %v1696_v39 = vld [vmem:[#allocation8 + $0x1430] sm:$0xff]  ;;  %v10833_v44 = vcombine.low %v1684_v32, %v1688_v33 }
 0x44f   :  { %8108 = vmatprep.subr.bf16.mxu0 %v10762_v42  ;;  %v1409_v42 = vld [vmem:[#allocation8 + $0xb38] sm:$0xff] }
 0x450   :  { %v10555_v5 = vcombine.low %v1405_v41, %v1409_v42 }
 0x451   :  { %8367 = vmatpush1.bf16.msra.mxu1 %v10507_v51  ;;  %v10556_v51 = vcombine.high %v1405_v41, %v1409_v42  ;;  %v1445_v42 = vld [vmem:[#allocation8 + $0xc58] sm:$0xff] }
 0x452   :  { %8109 = vmatpush1.bf16.msra.mxu0 %v10761_v52  ;;  %8368 = vmatprep.subr.bf16.mxu1 %v10516_v53  ;;  %v10810_v52 = vcombine.high %v1660_v48, %v1664_v43  ;;  %v1413_v53 = vld [vmem:[#allocation8 + $0xb58] sm:$0xff]  ;;  %v10841_v43 = vcombine.low %v1692_v18, %v1696_v39 }
 0x453   :  { %8110 = vmatprep.subr.bf16.mxu0 %v10770_v57  ;;  %v1417_v57 = vld [vmem:[#allocation8 + $0xb78] sm:$0xff] }
 0x454   :  { %v10563_v62 = vcombine.low %v1413_v53, %v1417_v57  ;;  %v1449_v48 = vld [vmem:[#allocation8 + $0xc78] sm:$0xff] }
 0x455   :  { %8369 = vmatpush1.bf16.msra.mxu1 %v10515_v61  ;;  %v10564_v61 = vcombine.high %v1413_v53, %v1417_v57  ;;  %v1708_v53 = vld [vmem:[#allocation8 + $0x1490] sm:$0xff] }
 0x456   :  { %8111 = vmatpush1.bf16.msra.mxu0 %v10769_v13  ;;  %8370 = vmatprep.subr.bf16.mxu1 %v10524_v47  ;;  %v10818_v13 = vcombine.high %v1668_v59, %v1672_v4  ;;  %v1421_v47 = vld [vmem:[#allocation8 + $0xb98] sm:$0xff]  ;;  %v1712_v57 = vld [vmem:[#allocation8 + $0x14b0] sm:$0xff]  ;;  %v10595_v59 = vcombine.low %v1445_v42, %v1449_v48 }
 0x457   :  { %8112 = vmatprep.subr.bf16.mxu0 %v10778_v25  ;;  %v1425_v25 = vld [vmem:[#allocation8 + $0xbb8] sm:$0xff] }
 0x458   :  { %v10571_v56 = vcombine.low %v1421_v47, %v1425_v25 }
 0x459   :  { %8371 = vmatpush1.bf16.msra.mxu1 %v10523_v29  ;;  %v10572_v29 = vcombine.high %v1421_v47, %v1425_v25  ;;  %v1720_v47 = vld [vmem:[#allocation8 + $0x14f0] sm:$0xff] }
 0x45a   :  { %8113 = vmatpush1.bf16.msra.mxu0 %v10777_v30  ;;  %8372 = vmatprep.subr.bf16.mxu1 %v10532_v12  ;;  %v10826_v30 = vcombine.high %v1676_v26, %v1680_v27  ;;  %v1429_v12 = vld [vmem:[#allocation8 + $0xbd8] sm:$0xff]  ;;  %v10857_v26 = vcombine.low %v1708_v53, %v1712_v57 }
 0x45b   :  { %8114 = vmatprep.subr.bf16.mxu0 %v10786_v31  ;;  %v1433_v31 = vld [vmem:[#allocation8 + $0xbf8] sm:$0xff] }
 0x45c   :  { %v10579_v3 = vcombine.low %v1429_v12, %v1433_v31 }
 0x45d   :  { %8373 = vmatpush1.bf16.msra.mxu1 %v10531_v35  ;;  %v10580_v35 = vcombine.high %v1429_v12, %v1433_v31  ;;  %v1728_v12 = vld [vmem:[#allocation8 + $0x1530] sm:$0xff] }
 0x45e   :  { %8115 = vmatpush1.bf16.msra.mxu0 %v10785_v36  ;;  %8374 = vmatprep.subr.bf16.mxu1 %v10540_v37  ;;  %v10834_v36 = vcombine.high %v1684_v32, %v1688_v33  ;;  %v1437_v37 = vld [vmem:[#allocation8 + $0xc18] sm:$0xff] }
 0x45f   :  { %8116 = vmatprep.subr.bf16.mxu0 %v10794_v38  ;;  %v1441_v38 = vld [vmem:[#allocation8 + $0xc38] sm:$0xff] }
 0x460   :  { %v10587_v41 = vcombine.low %v1437_v37, %v1441_v38 }
 0x461   :  { %8375 = vmatpush1.bf16.msra.mxu1 %v10539_v40  ;;  %v10588_v40 = vcombine.high %v1437_v37, %v1441_v38 }
 0x462   :  { %8117 = vmatpush1.bf16.msra.mxu0 %v10793_v63  ;;  %8376 = vmatprep.subr.bf16.mxu1 %v10548_v10  ;;  %v10842_v63 = vcombine.high %v1692_v18, %v1696_v39  ;;  %v1700_v10 = vld [vmem:[#allocation8 + $0x1450] sm:$0xff] }
 0x463   :  { %8118 = vmatprep.subr.bf16.mxu0 %v10802_v22  ;;  %v1704_v22 = vld [vmem:[#allocation8 + $0x1470] sm:$0xff] }
 0x464   :  { %v10849_v4 = vcombine.low %v1700_v10, %v1704_v22 }
 0x465   :  { %8377 = vmatpush1.bf16.msra.mxu1 %v10547_v24  ;;  %v10850_v24 = vcombine.high %v1700_v10, %v1704_v22  ;;  %v1744_v10 = vld [vmem:[#allocation8 + $0x15b0] sm:$0xff]  ;;  %v2091_v22 = vrot.slane %v12557_v49, %v12425_v21 }
 0x466   :  { %8119 = vmatpush1.bf16.msra.mxu0 %v10801_v45  ;;  %8378 = vmatprep.subr.bf16.mxu1 %v10556_v51  ;;  %v1453_v45 = vld [vmem:[#allocation8 + $0xc98] sm:$0xff] }
 0x467   :  { %8120 = vmatprep.subr.bf16.mxu0 %v10810_v52  ;;  %v1457_v51 = vld [vmem:[#allocation8 + $0xcb8] sm:$0xff]  ;;  %v10596_v52 = vcombine.high %v1445_v42, %v1449_v48 }
 0x468   :  { %v10603_v25 = vcombine.low %v1453_v45, %v1457_v51 }
 0x469   :  { %8379 = vmatpush1.bf16.msra.mxu1 %v10555_v5  ;;  %v10604_v5 = vcombine.high %v1453_v45, %v1457_v51  ;;  %v1493_v45 = vld [vmem:[#allocation8 + $0xdd8] sm:$0xff] }
 0x46a   :  { %8121 = vmatpush1.bf16.msra.mxu0 %v10809_v8  ;;  %8380 = vmatprep.subr.bf16.mxu1 %v10564_v61  ;;  %v10858_v8 = vcombine.high %v1708_v53, %v1712_v57  ;;  %v1461_v61 = vld [vmem:[#allocation8 + $0xcd8] sm:$0xff]  ;;  %v1748_v57 = vld [vmem:[#allocation8 + $0x15d0] sm:$0xff] }
 0x46b   :  { %8122 = vmatprep.subr.bf16.mxu0 %v10818_v13  ;;  %v1465_v13 = vld [vmem:[#allocation8 + $0xcf8] sm:$0xff] }
 0x46c   :  { %v10612_v27 = vcombine.high %v1461_v61, %v1465_v13  ;;  %v1497_v51 = vld [vmem:[#allocation8 + $0xdf8] sm:$0xff] }
 0x46d   :  { %8381 = vmatpush1.bf16.msra.mxu1 %v10563_v62 }
 0x46e   :  { %8123 = vmatpush1.bf16.msra.mxu0 %v10817_v28  ;;  %8382 = vmatprep.subr.bf16.mxu1 %v10572_v29  ;;  %v1469_v28 = vld [vmem:[#allocation8 + $0xd18] sm:$0xff] }
 0x46f   :  { %8124 = vmatprep.subr.bf16.mxu0 %v10826_v30  ;;  %v1473_v29 = vld [vmem:[#allocation8 + $0xd38] sm:$0xff]  ;;  %v1724_v30 = vld [vmem:[#allocation8 + $0x1510] sm:$0xff] }
 0x470   :  { %v10620_v32 = vcombine.high %v1469_v28, %v1473_v29  ;;  %v10874_v33 = vcombine.high %v1724_v30, %v1728_v12  ;;  %v10619_v37 = vcombine.low %v1469_v28, %v1473_v29  ;;  %v10873_v38 = vcombine.low %v1724_v30, %v1728_v12  ;;  %v1760_v28 = vld [vmem:[#allocation8 + $0x1630] sm:$0xff] }
 0x471   :  { %8383 = vmatpush1.bf16.msra.mxu1 %v10571_v56  ;;  %v1477_v56 = vld [vmem:[#allocation8 + $0xd58] sm:$0xff]  ;;  %v10643_v12 = vcombine.low %v1493_v45, %v1497_v51 }
 0x472   :  { %8125 = vmatpush1.bf16.msra.mxu0 %v10825_v34  ;;  %8384 = vmatprep.subr.bf16.mxu1 %v10580_v35  ;;  %v1481_v34 = vld [vmem:[#allocation8 + $0xd78] sm:$0xff]  ;;  %v1732_v35 = vld [vmem:[#allocation8 + $0x1550] sm:$0xff] }
 0x473   :  { %8126 = vmatprep.subr.bf16.mxu0 %v10834_v36  ;;  %v1736_v36 = vld [vmem:[#allocation8 + $0x1570] sm:$0xff]  ;;  %v10628_v18 = vcombine.high %v1477_v56, %v1481_v34 }
 0x474   :  { %v10882_v39 = vcombine.high %v1732_v35, %v1736_v36  ;;  %v10881_v42 = vcombine.low %v1732_v35, %v1736_v36  ;;  %v1513_v35 = vld [vmem:[#allocation8 + $0xe78] sm:$0xff]  ;;  %v1764_v36 = vld [vmem:[#allocation8 + $0x1650] sm:$0xff] }
 0x475   :  { %8385 = vmatpush1.bf16.msra.mxu1 %v10579_v3  ;;  %v1485_v3 = vld [vmem:[#allocation8 + $0xd98] sm:$0xff] }
 0x476   :  { %8127 = vmatpush1.bf16.msra.mxu0 %v10833_v44  ;;  %8397 = vmatprep.subr.bf16.mxu1 %v10588_v40  ;;  %v1489_v44 = vld [vmem:[#allocation8 + $0xdb8] sm:$0xff]  ;;  %v2087_v40 = vrot.slane %v12557_v49, %v12421_v19  ;;  %v1752_v19 = vld [vmem:[#allocation8 + $0x15f0] sm:$0xff] }
 0x477   :  { %8139 = vmatprep.subr.bf16.mxu0 %v10842_v63  ;;  %v1740_v63 = vld [vmem:[#allocation8 + $0x1590] sm:$0xff]  ;;  %v10636_v48 = vcombine.high %v1485_v3, %v1489_v44 }
 0x478   :  { %8387 = vmatmul.mubr.bf16.vlgmr.msra.gmra.mrb[24].mxu1 %v12470_v7  ;;  %v1716_v7 = vld [vmem:[#allocation8 + $0x14d0] sm:$0xff]  ;;  %v10889_v49 = vcombine.low %v1740_v63, %v1744_v10 }
 0x479   :  { %8129 = vmatmul.mubr.bf16.vlgmr.msra.gmra.mrb[20].mxu0 %v12501_v55  ;;  %8398 = vmatpush1.bf16.msra.mxu1 %v10587_v41  ;;  %v10866_v62 = vcombine.high %v1716_v7, %v1720_v47  ;;  %v10865_v31 = vcombine.low %v1716_v7, %v1720_v47  ;;  %v10627_v41 = vcombine.low %v1477_v56, %v1481_v34  ;;  %v1501_v47 = vld [vmem:[#allocation8 + $0xe18] sm:$0xff] }
 0x47a   :  { %8140 = vmatpush1.bf16.msra.mxu0 %v10841_v43  ;;  %8171 = vmatprep.mubr.bf16.mxu0 %v12487_v46  ;;  %v10898_v7 = vcombine.high %v1748_v57, %v1752_v19  ;;  %v1509_v34 = vld [vmem:[#allocation8 + $0xe58] sm:$0xff] }
 0x47b   :  { %8429 = vmatprep.mubr.bf16.mxu1 %v12477_v16  ;;  %8141 = vmatprep.subr.bf16.mxu0 %v10850_v24  ;;  %v10611_v16 = vcombine.low %v1461_v61, %v1465_v13  ;;  %v10890_v24 = vcombine.high %v1740_v63, %v1744_v10  ;;  %v10644_v61 = vcombine.high %v1493_v45, %v1497_v51  ;;  %v1772_v63 = vld [vmem:[#allocation8 + $0x1690] sm:$0xff] }
 0x47c   :  { %8399 = vmatprep.subr.bf16.mxu1 %v10596_v52  ;;  %v1776_v10 = vld [vmem:[#allocation8 + $0x16b0] sm:$0xff] }
 0x47d   :  { %8400 = vmatpush1.bf16.msra.mxu1 %v10595_v59  ;;  %v1780_v45 = vld [vmem:[#allocation8 + $0x16d0] sm:$0xff] }
 0x47e   :  { %8142 = vmatpush1.bf16.msra.mxu0 %v10849_v4  ;;  %8401 = vmatprep.subr.bf16.mxu1 %v10604_v5  ;;  %v10635_v5 = vcombine.low %v1485_v3, %v1489_v44  ;;  %v1517_v44 = vld [vmem:[#allocation8 + $0xe98] sm:$0xff]  ;;  %v1784_v51 = vld [vmem:[#allocation8 + $0x16f0] sm:$0xff] }
 0x47f   :  { %8143 = vmatprep.subr.bf16.mxu0 %v10858_v8 }
 0x481   :  { %8402 = vmatpush1.bf16.msra.mxu1 %v10603_v25  ;;  %v1505_v25 = vld [vmem:[#allocation8 + $0xe38] sm:$0xff] }
 0x482   :  { %8144 = vmatpush1.bf16.msra.mxu0 %v10857_v26  ;;  %8403 = vmatprep.subr.bf16.mxu1 %v10612_v27 }
 0x483   :  { %8145 = vmatprep.subr.bf16.mxu0 %v10866_v62  ;;  %v1756_v62 = vld [vmem:[#allocation8 + $0x1610] sm:$0xff] }
 0x484   :  { %v10906_v56 = vcombine.high %v1756_v62, %v1760_v28 }
 0x485   :  { %8404 = vmatpush1.bf16.msra.mxu1 %v10611_v16 }
 0x486   :  { %8146 = vmatpush1.bf16.msra.mxu0 %v10865_v31  ;;  %8405 = vmatprep.subr.bf16.mxu1 %v10620_v32  ;;  %v10897_v31 = vcombine.low %v1748_v57, %v1752_v19  ;;  %v10652_v32 = vcombine.high %v1501_v47, %v1505_v25  ;;  %v10930_v19 = vcombine.high %v1780_v45, %v1784_v51 }
 0x487   :  { %8147 = vmatprep.subr.bf16.mxu0 %v10874_v33 }
 0x489   :  { %8406 = vmatpush1.bf16.msra.mxu1 %v10619_v37  ;;  %v1768_v37 = vld [vmem:[#allocation8 + $0x1670] sm:$0xff] }
 0x48a   :  { %8148 = vmatpush1.bf16.msra.mxu0 %v10873_v38  ;;  %8407 = vmatprep.subr.bf16.mxu1 %v10628_v18  ;;  %v10651_v38 = vcombine.low %v1501_v47, %v1505_v25  ;;  %v10905_v18 = vcombine.low %v1756_v62, %v1760_v28  ;;  %v10914_v3 = vcombine.high %v1764_v36, %v1768_v37  ;;  %v1545_v47 = vld [vmem:[#allocation8 + $0xf78] sm:$0xff]  ;;  %v1796_v25 = vld [vmem:[#allocation8 + $0x1750] sm:$0xff] }
 0x48b   :  { %v7915_v43 = vpop.f32.mrb[20].mxu1  ;;  %8149 = vmatprep.subr.bf16.mxu0 %v10882_v39  ;;  %v10660_v39 = vcombine.high %v1509_v34, %v1513_v35 }
 0x48c   :  { %v11423_v52 = vadd.f32 %v7915_v43, %v2087_v40  ;;  %v7917_v53 = vpop.f32.mrb[21].mxu1  ;;  %v1525_v43 = vld [vmem:[#allocation8 + $0xed8] sm:$0xff] }
 0x48d   :  { %v11424_v59 = vadd.f32 %v7917_v53, %v2091_v22  ;;  %v7919_v4 = vpop.f32.mrb[22].mxu1  ;;  %8408 = vmatpush1.bf16.msra.mxu1 %v10627_v41  ;;  %v10913_v41 = vcombine.low %v1764_v36, %v1768_v37  ;;  %v10921_v53 = vcombine.low %v1772_v63, %v1776_v10  ;;  %v1557_v37 = vld [vmem:[#allocation8 + $0xfd8] sm:$0xff] }
 0x48e   :  { %v11425_v8 = vadd.f32 %v7919_v4, %v2087_v40  ;;  %8150 = vmatpush1.bf16.msra.mxu0 %v10881_v42  ;;  %v7921_v21 = vpop.f32.mrb[23].mxu1  ;;  %8409 = vmatprep.subr.bf16.mxu1 %v10636_v48  ;;  %v8614_v26 = vmax.f32 %v11423_v52, 0.0  ;;  %v1521_v40 = vld [vmem:[#allocation8 + $0xeb8] sm:$0xff]  ;;  %v10922_v48 = vcombine.high %v1772_v63, %v1776_v10 }
 0x48f   :  { %v11426_v13 = vadd.f32 %v7921_v21, %v2091_v22  ;;  %8151 = vmatprep.subr.bf16.mxu0 %v10890_v24  ;;  %v8615_v29 = vmax.f32 %v11424_v59, 0.0  ;;  %v10659_v22 = vcombine.low %v1509_v34, %v1513_v35  ;;  %v10668_v42 = vcombine.high %v1517_v44, %v1521_v40  ;;  %v1529_v24 = vld [vmem:[#allocation8 + $0xef8] sm:$0xff] }
 0x490   :  { %v8622_v27 = vmax.f32 %v11425_v8, 0.0  ;;  %v10667_v52 = vcombine.low %v1517_v44, %v1521_v40  ;;  %v10676_v57 = vcombine.high %v1525_v43, %v1529_v24  ;;  %v1533_v59 = vld [vmem:[#allocation8 + $0xf18] sm:$0xff]  ;;  %v1792_v8 = vld [vmem:[#allocation8 + $0x1730] sm:$0xff]  ;;  %v10675_v21 = vcombine.low %v1525_v43, %v1529_v24 }
 0x491   :  { %v8623_v30 = vmax.f32 %v11426_v13, 0.0  ;;  %8410 = vmatpush1.bf16.msra.mxu1 %v10635_v5  ;;  %v1537_v4 = vld [vmem:[#allocation8 + $0xf38] sm:$0xff]  ;;  %v1788_v5 = vld [vmem:[#allocation8 + $0x1710] sm:$0xff] }
 0x492   :  { %v12583_v16 = vpack.c.bf16 %v8622_v27, %v8614_v26  ;;  %8152 = vmatpush1.bf16.msra.mxu0 %v10889_v49  ;;  %8411 = vmatprep.subr.bf16.mxu1 %v10644_v61  ;;  %v10929_v49 = vcombine.low %v1780_v45, %v1784_v51  ;;  %v10684_v61 = vcombine.high %v1533_v59, %v1537_v4  ;;  %v1800_v26 = vld [vmem:[#allocation8 + $0x1770] sm:$0xff]  ;;  %v1565_v10 = vld [vmem:[#allocation8 + $0x1018] sm:$0xff] }
 0x493   :  { %v12585_v33 = vpack.c.bf16 %v8623_v30, %v8615_v29  ;;  %8153 = vmatprep.subr.bf16.mxu0 %v10898_v7  ;;  %v10938_v13 = vcombine.high %v1788_v5, %v1792_v8  ;;  %v1541_v7 = vld [vmem:[#allocation8 + $0xf58] sm:$0xff]  ;;  %v10683_v27 = vcombine.low %v1533_v59, %v1537_v4  ;;  %v10937_v62 = vcombine.low %v1788_v5, %v1792_v8  ;;  %v1828_v51 = vld [vmem:[#allocation8 + $0x1850] sm:$0xff] }
 0x494   :  { %v10692_v28 = vcombine.high %v1541_v7, %v1545_v47  ;;  %v10946_v29 = vcombine.high %v1796_v25, %v1800_v26  ;;  %v1549_v30 = vld [vmem:[#allocation8 + $0xf98] sm:$0xff]  ;;  %v10945_v34 = vcombine.low %v1796_v25, %v1800_v26 }
 0x495   :  { %8412 = vmatpush1.bf16.msra.mxu1 %v10643_v12  ;;  %v1553_v12 = vld [vmem:[#allocation8 + $0xfb8] sm:$0xff] }
 0x496   :  { %8154 = vmatpush1.bf16.msra.mxu0 %v10897_v31  ;;  %8413 = vmatprep.subr.bf16.mxu1 %v10652_v32  ;;  %v1804_v31 = vld [vmem:[#allocation8 + $0x1790] sm:$0xff]  ;;  %v10700_v35 = vcombine.high %v1549_v30, %v1553_v12  ;;  %v1581_v5 = vld [vmem:[#allocation8 + $0x1098] sm:$0xff] }
 0x497   :  { %8155 = vmatprep.subr.bf16.mxu0 %v10906_v56  ;;  %v1808_v32 = vld [vmem:[#allocation8 + $0x17b0] sm:$0xff]  ;;  %v10691_v56 = vcombine.low %v1541_v7, %v1545_v47  ;;  %v1585_v8 = vld [vmem:[#allocation8 + $0x10b8] sm:$0xff] }
 0x498   :  { %v10954_v36 = vcombine.high %v1804_v31, %v1808_v32  ;;  %v10953_v44 = vcombine.low %v1804_v31, %v1808_v32  ;;  %v10732_v47 = vcombine.high %v1581_v5, %v1585_v8  ;;  %v1589_v26 = vld [vmem:[#allocation8 + $0x10d8] sm:$0xff] }
 0x499   :  { %8414 = vmatpush1.bf16.msra.mxu1 %v10651_v38  ;;  %v1561_v38 = vld [vmem:[#allocation8 + $0xff8] sm:$0xff] }
 0x49a   :  { %8156 = vmatpush1.bf16.msra.mxu0 %v10905_v18  ;;  %8415 = vmatprep.subr.bf16.mxu1 %v10660_v39  ;;  %v1812_v18 = vld [vmem:[#allocation8 + $0x17d0] sm:$0xff]  ;;  %v10708_v40 = vcombine.high %v1557_v37, %v1561_v38  ;;  %v1597_v31 = vld [vmem:[#allocation8 + $0x1118] sm:$0xff] }
 0x49b   :  { %8157 = vmatprep.subr.bf16.mxu0 %v10914_v3  ;;  %v1816_v39 = vld [vmem:[#allocation8 + $0x17f0] sm:$0xff]  ;;  %v10699_v3 = vcombine.low %v1549_v30, %v1553_v12  ;;  %v1601_v32 = vld [vmem:[#allocation8 + $0x1138] sm:$0xff] }
 0x49c   :  { %v10962_v63 = vcombine.high %v1812_v18, %v1816_v39  ;;  %v10961_v43 = vcombine.low %v1812_v18, %v1816_v39  ;;  %v1609_v18 = vld [vmem:[#allocation8 + $0x1178] sm:$0xff]  ;;  %v1860_v39 = vld [vmem:[#allocation8 + $0x1950] sm:$0xff] }
 0x49d   :  { %8416 = vmatpush1.bf16.msra.mxu1 %v10659_v22  ;;  %v1569_v22 = vld [vmem:[#allocation8 + $0x1038] sm:$0xff] }
 0x49e   :  { %8158 = vmatpush1.bf16.msra.mxu0 %v10913_v41  ;;  %8417 = vmatprep.subr.bf16.mxu1 %v10668_v42  ;;  %v1820_v41 = vld [vmem:[#allocation8 + $0x1810] sm:$0xff]  ;;  %v10716_v24 = vcombine.high %v1565_v10, %v1569_v22 }
 0x49f   :  { %8159 = vmatprep.subr.bf16.mxu0 %v10922_v48  ;;  %v1824_v42 = vld [vmem:[#allocation8 + $0x1830] sm:$0xff]  ;;  %v10707_v48 = vcombine.low %v1557_v37, %v1561_v38  ;;  %v1605_v38 = vld [vmem:[#allocation8 + $0x1158] sm:$0xff] }
 0x4a0   :  { %v10970_v45 = vcombine.high %v1820_v41, %v1824_v42  ;;  %v10969_v59 = vcombine.low %v1820_v41, %v1824_v42  ;;  %v1617_v41 = vld [vmem:[#allocation8 + $0x11b8] sm:$0xff]  ;;  %v1868_v42 = vld [vmem:[#allocation8 + $0x1990] sm:$0xff] }
 0x4a1   :  { %8418 = vmatpush1.bf16.msra.mxu1 %v10667_v52  ;;  %v1832_v52 = vld [vmem:[#allocation8 + $0x1870] sm:$0xff] }
 0x4a2   :  { %8160 = vmatpush1.bf16.msra.mxu0 %v10921_v53  ;;  %8419 = vmatprep.subr.bf16.mxu1 %v10676_v57  ;;  %v10715_v53 = vcombine.low %v1565_v10, %v1569_v22  ;;  %v1573_v57 = vld [vmem:[#allocation8 + $0x1058] sm:$0xff]  ;;  %v10978_v4 = vcombine.high %v1828_v51, %v1832_v52  ;;  %v10977_v7 = vcombine.low %v1828_v51, %v1832_v52 }
 0x4a3   :  { %8161 = vmatprep.subr.bf16.mxu0 %v10930_v19  ;;  %v1577_v19 = vld [vmem:[#allocation8 + $0x1078] sm:$0xff] }
 0x4a4   :  { %v1613_v22 = vld [vmem:[#allocation8 + $0x1198] sm:$0xff] }
 0x4a5   :  { %8420 = vmatpush1.bf16.msra.mxu1 %v10675_v21  ;;  %v10724_v21 = vcombine.high %v1573_v57, %v1577_v19  ;;  %v1621_v52 = vld [vmem:[#allocation8 + $0x11d8] sm:$0xff] }
 0x4a6   :  { %8162 = vmatpush1.bf16.msra.mxu0 %v10929_v49  ;;  %8421 = vmatprep.subr.bf16.mxu1 %v10684_v61  ;;  %v1836_v49 = vld [vmem:[#allocation8 + $0x1890] sm:$0xff] }
 0x4a7   :  { %8163 = vmatprep.subr.bf16.mxu0 %v10938_v13  ;;  %v1840_v61 = vld [vmem:[#allocation8 + $0x18b0] sm:$0xff]  ;;  %v10723_v13 = vcombine.low %v1573_v57, %v1577_v19 }
 0x4a8   :  { %v10986_v25 = vcombine.high %v1836_v49, %v1840_v61  ;;  %v1876_v57 = vld [vmem:[#allocation8 + $0x19d0] sm:$0xff] }
 0x4a9   :  { %8422 = vmatpush1.bf16.msra.mxu1 %v10683_v27  ;;  %v1593_v27 = vld [vmem:[#allocation8 + $0x10f8] sm:$0xff]  ;;  %v1880_v19 = vld [vmem:[#allocation8 + $0x19f0] sm:$0xff] }
 0x4aa   :  { %8164 = vmatpush1.bf16.msra.mxu0 %v10937_v62  ;;  %8423 = vmatprep.subr.bf16.mxu1 %v10692_v28  ;;  %v1848_v62 = vld [vmem:[#allocation8 + $0x18f0] sm:$0xff]  ;;  %v10731_v28 = vcombine.low %v1581_v5, %v1585_v8  ;;  %v10740_v30 = vcombine.high %v1589_v26, %v1593_v27  ;;  %v11026_v8 = vcombine.high %v1876_v57, %v1880_v19 }
 0x4ab   :  { %8165 = vmatprep.subr.bf16.mxu0 %v10946_v29  ;;  %v10985_v29 = vcombine.low %v1836_v49, %v1840_v61  ;;  %v1633_v49 = vld [vmem:[#allocation8 + $0x1238] sm:$0xff]  ;;  %v1884_v61 = vld [vmem:[#allocation8 + $0x1a10] sm:$0xff] }
 0x4ad   :  { %8424 = vmatpush1.bf16.msra.mxu1 %v10691_v56  ;;  %v1852_v56 = vld [vmem:[#allocation8 + $0x1910] sm:$0xff] }
 0x4ae   :  { %8166 = vmatpush1.bf16.msra.mxu0 %v10945_v34  ;;  %8425 = vmatprep.subr.bf16.mxu1 %v10700_v35  ;;  %v1856_v34 = vld [vmem:[#allocation8 + $0x1930] sm:$0xff] }
 0x4af   :  { %8167 = vmatprep.subr.bf16.mxu0 %v10954_v36  ;;  %v10748_v36 = vcombine.high %v1597_v31, %v1601_v32  ;;  %v11002_v37 = vcombine.high %v1852_v56, %v1856_v34 }
 0x4b1   :  { %8426 = vmatpush1.bf16.msra.mxu1 %v10699_v3  ;;  %v1864_v3 = vld [vmem:[#allocation8 + $0x1970] sm:$0xff] }
 0x4b2   :  { %8168 = vmatpush1.bf16.msra.mxu0 %v10953_v44  ;;  %8427 = vmatprep.subr.bf16.mxu1 %v10708_v40  ;;  %v10747_v44 = vcombine.low %v1597_v31, %v1601_v32  ;;  %v11001_v40 = vcombine.low %v1852_v56, %v1856_v34  ;;  %v11010_v10 = vcombine.high %v1860_v39, %v1864_v3  ;;  %v1645_v32 = vld [vmem:[#allocation8 + $0x1298] sm:$0xff]  ;;  %v1900_v34 = vld [vmem:[#allocation8 + $0x1a90] sm:$0xff] }
 0x4b3   :  { %8169 = vmatprep.subr.bf16.mxu0 %v10962_v63  ;;  %v10756_v63 = vcombine.high %v1605_v38, %v1609_v18  ;;  %v1649_v56 = vld [vmem:[#allocation8 + $0x12b8] sm:$0xff] }
 0x4b5   :  { %8428 = vmatpush1.bf16.msra.mxu1 %v10707_v48  ;;  %v1872_v48 = vld [vmem:[#allocation8 + $0x19b0] sm:$0xff] }
 0x4b6   :  { %8170 = vmatpush1.bf16.msra.mxu0 %v10961_v43  ;;  %8440 = vmatprep.subr.bf16.mxu1 %v10716_v24  ;;  %v10755_v43 = vcombine.low %v1605_v38, %v1609_v18  ;;  %v11009_v24 = vcombine.low %v1860_v39, %v1864_v3  ;;  %v11018_v51 = vcombine.high %v1868_v42, %v1872_v48  ;;  %v1653_v18 = vld [vmem:[#allocation8 + $0x12d8] sm:$0xff]  ;;  %v1908_v3 = vld [vmem:[#allocation8 + $0x1ad0] sm:$0xff] }
 0x4b7   :  { %8182 = vmatprep.subr.bf16.mxu0 %v10970_v45  ;;  %v10764_v45 = vcombine.high %v1613_v22, %v1617_v41  ;;  %v1657_v39 = vld [vmem:[#allocation8 + $0x12f8] sm:$0xff] }
 0x4b8   :  { %8430 = vmatmul.mubr.bf16.vlgmr.msra.gmra.mrb[24].mxu1 %v12474_v15  ;;  %v1844_v15 = vld [vmem:[#allocation8 + $0x18d0] sm:$0xff] }
 0x4b9   :  { %8172 = vmatmul.mubr.bf16.vlgmr.msra.gmra.mrb[20].mxu0 %v12485_v14  ;;  %8441 = vmatpush1.bf16.msra.mxu1 %v10715_v53  ;;  %v10994_v12 = vcombine.high %v1844_v15, %v1848_v62  ;;  %v10993_v35 = vcombine.low %v1844_v15, %v1848_v62  ;;  %v1625_v53 = vld [vmem:[#allocation8 + $0x11f8] sm:$0xff]  ;;  %v1892_v62 = vld [vmem:[#allocation8 + $0x1a50] sm:$0xff] }
 0x4ba   :  { %8183 = vmatpush1.bf16.msra.mxu0 %v10969_v59  ;;  %8214 = vmatprep.mubr.bf16.mxu0 %v12515_v2  ;;  %v10763_v59 = vcombine.low %v1613_v22, %v1617_v41  ;;  %v10772_v5 = vcombine.high %v1621_v52, %v1625_v53  ;;  %v1641_v15 = vld [vmem:[#allocation8 + $0x1278] sm:$0xff] }
 0x4bb   :  { %8472 = vmatprep.mubr.bf16.mxu1 %v12503_v54  ;;  %8184 = vmatprep.subr.bf16.mxu0 %v10978_v4  ;;  %v10739_v54 = vcombine.low %v1589_v26, %v1593_v27  ;;  %v11017_v4 = vcombine.low %v1868_v42, %v1872_v48  ;;  %v1637_v27 = vld [vmem:[#allocation8 + $0x1258] sm:$0xff]  ;;  %v1916_v48 = vld [vmem:[#allocation8 + $0x1b10] sm:$0xff] }
 0x4bc   :  { %8442 = vmatprep.subr.bf16.mxu1 %v10724_v21  ;;  %v1629_v21 = vld [vmem:[#allocation8 + $0x1218] sm:$0xff] }
 0x4bd   :  { %8443 = vmatpush1.bf16.msra.mxu1 %v10723_v13  ;;  %v1888_v13 = vld [vmem:[#allocation8 + $0x1a30] sm:$0xff]  ;;  %v1661_v41 = vld [vmem:[#allocation8 + $0x1318] sm:$0xff] }
 0x4be   :  { %8185 = vmatpush1.bf16.msra.mxu0 %v10977_v7  ;;  %8444 = vmatprep.subr.bf16.mxu1 %v10732_v47  ;;  %v10771_v7 = vcombine.low %v1621_v52, %v1625_v53  ;;  %v11025_v47 = vcombine.low %v1876_v57, %v1880_v19  ;;  %v11034_v26 = vcombine.high %v1884_v61, %v1888_v13  ;;  %v1665_v42 = vld [vmem:[#allocation8 + $0x1338] sm:$0xff]  ;;  %v1924_v19 = vld [vmem:[#allocation8 + $0x1b50] sm:$0xff] }
 0x4bf   :  { %8186 = vmatprep.subr.bf16.mxu0 %v10986_v25  ;;  %v10780_v25 = vcombine.high %v1629_v21, %v1633_v49  ;;  %v1669_v53 = vld [vmem:[#allocation8 + $0x1358] sm:$0xff] }
 0x4c0   :  { %v1673_v57 = vld [vmem:[#allocation8 + $0x1378] sm:$0xff] }
 0x4c1   :  { %8445 = vmatpush1.bf16.msra.mxu1 %v10731_v28  ;;  %v1896_v28 = vld [vmem:[#allocation8 + $0x1a70] sm:$0xff] }
 0x4c2   :  { %8187 = vmatpush1.bf16.msra.mxu0 %v10985_v29  ;;  %8446 = vmatprep.subr.bf16.mxu1 %v10740_v30  ;;  %v10779_v29 = vcombine.low %v1629_v21, %v1633_v49  ;;  %v11033_v30 = vcombine.low %v1884_v61, %v1888_v13  ;;  %v11042_v31 = vcombine.high %v1892_v62, %v1896_v28  ;;  %v1677_v49 = vld [vmem:[#allocation8 + $0x1398] sm:$0xff]  ;;  %v1932_v13 = vld [vmem:[#allocation8 + $0x1b90] sm:$0xff] }
 0x4c3   :  { %8188 = vmatprep.subr.bf16.mxu0 %v10994_v12  ;;  %v10788_v12 = vcombine.high %v1637_v27, %v1641_v15  ;;  %v1681_v61 = vld [vmem:[#allocation8 + $0x13b8] sm:$0xff] }
 0x4c5   :  { %8447 = vmatpush1.bf16.msra.mxu1 %v10739_v54  ;;  %v1904_v54 = vld [vmem:[#allocation8 + $0x1ab0] sm:$0xff] }
 0x4c6   :  { %8189 = vmatpush1.bf16.msra.mxu0 %v10993_v35  ;;  %8448 = vmatprep.subr.bf16.mxu1 %v10748_v36  ;;  %v10787_v35 = vcombine.low %v1637_v27, %v1641_v15  ;;  %v11041_v36 = vcombine.low %v1892_v62, %v1896_v28  ;;  %v11050_v38 = vcombine.high %v1900_v34, %v1904_v54  ;;  %v1685_v15 = vld [vmem:[#allocation8 + $0x13d8] sm:$0xff]  ;;  %v1940_v28 = vld [vmem:[#allocation8 + $0x1bd0] sm:$0xff] }
 0x4c7   :  { %8190 = vmatprep.subr.bf16.mxu0 %v11002_v37  ;;  %v10796_v37 = vcombine.high %v1645_v32, %v1649_v56  ;;  %v1689_v62 = vld [vmem:[#allocation8 + $0x13f8] sm:$0xff] }
 0x4c9   :  { %8449 = vmatpush1.bf16.msra.mxu1 %v10747_v44  ;;  %v1912_v44 = vld [vmem:[#allocation8 + $0x1af0] sm:$0xff] }
 0x4ca   :  { %8191 = vmatpush1.bf16.msra.mxu0 %v11001_v40  ;;  %8450 = vmatprep.subr.bf16.mxu1 %v10756_v63  ;;  %v10795_v40 = vcombine.low %v1645_v32, %v1649_v56  ;;  %v11049_v63 = vcombine.low %v1900_v34, %v1904_v54  ;;  %v11058_v22 = vcombine.high %v1908_v3, %v1912_v44  ;;  %v1693_v56 = vld [vmem:[#allocation8 + $0x1418] sm:$0xff]  ;;  %v1948_v54 = vld [vmem:[#allocation8 + $0x1c10] sm:$0xff] }
 0x4cb   :  { %8192 = vmatprep.subr.bf16.mxu0 %v11010_v10  ;;  %v10804_v10 = vcombine.high %v1653_v18, %v1657_v39  ;;  %v1697_v34 = vld [vmem:[#allocation8 + $0x1438] sm:$0xff] }
 0x4cd   :  { %8451 = vmatpush1.bf16.msra.mxu1 %v10755_v43  ;;  %v1920_v43 = vld [vmem:[#allocation8 + $0x1b30] sm:$0xff] }
 0x4ce   :  { %8193 = vmatpush1.bf16.msra.mxu0 %v11009_v24  ;;  %8452 = vmatprep.subr.bf16.mxu1 %v10764_v45  ;;  %v10803_v24 = vcombine.low %v1653_v18, %v1657_v39  ;;  %v11057_v45 = vcombine.low %v1908_v3, %v1912_v44  ;;  %v11066_v52 = vcombine.high %v1916_v48, %v1920_v43  ;;  %v1956_v39 = vld [vmem:[#allocation8 + $0x1c50] sm:$0xff] }
 0x4cf   :  { %8194 = vmatprep.subr.bf16.mxu0 %v11018_v51  ;;  %v10812_v51 = vcombine.high %v1661_v41, %v1665_v42  ;;  %v1960_v3 = vld [vmem:[#allocation8 + $0x1c70] sm:$0xff]  ;;  %v10843_v44 = vcombine.low %v1693_v56, %v1697_v34 }
 0x4d1   :  { %8453 = vmatpush1.bf16.msra.mxu1 %v10763_v59  ;;  %v1928_v59 = vld [vmem:[#allocation8 + $0x1b70] sm:$0xff] }
 0x4d2   :  { %8195 = vmatpush1.bf16.msra.mxu0 %v11017_v4  ;;  %8454 = vmatprep.subr.bf16.mxu1 %v10772_v5  ;;  %v10811_v4 = vcombine.low %v1661_v41, %v1665_v42  ;;  %v11065_v5 = vcombine.low %v1916_v48, %v1920_v43  ;;  %v11074_v21 = vcombine.high %v1924_v19, %v1928_v59  ;;  %v1709_v41 = vld [vmem:[#allocation8 + $0x1498] sm:$0xff]  ;;  %v1964_v43 = vld [vmem:[#allocation8 + $0x1c90] sm:$0xff] }
 0x4d3   :  { %8196 = vmatprep.subr.bf16.mxu0 %v11026_v8  ;;  %v10820_v8 = vcombine.high %v1669_v53, %v1673_v57  ;;  %v1713_v42 = vld [vmem:[#allocation8 + $0x14b8] sm:$0xff] }
 0x4d5   :  { %8455 = vmatpush1.bf16.msra.mxu1 %v10771_v7  ;;  %v1936_v7 = vld [vmem:[#allocation8 + $0x1bb0] sm:$0xff] }
 0x4d6   :  { %8197 = vmatpush1.bf16.msra.mxu0 %v11025_v47  ;;  %8456 = vmatprep.subr.bf16.mxu1 %v10780_v25  ;;  %v10819_v47 = vcombine.low %v1669_v53, %v1673_v57  ;;  %v11073_v25 = vcombine.low %v1924_v19, %v1928_v59  ;;  %v11082_v27 = vcombine.high %v1932_v13, %v1936_v7  ;;  %v1717_v57 = vld [vmem:[#allocation8 + $0x14d8] sm:$0xff]  ;;  %v1976_v59 = vld [vmem:[#allocation8 + $0x1cf0] sm:$0xff] }
 0x4d7   :  { %8198 = vmatprep.subr.bf16.mxu0 %v11034_v26  ;;  %v10828_v26 = vcombine.high %v1677_v49, %v1681_v61  ;;  %v1721_v19 = vld [vmem:[#allocation8 + $0x14f8] sm:$0xff] }
 0x4d9   :  { %8457 = vmatpush1.bf16.msra.mxu1 %v10779_v29  ;;  %v1944_v29 = vld [vmem:[#allocation8 + $0x1bf0] sm:$0xff] }
 0x4da   :  { %8199 = vmatpush1.bf16.msra.mxu0 %v11033_v30  ;;  %8458 = vmatprep.subr.bf16.mxu1 %v10788_v12  ;;  %v10827_v30 = vcombine.low %v1677_v49, %v1681_v61  ;;  %v11081_v12 = vcombine.low %v1932_v13, %v1936_v7  ;;  %v11090_v32 = vcombine.high %v1940_v28, %v1944_v29  ;;  %v1725_v49 = vld [vmem:[#allocation8 + $0x1518] sm:$0xff]  ;;  %v1980_v13 = vld [vmem:[#allocation8 + $0x1d10] sm:$0xff] }
 0x4db   :  { %8200 = vmatprep.subr.bf16.mxu0 %v11042_v31  ;;  %v10836_v31 = vcombine.high %v1685_v15, %v1689_v62  ;;  %v1729_v61 = vld [vmem:[#allocation8 + $0x1538] sm:$0xff]  ;;  %v1984_v7 = vld [vmem:[#allocation8 + $0x1d30] sm:$0xff] }
 0x4dd   :  { %8459 = vmatpush1.bf16.msra.mxu1 %v10787_v35  ;;  %v1952_v35 = vld [vmem:[#allocation8 + $0x1c30] sm:$0xff] }
 0x4de   :  { %8201 = vmatpush1.bf16.msra.mxu0 %v11041_v36  ;;  %8460 = vmatprep.subr.bf16.mxu1 %v10796_v37  ;;  %v10835_v36 = vcombine.low %v1685_v15, %v1689_v62  ;;  %v11089_v37 = vcombine.low %v1940_v28, %v1944_v29  ;;  %v11098_v18 = vcombine.high %v1948_v54, %v1952_v35  ;;  %v1737_v15 = vld [vmem:[#allocation8 + $0x1578] sm:$0xff]  ;;  %v1988_v62 = vld [vmem:[#allocation8 + $0x1d50] sm:$0xff] }
 0x4df   :  { %8202 = vmatprep.subr.bf16.mxu0 %v11050_v38  ;;  %v10844_v38 = vcombine.high %v1693_v56, %v1697_v34  ;;  %v1992_v28 = vld [vmem:[#allocation8 + $0x1d70] sm:$0xff]  ;;  %v10875_v29 = vcombine.low %v1725_v49, %v1729_v61  ;;  %v1745_v56 = vld [vmem:[#allocation8 + $0x15b8] sm:$0xff] }
 0x4e0   :  { %v1996_v34 = vld [vmem:[#allocation8 + $0x1d90] sm:$0xff] }
 0x4e1   :  { %8461 = vmatpush1.bf16.msra.mxu1 %v10795_v40  ;;  %v1701_v40 = vld [vmem:[#allocation8 + $0x1458] sm:$0xff] }
 0x4e2   :  { %8203 = vmatpush1.bf16.msra.mxu0 %v11049_v63  ;;  %8462 = vmatprep.subr.bf16.mxu1 %v10804_v10  ;;  %v1705_v63 = vld [vmem:[#allocation8 + $0x1478] sm:$0xff]  ;;  %v11097_v10 = vcombine.low %v1948_v54, %v1952_v35  ;;  %v2000_v54 = vld [vmem:[#allocation8 + $0x1db0] sm:$0xff] }
 0x4e3   :  { %8204 = vmatprep.subr.bf16.mxu0 %v11058_v22  ;;  %v11106_v22 = vcombine.high %v1956_v39, %v1960_v3  ;;  %v10852_v48 = vcombine.high %v1701_v40, %v1705_v63 }
 0x4e5   :  { %8463 = vmatpush1.bf16.msra.mxu1 %v10803_v24  ;;  %v1968_v24 = vld [vmem:[#allocation8 + $0x1cb0] sm:$0xff] }
 0x4e6   :  { %8205 = vmatpush1.bf16.msra.mxu0 %v11057_v45  ;;  %8464 = vmatprep.subr.bf16.mxu1 %v10812_v51  ;;  %v10851_v45 = vcombine.low %v1701_v40, %v1705_v63  ;;  %v11105_v51 = vcombine.low %v1956_v39, %v1960_v3  ;;  %v11114_v53 = vcombine.high %v1964_v43, %v1968_v24  ;;  %v1753_v39 = vld [vmem:[#allocation8 + $0x15f8] sm:$0xff]  ;;  %v2004_v3 = vld [vmem:[#allocation8 + $0x1dd0] sm:$0xff] }
 0x4e7   :  { %8206 = vmatprep.subr.bf16.mxu0 %v11066_v52  ;;  %v10860_v52 = vcombine.high %v1709_v41, %v1713_v42  ;;  %v11145_v63 = vcombine.low %v1996_v34, %v2000_v54 }
 0x4e9   :  { %8465 = vmatpush1.bf16.msra.mxu1 %v10811_v4  ;;  %v10859_v4 = vcombine.low %v1709_v41, %v1713_v42  ;;  %v1757_v41 = vld [vmem:[#allocation8 + $0x1618] sm:$0xff] }
 0x4ea   :  { %8207 = vmatpush1.bf16.msra.mxu0 %v11065_v5  ;;  %8466 = vmatprep.subr.bf16.mxu1 %v10820_v8  ;;  %v11113_v5 = vcombine.low %v1964_v43, %v1968_v24  ;;  %v10868_v8 = vcombine.high %v1717_v57, %v1721_v19  ;;  %v1761_v42 = vld [vmem:[#allocation8 + $0x1638] sm:$0xff]  ;;  %v2016_v43 = vld [vmem:[#allocation8 + $0x1e30] sm:$0xff] }
 0x4eb   :  { %8208 = vmatprep.subr.bf16.mxu0 %v11074_v21 }
 0x4ed   :  { %8467 = vmatpush1.bf16.msra.mxu1 %v10819_v47 }
 0x4ee   :  { %8209 = vmatpush1.bf16.msra.mxu0 %v11073_v25  ;;  %8468 = vmatprep.subr.bf16.mxu1 %v10828_v26  ;;  %v10876_v25 = vcombine.high %v1725_v49, %v1729_v61  ;;  %v11130_v26 = vcombine.high %v1980_v13, %v1984_v7  ;;  %v1777_v49 = vld [vmem:[#allocation8 + $0x16b8] sm:$0xff]  ;;  %v2028_v61 = vld [vmem:[#allocation8 + $0x1e90] sm:$0xff] }
 0x4ef   :  { %8210 = vmatprep.subr.bf16.mxu0 %v11082_v27  ;;  %v1733_v27 = vld [vmem:[#allocation8 + $0x1558] sm:$0xff] }
 0x4f0   :  { %v10883_v35 = vcombine.low %v1733_v27, %v1737_v15 }
 0x4f1   :  { %8469 = vmatpush1.bf16.msra.mxu1 %v10827_v30  ;;  %v11129_v30 = vcombine.low %v1980_v13, %v1984_v7  ;;  %v2032_v13 = vld [vmem:[#allocation8 + $0x1eb0] sm:$0xff] }
 0x4f2   :  { %8211 = vmatpush1.bf16.msra.mxu0 %v11081_v12  ;;  %8470 = vmatprep.subr.bf16.mxu1 %v10836_v31  ;;  %v10884_v12 = vcombine.high %v1733_v27, %v1737_v15  ;;  %v11138_v31 = vcombine.high %v1988_v62, %v1992_v28  ;;  %v1785_v27 = vld [vmem:[#allocation8 + $0x16f8] sm:$0xff]  ;;  %v2036_v15 = vld [vmem:[#allocation8 + $0x1ed0] sm:$0xff] }
 0x4f3   :  { %8212 = vmatprep.subr.bf16.mxu0 %v11090_v32  ;;  %v1741_v32 = vld [vmem:[#allocation8 + $0x1598] sm:$0xff] }
 0x4f4   :  { %v10891_v40 = vcombine.low %v1741_v32, %v1745_v56 }
 0x4f5   :  { %8471 = vmatpush1.bf16.msra.mxu1 %v10835_v36  ;;  %v11137_v36 = vcombine.low %v1988_v62, %v1992_v28  ;;  %v2040_v62 = vld [vmem:[#allocation8 + $0x1ef0] sm:$0xff] }
 0x4f6   :  { %8213 = vmatpush1.bf16.msra.mxu0 %v11089_v37  ;;  %8483 = vmatprep.subr.bf16.mxu1 %v10844_v38  ;;  %v10892_v37 = vcombine.high %v1741_v32, %v1745_v56  ;;  %v11146_v38 = vcombine.high %v1996_v34, %v2000_v54  ;;  %v1793_v32 = vld [vmem:[#allocation8 + $0x1738] sm:$0xff]  ;;  %v2044_v56 = vld [vmem:[#allocation8 + $0x1f10] sm:$0xff] }
 0x4f7   :  { %8225 = vmatprep.subr.bf16.mxu0 %v11098_v18  ;;  %v1749_v18 = vld [vmem:[#allocation8 + $0x15d8] sm:$0xff]  ;;  %v2048_v34 = vld [vmem:[#allocation8 + $0x1f30] sm:$0xff] }
 0x4f8   :  { %8473 = vmatmul.mubr.bf16.vlgmr.msra.gmra.mrb[24].mxu1 %v12501_v55  ;;  %v1972_v55 = vld [vmem:[#allocation8 + $0x1cd0] sm:$0xff]  ;;  %v10899_v24 = vcombine.low %v1749_v18, %v1753_v39 }
 0x4f9   :  { %8215 = vmatmul.mubr.bf16.vlgmr.msra.gmra.mrb[20].mxu0 %v12513_v58  ;;  %8484 = vmatpush1.bf16.msra.mxu1 %v10843_v44  ;;  %v11122_v21 = vcombine.high %v1972_v55, %v1976_v59  ;;  %v11121_v47 = vcombine.low %v1972_v55, %v1976_v59  ;;  %v2008_v44 = vld [vmem:[#allocation8 + $0x1df0] sm:$0xff]  ;;  %v10907_v59 = vcombine.low %v1757_v41, %v1761_v42 }
 0x4fa   :  { %8226 = vmatpush1.bf16.msra.mxu0 %v11097_v10  ;;  %8257 = vmatprep.mubr.bf16.mxu0 %v12495_v23  ;;  %v10900_v10 = vcombine.high %v1749_v18, %v1753_v39  ;;  %v2024_v55 = vld [vmem:[#allocation8 + $0x1e70] sm:$0xff]  ;;  %v1801_v18 = vld [vmem:[#allocation8 + $0x1778] sm:$0xff] }
 0x4fb   :  { %8515 = vmatprep.mubr.bf16.mxu1 %v12487_v46  ;;  %8227 = vmatprep.subr.bf16.mxu0 %v11106_v22  ;;  %v10867_v46 = vcombine.low %v1717_v57, %v1721_v19  ;;  %v11154_v22 = vcombine.high %v2004_v3, %v2008_v44  ;;  %v1769_v57 = vld [vmem:[#allocation8 + $0x1678] sm:$0xff]  ;;  %v2020_v19 = vld [vmem:[#allocation8 + $0x1e50] sm:$0xff] }
 0x4fc   :  { %8485 = vmatprep.subr.bf16.mxu1 %v10852_v48  ;;  %v2012_v48 = vld [vmem:[#allocation8 + $0x1e10] sm:$0xff] }
 0x4fd   :  { %8486 = vmatpush1.bf16.msra.mxu1 %v10851_v45  ;;  %v11153_v45 = vcombine.low %v2004_v3, %v2008_v44  ;;  %v2052_v39 = vld [vmem:[#allocation8 + $0x1f50] sm:$0xff] }
 0x4fe   :  { %8228 = vmatpush1.bf16.msra.mxu0 %v11105_v51  ;;  %8487 = vmatprep.subr.bf16.mxu1 %v10860_v52  ;;  %v10908_v51 = vcombine.high %v1757_v41, %v1761_v42  ;;  %v11162_v52 = vcombine.high %v2012_v48, %v2016_v43  ;;  %v2056_v3 = vld [vmem:[#allocation8 + $0x1f70] sm:$0xff]  ;;  %v1809_v41 = vld [vmem:[#allocation8 + $0x17b8] sm:$0xff] }
 0x4ff   :  { %8229 = vmatprep.subr.bf16.mxu0 %v11114_v53  ;;  %v1765_v53 = vld [vmem:[#allocation8 + $0x1658] sm:$0xff]  ;;  %v2060_v42 = vld [vmem:[#allocation8 + $0x1f90] sm:$0xff] }
 0x500   :  { %v10915_v7 = vcombine.low %v1765_v53, %v1769_v57 }
 0x501   :  { %8488 = vmatpush1.bf16.msra.mxu1 %v10859_v4  ;;  %v11161_v4 = vcombine.low %v2012_v48, %v2016_v43  ;;  %v2064_v48 = vld [vmem:[#allocation8 + $0x1fb0] sm:$0xff] }
 0x502   :  { %8230 = vmatpush1.bf16.msra.mxu0 %v11113_v5  ;;  %8489 = vmatprep.subr.bf16.mxu1 %v10868_v8  ;;  %v10916_v5 = vcombine.high %v1765_v53, %v1769_v57  ;;  %v11170_v8 = vcombine.high %v2020_v19, %v2024_v55  ;;  %v1817_v53 = vld [vmem:[#allocation8 + $0x17f8] sm:$0xff]  ;;  %v2068_v57 = vld [vmem:[#allocation8 + $0x1fd0] sm:$0xff] }
 0x503   :  { %8231 = vmatprep.subr.bf16.mxu0 %v11122_v21  ;;  %v1773_v21 = vld [vmem:[#allocation8 + $0x1698] sm:$0xff] }
 0x504   :  { %v10923_v28 = vcombine.low %v1773_v21, %v1777_v49 }
 0x505   :  { %8490 = vmatpush1.bf16.msra.mxu1 %v10867_v46  ;;  %v11169_v46 = vcombine.low %v2020_v19, %v2024_v55  ;;  %v2072_v19 = vld [vmem:[#allocation8 + $0x1ff0] sm:$0xff] }
 0x506   :  { %8232 = vmatpush1.bf16.msra.mxu0 %v11121_v47  ;;  %8491 = vmatprep.subr.bf16.mxu1 %v10876_v25  ;;  %v10924_v47 = vcombine.high %v1773_v21, %v1777_v49  ;;  %v11178_v25 = vcombine.high %v2028_v61, %v2032_v13  ;;  %v1825_v21 = vld [vmem:[#allocation8 + $0x1838] sm:$0xff] }
 0x507   :  { %8233 = vmatprep.subr.bf16.mxu0 %v11130_v26  ;;  %v1781_v26 = vld [vmem:[#allocation8 + $0x16d8] sm:$0xff] }
 0x508   :  { %v10931_v54 = vcombine.low %v1781_v26, %v1785_v27 }
 0x509   :  { %8492 = vmatpush1.bf16.msra.mxu1 %v10875_v29  ;;  %v11177_v29 = vcombine.low %v2028_v61, %v2032_v13  ;;  %v11217_v61 = vcombine.low %v2068_v57, %v2072_v19 }
 0x50a   :  { %8234 = vmatpush1.bf16.msra.mxu0 %v11129_v30  ;;  %8493 = vmatprep.subr.bf16.mxu1 %v10884_v12  ;;  %v10932_v30 = vcombine.high %v1781_v26, %v1785_v27  ;;  %v11186_v12 = vcombine.high %v2036_v15, %v2040_v62  ;;  %v11577_v26 = vld [vmem:[#allocation11] ss:$8 sps:$4 sm:$0xff]  }
 0x50b   :  { %8235 = vmatprep.subr.bf16.mxu0 %v11138_v31  ;;  %v1789_v31 = vld [vmem:[#allocation8 + $0x1718] sm:$0xff] }
 0x50c   :  { %v10939_v44 = vcombine.low %v1789_v31, %v1793_v32 }
 0x50d   :  { %8494 = vmatpush1.bf16.msra.mxu1 %v10883_v35  ;;  %v11185_v35 = vcombine.low %v2036_v15, %v2040_v62  ;;  %v1837_v15 = vld [vmem:[#allocation8 + $0x1898] sm:$0xff] }
 0x50e   :  { %8236 = vmatpush1.bf16.msra.mxu0 %v11137_v36  ;;  %8495 = vmatprep.subr.bf16.mxu1 %v10892_v37  ;;  %v10940_v36 = vcombine.high %v1789_v31, %v1793_v32  ;;  %v11194_v37 = vcombine.high %v2044_v56, %v2048_v34  ;;  %v1841_v62 = vld [vmem:[#allocation8 + $0x18b8] sm:$0xff]  ;;  %v11585_v31 = vld [vmem:[#allocation11 + $0x24] ss:$8 sps:$4 sm:$0xff]  }
 0x50f   :  { %8237 = vmatprep.subr.bf16.mxu0 %v11146_v38  ;;  %v1797_v38 = vld [vmem:[#allocation8 + $0x1758] sm:$0xff] }
 0x510   :  { %v10947_v43 = vcombine.low %v1797_v38, %v1801_v18  ;;  %v1845_v32 = vld [vmem:[#allocation8 + $0x18d8] sm:$0xff] }
 0x511   :  { %8496 = vmatpush1.bf16.msra.mxu1 %v10891_v40  ;;  %v11193_v40 = vcombine.low %v2044_v56, %v2048_v34  ;;  %v1849_v56 = vld [vmem:[#allocation8 + $0x18f8] sm:$0xff]  ;;  %v10987_v34 = vcombine.low %v1837_v15, %v1841_v62 }
 0x512   :  { %8238 = vmatpush1.bf16.msra.mxu0 %v11145_v63  ;;  %8497 = vmatprep.subr.bf16.mxu1 %v10900_v10  ;;  %v10948_v63 = vcombine.high %v1797_v38, %v1801_v18  ;;  %v11202_v10 = vcombine.high %v2052_v39, %v2056_v3  ;;  %v11591_v18 = vld [vmem:[#allocation11 + $0x44] ss:$8 sps:$4 sm:$0xff]  }
 0x513   :  { %8239 = vmatprep.subr.bf16.mxu0 %v11154_v22  ;;  %v1805_v22 = vld [vmem:[#allocation8 + $0x1798] sm:$0xff] }
 0x514   :  { %v10955_v55 = vcombine.low %v1805_v22, %v1809_v41 }
 0x515   :  { %8498 = vmatpush1.bf16.msra.mxu1 %v10899_v24  ;;  %v11201_v24 = vcombine.low %v2052_v39, %v2056_v3  ;;  %v1861_v39 = vld [vmem:[#allocation8 + $0x1958] sm:$0xff] }
 0x516   :  { %8240 = vmatpush1.bf16.msra.mxu0 %v11153_v45  ;;  %8499 = vmatprep.subr.bf16.mxu1 %v10908_v51  ;;  %v10956_v45 = vcombine.high %v1805_v22, %v1809_v41  ;;  %v11210_v51 = vcombine.high %v2060_v42, %v2064_v48  ;;  %v1865_v3 = vld [vmem:[#allocation8 + $0x1978] sm:$0xff] }
 0x517   :  { %8241 = vmatprep.subr.bf16.mxu0 %v11162_v52  ;;  %v1813_v52 = vld [vmem:[#allocation8 + $0x17d8] sm:$0xff] }
 0x518   :  { %v10963_v49 = vcombine.low %v1813_v52, %v1817_v53  ;;  %v1869_v22 = vld [vmem:[#allocation8 + $0x1998] sm:$0xff] }
 0x519   :  { %8500 = vmatpush1.bf16.msra.mxu1 %v10907_v59  ;;  %v11209_v59 = vcombine.low %v2060_v42, %v2064_v48  ;;  %v1873_v41 = vld [vmem:[#allocation8 + $0x19b8] sm:$0xff]  ;;  %v11011_v42 = vcombine.low %v1861_v39, %v1865_v3 }
 0x51a   :  { %8242 = vmatpush1.bf16.msra.mxu0 %v11161_v4  ;;  %8501 = vmatprep.subr.bf16.mxu1 %v10916_v5  ;;  %v10964_v4 = vcombine.high %v1813_v52, %v1817_v53  ;;  %v11218_v5 = vcombine.high %v2068_v57, %v2072_v19  ;;  %v11592_v48 = vld [vmem:[#allocation11 + $0x50] ss:$8 sps:$4 sm:$0xff]   ;;  %v11019_v52 = vcombine.low %v1869_v22, %v1873_v41  ;;  %v11595_v53 = vld [vmem:[#allocation11 + $0x60] ss:$8 sps:$4 sm:$0xff]   ;;  %v11600_v19 = vld [vmem:[#allocation11 + $0x74] ss:$8 sps:$4 sm:$0xff]  }
 0x51b   :  { %8243 = vmatprep.subr.bf16.mxu0 %v11170_v8  ;;  %v1821_v8 = vld [vmem:[#allocation8 + $0x1818] sm:$0xff] }
 0x51c   :  { %v10972_v13 = vcombine.high %v1821_v8, %v1825_v21 }
 0x51d   :  { %8502 = vmatpush1.bf16.msra.mxu1 %v10915_v7  ;;  %v11579_v7 = vld [vmem:[#allocation11 + $0x4] ss:$8 sps:$4 sm:$0xff]  }
 0x51e   :  { %8244 = vmatpush1.bf16.msra.mxu0 %v11169_v46  ;;  %8503 = vmatprep.subr.bf16.mxu1 %v10924_v47  ;;  %v1829_v46 = vld [vmem:[#allocation8 + $0x1858] sm:$0xff] }
 0x51f   :  { %8245 = vmatprep.subr.bf16.mxu0 %v11178_v25  ;;  %v1833_v47 = vld [vmem:[#allocation8 + $0x1878] sm:$0xff]  ;;  %v10971_v25 = vcombine.low %v1821_v8, %v1825_v21  ;;  %v11603_v21 = vld [vmem:[#allocation11 + $0x84] ss:$8 sps:$4 sm:$0xff]  }
 0x520   :  { %v10980_v27 = vcombine.high %v1829_v46, %v1833_v47 }
 0x521   :  { %8504 = vmatpush1.bf16.msra.mxu1 %v10923_v28  ;;  %v11582_v28 = vld [vmem:[#allocation11 + $0x14] ss:$8 sps:$4 sm:$0xff]  }
 0x522   :  { %8246 = vmatpush1.bf16.msra.mxu0 %v11177_v29  ;;  %8505 = vmatprep.subr.bf16.mxu1 %v10932_v30  ;;  %v10979_v29 = vcombine.low %v1829_v46, %v1833_v47  ;;  %v11580_v30 = vld [vmem:[#allocation11 + $0x10] ss:$8 sps:$4 sm:$0xff]   ;;  %v11606_v47 = vld [vmem:[#allocation11 + $0x94] ss:$8 sps:$4 sm:$0xff]  }
 0x523   :  { %8247 = vmatprep.subr.bf16.mxu0 %v11186_v12  ;;  %v10988_v12 = vcombine.high %v1837_v15, %v1841_v62  ;;  %v11604_v15 = vld [vmem:[#allocation11 + $0x90] ss:$8 sps:$4 sm:$0xff]  }
 0x525   :  { %8506 = vmatpush1.bf16.msra.mxu1 %v10931_v54  ;;  %v10996_v54 = vcombine.high %v1845_v32, %v1849_v56 }
 0x526   :  { %8248 = vmatpush1.bf16.msra.mxu0 %v11185_v35  ;;  %8507 = vmatprep.subr.bf16.mxu1 %v10940_v36  ;;  %v11588_v35 = vld [vmem:[#allocation11 + $0x34] ss:$8 sps:$4 sm:$0xff]  }
 0x527   :  { %8249 = vmatprep.subr.bf16.mxu0 %v11194_v37  ;;  %v1853_v36 = vld [vmem:[#allocation8 + $0x1918] sm:$0xff]  ;;  %v10995_v37 = vcombine.low %v1845_v32, %v1849_v56 }
 0x528   :  { %v11612_v56 = vld [vmem:[#allocation11 + $0xb4] ss:$8 sps:$4 sm:$0xff]  }
 0x529   :  { %8508 = vmatpush1.bf16.msra.mxu1 %v10939_v44 }
 0x52a   :  { %8250 = vmatpush1.bf16.msra.mxu0 %v11193_v40  ;;  %8509 = vmatprep.subr.bf16.mxu1 %v10948_v63  ;;  %v11589_v40 = vld [vmem:[#allocation11 + $0x40] ss:$8 sps:$4 sm:$0xff]   ;;  %v11012_v63 = vcombine.high %v1861_v39, %v1865_v3  ;;  %v11618_v3 = vld [vmem:[#allocation11 + $0xd4] ss:$8 sps:$4 sm:$0xff]  }
 0x52b   :  { %8251 = vmatprep.subr.bf16.mxu0 %v11202_v10  ;;  %v11594_v10 = vld [vmem:[#allocation11 + $0x54] ss:$8 sps:$4 sm:$0xff]  }
 0x52d   :  { %8510 = vmatpush1.bf16.msra.mxu1 %v10947_v43  ;;  %v11020_v43 = vcombine.high %v1869_v22, %v1873_v41  ;;  %v11621_v41 = vld [vmem:[#allocation11 + $0xe4] ss:$8 sps:$4 sm:$0xff]  }
 0x52e   :  { %8252 = vmatpush1.bf16.msra.mxu0 %v11201_v24  ;;  %8511 = vmatprep.subr.bf16.mxu1 %v10956_v45  ;;  %v11597_v24 = vld [vmem:[#allocation11 + $0x64] ss:$8 sps:$4 sm:$0xff]   ;;  %v1877_v45 = vld [vmem:[#allocation8 + $0x19d8] sm:$0xff] }
 0x52f   :  { %8253 = vmatprep.subr.bf16.mxu0 %v11210_v51  ;;  %v1881_v51 = vld [vmem:[#allocation8 + $0x19f8] sm:$0xff] }
 0x530   :  { %v11028_v57 = vcombine.high %v1877_v45, %v1881_v51 }
 0x531   :  { %8512 = vmatpush1.bf16.msra.mxu1 %v10955_v55  ;;  %v1885_v55 = vld [vmem:[#allocation8 + $0x1a18] sm:$0xff] }
 0x532   :  { %8254 = vmatpush1.bf16.msra.mxu0 %v11209_v59  ;;  %8513 = vmatprep.subr.bf16.mxu1 %v10964_v4  ;;  %v1889_v59 = vld [vmem:[#allocation8 + $0x1a38] sm:$0xff]  ;;  %v11027_v4 = vcombine.low %v1877_v45, %v1881_v51 }
 0x533   :  { %8255 = vmatprep.subr.bf16.mxu0 %v11218_v5  ;;  %v11598_v5 = vld [vmem:[#allocation11 + $0x70] ss:$8 sps:$4 sm:$0xff]   ;;  %v11036_v8 = vcombine.high %v1885_v55, %v1889_v59  ;;  %v11624_v51 = vld [vmem:[#allocation11 + $0xf4] ss:$8 sps:$4 sm:$0xff]  }
 0x535   :  { %8514 = vmatpush1.bf16.msra.mxu1 %v10963_v49  ;;  %v1893_v49 = vld [vmem:[#allocation8 + $0x1a58] sm:$0xff] }
 0x536   :  { %8256 = vmatpush1.bf16.msra.mxu0 %v11217_v61  ;;  %8526 = vmatprep.subr.bf16.mxu1 %v10972_v13  ;;  %v1897_v61 = vld [vmem:[#allocation8 + $0x1a78] sm:$0xff]  ;;  %v11035_v13 = vcombine.low %v1885_v55, %v1889_v59  ;;  %v11627_v59 = vld [vmem:[#allocation11 + $0x104] ss:$8 sps:$4 sm:$0xff]  }
 0x537   :  { %9416 = vmatprep.subr.bf16.mxu0 %v11579_v7  ;;  %v11601_v7 = vld [vmem:[#allocation11 + $0x80] ss:$8 sps:$4 sm:$0xff]   ;;  %v11044_v46 = vcombine.high %v1893_v49, %v1897_v61 }
 0x538   :  { %8516 = vmatmul.mubr.bf16.vlgmr.msra.gmra.mrb[24].mxu1 %v12485_v14  ;;  %v11583_v14 = vld [vmem:[#allocation11 + $0x20] ss:$8 sps:$4 sm:$0xff]  }
 0x539   :  { %8258 = vmatmul.mubr.bf16.vlgmr.msra.gmra.mrb[20].mxu0 %v12493_v50  ;;  %8527 = vmatpush1.bf16.msra.mxu1 %v10971_v25  ;;  %v1901_v25 = vld [vmem:[#allocation8 + $0x1a98] sm:$0xff] }
 0x53a   :  { %8558 = vmatprep.mubr.bf16.mxu1 %v12515_v2  ;;  %9417 = vmatpush1.bf16.msra.mxu0 %v11577_v26  ;;  %v1857_v2 = vld [vmem:[#allocation8 + $0x1938] sm:$0xff] }
 0x53b   :  { %9448 = vmatprep.mubr.bf16.mxu0 %v12569_v1  ;;  %8528 = vmatprep.subr.bf16.mxu1 %v10980_v27  ;;  %v11586_v1 = vld [vmem:[#allocation11 + $0x30] ss:$8 sps:$4 sm:$0xff]   ;;  %v11004_v38 = vcombine.high %v1853_v36, %v1857_v2  ;;  %v11003_v44 = vcombine.low %v1853_v36, %v1857_v2  ;;  %v11043_v27 = vcombine.low %v1893_v49, %v1897_v61  ;;  %v11615_v2 = vld [vmem:[#allocation11 + $0xc4] ss:$8 sps:$4 sm:$0xff]  }
 0x53c   :  { %9418 = vmatprep.subr.bf16.mxu0 %v11582_v28  ;;  %v1905_v26 = vld [vmem:[#allocation8 + $0x1ab8] sm:$0xff]  ;;  %v11609_v28 = vld [vmem:[#allocation11 + $0xa4] ss:$8 sps:$4 sm:$0xff]  }
 0x53d   :  { %8529 = vmatpush1.bf16.msra.mxu1 %v10979_v29  ;;  %v11052_v62 = vcombine.high %v1901_v25, %v1905_v26  ;;  %v1909_v29 = vld [vmem:[#allocation8 + $0x1ad8] sm:$0xff] }
 0x53e   :  { %9419 = vmatpush1.bf16.msra.mxu0 %v11580_v30  ;;  %8530 = vmatprep.subr.bf16.mxu1 %v10988_v12  ;;  %v1913_v30 = vld [vmem:[#allocation8 + $0x1af8] sm:$0xff]  ;;  %v11051_v12 = vcombine.low %v1901_v25, %v1905_v26  ;;  %v11633_v26 = vld [vmem:[#allocation11 + $0x124] ss:$8 sps:$4 sm:$0xff]  }
 0x53f   :  { %9420 = vmatprep.subr.bf16.mxu0 %v11585_v31  ;;  %v11607_v31 = vld [vmem:[#allocation11 + $0xa0] ss:$8 sps:$4 sm:$0xff]   ;;  %v11060_v32 = vcombine.high %v1909_v29, %v1913_v30  ;;  %v1965_v61 = vld [vmem:[#allocation8 + $0x1c98] sm:$0xff] }
 0x541   :  { %8531 = vmatpush1.bf16.msra.mxu1 %v10987_v34  ;;  %v1917_v34 = vld [vmem:[#allocation8 + $0x1b18] sm:$0xff] }
 0x542   :  { %9421 = vmatpush1.bf16.msra.mxu0 %v11583_v14  ;;  %8532 = vmatprep.subr.bf16.mxu1 %v10996_v54  ;;  %v1921_v14 = vld [vmem:[#allocation8 + $0x1b38] sm:$0xff]  ;;  %v11059_v54 = vcombine.low %v1909_v29, %v1913_v30 }
 0x543   :  { %9422 = vmatprep.subr.bf16.mxu0 %v11588_v35  ;;  %v11610_v35 = vld [vmem:[#allocation11 + $0xb0] ss:$8 sps:$4 sm:$0xff]   ;;  %v11068_v36 = vcombine.high %v1917_v34, %v1921_v14 }
 0x544   :  { %v1981_v29 = vld [vmem:[#allocation8 + $0x1d18] sm:$0xff] }
 0x545   :  { %8533 = vmatpush1.bf16.msra.mxu1 %v10995_v37  ;;  %v1925_v37 = vld [vmem:[#allocation8 + $0x1b58] sm:$0xff] }
 0x546   :  { %9423 = vmatpush1.bf16.msra.mxu0 %v11586_v1  ;;  %8534 = vmatprep.subr.bf16.mxu1 %v11004_v38  ;;  %v1929_v1 = vld [vmem:[#allocation8 + $0x1b78] sm:$0xff]  ;;  %v11067_v38 = vcombine.low %v1917_v34, %v1921_v14  ;;  %v11637_v14 = vld [vmem:[#allocation11 + $0x140] ss:$8 sps:$4 sm:$0xff]  }
 0x547   :  { %9424 = vmatprep.subr.bf16.mxu0 %v11591_v18  ;;  %v11613_v18 = vld [vmem:[#allocation11 + $0xc0] ss:$8 sps:$4 sm:$0xff]   ;;  %v11076_v39 = vcombine.high %v1925_v37, %v1929_v1 }
 0x549   :  { %8535 = vmatpush1.bf16.msra.mxu1 %v11003_v44  ;;  %v1933_v44 = vld [vmem:[#allocation8 + $0x1b98] sm:$0xff] }
 0x54a   :  { %9425 = vmatpush1.bf16.msra.mxu0 %v11589_v40  ;;  %8536 = vmatprep.subr.bf16.mxu1 %v11012_v63  ;;  %v1937_v40 = vld [vmem:[#allocation8 + $0x1bb8] sm:$0xff]  ;;  %v11075_v63 = vcombine.low %v1925_v37, %v1929_v1 }
 0x54b   :  { %9426 = vmatprep.subr.bf16.mxu0 %v11594_v10  ;;  %v11616_v10 = vld [vmem:[#allocation11 + $0xd0] ss:$8 sps:$4 sm:$0xff]   ;;  %v11084_v22 = vcombine.high %v1933_v44, %v1937_v40 }
 0x54c   :  { %v11640_v1 = vld [vmem:[#allocation11 + $0x150] ss:$8 sps:$4 sm:$0xff]  }
 0x54d   :  { %8537 = vmatpush1.bf16.msra.mxu1 %v11011_v42  ;;  %v1941_v42 = vld [vmem:[#allocation8 + $0x1bd8] sm:$0xff] }
 0x54e   :  { %9427 = vmatpush1.bf16.msra.mxu0 %v11592_v48  ;;  %8538 = vmatprep.subr.bf16.mxu1 %v11020_v43  ;;  %v1945_v48 = vld [vmem:[#allocation8 + $0x1bf8] sm:$0xff]  ;;  %v11083_v43 = vcombine.low %v1933_v44, %v1937_v40  ;;  %v11643_v40 = vld [vmem:[#allocation11 + $0x160] ss:$8 sps:$4 sm:$0xff]  }
 0x54f   :  { %9428 = vmatprep.subr.bf16.mxu0 %v11597_v24  ;;  %v11619_v24 = vld [vmem:[#allocation11 + $0xe0] ss:$8 sps:$4 sm:$0xff]   ;;  %v11092_v45 = vcombine.high %v1941_v42, %v1945_v48 }
 0x551   :  { %8539 = vmatpush1.bf16.msra.mxu1 %v11019_v52  ;;  %v1949_v52 = vld [vmem:[#allocation8 + $0x1c18] sm:$0xff] }
 0x552   :  { %9429 = vmatpush1.bf16.msra.mxu0 %v11595_v53  ;;  %8540 = vmatprep.subr.bf16.mxu1 %v11028_v57  ;;  %v1953_v53 = vld [vmem:[#allocation8 + $0x1c38] sm:$0xff]  ;;  %v11091_v57 = vcombine.low %v1941_v42, %v1945_v48 }
 0x553   :  { %9430 = vmatprep.subr.bf16.mxu0 %v11600_v19  ;;  %v11622_v19 = vld [vmem:[#allocation11 + $0xf0] ss:$8 sps:$4 sm:$0xff]   ;;  %v11100_v55 = vcombine.high %v1949_v52, %v1953_v53 }
 0x554   :  { %v11646_v48 = vld [vmem:[#allocation11 + $0x170] ss:$8 sps:$4 sm:$0xff]  }
 0x555   :  { %8541 = vmatpush1.bf16.msra.mxu1 %v11027_v4  ;;  %v1957_v4 = vld [vmem:[#allocation8 + $0x1c58] sm:$0xff] }
 0x556   :  { %9431 = vmatpush1.bf16.msra.mxu0 %v11598_v5  ;;  %8542 = vmatprep.subr.bf16.mxu1 %v11036_v8  ;;  %v1961_v5 = vld [vmem:[#allocation8 + $0x1c78] sm:$0xff]  ;;  %v11099_v8 = vcombine.low %v1949_v52, %v1953_v53  ;;  %v11649_v53 = vld [vmem:[#allocation11 + $0x180] ss:$8 sps:$4 sm:$0xff]  }
 0x557   :  { %9432 = vmatprep.subr.bf16.mxu0 %v11603_v21  ;;  %v11625_v21 = vld [vmem:[#allocation11 + $0x100] ss:$8 sps:$4 sm:$0xff]   ;;  %v11108_v49 = vcombine.high %v1957_v4, %v1961_v5 }
 0x559   :  { %8543 = vmatpush1.bf16.msra.mxu1 %v11035_v13  ;;  %v1969_v13 = vld [vmem:[#allocation8 + $0x1cb8] sm:$0xff] }
 0x55a   :  { %9433 = vmatpush1.bf16.msra.mxu0 %v11601_v7  ;;  %8544 = vmatprep.subr.bf16.mxu1 %v11044_v46  ;;  %v11630_v7 = vld [vmem:[#allocation11 + $0x114] ss:$8 sps:$4 sm:$0xff]   ;;  %v11107_v46 = vcombine.low %v1957_v4, %v1961_v5  ;;  %v11116_v25 = vcombine.high %v1965_v61, %v1969_v13  ;;  %v11652_v5 = vld [vmem:[#allocation11 + $0x190] ss:$8 sps:$4 sm:$0xff]  }
 0x55b   :  { %9434 = vmatprep.subr.bf16.mxu0 %v11606_v47  ;;  %v11628_v47 = vld [vmem:[#allocation11 + $0x110] ss:$8 sps:$4 sm:$0xff]  }
 0x55d   :  { %8545 = vmatpush1.bf16.msra.mxu1 %v11043_v27  ;;  %v1973_v27 = vld [vmem:[#allocation8 + $0x1cd8] sm:$0xff] }
 0x55e   :  { %9435 = vmatpush1.bf16.msra.mxu0 %v11604_v15  ;;  %8546 = vmatprep.subr.bf16.mxu1 %v11052_v62  ;;  %v1977_v15 = vld [vmem:[#allocation8 + $0x1cf8] sm:$0xff]  ;;  %v11115_v62 = vcombine.low %v1965_v61, %v1969_v13 }
 0x55f   :  { %9436 = vmatprep.subr.bf16.mxu0 %v11609_v28  ;;  %v11636_v28 = vld [vmem:[#allocation11 + $0x134] ss:$8 sps:$4 sm:$0xff]   ;;  %v11123_v30 = vcombine.low %v1973_v27, %v1977_v15 }
 0x560   :  { %v2041_v61 = vld [vmem:[#allocation8 + $0x1ef8] sm:$0xff] }
 0x561   :  { %8547 = vmatpush1.bf16.msra.mxu1 %v11051_v12 }
 0x562   :  { %9437 = vmatpush1.bf16.msra.mxu0 %v11607_v31  ;;  %8548 = vmatprep.subr.bf16.mxu1 %v11060_v32  ;;  %v11639_v31 = vld [vmem:[#allocation11 + $0x144] ss:$8 sps:$4 sm:$0xff]   ;;  %v1989_v32 = vld [vmem:[#allocation8 + $0x1d58] sm:$0xff] }
 0x563   :  { %9438 = vmatprep.subr.bf16.mxu0 %v11612_v56  ;;  %v1993_v56 = vld [vmem:[#allocation8 + $0x1d78] sm:$0xff] }
 0x564   :  { %v11139_v37 = vcombine.low %v1989_v32, %v1993_v56 }
 0x565   :  { %8549 = vmatpush1.bf16.msra.mxu1 %v11059_v54  ;;  %v11140_v54 = vcombine.high %v1989_v32, %v1993_v56  ;;  %v11664_v56 = vld [vmem:[#allocation11 + $0x1d0] ss:$8 sps:$4 sm:$0xff]  }
 0x566   :  { %9439 = vmatpush1.bf16.msra.mxu0 %v11610_v35  ;;  %8550 = vmatprep.subr.bf16.mxu1 %v11068_v36  ;;  %v11642_v35 = vld [vmem:[#allocation11 + $0x154] ss:$8 sps:$4 sm:$0xff]  }
 0x567   :  { %9440 = vmatprep.subr.bf16.mxu0 %v11615_v2  ;;  %v1997_v36 = vld [vmem:[#allocation8 + $0x1d98] sm:$0xff] }
 0x568   :  { %v2001_v2 = vld [vmem:[#allocation8 + $0x1db8] sm:$0xff] }
 0x569   :  { %8551 = vmatpush1.bf16.msra.mxu1 %v11067_v38  ;;  %v11148_v38 = vcombine.high %v1997_v36, %v2001_v2  ;;  %v11147_v44 = vcombine.low %v1997_v36, %v2001_v2  ;;  %v11667_v2 = vld [vmem:[#allocation11 + $0x1e0] ss:$8 sps:$4 sm:$0xff]  }
 0x56a   :  { %9441 = vmatpush1.bf16.msra.mxu0 %v11613_v18  ;;  %8552 = vmatprep.subr.bf16.mxu1 %v11076_v39  ;;  %v11645_v18 = vld [vmem:[#allocation11 + $0x164] ss:$8 sps:$4 sm:$0xff]   ;;  %v2005_v39 = vld [vmem:[#allocation8 + $0x1dd8] sm:$0xff] }
 0x56b   :  { %9442 = vmatprep.subr.bf16.mxu0 %v11618_v3  ;;  %v2009_v3 = vld [vmem:[#allocation8 + $0x1df8] sm:$0xff] }
 0x56c   :  { %v11155_v42 = vcombine.low %v2005_v39, %v2009_v3 }
 0x56d   :  { %8553 = vmatpush1.bf16.msra.mxu1 %v11075_v63  ;;  %v11156_v63 = vcombine.high %v2005_v39, %v2009_v3  ;;  %v11675_v39 = vld [vmem:[#allocation11 + $0x204] ss:$8 sps:$4 sm:$0xff]   ;;  %v11673_v3 = vld [vmem:[#allocation11 + $0x200] ss:$8 sps:$4 sm:$0xff]  }
 0x56e   :  { %9443 = vmatpush1.bf16.msra.mxu0 %v11616_v10  ;;  %8554 = vmatprep.subr.bf16.mxu1 %v11084_v22  ;;  %v11648_v10 = vld [vmem:[#allocation11 + $0x174] ss:$8 sps:$4 sm:$0xff]  }
 0x56f   :  { %9444 = vmatprep.subr.bf16.mxu0 %v11621_v41  ;;  %v2013_v22 = vld [vmem:[#allocation8 + $0x1e18] sm:$0xff] }
 0x570   :  { %v2017_v41 = vld [vmem:[#allocation8 + $0x1e38] sm:$0xff] }
 0x571   :  { %8555 = vmatpush1.bf16.msra.mxu1 %v11083_v43  ;;  %v11164_v43 = vcombine.high %v2013_v22, %v2017_v41  ;;  %v11163_v52 = vcombine.low %v2013_v22, %v2017_v41  ;;  %v11684_v22 = vld [vmem:[#allocation11 + $0x234] ss:$8 sps:$4 sm:$0xff]   ;;  %v11682_v41 = vld [vmem:[#allocation11 + $0x230] ss:$8 sps:$4 sm:$0xff]  }
 0x572   :  { %9445 = vmatpush1.bf16.msra.mxu0 %v11619_v24  ;;  %8556 = vmatprep.subr.bf16.mxu1 %v11092_v45  ;;  %v11651_v24 = vld [vmem:[#allocation11 + $0x184] ss:$8 sps:$4 sm:$0xff]   ;;  %v2021_v45 = vld [vmem:[#allocation8 + $0x1e58] sm:$0xff] }
 0x573   :  { %9446 = vmatprep.subr.bf16.mxu0 %v11624_v51  ;;  %v2025_v51 = vld [vmem:[#allocation8 + $0x1e78] sm:$0xff] }
 0x574   :  { %v11171_v4 = vcombine.low %v2021_v45, %v2025_v51 }
 0x575   :  { %8557 = vmatpush1.bf16.msra.mxu1 %v11091_v57  ;;  %v11172_v57 = vcombine.high %v2021_v45, %v2025_v51  ;;  %v11696_v45 = vld [vmem:[#allocation11 + $0x274] ss:$8 sps:$4 sm:$0xff]   ;;  %v11694_v51 = vld [vmem:[#allocation11 + $0x270] ss:$8 sps:$4 sm:$0xff]  }
 0x576   :  { %9447 = vmatpush1.bf16.msra.mxu0 %v11622_v19  ;;  %8569 = vmatprep.subr.bf16.mxu1 %v11100_v55  ;;  %v11654_v19 = vld [vmem:[#allocation11 + $0x194] ss:$8 sps:$4 sm:$0xff]  }
 0x577   :  { %9459 = vmatprep.subr.bf16.mxu0 %v11627_v59  ;;  %v2029_v55 = vld [vmem:[#allocation8 + $0x1e98] sm:$0xff] }
 0x578   :  { %8559 = vmatmul.mubr.bf16.vlgmr.msra.gmra.mrb[24].mxu1 %v12513_v58  ;;  %v11631_v58 = vld [vmem:[#allocation11 + $0x120] ss:$8 sps:$4 sm:$0xff]   ;;  %v2033_v59 = vld [vmem:[#allocation8 + $0x1eb8] sm:$0xff] }
 0x579   :  { %9449 = vmatmul.mubr.bf16.vlgmr.msra.gmra.mrb[24].mxu0 %v12567_v60  ;;  %8570 = vmatpush1.bf16.msra.mxu1 %v11099_v8  ;;  %v11124_v60 = vcombine.high %v1973_v27, %v1977_v15  ;;  %v11180_v8 = vcombine.high %v2029_v55, %v2033_v59  ;;  %v11179_v13 = vcombine.low %v2029_v55, %v2033_v59  ;;  %v11658_v15 = vld [vmem:[#allocation11 + $0x1b0] ss:$8 sps:$4 sm:$0xff]   ;;  %v11705_v55 = vld [vmem:[#allocation11 + $0x2a4] ss:$8 sps:$4 sm:$0xff]   ;;  %v11703_v59 = vld [vmem:[#allocation11 + $0x2a0] ss:$8 sps:$4 sm:$0xff]  }
 0x57a   :  { %8601 = vmatprep.mubr.bf16.mxu1 %v12495_v23  ;;  %9460 = vmatpush1.bf16.msra.mxu0 %v11625_v21  ;;  %v1985_v23 = vld [vmem:[#allocation8 + $0x1d38] sm:$0xff]  ;;  %v11657_v21 = vld [vmem:[#allocation11 + $0x1a4] ss:$8 sps:$4 sm:$0xff]  }
 0x57b   :  { %9491 = vmatprep.mubr.bf16.mxu0 %v12585_v33  ;;  %8571 = vmatprep.subr.bf16.mxu1 %v11108_v49  ;;  %v11634_v33 = vld [vmem:[#allocation11 + $0x130] ss:$8 sps:$4 sm:$0xff]   ;;  %v11132_v12 = vcombine.high %v1981_v29, %v1985_v23  ;;  %v11131_v34 = vcombine.low %v1981_v29, %v1985_v23  ;;  %v11661_v23 = vld [vmem:[#allocation11 + $0x1c0] ss:$8 sps:$4 sm:$0xff]  }
 0x57c   :  { %9461 = vmatprep.subr.bf16.mxu0 %v11630_v7  ;;  %v2037_v49 = vld [vmem:[#allocation8 + $0x1ed8] sm:$0xff]  ;;  %v11655_v7 = vld [vmem:[#allocation11 + $0x1a0] ss:$8 sps:$4 sm:$0xff]  }
 0x57d   :  { %8572 = vmatpush1.bf16.msra.mxu1 %v11107_v46  ;;  %v11188_v46 = vcombine.high %v2037_v49, %v2041_v61  ;;  %v11187_v27 = vcombine.low %v2037_v49, %v2041_v61  ;;  %v11714_v49 = vld [vmem:[#allocation11 + $0x2d4] ss:$8 sps:$4 sm:$0xff]   ;;  %v11712_v61 = vld [vmem:[#allocation11 + $0x2d0] ss:$8 sps:$4 sm:$0xff]  }
 0x57e   :  { %9462 = vmatpush1.bf16.msra.mxu0 %v11628_v47  ;;  %8573 = vmatprep.subr.bf16.mxu1 %v11116_v25  ;;  %v11660_v47 = vld [vmem:[#allocation11 + $0x1b4] ss:$8 sps:$4 sm:$0xff]  }
 0x57f   :  { %9463 = vmatprep.subr.bf16.mxu0 %v11633_v26  ;;  %v2045_v25 = vld [vmem:[#allocation8 + $0x1f18] sm:$0xff] }
 0x580   :  { %v2049_v26 = vld [vmem:[#allocation8 + $0x1f38] sm:$0xff] }
 0x581   :  { %8574 = vmatpush1.bf16.msra.mxu1 %v11115_v62  ;;  %v11196_v62 = vcombine.high %v2045_v25, %v2049_v26  ;;  %v11195_v29 = vcombine.low %v2045_v25, %v2049_v26  ;;  %v11723_v25 = vld [vmem:[#allocation11 + $0x304] ss:$8 sps:$4 sm:$0xff]   ;;  %v12605_v26 = vld [vmem:[#allocation10] sm:$0xff] }
 0x582   :  { %9464 = vmatpush1.bf16.msra.mxu0 %v11631_v58  ;;  %8575 = vmatprep.subr.bf16.mxu1 %v11124_v60  ;;  %v11663_v58 = vld [vmem:[#allocation11 + $0x1c4] ss:$8 sps:$4 sm:$0xff]   ;;  %v2053_v60 = vld [vmem:[#allocation8 + $0x1f58] sm:$0xff] }
 0x583   :  { %9465 = vmatprep.subr.bf16.mxu0 %v11636_v28  ;;  %v2057_v28 = vld [vmem:[#allocation8 + $0x1f78] sm:$0xff] }
 0x584   :  { %v11203_v32 = vcombine.low %v2053_v60, %v2057_v28 }
 0x585   :  { %8576 = vmatpush1.bf16.msra.mxu1 %v11123_v30  ;;  %v11204_v30 = vcombine.high %v2053_v60, %v2057_v28 }
 0x586   :  { %9466 = vmatpush1.bf16.msra.mxu0 %v11634_v33  ;;  %8577 = vmatprep.subr.bf16.mxu1 %v11132_v12  ;;  %v11666_v33 = vld [vmem:[#allocation11 + $0x1d4] ss:$8 sps:$4 sm:$0xff]  }
 0x587   :  { %9467 = vmatprep.subr.bf16.mxu0 %v11639_v31  ;;  %v2061_v12 = vld [vmem:[#allocation8 + $0x1f98] sm:$0xff] }
 0x588   :  { %v2065_v31 = vld [vmem:[#allocation8 + $0x1fb8] sm:$0xff] }
 0x589   :  { %8578 = vmatpush1.bf16.msra.mxu1 %v11131_v34  ;;  %v11212_v34 = vcombine.high %v2061_v12, %v2065_v31  ;;  %v11211_v36 = vcombine.low %v2061_v12, %v2065_v31 }
 0x58a   :  { %9468 = vmatpush1.bf16.msra.mxu0 %v11637_v14  ;;  %8579 = vmatprep.subr.bf16.mxu1 %v11140_v54  ;;  %v11669_v14 = vld [vmem:[#allocation11 + $0x1e4] ss:$8 sps:$4 sm:$0xff]   ;;  %v2069_v54 = vld [vmem:[#allocation8 + $0x1fd8] sm:$0xff] }
 0x58b   :  { %9469 = vmatprep.subr.bf16.mxu0 %v11642_v35  ;;  %v2073_v35 = vld [vmem:[#allocation8 + $0x1ff8] sm:$0xff] }
 0x58d   :  { %8580 = vmatpush1.bf16.msra.mxu1 %v11139_v37  ;;  %v11220_v37 = vcombine.high %v2069_v54, %v2073_v35 }
 0x58e   :  { %9470 = vmatpush1.bf16.msra.mxu0 %v11640_v1  ;;  %8581 = vmatprep.subr.bf16.mxu1 %v11148_v38  ;;  %v11672_v1 = vld [vmem:[#allocation11 + $0x1f4] ss:$8 sps:$4 sm:$0xff]   ;;  %v11219_v38 = vcombine.low %v2069_v54, %v2073_v35  ;;  %v11721_v54 = vld [vmem:[#allocation11 + $0x300] ss:$8 sps:$4 sm:$0xff]  }
 0x58f   :  { %9471 = vmatprep.subr.bf16.mxu0 %v11645_v18  ;;  %v11670_v18 = vld [vmem:[#allocation11 + $0x1f0] ss:$8 sps:$4 sm:$0xff]   ;;  %v11726_v35 = vld [vmem:[#allocation11 + $0x314] ss:$8 sps:$4 sm:$0xff]  }
 0x591   :  { %8582 = vmatpush1.bf16.msra.mxu1 %v11147_v44  ;;  %v11678_v44 = vld [vmem:[#allocation11 + $0x214] ss:$8 sps:$4 sm:$0xff]  }
 0x592   :  { %9472 = vmatpush1.bf16.msra.mxu0 %v11643_v40  ;;  %8583 = vmatprep.subr.bf16.mxu1 %v11156_v63  ;;  %v11676_v40 = vld [vmem:[#allocation11 + $0x210] ss:$8 sps:$4 sm:$0xff]   ;;  %v11681_v63 = vld [vmem:[#allocation11 + $0x224] ss:$8 sps:$4 sm:$0xff]  }
 0x593   :  { %9473 = vmatprep.subr.bf16.mxu0 %v11648_v10  ;;  %v11679_v10 = vld [vmem:[#allocation11 + $0x220] ss:$8 sps:$4 sm:$0xff]  }
 0x595   :  { %8584 = vmatpush1.bf16.msra.mxu1 %v11155_v42  ;;  %v11687_v42 = vld [vmem:[#allocation11 + $0x244] ss:$8 sps:$4 sm:$0xff]  }
 0x596   :  { %9474 = vmatpush1.bf16.msra.mxu0 %v11646_v48  ;;  %8585 = vmatprep.subr.bf16.mxu1 %v11164_v43  ;;  %v11685_v48 = vld [vmem:[#allocation11 + $0x240] ss:$8 sps:$4 sm:$0xff]   ;;  %v11690_v43 = vld [vmem:[#allocation11 + $0x254] ss:$8 sps:$4 sm:$0xff]  }
 0x597   :  { %9475 = vmatprep.subr.bf16.mxu0 %v11651_v24  ;;  %v11691_v24 = vld [vmem:[#allocation11 + $0x260] ss:$8 sps:$4 sm:$0xff]  }
 0x599   :  { %8586 = vmatpush1.bf16.msra.mxu1 %v11163_v52  ;;  %v11699_v52 = vld [vmem:[#allocation11 + $0x284] ss:$8 sps:$4 sm:$0xff]  }
 0x59a   :  { %9476 = vmatpush1.bf16.msra.mxu0 %v11649_v53  ;;  %8587 = vmatprep.subr.bf16.mxu1 %v11172_v57  ;;  %v11697_v53 = vld [vmem:[#allocation11 + $0x280] ss:$8 sps:$4 sm:$0xff]   ;;  %v11702_v57 = vld [vmem:[#allocation11 + $0x294] ss:$8 sps:$4 sm:$0xff]  }
 0x59b   :  { %9477 = vmatprep.subr.bf16.mxu0 %v11654_v19  ;;  %v11700_v19 = vld [vmem:[#allocation11 + $0x290] ss:$8 sps:$4 sm:$0xff]  }
 0x59d   :  { %8588 = vmatpush1.bf16.msra.mxu1 %v11171_v4  ;;  %v11708_v4 = vld [vmem:[#allocation11 + $0x2b4] ss:$8 sps:$4 sm:$0xff]  }
 0x59e   :  { %9478 = vmatpush1.bf16.msra.mxu0 %v11652_v5  ;;  %8589 = vmatprep.subr.bf16.mxu1 %v11180_v8  ;;  %v11706_v5 = vld [vmem:[#allocation11 + $0x2b0] ss:$8 sps:$4 sm:$0xff]   ;;  %v11711_v8 = vld [vmem:[#allocation11 + $0x2c4] ss:$8 sps:$4 sm:$0xff]  }
 0x59f   :  { %9479 = vmatprep.subr.bf16.mxu0 %v11657_v21  ;;  %v11709_v21 = vld [vmem:[#allocation11 + $0x2c0] ss:$8 sps:$4 sm:$0xff]  }
 0x5a1   :  { %8590 = vmatpush1.bf16.msra.mxu1 %v11179_v13  ;;  %v11717_v13 = vld [vmem:[#allocation11 + $0x2e4] ss:$8 sps:$4 sm:$0xff]  }
 0x5a2   :  { %9480 = vmatpush1.bf16.msra.mxu0 %v11655_v7  ;;  %8591 = vmatprep.subr.bf16.mxu1 %v11188_v46  ;;  %v11715_v7 = vld [vmem:[#allocation11 + $0x2e0] ss:$8 sps:$4 sm:$0xff]   ;;  %v11720_v46 = vld [vmem:[#allocation11 + $0x2f4] ss:$8 sps:$4 sm:$0xff]  }
 0x5a3   :  { %9481 = vmatprep.subr.bf16.mxu0 %v11660_v47  ;;  %v11718_v47 = vld [vmem:[#allocation11 + $0x2f0] ss:$8 sps:$4 sm:$0xff]  }
 0x5a5   :  { %8592 = vmatpush1.bf16.msra.mxu1 %v11187_v27  ;;  %v2095_v27 = vrot.slane %v12605_v26, %v12443_v0  ;;  %v11769_v0 = vld [vmem:[#allocation16] ss:$8 sps:$4 sm:$0xff]  }
 0x5a6   :  { %9482 = vmatpush1.bf16.msra.mxu0 %v11658_v15  ;;  %8593 = vmatprep.subr.bf16.mxu1 %v11196_v62  ;;  %v2099_v15 = vrot.slane %v12605_v26, %v12446_v6  ;;  %v11774_v6 = vld [vmem:[#allocation16 + $0x14] ss:$8 sps:$4 sm:$0xff]  }
 0x5a7   :  { %9483 = vmatprep.subr.bf16.mxu0 %v11663_v58 }
 0x5a9   :  { %8594 = vmatpush1.bf16.msra.mxu1 %v11195_v29 }
 0x5aa   :  { %9484 = vmatpush1.bf16.msra.mxu0 %v11661_v23  ;;  %8595 = vmatprep.subr.bf16.mxu1 %v11204_v30 }
 0x5ab   :  { %9485 = vmatprep.subr.bf16.mxu0 %v11666_v33 }
 0x5ad   :  { %8596 = vmatpush1.bf16.msra.mxu1 %v11203_v32 }
 0x5ae   :  { %9486 = vmatpush1.bf16.msra.mxu0 %v11664_v56  ;;  %8597 = vmatprep.subr.bf16.mxu1 %v11212_v34 }
 0x5af   :  { %9487 = vmatprep.subr.bf16.mxu0 %v11669_v14 }
 0x5b1   :  { %8598 = vmatpush1.bf16.msra.mxu1 %v11211_v36  ;;  %v11771_v36 = vld [vmem:[#allocation16 + $0x4] ss:$8 sps:$4 sm:$0xff]  }
 0x5b2   :  { %9488 = vmatpush1.bf16.msra.mxu0 %v11667_v2  ;;  %8599 = vmatprep.subr.bf16.mxu1 %v11220_v37  ;;  %v11724_v2 = vld [vmem:[#allocation11 + $0x310] ss:$8 sps:$4 sm:$0xff]   ;;  %v11729_v37 = vld [vmem:[#allocation11 + $0x324] ss:$8 sps:$4 sm:$0xff]  }
 0x5b3   :  { %9489 = vmatprep.subr.bf16.mxu0 %v11672_v1  ;;  %v11772_v1 = vld [vmem:[#allocation16 + $0x10] ss:$8 sps:$4 sm:$0xff]  }
 0x5b5   :  { %8600 = vmatpush1.bf16.msra.mxu1 %v11219_v38  ;;  %v11777_v38 = vld [vmem:[#allocation16 + $0x24] ss:$8 sps:$4 sm:$0xff]  }
 0x5b6   :  { %9490 = vmatpush1.bf16.msra.mxu0 %v11670_v18  ;;  %9824 = vmatprep.subr.bf16.mxu1 %v11771_v36  ;;  %v11727_v18 = vld [vmem:[#allocation11 + $0x320] ss:$8 sps:$4 sm:$0xff]  }
 0x5b7   :  { %9502 = vmatprep.subr.bf16.mxu0 %v11675_v39  ;;  %v11732_v39 = vld [vmem:[#allocation11 + $0x334] ss:$8 sps:$4 sm:$0xff]  }
 0x5b8   :  { %8602 = vmatmul.mubr.bf16.vlgmr.msra.gmra.mrb[24].mxu1 %v12493_v50  ;;  %v11688_v50 = vld [vmem:[#allocation11 + $0x250] ss:$8 sps:$4 sm:$0xff]  }
 0x5b9   :  { %9492 = vmatmul.mubr.bf16.vlgmr.msra.gmra.mrb[24].mxu0 %v12583_v16  ;;  %v11693_v16 = vld [vmem:[#allocation11 + $0x264] ss:$8 sps:$4 sm:$0xff]   ;;  %9825 = vmatpush1.bf16.msra.mxu1 %v11769_v0 }
 0x5ba   :  { %9503 = vmatpush1.bf16.msra.mxu0 %v11673_v3  ;;  %9826 = vmatprep.subr.bf16.mxu1 %v11774_v6  ;;  %v11775_v3 = vld [vmem:[#allocation16 + $0x20] ss:$8 sps:$4 sm:$0xff]  }
 0x5bb   :  { %9504 = vmatprep.subr.bf16.mxu0 %v11678_v44  ;;  %v11780_v44 = vld [vmem:[#allocation16 + $0x34] ss:$8 sps:$4 sm:$0xff]  }
 0x5bd   :  { %9827 = vmatpush1.bf16.msra.mxu1 %v11772_v1 }
 0x5be   :  { %9505 = vmatpush1.bf16.msra.mxu0 %v11676_v40  ;;  %9828 = vmatprep.subr.bf16.mxu1 %v11777_v38  ;;  %v11730_v40 = vld [vmem:[#allocation11 + $0x330] ss:$8 sps:$4 sm:$0xff]  }
 0x5bf   :  { %9506 = vmatprep.subr.bf16.mxu0 %v11681_v63  ;;  %v11735_v63 = vld [vmem:[#allocation11 + $0x344] ss:$8 sps:$4 sm:$0xff]  }
 0x5c1   :  { %9829 = vmatpush1.bf16.msra.mxu1 %v11775_v3 }
 0x5c2   :  { %9507 = vmatpush1.bf16.msra.mxu0 %v11679_v10  ;;  %v11778_v10 = vld [vmem:[#allocation16 + $0x30] ss:$8 sps:$4 sm:$0xff]   ;;  %9830 = vmatprep.subr.bf16.mxu1 %v11780_v44 }
 0x5c3   :  { %9508 = vmatprep.subr.bf16.mxu0 %v11684_v22  ;;  %v11783_v22 = vld [vmem:[#allocation16 + $0x44] ss:$8 sps:$4 sm:$0xff]  }
 0x5c5   :  { %9831 = vmatpush1.bf16.msra.mxu1 %v11778_v10  ;;  %v11816_v10 = vld [vmem:[#allocation16 + $0xf4] ss:$8 sps:$4 sm:$0xff]  }
 0x5c6   :  { %9509 = vmatpush1.bf16.msra.mxu0 %v11682_v41  ;;  %v11733_v41 = vld [vmem:[#allocation11 + $0x340] ss:$8 sps:$4 sm:$0xff]   ;;  %9832 = vmatprep.subr.bf16.mxu1 %v11783_v22  ;;  %v11814_v22 = vld [vmem:[#allocation16 + $0xf0] ss:$8 sps:$4 sm:$0xff]  }
 0x5c7   :  { %9510 = vmatprep.subr.bf16.mxu0 %v11687_v42  ;;  %v11738_v42 = vld [vmem:[#allocation11 + $0x354] ss:$8 sps:$4 sm:$0xff]  }
 0x5ca   :  { %9511 = vmatpush1.bf16.msra.mxu0 %v11685_v48  ;;  %v11781_v48 = vld [vmem:[#allocation16 + $0x40] ss:$8 sps:$4 sm:$0xff]  }
 0x5cb   :  { %9512 = vmatprep.subr.bf16.mxu0 %v11690_v43  ;;  %v11786_v43 = vld [vmem:[#allocation16 + $0x54] ss:$8 sps:$4 sm:$0xff]   ;;  %9833 = vmatpush1.bf16.msra.mxu1 %v11781_v48 }
 0x5cc   :  { %9834 = vmatprep.subr.bf16.mxu1 %v11786_v43 }
 0x5ce   :  { %9513 = vmatpush1.bf16.msra.mxu0 %v11688_v50  ;;  %v11736_v50 = vld [vmem:[#allocation11 + $0x350] ss:$8 sps:$4 sm:$0xff]  }
 0x5cf   :  { %9514 = vmatprep.subr.bf16.mxu0 %v11693_v16  ;;  %v11741_v16 = vld [vmem:[#allocation11 + $0x364] ss:$8 sps:$4 sm:$0xff]  }
 0x5d2   :  { %9515 = vmatpush1.bf16.msra.mxu0 %v11691_v24  ;;  %v11784_v24 = vld [vmem:[#allocation16 + $0x50] ss:$8 sps:$4 sm:$0xff]  }
 0x5d3   :  { %9516 = vmatprep.subr.bf16.mxu0 %v11696_v45  ;;  %v11789_v45 = vld [vmem:[#allocation16 + $0x64] ss:$8 sps:$4 sm:$0xff]   ;;  %9835 = vmatpush1.bf16.msra.mxu1 %v11784_v24 }
 0x5d4   :  { %9836 = vmatprep.subr.bf16.mxu1 %v11789_v45 }
 0x5d6   :  { %9517 = vmatpush1.bf16.msra.mxu0 %v11694_v51  ;;  %v11739_v51 = vld [vmem:[#allocation11 + $0x360] ss:$8 sps:$4 sm:$0xff]  }
 0x5d7   :  { %9518 = vmatprep.subr.bf16.mxu0 %v11699_v52  ;;  %v11744_v52 = vld [vmem:[#allocation11 + $0x374] ss:$8 sps:$4 sm:$0xff]  }
 0x5da   :  { %9519 = vmatpush1.bf16.msra.mxu0 %v11697_v53  ;;  %v11787_v53 = vld [vmem:[#allocation16 + $0x60] ss:$8 sps:$4 sm:$0xff]  }
 0x5db   :  { %9520 = vmatprep.subr.bf16.mxu0 %v11702_v57  ;;  %v11792_v57 = vld [vmem:[#allocation16 + $0x74] ss:$8 sps:$4 sm:$0xff]   ;;  %9837 = vmatpush1.bf16.msra.mxu1 %v11787_v53 }
 0x5dc   :  { %9838 = vmatprep.subr.bf16.mxu1 %v11792_v57 }
 0x5de   :  { %9521 = vmatpush1.bf16.msra.mxu0 %v11700_v19  ;;  %v11742_v19 = vld [vmem:[#allocation11 + $0x370] ss:$8 sps:$4 sm:$0xff]  }
 0x5df   :  { %9522 = vmatprep.subr.bf16.mxu0 %v11705_v55  ;;  %v11747_v55 = vld [vmem:[#allocation11 + $0x384] ss:$8 sps:$4 sm:$0xff]  }
 0x5e2   :  { %9523 = vmatpush1.bf16.msra.mxu0 %v11703_v59  ;;  %v11790_v59 = vld [vmem:[#allocation16 + $0x70] ss:$8 sps:$4 sm:$0xff]  }
 0x5e3   :  { %9524 = vmatprep.subr.bf16.mxu0 %v11708_v4  ;;  %v11795_v4 = vld [vmem:[#allocation16 + $0x84] ss:$8 sps:$4 sm:$0xff]   ;;  %9839 = vmatpush1.bf16.msra.mxu1 %v11790_v59 }
 0x5e4   :  { %9840 = vmatprep.subr.bf16.mxu1 %v11795_v4 }
 0x5e6   :  { %9525 = vmatpush1.bf16.msra.mxu0 %v11706_v5  ;;  %v11745_v5 = vld [vmem:[#allocation11 + $0x380] ss:$8 sps:$4 sm:$0xff]  }
 0x5e7   :  { %9526 = vmatprep.subr.bf16.mxu0 %v11711_v8  ;;  %v11750_v8 = vld [vmem:[#allocation11 + $0x394] ss:$8 sps:$4 sm:$0xff]  }
 0x5ea   :  { %9527 = vmatpush1.bf16.msra.mxu0 %v11709_v21  ;;  %v11793_v21 = vld [vmem:[#allocation16 + $0x80] ss:$8 sps:$4 sm:$0xff]  }
 0x5eb   :  { %9528 = vmatprep.subr.bf16.mxu0 %v11714_v49  ;;  %v11798_v49 = vld [vmem:[#allocation16 + $0x94] ss:$8 sps:$4 sm:$0xff]   ;;  %9841 = vmatpush1.bf16.msra.mxu1 %v11793_v21 }
 0x5ec   :  { %9842 = vmatprep.subr.bf16.mxu1 %v11798_v49  ;;  %v11817_v49 = vld [vmem:[#allocation14] ss:$8 sps:$4 sm:$0xff]  }
 0x5ee   :  { %9529 = vmatpush1.bf16.msra.mxu0 %v11712_v61  ;;  %v11748_v61 = vld [vmem:[#allocation11 + $0x390] ss:$8 sps:$4 sm:$0xff]  }
 0x5ef   :  { %9530 = vmatprep.subr.bf16.mxu0 %v11717_v13  ;;  %v11753_v13 = vld [vmem:[#allocation11 + $0x3a4] ss:$8 sps:$4 sm:$0xff]  }
 0x5f2   :  { %9531 = vmatpush1.bf16.msra.mxu0 %v11715_v7  ;;  %v11796_v7 = vld [vmem:[#allocation16 + $0x90] ss:$8 sps:$4 sm:$0xff]  }
 0x5f3   :  { %9532 = vmatprep.subr.bf16.mxu0 %v11720_v46  ;;  %v11801_v46 = vld [vmem:[#allocation16 + $0xa4] ss:$8 sps:$4 sm:$0xff]   ;;  %9843 = vmatpush1.bf16.msra.mxu1 %v11796_v7  ;;  %v11820_v7 = vld [vmem:[#allocation14 + $0x10] ss:$8 sps:$4 sm:$0xff]  }
 0x5f4   :  { %9844 = vmatprep.subr.bf16.mxu1 %v11801_v46  ;;  %v11825_v46 = vld [vmem:[#allocation14 + $0x24] ss:$8 sps:$4 sm:$0xff]  }
 0x5f6   :  { %9533 = vmatpush1.bf16.msra.mxu0 %v11718_v47  ;;  %v11751_v47 = vld [vmem:[#allocation11 + $0x3a0] ss:$8 sps:$4 sm:$0xff]  }
 0x5f7   :  { %9545 = vmatprep.subr.bf16.mxu0 %v11723_v25  ;;  %v11756_v25 = vld [vmem:[#allocation11 + $0x3b4] ss:$8 sps:$4 sm:$0xff]  }
 0x60c   :  { %v8259_v62 = vpop.f32.mrb[20].mxu0 }
 0x60d   :  { %v11427_v58 = vadd.f32 %v8259_v62, %v2095_v27  ;;  %v8261_v60 = vpop.f32.mrb[21].mxu0  ;;  %v11754_v62 = vld [vmem:[#allocation11 + $0x3b0] ss:$8 sps:$4 sm:$0xff]  }
 0x60e   :  { %v11428_v28 = vadd.f32 %v8261_v60, %v2099_v15  ;;  %v8263_v29 = vpop.f32.mrb[22].mxu0  ;;  %v11802_v60 = vld [vmem:[#allocation16 + $0xb0] ss:$8 sps:$4 sm:$0xff]  }
 0x60f   :  { %v11429_v23 = vadd.f32 %v8263_v29, %v2095_v27  ;;  %v8265_v30 = vpop.f32.mrb[23].mxu0  ;;  %v8616_v12 = vmax.f32 %v11427_v58, 0.0  ;;  %v11799_v27 = vld [vmem:[#allocation16 + $0xa0] ss:$8 sps:$4 sm:$0xff]  }
 0x610   :  { %v11430_v33 = vadd.f32 %v8265_v30, %v2099_v15  ;;  %v8617_v32 = vmax.f32 %v11428_v28, 0.0  ;;  %v11804_v15 = vld [vmem:[#allocation16 + $0xb4] ss:$8 sps:$4 sm:$0xff]   ;;  %v11759_v58 = vld [vmem:[#allocation11 + $0x3c4] ss:$8 sps:$4 sm:$0xff]   ;;  %9845 = vmatpush1.bf16.msra.mxu1 %v11799_v27 }
 0x611   :  { %v8624_v31 = vmax.f32 %v11429_v23, 0.0  ;;  %9846 = vmatprep.subr.bf16.mxu1 %v11804_v15  ;;  %v11807_v28 = vld [vmem:[#allocation16 + $0xc4] ss:$8 sps:$4 sm:$0xff]   ;;  %v11762_v23 = vld [vmem:[#allocation11 + $0x3d4] ss:$8 sps:$4 sm:$0xff]  }
 0x612   :  { %v8625_v56 = vmax.f32 %v11430_v33, 0.0  ;;  %v11757_v29 = vld [vmem:[#allocation11 + $0x3c0] ss:$8 sps:$4 sm:$0xff]   ;;  %v11760_v33 = vld [vmem:[#allocation11 + $0x3d0] ss:$8 sps:$4 sm:$0xff]  }
 0x613   :  { %v8632_v34 = vpack.c.bf16 %v8624_v31, %v8616_v12  ;;  %v11805_v30 = vld [vmem:[#allocation16 + $0xc0] ss:$8 sps:$4 sm:$0xff]   ;;  %v11826_v27 = vld [vmem:[#allocation14 + $0x30] ss:$8 sps:$4 sm:$0xff]   ;;  %v11831_v15 = vld [vmem:[#allocation14 + $0x44] ss:$8 sps:$4 sm:$0xff]  }
 0x614   :  { %v8633_v14 = vpack.c.bf16 %v8625_v56, %v8617_v32  ;;  %9847 = vmatpush1.bf16.msra.mxu1 %v11802_v60  ;;  %v11765_v12 = vld [vmem:[#allocation11 + $0x3e4] ss:$8 sps:$4 sm:$0xff]   ;;  %v11763_v31 = vld [vmem:[#allocation11 + $0x3e0] ss:$8 sps:$4 sm:$0xff]   ;;  %v11768_v32 = vld [vmem:[#allocation11 + $0x3f4] ss:$8 sps:$4 sm:$0xff]  }
 0x615   :  { %9848 = vmatprep.subr.bf16.mxu1 %v11807_v28  ;;  %v11766_v56 = vld [vmem:[#allocation11 + $0x3f0] ss:$8 sps:$4 sm:$0xff]  }
 0x616   :  { %9534 = vmatprep.mubr.bf16.mxu0 %v8633_v14  ;;  %v2107_v14 = vrot.slane %v12605_v26, %v12456_v11  ;;  %v11813_v11 = vld [vmem:[#allocation16 + $0xe4] ss:$8 sps:$4 sm:$0xff]   ;;  %v11832_v60 = vld [vmem:[#allocation14 + $0x50] ss:$8 sps:$4 sm:$0xff]  }
 0x617   :  { %9535 = vmatmul.mubr.bf16.vlgmr.msra.gmra.mrb[24].mxu0 %v8632_v34  ;;  %v2103_v34 = vrot.slane %v12605_v26, %v12450_v9  ;;  %v11810_v9 = vld [vmem:[#allocation16 + $0xd4] ss:$8 sps:$4 sm:$0xff]   ;;  %v11811_v26 = vld [vmem:[#allocation16 + $0xe0] ss:$8 sps:$4 sm:$0xff]   ;;  %v11837_v28 = vld [vmem:[#allocation14 + $0x64] ss:$8 sps:$4 sm:$0xff]  }
 0x618   :  { %9546 = vmatpush1.bf16.msra.mxu0 %v11721_v54  ;;  %9849 = vmatpush1.bf16.msra.mxu1 %v11805_v30  ;;  %v11838_v30 = vld [vmem:[#allocation14 + $0x70] ss:$8 sps:$4 sm:$0xff]  }
 0x619   :  { %9547 = vmatprep.subr.bf16.mxu0 %v11726_v35  ;;  %9850 = vmatprep.subr.bf16.mxu1 %v11810_v9 }
 0x61c   :  { %9548 = vmatpush1.bf16.msra.mxu0 %v11724_v2 }
 0x61d   :  { %9549 = vmatprep.subr.bf16.mxu0 %v11729_v37 }
 0x620   :  { %9550 = vmatpush1.bf16.msra.mxu0 %v11727_v18 }
 0x621   :  { %9551 = vmatprep.subr.bf16.mxu0 %v11732_v39 }
 0x624   :  { %9552 = vmatpush1.bf16.msra.mxu0 %v11730_v40 }
 0x625   :  { %9553 = vmatprep.subr.bf16.mxu0 %v11735_v63  ;;  %v11808_v63 = vld [vmem:[#allocation16 + $0xd0] ss:$8 sps:$4 sm:$0xff]  }
 0x626   :  { %9851 = vmatpush1.bf16.msra.mxu1 %v11808_v63 }
 0x627   :  { %9852 = vmatprep.subr.bf16.mxu1 %v11813_v11 }
 0x628   :  { %9554 = vmatpush1.bf16.msra.mxu0 %v11733_v41  ;;  %v11819_v41 = vld [vmem:[#allocation14 + $0x4] ss:$8 sps:$4 sm:$0xff]  }
 0x629   :  { %9555 = vmatprep.subr.bf16.mxu0 %v11738_v42  ;;  %v8764_v42 = vld [vmem:[#allocation13] sm:$0x3] }
 0x62a   :  { %9853 = vmatpush1.bf16.msra.mxu1 %v11811_v26  ;;  %v8769_v48 = vrot.slane %v8764_v42, %v12417_v17  ;;  %v8773_v43 = vrot.slane %v8764_v42, %v12423_v20  ;;  %v10082_v26 = vld [vmem:[#allocation19] sm:$0x3] }
 0x62b   :  { %9854 = vmatprep.subr.bf16.mxu1 %v11816_v10 }
 0x62c   :  { %9556 = vmatpush1.bf16.msra.mxu0 %v11736_v50 }
 0x62d   :  { %9557 = vmatprep.subr.bf16.mxu0 %v11741_v16 }
 0x62e   :  { %9855 = vmatpush1.bf16.msra.mxu1 %v11814_v22 }
 0x62f   :  { %10025 = vmatprep.subr.bf16.mxu1 %v11819_v41 }
 0x630   :  { %9558 = vmatpush1.bf16.msra.mxu0 %v11739_v51 }
 0x631   :  { %9559 = vmatprep.subr.bf16.mxu0 %v11744_v52 }
 0x634   :  { %9560 = vmatpush1.bf16.msra.mxu0 %v11742_v19 }
 0x635   :  { %9561 = vmatprep.subr.bf16.mxu0 %v11747_v55 }
 0x638   :  { %9562 = vmatpush1.bf16.msra.mxu0 %v11745_v5 }
 0x639   :  { %9563 = vmatprep.subr.bf16.mxu0 %v11750_v8 }
 0x63c   :  { %9564 = vmatpush1.bf16.msra.mxu0 %v11748_v61 }
 0x63d   :  { %9565 = vmatprep.subr.bf16.mxu0 %v11753_v13  ;;  %v11822_v13 = vld [vmem:[#allocation14 + $0x14] ss:$8 sps:$4 sm:$0xff]  }
 0x640   :  { %9566 = vmatpush1.bf16.msra.mxu0 %v11751_v47  ;;  %v11823_v47 = vld [vmem:[#allocation14 + $0x20] ss:$8 sps:$4 sm:$0xff]  }
 0x641   :  { %9567 = vmatprep.subr.bf16.mxu0 %v11756_v25  ;;  %v11828_v25 = vld [vmem:[#allocation14 + $0x34] ss:$8 sps:$4 sm:$0xff]  }
 0x644   :  { %9568 = vmatpush1.bf16.msra.mxu0 %v11754_v62  ;;  %v11829_v62 = vld [vmem:[#allocation14 + $0x40] ss:$8 sps:$4 sm:$0xff]  }
 0x645   :  { %9569 = vmatprep.subr.bf16.mxu0 %v11759_v58  ;;  %v11834_v58 = vld [vmem:[#allocation14 + $0x54] ss:$8 sps:$4 sm:$0xff]  }
 0x648   :  { %9570 = vmatpush1.bf16.msra.mxu0 %v11757_v29  ;;  %v11835_v29 = vld [vmem:[#allocation14 + $0x60] ss:$8 sps:$4 sm:$0xff]  }
 0x649   :  { %9571 = vmatprep.subr.bf16.mxu0 %v11762_v23  ;;  %v11840_v23 = vld [vmem:[#allocation14 + $0x74] ss:$8 sps:$4 sm:$0xff]  }
 0x64c   :  { %9572 = vmatpush1.bf16.msra.mxu0 %v11760_v33  ;;  %v11843_v33 = vld [vmem:[#allocation14 + $0x84] ss:$8 sps:$4 sm:$0xff]  }
 0x64d   :  { %9573 = vmatprep.subr.bf16.mxu0 %v11765_v12  ;;  %v11841_v12 = vld [vmem:[#allocation14 + $0x80] ss:$8 sps:$4 sm:$0xff]  }
 0x650   :  { %9574 = vmatpush1.bf16.msra.mxu0 %v11763_v31  ;;  %v11846_v31 = vld [vmem:[#allocation14 + $0x94] ss:$8 sps:$4 sm:$0xff]  }
 0x651   :  { %9575 = vmatprep.subr.bf16.mxu0 %v11768_v32  ;;  %v11844_v32 = vld [vmem:[#allocation14 + $0x90] ss:$8 sps:$4 sm:$0xff]  }
 0x654   :  { %9576 = vmatpush1.bf16.msra.mxu0 %v11766_v56  ;;  %v11849_v56 = vld [vmem:[#allocation14 + $0xa4] ss:$8 sps:$4 sm:$0xff]  }
 0x68b   :  { %v8603_v54 = vpop.f32.mrb[24].mxu1 }
 0x68c   :  { %v11431_v35 = vadd.f32 %v8603_v54, %v2103_v34  ;;  %v8605_v0 = vpop.f32.mrb[25].mxu1  ;;  %v11850_v54 = vld [vmem:[#allocation14 + $0xb0] ss:$8 sps:$4 sm:$0xff]  }
 0x68d   :  { %v11432_v36 = vadd.f32 %v8605_v0, %v2107_v14  ;;  %v8607_v6 = vpop.f32.mrb[26].mxu1  ;;  %v11853_v0 = vld [vmem:[#allocation14 + $0xc0] ss:$8 sps:$4 sm:$0xff]  }
 0x68e   :  { %v11433_v2 = vadd.f32 %v8607_v6, %v2103_v34  ;;  %v8609_v37 = vpop.f32.mrb[27].mxu1  ;;  %v8618_v38 = vmax.f32 %v11431_v35, 0.0  ;;  %v11847_v34 = vld [vmem:[#allocation14 + $0xa0] ss:$8 sps:$4 sm:$0xff]   ;;  %v11855_v35 = vld [vmem:[#allocation14 + $0xc4] ss:$8 sps:$4 sm:$0xff]  }
 0x68f   :  { %v11434_v1 = vadd.f32 %v8609_v37, %v2107_v14  ;;  %v8619_v39 = vmax.f32 %v11432_v36, 0.0  ;;  %v11852_v14 = vld [vmem:[#allocation14 + $0xb4] ss:$8 sps:$4 sm:$0xff]   ;;  %v11856_v6 = vld [vmem:[#allocation14 + $0xd0] ss:$8 sps:$4 sm:$0xff]  }
 0x690   :  { %v8626_v18 = vmax.f32 %v11433_v2, 0.0  ;;  %v11858_v36 = vld [vmem:[#allocation14 + $0xd4] ss:$8 sps:$4 sm:$0xff]   ;;  %v11861_v2 = vld [vmem:[#allocation14 + $0xe4] ss:$8 sps:$4 sm:$0xff]  }
 0x691   :  { %v8627_v3 = vmax.f32 %v11434_v1, 0.0  ;;  %v11859_v37 = vld [vmem:[#allocation14 + $0xe0] ss:$8 sps:$4 sm:$0xff]   ;;  %v11864_v1 = vld [vmem:[#allocation14 + $0xf4] ss:$8 sps:$4 sm:$0xff]  }
 0x692   :  { %v8634_v44 = vpack.c.bf16 %v8626_v18, %v8618_v38  ;;  %v11862_v38 = vld [vmem:[#allocation14 + $0xf0] ss:$8 sps:$4 sm:$0xff]  }
 0x693   :  { %v8635_v40 = vpack.c.bf16 %v8627_v3, %v8619_v39 }
 0x695   :  { %9577 = vmatprep.mubr.bf16.mxu0 %v8635_v40  ;;  %v10066_v40 = vld [vmem:[#allocation17] sm:$0x3] }
 0x696   :  { %9578 = vmatmul.mubr.bf16.vlgmr.msra.gmra.mrb[24].mxu0 %v8634_v44  ;;  %v10071_v9 = vrot.slane %v10066_v40, %v12417_v17  ;;  %v10075_v11 = vrot.slane %v10066_v40, %v12423_v20 }
 0x769   :  { %v9579_v50 = vpop.f32.mrb[24].mxu0 }
 0x76a   :  { %v11435_v16 = vadd.f32 %v9579_v50, %v8769_v48  ;;  %v9581_v24 = vpop.f32.mrb[25].mxu0  ;;  %v10087_v50 = vrot.slane %v10082_v26, %v12417_v17 }
 0x76b   :  { %v11436_v45 = vadd.f32 %v9581_v24, %v8773_v43  ;;  %v9583_v51 = vpop.f32.mrb[26].mxu0  ;;  %v10091_v24 = vrot.slane %v10082_v26, %v12423_v20 }
 0x76c   :  { %v11437_v52 = vadd.f32 %v9583_v51, %v8769_v48  ;;  %v9585_v53 = vpop.f32.mrb[27].mxu0  ;;  %v9588_v19 = vmax.f32 %v11435_v16, 0.0 }
 0x76d   :  { %v11438_v57 = vadd.f32 %v9585_v53, %v8773_v43  ;;  %v9589_v59 = vmax.f32 %v11436_v45, 0.0 }
 0x76e   :  { %v9590_v55 = vmax.f32 %v11437_v52, 0.0 }
 0x76f   :  { %v9591_v4 = vmax.f32 %v11438_v57, 0.0 }
 0x770   :  { %v12617_v5 = vpack.c.bf16 %v9590_v55, %v9588_v19  ;;  %v11413_v19 = vld [vmem:[#allocation2] ss:$0 sm:$0xff] }
 0x771   :  { %v9593_v8 = vpack.c.bf16 %v9591_v4, %v9589_v59 }
 0x772   :  { %v9660_v61 = vrot.slane %v12617_v5, 4 }
 0x773   :  { %v9661_v21 = vrot.slane %v9593_v8, 4 }
 0x775   :  { %9856 = vmatprep.mubr.bf16.mxu1 %v9661_v21 }
 0x776   :  { %9857 = vmatmul.mubr.bf16.vlgmr.msra.gmra.mrb[28].mxu1 %v9660_v61 }
 0x777   :  { %10026 = vmatpush1.bf16.msra.mxu1 %v11817_v49  ;;  %10057 = vmatprep.mubr.bf16.mxu1 %v9593_v8 }
 0x778   :  { %10027 = vmatprep.subr.bf16.mxu1 %v11822_v13 }
 0x77b   :  { %10028 = vmatpush1.bf16.msra.mxu1 %v11820_v7 }
 0x77c   :  { %10029 = vmatprep.subr.bf16.mxu1 %v11825_v46 }
 0x77f   :  { %10030 = vmatpush1.bf16.msra.mxu1 %v11823_v47 }
 0x780   :  { %10031 = vmatprep.subr.bf16.mxu1 %v11828_v25 }
 0x783   :  { %10032 = vmatpush1.bf16.msra.mxu1 %v11826_v27 }
 0x784   :  { %10033 = vmatprep.subr.bf16.mxu1 %v11831_v15 }
 0x787   :  { %10034 = vmatpush1.bf16.msra.mxu1 %v11829_v62 }
 0x788   :  { %10035 = vmatprep.subr.bf16.mxu1 %v11834_v58 }
 0x78b   :  { %10036 = vmatpush1.bf16.msra.mxu1 %v11832_v60 }
 0x78c   :  { %10037 = vmatprep.subr.bf16.mxu1 %v11837_v28 }
 0x78f   :  { %10038 = vmatpush1.bf16.msra.mxu1 %v11835_v29 }
 0x790   :  { %10039 = vmatprep.subr.bf16.mxu1 %v11840_v23 }
 0x793   :  { %10040 = vmatpush1.bf16.msra.mxu1 %v11838_v30 }
 0x794   :  { %10041 = vmatprep.subr.bf16.mxu1 %v11843_v33 }
 0x797   :  { %10042 = vmatpush1.bf16.msra.mxu1 %v11841_v12 }
 0x798   :  { %10043 = vmatprep.subr.bf16.mxu1 %v11846_v31 }
 0x79b   :  { %10044 = vmatpush1.bf16.msra.mxu1 %v11844_v32 }
 0x79c   :  { %10045 = vmatprep.subr.bf16.mxu1 %v11849_v56 }
 0x79f   :  { %10046 = vmatpush1.bf16.msra.mxu1 %v11847_v34 }
 0x7a0   :  { %10047 = vmatprep.subr.bf16.mxu1 %v11852_v14 }
 0x7a3   :  { %10048 = vmatpush1.bf16.msra.mxu1 %v11850_v54 }
 0x7a4   :  { %10049 = vmatprep.subr.bf16.mxu1 %v11855_v35 }
 0x7a7   :  { %10050 = vmatpush1.bf16.msra.mxu1 %v11853_v0 }
 0x7a8   :  { %10051 = vmatprep.subr.bf16.mxu1 %v11858_v36 }
 0x7ab   :  { %10052 = vmatpush1.bf16.msra.mxu1 %v11856_v6 }
 0x7ac   :  { %10053 = vmatprep.subr.bf16.mxu1 %v11861_v2 }
 0x7af   :  { %10054 = vmatpush1.bf16.msra.mxu1 %v11859_v37 }
 0x7b0   :  { %10055 = vmatprep.subr.bf16.mxu1 %v11864_v1 }
 0x7b3   :  { %10056 = vmatpush1.bf16.msra.mxu1 %v11862_v38 }
 0x7b6   :  { %10058 = vmatmul.mubr.bf16.vlgmr.msra.gmra.mrb[32].mxu1 %v12617_v5 }
 0x849   :  { %v9858_v18 = vpop.f32.mrb[28].mxu1 }
 0x84a   :  { %v9860_v39 = vpop.f32.mrb[29].mxu1 }
 0x84b   :  { %v9862_v3 = vpop.f32.mrb[30].mxu1 }
 0x84c   :  { %v9863_v44 = vpop.f32.mrb[31].mxu1 }
 0x889   :  { %v10059_v63 = vpop.f32.mrb[32].mxu1 }
 0x88a   :  { %v10060_v10 = vadd.f32 %v10059_v63, %v9858_v18  ;;  %v10061_v22 = vpop.f32.mrb[33].mxu1 }
 0x88b   :  { %v10062_v41 = vadd.f32 %v10061_v22, %v9860_v39  ;;  %v10063_v42 = vpop.f32.mrb[34].mxu1 }
 0x88c   :  { %v10078_v48 = vadd.f32 %v10071_v9, %v10060_v10  ;;  %v10064_v43 = vpop.f32.mrb[35].mxu1 }
 0x88d   :  { %v10079_v16 = vadd.f32 %v10075_v11, %v10062_v41 }
 0x88e   :  { %v10080_v45 = vmax.f32 %v10078_v48, 0.0 }
 0x88f   :  { %v10081_v51 = vmax.f32 %v10079_v16, 0.0 }
 0x890   :  { %v10094_v52 = vmul.f32 %v10087_v50, %v10080_v45 }
 0x891   :  { %v10095_v53 = vmul.f32 %v10091_v24, %v10081_v51 }
 0x893   :  { %v10096_v57 = vadd.f32 %v10095_v53, %v10094_v52 }
 0x895   :  { %10097 = vadd.xlane.f32.xlu0 %v10096_v57 }
 0x922   :  { %v10098_v55 = vpop.xlane.xlu0 %10097 }
 0x923   :  { %v10106_v59 = vadd.f32 %v11413_v19, %v10098_v55 }
 0x925   :  { %v11414_v4 = vmul.f32 -1.442695, %v10106_v59 }
 0x927   :  { %11865 = vpow2.f32 %v11414_v4 }
 0x931   :  { %v11866_v5 = vpop.eup %11865 }
 0x932   :  { %v10110_v8 = vadd.f32 1.0, %v11866_v5 }
 0x934   :  { %11867 = vrcp.f32 %v10110_v8 }
 0x93e   :  { %v11868_v21 = vpop.eup %11867 }
 0x93f   :  { %10114 = vst.msk [vmem:[%s12640_s12] sm:$0xff] %vm10113_vm1, %v11868_v21 }
 0x940   :  { %10119 = vsyncpa [#allocation4], 1 }
 0x941   :  { %10120 = vsyncpa [#allocation6], 1 }
 0x942   :  { %10121 = vsyncpa [#allocation9], 1 }
 0x943   :  { %10122 = vsyncpa [#allocation12], 1 }
 0x944   :  { %10123 = vsyncpa [#allocation15], 1 }
 0x945   :  { %10124 = vsyncpa [#allocation18], 1 }

</bundles_post_ra>
